<compile_context>
chip_gen: v7x
topology: tpu7x:2x2x1
jax: 0.10.0
libtpu: 0.0.40
codegen_flags: <defaults>
</compile_context>

<pallas_src>
import functools

import jax
import jax.numpy as jnp
import numpy as np
from jax.experimental import pallas as pl
from jax.experimental.pallas import tpu as pltpu

_INV_SQRT2 = 0.7071067811865476
_ERF_P = 0.3275911
_ERF_A = (0.254829592, -0.284496736, 1.421413741, -1.453152027, 1.061405429)


def _gelu_exact(x):
    """Branchless exact GELU: relu(x) - |x| * (P5(t)/2) * exp(-x^2/2).

    A&S 7.1.26 erf polynomial (|err| < 1.5e-7 ~ f32 eps); erf's odd symmetry is folded into
    relu(x) so there is no sign/abs/select chain; exp sits in the EUP slot.
    """
    a1, a2, a3, a4, a5 = (0.5 * a for a in _ERF_A)           # fold the 0.5 GELU prefactor in
    ax = jnp.abs(x)
    t = 1.0 / (1.0 + (_ERF_P * _INV_SQRT2) * ax)
    poly = ((((a5 * t + a4) * t + a3) * t + a2) * t + a1) * t
    return jnp.maximum(x, 0.0) - ax * poly * jnp.exp(-0.5 * x * x)


def _shift_zfill(v, s):
    """y[:, p] = v[:, p + s] if 0 <= p + s < n else 0   (s is a static Python int)."""
    if s == 0:
        return v
    n = v.shape[-1]
    z = jnp.zeros(v.shape[:-1] + (abs(s),), v.dtype)
    if s > 0:
        return jnp.concatenate([v[:, s:], z], axis=-1)
    return jnp.concatenate([z, v[:, : n + s]], axis=-1)


def _block_kernel(x_ref, wl_ref, wr_ref, w1_ref, b1_ref, w2_ref, b2_ref, o_ref,
                  *, lam, W, K):
    BB, C, HW = x_ref.shape
    pad = K // 2

    # ---------------- hoisted, sample-independent values ----------------
    # Column index of every flattened position.  Float div + floor is exact here (HW < 2^24 and
    # exact multiples of W divide exactly), and avoids relying on vector integer mod support.
    pidx = jax.lax.broadcasted_iota(jnp.int32, (1, HW), 1).astype(jnp.float32)
    col = pidx - jnp.floor(pidx / W) * W                      # (1, HW)

    # Per-dx column-validity mask: only one bound is active per sign of the shift.
    col_ok = []
    for dx in range(K):
        dxo = dx - pad
        if dxo == 0:
            col_ok.append(None)
        elif dxo < 0:
            col_ok.append(col >= float(-dxo))
        else:
            col_ok.append(col < float(W - dxo))

    wl = wl_ref[...]                                          # (C, K*K) per-channel tap weights
    wr = wr_ref[...]
    wl_col = [wl[:, t:t + 1] for t in range(K * K)]           # hoisted (C, 1) tap columns
    wr_col = [wr[:, t:t + 1] for t in range(K * K)]
    w1 = w1_ref[...]                                          # (4C, C)  LN affine folded in
    b1 = b1_ref[...]                                          # (4C, 1)
    w2 = w2_ref[...]                                          # (C, 4C)  gamma folded in
    b2 = b2_ref[...]                                          # (C, 1)

    for b in range(BB):                                       # BB samples per grid step
        x_in = x_ref[b]                                       # (C, HW) f32, lane-dense

        # 7 column-shifted + column-masked copies of x, shared by both convs and all dy.
        xc = []
        for dx in range(K):
            dxo = dx - pad
            if dxo == 0:
                xc.append(x_in)
            else:
                v = _shift_zfill(x_in, dxo)
                xc.append(jnp.where(col_ok[dx], v, 0.0))

        # Fused left/right 7x7 depthwise conv, factored per dy:
        #   acc += rowshift_{dy}( sum_dx w[:, dy, dx] * xc[dx] )
        # The zero-fill row shift is exactly the row-validity mask, so no extra masking.
        # (Conv bias omitted on purpose: the affine=False InstanceNorm cancels it exactly.)
        acc_l = jnp.zeros((C, HW), jnp.float32)
        acc_r = jnp.zeros((C, HW), jnp.float32)
        for dy in range(K):
            dyo = dy - pad
            t0 = dy * K
            sl = xc[0] * wl_col[t0]
            sr = xc[0] * wr_col[t0]
            for dx in range(1, K):
                sl = sl + xc[dx] * wl_col[t0 + dx]
                sr = sr + xc[dx] * wr_col[t0 + dx]
            acc_l = acc_l + _shift_zfill(sl, dyo * W)
            acc_r = acc_r + _shift_zfill(sr, dyo * W)

        def inorm_relu(a):                                    # InstanceNorm2d(affine=False)+ReLU
            mu = jnp.mean(a, axis=1, keepdims=True)           # one-pass mean / E[x^2]
            ex2 = jnp.mean(a * a, axis=1, keepdims=True)
            return jnp.maximum((a - mu) * jax.lax.rsqrt(ex2 - mu * mu + 1e-5), 0.0)

        x_l = inorm_relu(acc_l)
        x_r = inorm_relu(acc_r)
        v = lam * jnp.minimum(x_l, x_r) - x_l                 # lambda*min(l, r) - l

        # LayerNorm over channels (eps=1e-6); its affine is folded into w1/b1 in the wrapper.
        mu = jnp.mean(v, axis=0, keepdims=True)
        ex2 = jnp.mean(v * v, axis=0, keepdims=True)
        vn = (v - mu) * jax.lax.rsqrt(ex2 - mu * mu + 1e-6)

        # Pointwise MLP on the MXU, channels-first: (4C,C)@(C,HW) then (C,4C)@(4C,HW).
        h = jnp.dot(w1, vn, preferred_element_type=jnp.float32) + b1
        h = _gelu_exact(h)
        y = jnp.dot(w2, h, preferred_element_type=jnp.float32) + b2

        o_ref[b] = (x_in + y).astype(o_ref.dtype)             # residual (DropPath == Identity)


def next_min_minus_lambda_block(x_nchw, params, *, lam=2.0, batch_block=8):
    """Pallas implementation of NextMinMinusLambdaBlock.forward (drop_path=0)."""
    B, C, H, W = x_nchw.shape
    K = params["wl"].shape[0]
    C4 = params["w1"].shape[1]
    HW = H * W
    f32 = jnp.float32

    # Largest divisor of B that is <= batch_block (at production sizes keep batch_block small
    # enough that ~13 * BB * C * HW * 4 bytes of conv-loop temporaries fit the VMEM budget).
    bb = 1
    for d in range(1, min(batch_block, B) + 1):
        if B % d == 0:
            bb = d

    # Free contiguous reshape; no transpose / padded copy materialized in HBM.
    x2 = x_nchw.reshape(B, C, HW).astype(f32)

    # Per-channel depthwise tap weights as (C, K*K).  dwconv biases (bl/br) are dropped: the
    # following affine=False InstanceNorm subtracts the per-channel mean, cancelling them exactly.
    wl_t = params["wl"].astype(f32).reshape(K * K, C).T
    wr_t = params["wr"].astype(f32).reshape(K * K, C).T

    # Fold LayerNorm affine into pwconv1 and gamma into pwconv2 (exact algebra), transposed for
    # the channels-first matmuls in the kernel.
    ln_w = params["ln_w"].astype(f32)
    ln_b = params["ln_b"].astype(f32)
    w1 = params["w1"].astype(f32)
    b1 = params["b1"].astype(f32)
    w2 = params["w2"].astype(f32)
    b2 = params["b2"].astype(f32)
    gamma = params["gamma"].astype(f32)
    w1_t = (ln_w[:, None] * w1).T                    # (4C, C)
    b1_c = (b1 + ln_b @ w1).reshape(C4, 1)           # (4C, 1)
    w2_t = (w2 * gamma[None, :]).T                   # (C, 4C)
    b2_c = (b2 * gamma).reshape(C, 1)                # (C, 1)

    kernel = functools.partial(_block_kernel, lam=lam, W=W, K=K)

    out = pl.pallas_call(
        kernel,
        out_shape=jax.ShapeDtypeStruct((B, C, HW), f32),
        grid_spec=pltpu.PrefetchScalarGridSpec(
            num_scalar_prefetch=0,
            grid=(B // bb,),
            in_specs=[
                pl.BlockSpec((bb, C, HW), lambda i: (i, 0, 0)),   # x (residual + conv source)
                pl.BlockSpec((C, K * K), lambda i: (0, 0)),       # left dwconv taps
                pl.BlockSpec((C, K * K), lambda i: (0, 0)),       # right dwconv taps
                pl.BlockSpec((C4, C), lambda i: (0, 0)),          # pwconv1 (LN affine folded)
                pl.BlockSpec((C4, 1), lambda i: (0, 0)),          # pwconv1 bias (folded)
                pl.BlockSpec((C, C4), lambda i: (0, 0)),          # pwconv2 (gamma folded)
                pl.BlockSpec((C, 1), lambda i: (0, 0)),           # pwconv2 bias (folded)
            ],
            out_specs=pl.BlockSpec((bb, C, HW), lambda i: (i, 0, 0)),
        ),
        compiler_params=pltpu.CompilerParams(
            dimension_semantics=("parallel",),          # batch blocks shard across v7x's 2 TCs
            vmem_limit_bytes=32 * 1024 * 1024,          # explicit budget; safe on v5e/v6e/v7x
        ),
    )(x2, wl_t, wr_t, w1_t, b1_c, w2_t, b2_c)

    return out.reshape(B, C, H, W)


# ------------------------- pure-JAX reference (module semantics, for validation) -------------
def _reference(x_nchw, params, *, lam=2.0):
    x = jnp.transpose(x_nchw, (0, 2, 3, 1)).astype(jnp.float32)  # NHWC
    C = x.shape[-1]

    def dwconv(xh, w_kkc, b_c):
        w = w_kkc[:, :, None, :]  # HWIO with I = C/groups = 1
        y = jax.lax.conv_general_dilated(
            xh, w, window_strides=(1, 1), padding="SAME",
            dimension_numbers=("NHWC", "HWIO", "NHWC"), feature_group_count=C)
        return y + b_c

    def inorm_relu(v):
        mu = jnp.mean(v, axis=(1, 2), keepdims=True)
        var = jnp.mean(jnp.square(v - mu), axis=(1, 2), keepdims=True)
        return jnp.maximum((v - mu) / jnp.sqrt(var + 1e-5), 0.0)

    xl = inorm_relu(dwconv(x, params["wl"], params["bl"]))
    xr = inorm_relu(dwconv(x, params["wr"], params["br"]))
    v = lam * jnp.minimum(xl, xr) - xl

    mu = jnp.mean(v, axis=-1, keepdims=True)
    var = jnp.mean(jnp.square(v - mu), axis=-1, keepdims=True)
    v = (v - mu) / jnp.sqrt(var + 1e-6)
    v = v * params["ln_w"] + params["ln_b"]

    h = jnp.dot(v, params["w1"]) + params["b1"]
    h = jax.nn.gelu(h, approximate=False)
    y = jnp.dot(h, params["w2"]) + params["b2"]
    y = y * params["gamma"]

    out = x + y
    return jnp.transpose(out, (0, 3, 1, 2))


if __name__ == "__main__":
    B, C, H, W = 2, 16, 16, 16
    K = 7

    key = jax.random.PRNGKey(0)
    ks = jax.random.split(key, 9)
    params = dict(
        wl=0.1 * jax.random.normal(ks[0], (K, K, C), jnp.float32),
        bl=0.1 * jax.random.normal(ks[1], (C,), jnp.float32),
        wr=0.1 * jax.random.normal(ks[2], (K, K, C), jnp.float32),
        br=0.1 * jax.random.normal(ks[3], (C,), jnp.float32),
        ln_w=jnp.ones((C,), jnp.float32),
        ln_b=jnp.zeros((C,), jnp.float32),
        w1=0.1 * jax.random.normal(ks[4], (C, 4 * C), jnp.float32),
        b1=0.1 * jax.random.normal(ks[5], (4 * C,), jnp.float32),
        w2=0.1 * jax.random.normal(ks[6], (4 * C, C), jnp.float32),
        b2=0.1 * jax.random.normal(ks[7], (C,), jnp.float32),
        gamma=1e-6 * jnp.ones((C,), jnp.float32),  # layer_scale_init_value = 1e-6
    )
    x = jax.random.normal(ks[8], (B, C, H, W), jnp.float32)

    out = jax.block_until_ready(next_min_minus_lambda_block(x, params))

    # Validate against the un-folded pure-JAX reference (which includes the conv bias, LN affine
    # and gamma explicitly), and once more with gamma=1 so the MLP branch is not ~1e-6.
    ref = _reference(x, params)
    np.testing.assert_allclose(np.asarray(out), np.asarray(ref), rtol=1e-4, atol=1e-4)

    params_g1 = dict(params, gamma=jnp.ones((C,), jnp.float32))
    out_g1 = jax.block_until_ready(next_min_minus_lambda_block(x, params_g1))
    ref_g1 = _reference(x, params_g1)
    np.testing.assert_allclose(np.asarray(out_g1), np.asarray(ref_g1), rtol=1e-4, atol=1e-4)

    # Also exercise a batch-block of 1 (grid length > 1, both v7x TCs busy).
    out_bb1 = jax.block_until_ready(
        next_min_minus_lambda_block(x, params, batch_block=1))
    np.testing.assert_allclose(np.asarray(out_bb1), np.asarray(ref), rtol=1e-4, atol=1e-4)

    print("KERNEL_OK")
</pallas_src>

<mosaic_0001>
module attributes {stable_mosaic.version = 11 : i64} {
  func.func @_block_kernel(%arg0: i32, %arg1: memref<2x16x256xf32, #tpu.memory_space<vmem>>, %arg2: memref<16x49xf32, #tpu.memory_space<vmem>>, %arg3: memref<16x49xf32, #tpu.memory_space<vmem>>, %arg4: memref<64x16xf32, #tpu.memory_space<vmem>>, %arg5: memref<64x1xf32, #tpu.memory_space<vmem>>, %arg6: memref<16x64xf32, #tpu.memory_space<vmem>>, %arg7: memref<16x1xf32, #tpu.memory_space<vmem>>, %arg8: memref<2x16x256xf32, #tpu.memory_space<vmem>>) attributes {dimension_semantics = [#tpu.dimension_semantics<parallel>], iteration_bounds = array<i64: 1>, scalar_prefetch = 0 : i64, scratch_operands = 0 : i64, tpu.core_type = #tpu.core_type<tc>, window_params = [{transform_indices = @transform_0, window_bounds = array<i64: 2, 16, 256>}, {pipeline_mode = #tpu.pipeline_mode<synchronous>, transform_indices = @transform_1, window_bounds = array<i64: 16, 49>}, {pipeline_mode = #tpu.pipeline_mode<synchronous>, transform_indices = @transform_2, window_bounds = array<i64: 16, 49>}, {pipeline_mode = #tpu.pipeline_mode<synchronous>, transform_indices = @transform_3, window_bounds = array<i64: 64, 16>}, {pipeline_mode = #tpu.pipeline_mode<synchronous>, transform_indices = @transform_4, window_bounds = array<i64: 64, 1>}, {pipeline_mode = #tpu.pipeline_mode<synchronous>, transform_indices = @transform_5, window_bounds = array<i64: 16, 64>}, {pipeline_mode = #tpu.pipeline_mode<synchronous>, transform_indices = @transform_6, window_bounds = array<i64: 16, 1>}, {transform_indices = @transform_7, window_bounds = array<i64: 2, 16, 256>}]} {
    %0 = tpu.iota {dimensions = array<i32: 1>} : vector<1x256xi32>
    %1 = arith.sitofp %0 : vector<1x256xi32> to vector<1x256xf32>
    %cst = arith.constant 1.600000e+01 : f32
    %2 = vector.broadcast %cst : f32 to vector<1x256xf32>
    %3 = arith.divf %1, %2 : vector<1x256xf32>
    %4 = math.floor %3 : vector<1x256xf32>
    %cst_0 = arith.constant 1.600000e+01 : f32
    %5 = vector.broadcast %cst_0 : f32 to vector<1x256xf32>
    %6 = arith.mulf %4, %5 : vector<1x256xf32>
    %7 = arith.subf %1, %6 : vector<1x256xf32>
    %cst_1 = arith.constant 3.000000e+00 : f32
    %8 = vector.broadcast %cst_1 : f32 to vector<1x256xf32>
    %9 = arith.cmpf oge, %7, %8 : vector<1x256xf32>
    %cst_2 = arith.constant 2.000000e+00 : f32
    %10 = vector.broadcast %cst_2 : f32 to vector<1x256xf32>
    %11 = arith.cmpf oge, %7, %10 : vector<1x256xf32>
    %cst_3 = arith.constant 1.000000e+00 : f32
    %12 = vector.broadcast %cst_3 : f32 to vector<1x256xf32>
    %13 = arith.cmpf oge, %7, %12 : vector<1x256xf32>
    %cst_4 = arith.constant 1.500000e+01 : f32
    %14 = vector.broadcast %cst_4 : f32 to vector<1x256xf32>
    %15 = arith.cmpf olt, %7, %14 : vector<1x256xf32>
    %cst_5 = arith.constant 1.400000e+01 : f32
    %16 = vector.broadcast %cst_5 : f32 to vector<1x256xf32>
    %17 = arith.cmpf olt, %7, %16 : vector<1x256xf32>
    %cst_6 = arith.constant 1.300000e+01 : f32
    %18 = vector.broadcast %cst_6 : f32 to vector<1x256xf32>
    %19 = arith.cmpf olt, %7, %18 : vector<1x256xf32>
    %c0 = arith.constant 0 : index
    %c0_7 = arith.constant 0 : index
    %20 = vector.load %arg2[%c0, %c0_7] : memref<16x49xf32, #tpu.memory_space<vmem>>, vector<16x49xf32>
    %c0_8 = arith.constant 0 : index
    %c0_9 = arith.constant 0 : index
    %21 = vector.load %arg3[%c0_8, %c0_9] : memref<16x49xf32, #tpu.memory_space<vmem>>, vector<16x49xf32>
    %22 = vector.extract_strided_slice %20 {offsets = [0, 0], sizes = [16, 1], strides = [1, 1]} : vector<16x49xf32> to vector<16x1xf32>
    %23 = vector.extract_strided_slice %20 {offsets = [0, 1], sizes = [16, 1], strides = [1, 1]} : vector<16x49xf32> to vector<16x1xf32>
    %24 = vector.extract_strided_slice %20 {offsets = [0, 2], sizes = [16, 1], strides = [1, 1]} : vector<16x49xf32> to vector<16x1xf32>
    %25 = vector.extract_strided_slice %20 {offsets = [0, 3], sizes = [16, 1], strides = [1, 1]} : vector<16x49xf32> to vector<16x1xf32>
    %26 = vector.extract_strided_slice %20 {offsets = [0, 4], sizes = [16, 1], strides = [1, 1]} : vector<16x49xf32> to vector<16x1xf32>
    %27 = vector.extract_strided_slice %20 {offsets = [0, 5], sizes = [16, 1], strides = [1, 1]} : vector<16x49xf32> to vector<16x1xf32>
    %28 = vector.extract_strided_slice %20 {offsets = [0, 6], sizes = [16, 1], strides = [1, 1]} : vector<16x49xf32> to vector<16x1xf32>
    %29 = vector.extract_strided_slice %20 {offsets = [0, 7], sizes = [16, 1], strides = [1, 1]} : vector<16x49xf32> to vector<16x1xf32>
    %30 = vector.extract_strided_slice %20 {offsets = [0, 8], sizes = [16, 1], strides = [1, 1]} : vector<16x49xf32> to vector<16x1xf32>
    %31 = vector.extract_strided_slice %20 {offsets = [0, 9], sizes = [16, 1], strides = [1, 1]} : vector<16x49xf32> to vector<16x1xf32>
    %32 = vector.extract_strided_slice %20 {offsets = [0, 10], sizes = [16, 1], strides = [1, 1]} : vector<16x49xf32> to vector<16x1xf32>
    %33 = vector.extract_strided_slice %20 {offsets = [0, 11], sizes = [16, 1], strides = [1, 1]} : vector<16x49xf32> to vector<16x1xf32>
    %34 = vector.extract_strided_slice %20 {offsets = [0, 12], sizes = [16, 1], strides = [1, 1]} : vector<16x49xf32> to vector<16x1xf32>
    %35 = vector.extract_strided_slice %20 {offsets = [0, 13], sizes = [16, 1], strides = [1, 1]} : vector<16x49xf32> to vector<16x1xf32>
    %36 = vector.extract_strided_slice %20 {offsets = [0, 14], sizes = [16, 1], strides = [1, 1]} : vector<16x49xf32> to vector<16x1xf32>
    %37 = vector.extract_strided_slice %20 {offsets = [0, 15], sizes = [16, 1], strides = [1, 1]} : vector<16x49xf32> to vector<16x1xf32>
    %38 = vector.extract_strided_slice %20 {offsets = [0, 16], sizes = [16, 1], strides = [1, 1]} : vector<16x49xf32> to vector<16x1xf32>
    %39 = vector.extract_strided_slice %20 {offsets = [0, 17], sizes = [16, 1], strides = [1, 1]} : vector<16x49xf32> to vector<16x1xf32>
    %40 = vector.extract_strided_slice %20 {offsets = [0, 18], sizes = [16, 1], strides = [1, 1]} : vector<16x49xf32> to vector<16x1xf32>
    %41 = vector.extract_strided_slice %20 {offsets = [0, 19], sizes = [16, 1], strides = [1, 1]} : vector<16x49xf32> to vector<16x1xf32>
    %42 = vector.extract_strided_slice %20 {offsets = [0, 20], sizes = [16, 1], strides = [1, 1]} : vector<16x49xf32> to vector<16x1xf32>
    %43 = vector.extract_strided_slice %20 {offsets = [0, 21], sizes = [16, 1], strides = [1, 1]} : vector<16x49xf32> to vector<16x1xf32>
    %44 = vector.extract_strided_slice %20 {offsets = [0, 22], sizes = [16, 1], strides = [1, 1]} : vector<16x49xf32> to vector<16x1xf32>
    %45 = vector.extract_strided_slice %20 {offsets = [0, 23], sizes = [16, 1], strides = [1, 1]} : vector<16x49xf32> to vector<16x1xf32>
    %46 = vector.extract_strided_slice %20 {offsets = [0, 24], sizes = [16, 1], strides = [1, 1]} : vector<16x49xf32> to vector<16x1xf32>
    %47 = vector.extract_strided_slice %20 {offsets = [0, 25], sizes = [16, 1], strides = [1, 1]} : vector<16x49xf32> to vector<16x1xf32>
    %48 = vector.extract_strided_slice %20 {offsets = [0, 26], sizes = [16, 1], strides = [1, 1]} : vector<16x49xf32> to vector<16x1xf32>
    %49 = vector.extract_strided_slice %20 {offsets = [0, 27], sizes = [16, 1], strides = [1, 1]} : vector<16x49xf32> to vector<16x1xf32>
    %50 = vector.extract_strided_slice %20 {offsets = [0, 28], sizes = [16, 1], strides = [1, 1]} : vector<16x49xf32> to vector<16x1xf32>
    %51 = vector.extract_strided_slice %20 {offsets = [0, 29], sizes = [16, 1], strides = [1, 1]} : vector<16x49xf32> to vector<16x1xf32>
    %52 = vector.extract_strided_slice %20 {offsets = [0, 30], sizes = [16, 1], strides = [1, 1]} : vector<16x49xf32> to vector<16x1xf32>
    %53 = vector.extract_strided_slice %20 {offsets = [0, 31], sizes = [16, 1], strides = [1, 1]} : vector<16x49xf32> to vector<16x1xf32>
    %54 = vector.extract_strided_slice %20 {offsets = [0, 32], sizes = [16, 1], strides = [1, 1]} : vector<16x49xf32> to vector<16x1xf32>
    %55 = vector.extract_strided_slice %20 {offsets = [0, 33], sizes = [16, 1], strides = [1, 1]} : vector<16x49xf32> to vector<16x1xf32>
    %56 = vector.extract_strided_slice %20 {offsets = [0, 34], sizes = [16, 1], strides = [1, 1]} : vector<16x49xf32> to vector<16x1xf32>
    %57 = vector.extract_strided_slice %20 {offsets = [0, 35], sizes = [16, 1], strides = [1, 1]} : vector<16x49xf32> to vector<16x1xf32>
    %58 = vector.extract_strided_slice %20 {offsets = [0, 36], sizes = [16, 1], strides = [1, 1]} : vector<16x49xf32> to vector<16x1xf32>
    %59 = vector.extract_strided_slice %20 {offsets = [0, 37], sizes = [16, 1], strides = [1, 1]} : vector<16x49xf32> to vector<16x1xf32>
    %60 = vector.extract_strided_slice %20 {offsets = [0, 38], sizes = [16, 1], strides = [1, 1]} : vector<16x49xf32> to vector<16x1xf32>
    %61 = vector.extract_strided_slice %20 {offsets = [0, 39], sizes = [16, 1], strides = [1, 1]} : vector<16x49xf32> to vector<16x1xf32>
    %62 = vector.extract_strided_slice %20 {offsets = [0, 40], sizes = [16, 1], strides = [1, 1]} : vector<16x49xf32> to vector<16x1xf32>
    %63 = vector.extract_strided_slice %20 {offsets = [0, 41], sizes = [16, 1], strides = [1, 1]} : vector<16x49xf32> to vector<16x1xf32>
    %64 = vector.extract_strided_slice %20 {offsets = [0, 42], sizes = [16, 1], strides = [1, 1]} : vector<16x49xf32> to vector<16x1xf32>
    %65 = vector.extract_strided_slice %20 {offsets = [0, 43], sizes = [16, 1], strides = [1, 1]} : vector<16x49xf32> to vector<16x1xf32>
    %66 = vector.extract_strided_slice %20 {offsets = [0, 44], sizes = [16, 1], strides = [1, 1]} : vector<16x49xf32> to vector<16x1xf32>
    %67 = vector.extract_strided_slice %20 {offsets = [0, 45], sizes = [16, 1], strides = [1, 1]} : vector<16x49xf32> to vector<16x1xf32>
    %68 = vector.extract_strided_slice %20 {offsets = [0, 46], sizes = [16, 1], strides = [1, 1]} : vector<16x49xf32> to vector<16x1xf32>
    %69 = vector.extract_strided_slice %20 {offsets = [0, 47], sizes = [16, 1], strides = [1, 1]} : vector<16x49xf32> to vector<16x1xf32>
    %70 = vector.extract_strided_slice %20 {offsets = [0, 48], sizes = [16, 1], strides = [1, 1]} : vector<16x49xf32> to vector<16x1xf32>
    %71 = vector.extract_strided_slice %21 {offsets = [0, 0], sizes = [16, 1], strides = [1, 1]} : vector<16x49xf32> to vector<16x1xf32>
    %72 = vector.extract_strided_slice %21 {offsets = [0, 1], sizes = [16, 1], strides = [1, 1]} : vector<16x49xf32> to vector<16x1xf32>
    %73 = vector.extract_strided_slice %21 {offsets = [0, 2], sizes = [16, 1], strides = [1, 1]} : vector<16x49xf32> to vector<16x1xf32>
    %74 = vector.extract_strided_slice %21 {offsets = [0, 3], sizes = [16, 1], strides = [1, 1]} : vector<16x49xf32> to vector<16x1xf32>
    %75 = vector.extract_strided_slice %21 {offsets = [0, 4], sizes = [16, 1], strides = [1, 1]} : vector<16x49xf32> to vector<16x1xf32>
    %76 = vector.extract_strided_slice %21 {offsets = [0, 5], sizes = [16, 1], strides = [1, 1]} : vector<16x49xf32> to vector<16x1xf32>
    %77 = vector.extract_strided_slice %21 {offsets = [0, 6], sizes = [16, 1], strides = [1, 1]} : vector<16x49xf32> to vector<16x1xf32>
    %78 = vector.extract_strided_slice %21 {offsets = [0, 7], sizes = [16, 1], strides = [1, 1]} : vector<16x49xf32> to vector<16x1xf32>
    %79 = vector.extract_strided_slice %21 {offsets = [0, 8], sizes = [16, 1], strides = [1, 1]} : vector<16x49xf32> to vector<16x1xf32>
    %80 = vector.extract_strided_slice %21 {offsets = [0, 9], sizes = [16, 1], strides = [1, 1]} : vector<16x49xf32> to vector<16x1xf32>
    %81 = vector.extract_strided_slice %21 {offsets = [0, 10], sizes = [16, 1], strides = [1, 1]} : vector<16x49xf32> to vector<16x1xf32>
    %82 = vector.extract_strided_slice %21 {offsets = [0, 11], sizes = [16, 1], strides = [1, 1]} : vector<16x49xf32> to vector<16x1xf32>
    %83 = vector.extract_strided_slice %21 {offsets = [0, 12], sizes = [16, 1], strides = [1, 1]} : vector<16x49xf32> to vector<16x1xf32>
    %84 = vector.extract_strided_slice %21 {offsets = [0, 13], sizes = [16, 1], strides = [1, 1]} : vector<16x49xf32> to vector<16x1xf32>
    %85 = vector.extract_strided_slice %21 {offsets = [0, 14], sizes = [16, 1], strides = [1, 1]} : vector<16x49xf32> to vector<16x1xf32>
    %86 = vector.extract_strided_slice %21 {offsets = [0, 15], sizes = [16, 1], strides = [1, 1]} : vector<16x49xf32> to vector<16x1xf32>
    %87 = vector.extract_strided_slice %21 {offsets = [0, 16], sizes = [16, 1], strides = [1, 1]} : vector<16x49xf32> to vector<16x1xf32>
    %88 = vector.extract_strided_slice %21 {offsets = [0, 17], sizes = [16, 1], strides = [1, 1]} : vector<16x49xf32> to vector<16x1xf32>
    %89 = vector.extract_strided_slice %21 {offsets = [0, 18], sizes = [16, 1], strides = [1, 1]} : vector<16x49xf32> to vector<16x1xf32>
    %90 = vector.extract_strided_slice %21 {offsets = [0, 19], sizes = [16, 1], strides = [1, 1]} : vector<16x49xf32> to vector<16x1xf32>
    %91 = vector.extract_strided_slice %21 {offsets = [0, 20], sizes = [16, 1], strides = [1, 1]} : vector<16x49xf32> to vector<16x1xf32>
    %92 = vector.extract_strided_slice %21 {offsets = [0, 21], sizes = [16, 1], strides = [1, 1]} : vector<16x49xf32> to vector<16x1xf32>
    %93 = vector.extract_strided_slice %21 {offsets = [0, 22], sizes = [16, 1], strides = [1, 1]} : vector<16x49xf32> to vector<16x1xf32>
    %94 = vector.extract_strided_slice %21 {offsets = [0, 23], sizes = [16, 1], strides = [1, 1]} : vector<16x49xf32> to vector<16x1xf32>
    %95 = vector.extract_strided_slice %21 {offsets = [0, 24], sizes = [16, 1], strides = [1, 1]} : vector<16x49xf32> to vector<16x1xf32>
    %96 = vector.extract_strided_slice %21 {offsets = [0, 25], sizes = [16, 1], strides = [1, 1]} : vector<16x49xf32> to vector<16x1xf32>
    %97 = vector.extract_strided_slice %21 {offsets = [0, 26], sizes = [16, 1], strides = [1, 1]} : vector<16x49xf32> to vector<16x1xf32>
    %98 = vector.extract_strided_slice %21 {offsets = [0, 27], sizes = [16, 1], strides = [1, 1]} : vector<16x49xf32> to vector<16x1xf32>
    %99 = vector.extract_strided_slice %21 {offsets = [0, 28], sizes = [16, 1], strides = [1, 1]} : vector<16x49xf32> to vector<16x1xf32>
    %100 = vector.extract_strided_slice %21 {offsets = [0, 29], sizes = [16, 1], strides = [1, 1]} : vector<16x49xf32> to vector<16x1xf32>
    %101 = vector.extract_strided_slice %21 {offsets = [0, 30], sizes = [16, 1], strides = [1, 1]} : vector<16x49xf32> to vector<16x1xf32>
    %102 = vector.extract_strided_slice %21 {offsets = [0, 31], sizes = [16, 1], strides = [1, 1]} : vector<16x49xf32> to vector<16x1xf32>
    %103 = vector.extract_strided_slice %21 {offsets = [0, 32], sizes = [16, 1], strides = [1, 1]} : vector<16x49xf32> to vector<16x1xf32>
    %104 = vector.extract_strided_slice %21 {offsets = [0, 33], sizes = [16, 1], strides = [1, 1]} : vector<16x49xf32> to vector<16x1xf32>
    %105 = vector.extract_strided_slice %21 {offsets = [0, 34], sizes = [16, 1], strides = [1, 1]} : vector<16x49xf32> to vector<16x1xf32>
    %106 = vector.extract_strided_slice %21 {offsets = [0, 35], sizes = [16, 1], strides = [1, 1]} : vector<16x49xf32> to vector<16x1xf32>
    %107 = vector.extract_strided_slice %21 {offsets = [0, 36], sizes = [16, 1], strides = [1, 1]} : vector<16x49xf32> to vector<16x1xf32>
    %108 = vector.extract_strided_slice %21 {offsets = [0, 37], sizes = [16, 1], strides = [1, 1]} : vector<16x49xf32> to vector<16x1xf32>
    %109 = vector.extract_strided_slice %21 {offsets = [0, 38], sizes = [16, 1], strides = [1, 1]} : vector<16x49xf32> to vector<16x1xf32>
    %110 = vector.extract_strided_slice %21 {offsets = [0, 39], sizes = [16, 1], strides = [1, 1]} : vector<16x49xf32> to vector<16x1xf32>
    %111 = vector.extract_strided_slice %21 {offsets = [0, 40], sizes = [16, 1], strides = [1, 1]} : vector<16x49xf32> to vector<16x1xf32>
    %112 = vector.extract_strided_slice %21 {offsets = [0, 41], sizes = [16, 1], strides = [1, 1]} : vector<16x49xf32> to vector<16x1xf32>
    %113 = vector.extract_strided_slice %21 {offsets = [0, 42], sizes = [16, 1], strides = [1, 1]} : vector<16x49xf32> to vector<16x1xf32>
    %114 = vector.extract_strided_slice %21 {offsets = [0, 43], sizes = [16, 1], strides = [1, 1]} : vector<16x49xf32> to vector<16x1xf32>
    %115 = vector.extract_strided_slice %21 {offsets = [0, 44], sizes = [16, 1], strides = [1, 1]} : vector<16x49xf32> to vector<16x1xf32>
    %116 = vector.extract_strided_slice %21 {offsets = [0, 45], sizes = [16, 1], strides = [1, 1]} : vector<16x49xf32> to vector<16x1xf32>
    %117 = vector.extract_strided_slice %21 {offsets = [0, 46], sizes = [16, 1], strides = [1, 1]} : vector<16x49xf32> to vector<16x1xf32>
    %118 = vector.extract_strided_slice %21 {offsets = [0, 47], sizes = [16, 1], strides = [1, 1]} : vector<16x49xf32> to vector<16x1xf32>
    %119 = vector.extract_strided_slice %21 {offsets = [0, 48], sizes = [16, 1], strides = [1, 1]} : vector<16x49xf32> to vector<16x1xf32>
    %c0_10 = arith.constant 0 : index
    %c0_11 = arith.constant 0 : index
    %120 = vector.load %arg4[%c0_10, %c0_11] : memref<64x16xf32, #tpu.memory_space<vmem>>, vector<64x16xf32>
    %c0_12 = arith.constant 0 : index
    %c0_13 = arith.constant 0 : index
    %121 = vector.load %arg5[%c0_12, %c0_13] : memref<64x1xf32, #tpu.memory_space<vmem>>, vector<64x1xf32>
    %c0_14 = arith.constant 0 : index
    %c0_15 = arith.constant 0 : index
    %122 = vector.load %arg6[%c0_14, %c0_15] : memref<16x64xf32, #tpu.memory_space<vmem>>, vector<16x64xf32>
    %c0_16 = arith.constant 0 : index
    %c0_17 = arith.constant 0 : index
    %123 = vector.load %arg7[%c0_16, %c0_17] : memref<16x1xf32, #tpu.memory_space<vmem>>, vector<16x1xf32>
    %c0_18 = arith.constant 0 : index
    %c0_19 = arith.constant 0 : index
    %c0_20 = arith.constant 0 : index
    %124 = vector.load %arg1[%c0_18, %c0_19, %c0_20] : memref<2x16x256xf32, #tpu.memory_space<vmem>>, vector<1x16x256xf32>
    %125 = vector.shape_cast %124 : vector<1x16x256xf32> to vector<16x256xf32>
    %cst_21 = arith.constant 0.000000e+00 : f32
    %126 = vector.broadcast %cst_21 : f32 to vector<16x3xf32>
    %127 = vector.extract_strided_slice %125 {offsets = [0, 0], sizes = [16, 253], strides = [1, 1]} : vector<16x256xf32> to vector<16x253xf32>
    %128 = tpu.concatenate %126, %127 in 1 : vector<16x3xf32>, vector<16x253xf32> -> vector<16x256xf32>
    %cst_22 = arith.constant 0.000000e+00 : f32
    %129 = vector.shape_cast %9 : vector<1x256xi1> to vector<1x256xi1>
    %130 = vector.broadcast %129 : vector<1x256xi1> to vector<16x256xi1>
    %131 = vector.broadcast %cst_22 : f32 to vector<16x256xf32>
    %132 = arith.select %130, %128, %131 : vector<16x256xi1>, vector<16x256xf32>
    %cst_23 = arith.constant 0.000000e+00 : f32
    %133 = vector.broadcast %cst_23 : f32 to vector<16x2xf32>
    %134 = vector.extract_strided_slice %125 {offsets = [0, 0], sizes = [16, 254], strides = [1, 1]} : vector<16x256xf32> to vector<16x254xf32>
    %135 = tpu.concatenate %133, %134 in 1 : vector<16x2xf32>, vector<16x254xf32> -> vector<16x256xf32>
    %cst_24 = arith.constant 0.000000e+00 : f32
    %136 = vector.shape_cast %11 : vector<1x256xi1> to vector<1x256xi1>
    %137 = vector.broadcast %136 : vector<1x256xi1> to vector<16x256xi1>
    %138 = vector.broadcast %cst_24 : f32 to vector<16x256xf32>
    %139 = arith.select %137, %135, %138 : vector<16x256xi1>, vector<16x256xf32>
    %cst_25 = arith.constant 0.000000e+00 : f32
    %140 = vector.broadcast %cst_25 : f32 to vector<16x1xf32>
    %141 = vector.extract_strided_slice %125 {offsets = [0, 0], sizes = [16, 255], strides = [1, 1]} : vector<16x256xf32> to vector<16x255xf32>
    %142 = tpu.concatenate %140, %141 in 1 : vector<16x1xf32>, vector<16x255xf32> -> vector<16x256xf32>
    %cst_26 = arith.constant 0.000000e+00 : f32
    %143 = vector.shape_cast %13 : vector<1x256xi1> to vector<1x256xi1>
    %144 = vector.broadcast %143 : vector<1x256xi1> to vector<16x256xi1>
    %145 = vector.broadcast %cst_26 : f32 to vector<16x256xf32>
    %146 = arith.select %144, %142, %145 : vector<16x256xi1>, vector<16x256xf32>
    %cst_27 = arith.constant 0.000000e+00 : f32
    %147 = vector.broadcast %cst_27 : f32 to vector<16x1xf32>
    %148 = vector.extract_strided_slice %125 {offsets = [0, 1], sizes = [16, 255], strides = [1, 1]} : vector<16x256xf32> to vector<16x255xf32>
    %149 = tpu.concatenate %148, %147 in 1 : vector<16x255xf32>, vector<16x1xf32> -> vector<16x256xf32>
    %cst_28 = arith.constant 0.000000e+00 : f32
    %150 = vector.shape_cast %15 : vector<1x256xi1> to vector<1x256xi1>
    %151 = vector.broadcast %150 : vector<1x256xi1> to vector<16x256xi1>
    %152 = vector.broadcast %cst_28 : f32 to vector<16x256xf32>
    %153 = arith.select %151, %149, %152 : vector<16x256xi1>, vector<16x256xf32>
    %cst_29 = arith.constant 0.000000e+00 : f32
    %154 = vector.broadcast %cst_29 : f32 to vector<16x2xf32>
    %155 = vector.extract_strided_slice %125 {offsets = [0, 2], sizes = [16, 254], strides = [1, 1]} : vector<16x256xf32> to vector<16x254xf32>
    %156 = tpu.concatenate %155, %154 in 1 : vector<16x254xf32>, vector<16x2xf32> -> vector<16x256xf32>
    %cst_30 = arith.constant 0.000000e+00 : f32
    %157 = vector.shape_cast %17 : vector<1x256xi1> to vector<1x256xi1>
    %158 = vector.broadcast %157 : vector<1x256xi1> to vector<16x256xi1>
    %159 = vector.broadcast %cst_30 : f32 to vector<16x256xf32>
    %160 = arith.select %158, %156, %159 : vector<16x256xi1>, vector<16x256xf32>
    %cst_31 = arith.constant 0.000000e+00 : f32
    %161 = vector.broadcast %cst_31 : f32 to vector<16x3xf32>
    %162 = vector.extract_strided_slice %125 {offsets = [0, 3], sizes = [16, 253], strides = [1, 1]} : vector<16x256xf32> to vector<16x253xf32>
    %163 = tpu.concatenate %162, %161 in 1 : vector<16x253xf32>, vector<16x3xf32> -> vector<16x256xf32>
    %cst_32 = arith.constant 0.000000e+00 : f32
    %164 = vector.shape_cast %19 : vector<1x256xi1> to vector<1x256xi1>
    %165 = vector.broadcast %164 : vector<1x256xi1> to vector<16x256xi1>
    %166 = vector.broadcast %cst_32 : f32 to vector<16x256xf32>
    %167 = arith.select %165, %163, %166 : vector<16x256xi1>, vector<16x256xf32>
    %cst_33 = arith.constant 0.000000e+00 : f32
    %168 = vector.broadcast %cst_33 : f32 to vector<16x256xf32>
    %cst_34 = arith.constant 0.000000e+00 : f32
    %169 = vector.broadcast %cst_34 : f32 to vector<16x256xf32>
    %170 = vector.broadcast %22 : vector<16x1xf32> to vector<16x256xf32>
    %171 = arith.mulf %132, %170 : vector<16x256xf32>
    %172 = vector.broadcast %71 : vector<16x1xf32> to vector<16x256xf32>
    %173 = arith.mulf %132, %172 : vector<16x256xf32>
    %174 = vector.broadcast %23 : vector<16x1xf32> to vector<16x256xf32>
    %175 = arith.mulf %139, %174 : vector<16x256xf32>
    %176 = arith.addf %171, %175 : vector<16x256xf32>
    %177 = vector.broadcast %72 : vector<16x1xf32> to vector<16x256xf32>
    %178 = arith.mulf %139, %177 : vector<16x256xf32>
    %179 = arith.addf %173, %178 : vector<16x256xf32>
    %180 = vector.broadcast %24 : vector<16x1xf32> to vector<16x256xf32>
    %181 = arith.mulf %146, %180 : vector<16x256xf32>
    %182 = arith.addf %176, %181 : vector<16x256xf32>
    %183 = vector.broadcast %73 : vector<16x1xf32> to vector<16x256xf32>
    %184 = arith.mulf %146, %183 : vector<16x256xf32>
    %185 = arith.addf %179, %184 : vector<16x256xf32>
    %186 = vector.broadcast %25 : vector<16x1xf32> to vector<16x256xf32>
    %187 = arith.mulf %125, %186 : vector<16x256xf32>
    %188 = arith.addf %182, %187 : vector<16x256xf32>
    %189 = vector.broadcast %74 : vector<16x1xf32> to vector<16x256xf32>
    %190 = arith.mulf %125, %189 : vector<16x256xf32>
    %191 = arith.addf %185, %190 : vector<16x256xf32>
    %192 = vector.broadcast %26 : vector<16x1xf32> to vector<16x256xf32>
    %193 = arith.mulf %153, %192 : vector<16x256xf32>
    %194 = arith.addf %188, %193 : vector<16x256xf32>
    %195 = vector.broadcast %75 : vector<16x1xf32> to vector<16x256xf32>
    %196 = arith.mulf %153, %195 : vector<16x256xf32>
    %197 = arith.addf %191, %196 : vector<16x256xf32>
    %198 = vector.broadcast %27 : vector<16x1xf32> to vector<16x256xf32>
    %199 = arith.mulf %160, %198 : vector<16x256xf32>
    %200 = arith.addf %194, %199 : vector<16x256xf32>
    %201 = vector.broadcast %76 : vector<16x1xf32> to vector<16x256xf32>
    %202 = arith.mulf %160, %201 : vector<16x256xf32>
    %203 = arith.addf %197, %202 : vector<16x256xf32>
    %204 = vector.broadcast %28 : vector<16x1xf32> to vector<16x256xf32>
    %205 = arith.mulf %167, %204 : vector<16x256xf32>
    %206 = arith.addf %200, %205 : vector<16x256xf32>
    %207 = vector.broadcast %77 : vector<16x1xf32> to vector<16x256xf32>
    %208 = arith.mulf %167, %207 : vector<16x256xf32>
    %209 = arith.addf %203, %208 : vector<16x256xf32>
    %cst_35 = arith.constant 0.000000e+00 : f32
    %210 = vector.broadcast %cst_35 : f32 to vector<16x48xf32>
    %211 = vector.extract_strided_slice %206 {offsets = [0, 0], sizes = [16, 208], strides = [1, 1]} : vector<16x256xf32> to vector<16x208xf32>
    %212 = tpu.concatenate %210, %211 in 1 : vector<16x48xf32>, vector<16x208xf32> -> vector<16x256xf32>
    %213 = arith.addf %168, %212 : vector<16x256xf32>
    %cst_36 = arith.constant 0.000000e+00 : f32
    %214 = vector.broadcast %cst_36 : f32 to vector<16x48xf32>
    %215 = vector.extract_strided_slice %209 {offsets = [0, 0], sizes = [16, 208], strides = [1, 1]} : vector<16x256xf32> to vector<16x208xf32>
    %216 = tpu.concatenate %214, %215 in 1 : vector<16x48xf32>, vector<16x208xf32> -> vector<16x256xf32>
    %217 = arith.addf %169, %216 : vector<16x256xf32>
    %218 = vector.broadcast %29 : vector<16x1xf32> to vector<16x256xf32>
    %219 = arith.mulf %132, %218 : vector<16x256xf32>
    %220 = vector.broadcast %78 : vector<16x1xf32> to vector<16x256xf32>
    %221 = arith.mulf %132, %220 : vector<16x256xf32>
    %222 = vector.broadcast %30 : vector<16x1xf32> to vector<16x256xf32>
    %223 = arith.mulf %139, %222 : vector<16x256xf32>
    %224 = arith.addf %219, %223 : vector<16x256xf32>
    %225 = vector.broadcast %79 : vector<16x1xf32> to vector<16x256xf32>
    %226 = arith.mulf %139, %225 : vector<16x256xf32>
    %227 = arith.addf %221, %226 : vector<16x256xf32>
    %228 = vector.broadcast %31 : vector<16x1xf32> to vector<16x256xf32>
    %229 = arith.mulf %146, %228 : vector<16x256xf32>
    %230 = arith.addf %224, %229 : vector<16x256xf32>
    %231 = vector.broadcast %80 : vector<16x1xf32> to vector<16x256xf32>
    %232 = arith.mulf %146, %231 : vector<16x256xf32>
    %233 = arith.addf %227, %232 : vector<16x256xf32>
    %234 = vector.broadcast %32 : vector<16x1xf32> to vector<16x256xf32>
    %235 = arith.mulf %125, %234 : vector<16x256xf32>
    %236 = arith.addf %230, %235 : vector<16x256xf32>
    %237 = vector.broadcast %81 : vector<16x1xf32> to vector<16x256xf32>
    %238 = arith.mulf %125, %237 : vector<16x256xf32>
    %239 = arith.addf %233, %238 : vector<16x256xf32>
    %240 = vector.broadcast %33 : vector<16x1xf32> to vector<16x256xf32>
    %241 = arith.mulf %153, %240 : vector<16x256xf32>
    %242 = arith.addf %236, %241 : vector<16x256xf32>
    %243 = vector.broadcast %82 : vector<16x1xf32> to vector<16x256xf32>
    %244 = arith.mulf %153, %243 : vector<16x256xf32>
    %245 = arith.addf %239, %244 : vector<16x256xf32>
    %246 = vector.broadcast %34 : vector<16x1xf32> to vector<16x256xf32>
    %247 = arith.mulf %160, %246 : vector<16x256xf32>
    %248 = arith.addf %242, %247 : vector<16x256xf32>
    %249 = vector.broadcast %83 : vector<16x1xf32> to vector<16x256xf32>
    %250 = arith.mulf %160, %249 : vector<16x256xf32>
    %251 = arith.addf %245, %250 : vector<16x256xf32>
    %252 = vector.broadcast %35 : vector<16x1xf32> to vector<16x256xf32>
    %253 = arith.mulf %167, %252 : vector<16x256xf32>
    %254 = arith.addf %248, %253 : vector<16x256xf32>
    %255 = vector.broadcast %84 : vector<16x1xf32> to vector<16x256xf32>
    %256 = arith.mulf %167, %255 : vector<16x256xf32>
    %257 = arith.addf %251, %256 : vector<16x256xf32>
    %cst_37 = arith.constant 0.000000e+00 : f32
    %258 = vector.broadcast %cst_37 : f32 to vector<16x32xf32>
    %259 = vector.extract_strided_slice %254 {offsets = [0, 0], sizes = [16, 224], strides = [1, 1]} : vector<16x256xf32> to vector<16x224xf32>
    %260 = tpu.concatenate %258, %259 in 1 : vector<16x32xf32>, vector<16x224xf32> -> vector<16x256xf32>
    %261 = arith.addf %213, %260 : vector<16x256xf32>
    %cst_38 = arith.constant 0.000000e+00 : f32
    %262 = vector.broadcast %cst_38 : f32 to vector<16x32xf32>
    %263 = vector.extract_strided_slice %257 {offsets = [0, 0], sizes = [16, 224], strides = [1, 1]} : vector<16x256xf32> to vector<16x224xf32>
    %264 = tpu.concatenate %262, %263 in 1 : vector<16x32xf32>, vector<16x224xf32> -> vector<16x256xf32>
    %265 = arith.addf %217, %264 : vector<16x256xf32>
    %266 = vector.broadcast %36 : vector<16x1xf32> to vector<16x256xf32>
    %267 = arith.mulf %132, %266 : vector<16x256xf32>
    %268 = vector.broadcast %85 : vector<16x1xf32> to vector<16x256xf32>
    %269 = arith.mulf %132, %268 : vector<16x256xf32>
    %270 = vector.broadcast %37 : vector<16x1xf32> to vector<16x256xf32>
    %271 = arith.mulf %139, %270 : vector<16x256xf32>
    %272 = arith.addf %267, %271 : vector<16x256xf32>
    %273 = vector.broadcast %86 : vector<16x1xf32> to vector<16x256xf32>
    %274 = arith.mulf %139, %273 : vector<16x256xf32>
    %275 = arith.addf %269, %274 : vector<16x256xf32>
    %276 = vector.broadcast %38 : vector<16x1xf32> to vector<16x256xf32>
    %277 = arith.mulf %146, %276 : vector<16x256xf32>
    %278 = arith.addf %272, %277 : vector<16x256xf32>
    %279 = vector.broadcast %87 : vector<16x1xf32> to vector<16x256xf32>
    %280 = arith.mulf %146, %279 : vector<16x256xf32>
    %281 = arith.addf %275, %280 : vector<16x256xf32>
    %282 = vector.broadcast %39 : vector<16x1xf32> to vector<16x256xf32>
    %283 = arith.mulf %125, %282 : vector<16x256xf32>
    %284 = arith.addf %278, %283 : vector<16x256xf32>
    %285 = vector.broadcast %88 : vector<16x1xf32> to vector<16x256xf32>
    %286 = arith.mulf %125, %285 : vector<16x256xf32>
    %287 = arith.addf %281, %286 : vector<16x256xf32>
    %288 = vector.broadcast %40 : vector<16x1xf32> to vector<16x256xf32>
    %289 = arith.mulf %153, %288 : vector<16x256xf32>
    %290 = arith.addf %284, %289 : vector<16x256xf32>
    %291 = vector.broadcast %89 : vector<16x1xf32> to vector<16x256xf32>
    %292 = arith.mulf %153, %291 : vector<16x256xf32>
    %293 = arith.addf %287, %292 : vector<16x256xf32>
    %294 = vector.broadcast %41 : vector<16x1xf32> to vector<16x256xf32>
    %295 = arith.mulf %160, %294 : vector<16x256xf32>
    %296 = arith.addf %290, %295 : vector<16x256xf32>
    %297 = vector.broadcast %90 : vector<16x1xf32> to vector<16x256xf32>
    %298 = arith.mulf %160, %297 : vector<16x256xf32>
    %299 = arith.addf %293, %298 : vector<16x256xf32>
    %300 = vector.broadcast %42 : vector<16x1xf32> to vector<16x256xf32>
    %301 = arith.mulf %167, %300 : vector<16x256xf32>
    %302 = arith.addf %296, %301 : vector<16x256xf32>
    %303 = vector.broadcast %91 : vector<16x1xf32> to vector<16x256xf32>
    %304 = arith.mulf %167, %303 : vector<16x256xf32>
    %305 = arith.addf %299, %304 : vector<16x256xf32>
    %cst_39 = arith.constant 0.000000e+00 : f32
    %306 = vector.broadcast %cst_39 : f32 to vector<16x16xf32>
    %307 = vector.extract_strided_slice %302 {offsets = [0, 0], sizes = [16, 240], strides = [1, 1]} : vector<16x256xf32> to vector<16x240xf32>
    %308 = tpu.concatenate %306, %307 in 1 : vector<16x16xf32>, vector<16x240xf32> -> vector<16x256xf32>
    %309 = arith.addf %261, %308 : vector<16x256xf32>
    %cst_40 = arith.constant 0.000000e+00 : f32
    %310 = vector.broadcast %cst_40 : f32 to vector<16x16xf32>
    %311 = vector.extract_strided_slice %305 {offsets = [0, 0], sizes = [16, 240], strides = [1, 1]} : vector<16x256xf32> to vector<16x240xf32>
    %312 = tpu.concatenate %310, %311 in 1 : vector<16x16xf32>, vector<16x240xf32> -> vector<16x256xf32>
    %313 = arith.addf %265, %312 : vector<16x256xf32>
    %314 = vector.broadcast %43 : vector<16x1xf32> to vector<16x256xf32>
    %315 = arith.mulf %132, %314 : vector<16x256xf32>
    %316 = vector.broadcast %92 : vector<16x1xf32> to vector<16x256xf32>
    %317 = arith.mulf %132, %316 : vector<16x256xf32>
    %318 = vector.broadcast %44 : vector<16x1xf32> to vector<16x256xf32>
    %319 = arith.mulf %139, %318 : vector<16x256xf32>
    %320 = arith.addf %315, %319 : vector<16x256xf32>
    %321 = vector.broadcast %93 : vector<16x1xf32> to vector<16x256xf32>
    %322 = arith.mulf %139, %321 : vector<16x256xf32>
    %323 = arith.addf %317, %322 : vector<16x256xf32>
    %324 = vector.broadcast %45 : vector<16x1xf32> to vector<16x256xf32>
    %325 = arith.mulf %146, %324 : vector<16x256xf32>
    %326 = arith.addf %320, %325 : vector<16x256xf32>
    %327 = vector.broadcast %94 : vector<16x1xf32> to vector<16x256xf32>
    %328 = arith.mulf %146, %327 : vector<16x256xf32>
    %329 = arith.addf %323, %328 : vector<16x256xf32>
    %330 = vector.broadcast %46 : vector<16x1xf32> to vector<16x256xf32>
    %331 = arith.mulf %125, %330 : vector<16x256xf32>
    %332 = arith.addf %326, %331 : vector<16x256xf32>
    %333 = vector.broadcast %95 : vector<16x1xf32> to vector<16x256xf32>
    %334 = arith.mulf %125, %333 : vector<16x256xf32>
    %335 = arith.addf %329, %334 : vector<16x256xf32>
    %336 = vector.broadcast %47 : vector<16x1xf32> to vector<16x256xf32>
    %337 = arith.mulf %153, %336 : vector<16x256xf32>
    %338 = arith.addf %332, %337 : vector<16x256xf32>
    %339 = vector.broadcast %96 : vector<16x1xf32> to vector<16x256xf32>
    %340 = arith.mulf %153, %339 : vector<16x256xf32>
    %341 = arith.addf %335, %340 : vector<16x256xf32>
    %342 = vector.broadcast %48 : vector<16x1xf32> to vector<16x256xf32>
    %343 = arith.mulf %160, %342 : vector<16x256xf32>
    %344 = arith.addf %338, %343 : vector<16x256xf32>
    %345 = vector.broadcast %97 : vector<16x1xf32> to vector<16x256xf32>
    %346 = arith.mulf %160, %345 : vector<16x256xf32>
    %347 = arith.addf %341, %346 : vector<16x256xf32>
    %348 = vector.broadcast %49 : vector<16x1xf32> to vector<16x256xf32>
    %349 = arith.mulf %167, %348 : vector<16x256xf32>
    %350 = arith.addf %344, %349 : vector<16x256xf32>
    %351 = vector.broadcast %98 : vector<16x1xf32> to vector<16x256xf32>
    %352 = arith.mulf %167, %351 : vector<16x256xf32>
    %353 = arith.addf %347, %352 : vector<16x256xf32>
    %354 = arith.addf %309, %350 : vector<16x256xf32>
    %355 = arith.addf %313, %353 : vector<16x256xf32>
    %356 = vector.broadcast %50 : vector<16x1xf32> to vector<16x256xf32>
    %357 = arith.mulf %132, %356 : vector<16x256xf32>
    %358 = vector.broadcast %99 : vector<16x1xf32> to vector<16x256xf32>
    %359 = arith.mulf %132, %358 : vector<16x256xf32>
    %360 = vector.broadcast %51 : vector<16x1xf32> to vector<16x256xf32>
    %361 = arith.mulf %139, %360 : vector<16x256xf32>
    %362 = arith.addf %357, %361 : vector<16x256xf32>
    %363 = vector.broadcast %100 : vector<16x1xf32> to vector<16x256xf32>
    %364 = arith.mulf %139, %363 : vector<16x256xf32>
    %365 = arith.addf %359, %364 : vector<16x256xf32>
    %366 = vector.broadcast %52 : vector<16x1xf32> to vector<16x256xf32>
    %367 = arith.mulf %146, %366 : vector<16x256xf32>
    %368 = arith.addf %362, %367 : vector<16x256xf32>
    %369 = vector.broadcast %101 : vector<16x1xf32> to vector<16x256xf32>
    %370 = arith.mulf %146, %369 : vector<16x256xf32>
    %371 = arith.addf %365, %370 : vector<16x256xf32>
    %372 = vector.broadcast %53 : vector<16x1xf32> to vector<16x256xf32>
    %373 = arith.mulf %125, %372 : vector<16x256xf32>
    %374 = arith.addf %368, %373 : vector<16x256xf32>
    %375 = vector.broadcast %102 : vector<16x1xf32> to vector<16x256xf32>
    %376 = arith.mulf %125, %375 : vector<16x256xf32>
    %377 = arith.addf %371, %376 : vector<16x256xf32>
    %378 = vector.broadcast %54 : vector<16x1xf32> to vector<16x256xf32>
    %379 = arith.mulf %153, %378 : vector<16x256xf32>
    %380 = arith.addf %374, %379 : vector<16x256xf32>
    %381 = vector.broadcast %103 : vector<16x1xf32> to vector<16x256xf32>
    %382 = arith.mulf %153, %381 : vector<16x256xf32>
    %383 = arith.addf %377, %382 : vector<16x256xf32>
    %384 = vector.broadcast %55 : vector<16x1xf32> to vector<16x256xf32>
    %385 = arith.mulf %160, %384 : vector<16x256xf32>
    %386 = arith.addf %380, %385 : vector<16x256xf32>
    %387 = vector.broadcast %104 : vector<16x1xf32> to vector<16x256xf32>
    %388 = arith.mulf %160, %387 : vector<16x256xf32>
    %389 = arith.addf %383, %388 : vector<16x256xf32>
    %390 = vector.broadcast %56 : vector<16x1xf32> to vector<16x256xf32>
    %391 = arith.mulf %167, %390 : vector<16x256xf32>
    %392 = arith.addf %386, %391 : vector<16x256xf32>
    %393 = vector.broadcast %105 : vector<16x1xf32> to vector<16x256xf32>
    %394 = arith.mulf %167, %393 : vector<16x256xf32>
    %395 = arith.addf %389, %394 : vector<16x256xf32>
    %cst_41 = arith.constant 0.000000e+00 : f32
    %396 = vector.broadcast %cst_41 : f32 to vector<16x16xf32>
    %397 = vector.extract_strided_slice %392 {offsets = [0, 16], sizes = [16, 240], strides = [1, 1]} : vector<16x256xf32> to vector<16x240xf32>
    %398 = tpu.concatenate %397, %396 in 1 : vector<16x240xf32>, vector<16x16xf32> -> vector<16x256xf32>
    %399 = arith.addf %354, %398 : vector<16x256xf32>
    %cst_42 = arith.constant 0.000000e+00 : f32
    %400 = vector.broadcast %cst_42 : f32 to vector<16x16xf32>
    %401 = vector.extract_strided_slice %395 {offsets = [0, 16], sizes = [16, 240], strides = [1, 1]} : vector<16x256xf32> to vector<16x240xf32>
    %402 = tpu.concatenate %401, %400 in 1 : vector<16x240xf32>, vector<16x16xf32> -> vector<16x256xf32>
    %403 = arith.addf %355, %402 : vector<16x256xf32>
    %404 = vector.broadcast %57 : vector<16x1xf32> to vector<16x256xf32>
    %405 = arith.mulf %132, %404 : vector<16x256xf32>
    %406 = vector.broadcast %106 : vector<16x1xf32> to vector<16x256xf32>
    %407 = arith.mulf %132, %406 : vector<16x256xf32>
    %408 = vector.broadcast %58 : vector<16x1xf32> to vector<16x256xf32>
    %409 = arith.mulf %139, %408 : vector<16x256xf32>
    %410 = arith.addf %405, %409 : vector<16x256xf32>
    %411 = vector.broadcast %107 : vector<16x1xf32> to vector<16x256xf32>
    %412 = arith.mulf %139, %411 : vector<16x256xf32>
    %413 = arith.addf %407, %412 : vector<16x256xf32>
    %414 = vector.broadcast %59 : vector<16x1xf32> to vector<16x256xf32>
    %415 = arith.mulf %146, %414 : vector<16x256xf32>
    %416 = arith.addf %410, %415 : vector<16x256xf32>
    %417 = vector.broadcast %108 : vector<16x1xf32> to vector<16x256xf32>
    %418 = arith.mulf %146, %417 : vector<16x256xf32>
    %419 = arith.addf %413, %418 : vector<16x256xf32>
    %420 = vector.broadcast %60 : vector<16x1xf32> to vector<16x256xf32>
    %421 = arith.mulf %125, %420 : vector<16x256xf32>
    %422 = arith.addf %416, %421 : vector<16x256xf32>
    %423 = vector.broadcast %109 : vector<16x1xf32> to vector<16x256xf32>
    %424 = arith.mulf %125, %423 : vector<16x256xf32>
    %425 = arith.addf %419, %424 : vector<16x256xf32>
    %426 = vector.broadcast %61 : vector<16x1xf32> to vector<16x256xf32>
    %427 = arith.mulf %153, %426 : vector<16x256xf32>
    %428 = arith.addf %422, %427 : vector<16x256xf32>
    %429 = vector.broadcast %110 : vector<16x1xf32> to vector<16x256xf32>
    %430 = arith.mulf %153, %429 : vector<16x256xf32>
    %431 = arith.addf %425, %430 : vector<16x256xf32>
    %432 = vector.broadcast %62 : vector<16x1xf32> to vector<16x256xf32>
    %433 = arith.mulf %160, %432 : vector<16x256xf32>
    %434 = arith.addf %428, %433 : vector<16x256xf32>
    %435 = vector.broadcast %111 : vector<16x1xf32> to vector<16x256xf32>
    %436 = arith.mulf %160, %435 : vector<16x256xf32>
    %437 = arith.addf %431, %436 : vector<16x256xf32>
    %438 = vector.broadcast %63 : vector<16x1xf32> to vector<16x256xf32>
    %439 = arith.mulf %167, %438 : vector<16x256xf32>
    %440 = arith.addf %434, %439 : vector<16x256xf32>
    %441 = vector.broadcast %112 : vector<16x1xf32> to vector<16x256xf32>
    %442 = arith.mulf %167, %441 : vector<16x256xf32>
    %443 = arith.addf %437, %442 : vector<16x256xf32>
    %cst_43 = arith.constant 0.000000e+00 : f32
    %444 = vector.broadcast %cst_43 : f32 to vector<16x32xf32>
    %445 = vector.extract_strided_slice %440 {offsets = [0, 32], sizes = [16, 224], strides = [1, 1]} : vector<16x256xf32> to vector<16x224xf32>
    %446 = tpu.concatenate %445, %444 in 1 : vector<16x224xf32>, vector<16x32xf32> -> vector<16x256xf32>
    %447 = arith.addf %399, %446 : vector<16x256xf32>
    %cst_44 = arith.constant 0.000000e+00 : f32
    %448 = vector.broadcast %cst_44 : f32 to vector<16x32xf32>
    %449 = vector.extract_strided_slice %443 {offsets = [0, 32], sizes = [16, 224], strides = [1, 1]} : vector<16x256xf32> to vector<16x224xf32>
    %450 = tpu.concatenate %449, %448 in 1 : vector<16x224xf32>, vector<16x32xf32> -> vector<16x256xf32>
    %451 = arith.addf %403, %450 : vector<16x256xf32>
    %452 = vector.broadcast %64 : vector<16x1xf32> to vector<16x256xf32>
    %453 = arith.mulf %132, %452 : vector<16x256xf32>
    %454 = vector.broadcast %113 : vector<16x1xf32> to vector<16x256xf32>
    %455 = arith.mulf %132, %454 : vector<16x256xf32>
    %456 = vector.broadcast %65 : vector<16x1xf32> to vector<16x256xf32>
    %457 = arith.mulf %139, %456 : vector<16x256xf32>
    %458 = arith.addf %453, %457 : vector<16x256xf32>
    %459 = vector.broadcast %114 : vector<16x1xf32> to vector<16x256xf32>
    %460 = arith.mulf %139, %459 : vector<16x256xf32>
    %461 = arith.addf %455, %460 : vector<16x256xf32>
    %462 = vector.broadcast %66 : vector<16x1xf32> to vector<16x256xf32>
    %463 = arith.mulf %146, %462 : vector<16x256xf32>
    %464 = arith.addf %458, %463 : vector<16x256xf32>
    %465 = vector.broadcast %115 : vector<16x1xf32> to vector<16x256xf32>
    %466 = arith.mulf %146, %465 : vector<16x256xf32>
    %467 = arith.addf %461, %466 : vector<16x256xf32>
    %468 = vector.broadcast %67 : vector<16x1xf32> to vector<16x256xf32>
    %469 = arith.mulf %125, %468 : vector<16x256xf32>
    %470 = arith.addf %464, %469 : vector<16x256xf32>
    %471 = vector.broadcast %116 : vector<16x1xf32> to vector<16x256xf32>
    %472 = arith.mulf %125, %471 : vector<16x256xf32>
    %473 = arith.addf %467, %472 : vector<16x256xf32>
    %474 = vector.broadcast %68 : vector<16x1xf32> to vector<16x256xf32>
    %475 = arith.mulf %153, %474 : vector<16x256xf32>
    %476 = arith.addf %470, %475 : vector<16x256xf32>
    %477 = vector.broadcast %117 : vector<16x1xf32> to vector<16x256xf32>
    %478 = arith.mulf %153, %477 : vector<16x256xf32>
    %479 = arith.addf %473, %478 : vector<16x256xf32>
    %480 = vector.broadcast %69 : vector<16x1xf32> to vector<16x256xf32>
    %481 = arith.mulf %160, %480 : vector<16x256xf32>
    %482 = arith.addf %476, %481 : vector<16x256xf32>
    %483 = vector.broadcast %118 : vector<16x1xf32> to vector<16x256xf32>
    %484 = arith.mulf %160, %483 : vector<16x256xf32>
    %485 = arith.addf %479, %484 : vector<16x256xf32>
    %486 = vector.broadcast %70 : vector<16x1xf32> to vector<16x256xf32>
    %487 = arith.mulf %167, %486 : vector<16x256xf32>
    %488 = arith.addf %482, %487 : vector<16x256xf32>
    %489 = vector.broadcast %119 : vector<16x1xf32> to vector<16x256xf32>
    %490 = arith.mulf %167, %489 : vector<16x256xf32>
    %491 = arith.addf %485, %490 : vector<16x256xf32>
    %cst_45 = arith.constant 0.000000e+00 : f32
    %492 = vector.broadcast %cst_45 : f32 to vector<16x48xf32>
    %493 = vector.extract_strided_slice %488 {offsets = [0, 48], sizes = [16, 208], strides = [1, 1]} : vector<16x256xf32> to vector<16x208xf32>
    %494 = tpu.concatenate %493, %492 in 1 : vector<16x208xf32>, vector<16x48xf32> -> vector<16x256xf32>
    %495 = arith.addf %447, %494 : vector<16x256xf32>
    %cst_46 = arith.constant 0.000000e+00 : f32
    %496 = vector.broadcast %cst_46 : f32 to vector<16x48xf32>
    %497 = vector.extract_strided_slice %491 {offsets = [0, 48], sizes = [16, 208], strides = [1, 1]} : vector<16x256xf32> to vector<16x208xf32>
    %498 = tpu.concatenate %497, %496 in 1 : vector<16x208xf32>, vector<16x48xf32> -> vector<16x256xf32>
    %499 = arith.addf %451, %498 : vector<16x256xf32>
    %cst_47 = arith.constant dense<0.000000e+00> : vector<16xf32>
    %500 = vector.multi_reduction <add>, %495, %cst_47 [1] : vector<16x256xf32> to vector<16xf32>
    %501 = vector.shape_cast %500 : vector<16xf32> to vector<16x1xf32>
    %cst_48 = arith.constant 2.560000e+02 : f32
    %502 = vector.broadcast %cst_48 : f32 to vector<16x1xf32>
    %503 = arith.divf %501, %502 : vector<16x1xf32>
    %504 = arith.mulf %495, %495 : vector<16x256xf32>
    %cst_49 = arith.constant dense<0.000000e+00> : vector<16xf32>
    %505 = vector.multi_reduction <add>, %504, %cst_49 [1] : vector<16x256xf32> to vector<16xf32>
    %506 = vector.shape_cast %505 : vector<16xf32> to vector<16x1xf32>
    %cst_50 = arith.constant 2.560000e+02 : f32
    %507 = vector.broadcast %cst_50 : f32 to vector<16x1xf32>
    %508 = arith.divf %506, %507 : vector<16x1xf32>
    %509 = vector.broadcast %503 : vector<16x1xf32> to vector<16x256xf32>
    %510 = arith.subf %495, %509 : vector<16x256xf32>
    %511 = arith.mulf %503, %503 : vector<16x1xf32>
    %512 = arith.subf %508, %511 : vector<16x1xf32>
    %cst_51 = arith.constant 9.99999974E-6 : f32
    %513 = vector.broadcast %cst_51 : f32 to vector<16x1xf32>
    %514 = arith.addf %512, %513 : vector<16x1xf32>
    %515 = math.rsqrt %514 : vector<16x1xf32>
    %516 = vector.broadcast %515 : vector<16x1xf32> to vector<16x256xf32>
    %517 = arith.mulf %510, %516 : vector<16x256xf32>
    %cst_52 = arith.constant 0.000000e+00 : f32
    %518 = vector.broadcast %cst_52 : f32 to vector<16x256xf32>
    %519 = arith.maximumf %517, %518 : vector<16x256xf32>
    %cst_53 = arith.constant dense<0.000000e+00> : vector<16xf32>
    %520 = vector.multi_reduction <add>, %499, %cst_53 [1] : vector<16x256xf32> to vector<16xf32>
    %521 = vector.shape_cast %520 : vector<16xf32> to vector<16x1xf32>
    %cst_54 = arith.constant 2.560000e+02 : f32
    %522 = vector.broadcast %cst_54 : f32 to vector<16x1xf32>
    %523 = arith.divf %521, %522 : vector<16x1xf32>
    %524 = arith.mulf %499, %499 : vector<16x256xf32>
    %cst_55 = arith.constant dense<0.000000e+00> : vector<16xf32>
    %525 = vector.multi_reduction <add>, %524, %cst_55 [1] : vector<16x256xf32> to vector<16xf32>
    %526 = vector.shape_cast %525 : vector<16xf32> to vector<16x1xf32>
    %cst_56 = arith.constant 2.560000e+02 : f32
    %527 = vector.broadcast %cst_56 : f32 to vector<16x1xf32>
    %528 = arith.divf %526, %527 : vector<16x1xf32>
    %529 = vector.broadcast %523 : vector<16x1xf32> to vector<16x256xf32>
    %530 = arith.subf %499, %529 : vector<16x256xf32>
    %531 = arith.mulf %523, %523 : vector<16x1xf32>
    %532 = arith.subf %528, %531 : vector<16x1xf32>
    %cst_57 = arith.constant 9.99999974E-6 : f32
    %533 = vector.broadcast %cst_57 : f32 to vector<16x1xf32>
    %534 = arith.addf %532, %533 : vector<16x1xf32>
    %535 = math.rsqrt %534 : vector<16x1xf32>
    %536 = vector.broadcast %535 : vector<16x1xf32> to vector<16x256xf32>
    %537 = arith.mulf %530, %536 : vector<16x256xf32>
    %cst_58 = arith.constant 0.000000e+00 : f32
    %538 = vector.broadcast %cst_58 : f32 to vector<16x256xf32>
    %539 = arith.maximumf %537, %538 : vector<16x256xf32>
    %540 = arith.minimumf %519, %539 : vector<16x256xf32>
    %cst_59 = arith.constant 2.000000e+00 : f32
    %541 = vector.broadcast %cst_59 : f32 to vector<16x256xf32>
    %542 = arith.mulf %541, %540 : vector<16x256xf32>
    %543 = arith.subf %542, %519 : vector<16x256xf32>
    %cst_60 = arith.constant dense<0.000000e+00> : vector<256xf32>
    %544 = vector.multi_reduction <add>, %543, %cst_60 [0] : vector<16x256xf32> to vector<256xf32>
    %545 = vector.shape_cast %544 : vector<256xf32> to vector<1x256xf32>
    %cst_61 = arith.constant 1.600000e+01 : f32
    %546 = vector.broadcast %cst_61 : f32 to vector<1x256xf32>
    %547 = arith.divf %545, %546 : vector<1x256xf32>
    %548 = arith.mulf %543, %543 : vector<16x256xf32>
    %cst_62 = arith.constant dense<0.000000e+00> : vector<256xf32>
    %549 = vector.multi_reduction <add>, %548, %cst_62 [0] : vector<16x256xf32> to vector<256xf32>
    %550 = vector.shape_cast %549 : vector<256xf32> to vector<1x256xf32>
    %cst_63 = arith.constant 1.600000e+01 : f32
    %551 = vector.broadcast %cst_63 : f32 to vector<1x256xf32>
    %552 = arith.divf %550, %551 : vector<1x256xf32>
    %553 = vector.broadcast %547 : vector<1x256xf32> to vector<16x256xf32>
    %554 = arith.subf %543, %553 : vector<16x256xf32>
    %555 = arith.mulf %547, %547 : vector<1x256xf32>
    %556 = arith.subf %552, %555 : vector<1x256xf32>
    %cst_64 = arith.constant 9.99999997E-7 : f32
    %557 = vector.broadcast %cst_64 : f32 to vector<1x256xf32>
    %558 = arith.addf %556, %557 : vector<1x256xf32>
    %559 = math.rsqrt %558 : vector<1x256xf32>
    %560 = vector.broadcast %559 : vector<1x256xf32> to vector<16x256xf32>
    %561 = arith.mulf %554, %560 : vector<16x256xf32>
    %cst_65 = arith.constant dense<0.000000e+00> : vector<64x256xf32>
    %562 = tpu.matmul %120, %561, %cst_65 {dimension_numbers = #tpu.dot_dimension_numbers<[1], [0], [0], [1], [0, 0, 1, 1], [], []>} : vector<64x16xf32>, vector<16x256xf32>, vector<64x256xf32> -> vector<64x256xf32>
    %563 = vector.broadcast %121 : vector<64x1xf32> to vector<64x256xf32>
    %564 = arith.addf %562, %563 : vector<64x256xf32>
    %565 = math.absf %564 : vector<64x256xf32>
    %cst_66 = arith.constant 0.231641889 : f32
    %566 = vector.broadcast %cst_66 : f32 to vector<64x256xf32>
    %567 = arith.mulf %566, %565 : vector<64x256xf32>
    %cst_67 = arith.constant 1.000000e+00 : f32
    %568 = vector.broadcast %cst_67 : f32 to vector<64x256xf32>
    %569 = arith.addf %568, %567 : vector<64x256xf32>
    %cst_68 = arith.constant 1.000000e+00 : f32
    %570 = vector.broadcast %cst_68 : f32 to vector<64x256xf32>
    %571 = arith.divf %570, %569 : vector<64x256xf32>
    %cst_69 = arith.constant 0.53070271 : f32
    %572 = vector.broadcast %cst_69 : f32 to vector<64x256xf32>
    %573 = arith.mulf %572, %571 : vector<64x256xf32>
    %cst_70 = arith.constant -0.72657603 : f32
    %574 = vector.broadcast %cst_70 : f32 to vector<64x256xf32>
    %575 = arith.addf %573, %574 : vector<64x256xf32>
    %576 = arith.mulf %575, %571 : vector<64x256xf32>
    %cst_71 = arith.constant 0.710706889 : f32
    %577 = vector.broadcast %cst_71 : f32 to vector<64x256xf32>
    %578 = arith.addf %576, %577 : vector<64x256xf32>
    %579 = arith.mulf %578, %571 : vector<64x256xf32>
    %cst_72 = arith.constant -0.142248362 : f32
    %580 = vector.broadcast %cst_72 : f32 to vector<64x256xf32>
    %581 = arith.addf %579, %580 : vector<64x256xf32>
    %582 = arith.mulf %581, %571 : vector<64x256xf32>
    %cst_73 = arith.constant 0.127414793 : f32
    %583 = vector.broadcast %cst_73 : f32 to vector<64x256xf32>
    %584 = arith.addf %582, %583 : vector<64x256xf32>
    %585 = arith.mulf %584, %571 : vector<64x256xf32>
    %cst_74 = arith.constant 0.000000e+00 : f32
    %586 = vector.broadcast %cst_74 : f32 to vector<64x256xf32>
    %587 = arith.maximumf %564, %586 : vector<64x256xf32>
    %588 = arith.mulf %565, %585 : vector<64x256xf32>
    %cst_75 = arith.constant -5.000000e-01 : f32
    %589 = vector.broadcast %cst_75 : f32 to vector<64x256xf32>
    %590 = arith.mulf %589, %564 : vector<64x256xf32>
    %591 = arith.mulf %590, %564 : vector<64x256xf32>
    %592 = math.exp %591 : vector<64x256xf32>
    %593 = arith.mulf %588, %592 : vector<64x256xf32>
    %594 = arith.subf %587, %593 : vector<64x256xf32>
    %cst_76 = arith.constant dense<0.000000e+00> : vector<16x256xf32>
    %595 = tpu.matmul %122, %594, %cst_76 {dimension_numbers = #tpu.dot_dimension_numbers<[1], [0], [0], [1], [0, 0, 1, 1], [], []>} : vector<16x64xf32>, vector<64x256xf32>, vector<16x256xf32> -> vector<16x256xf32>
    %596 = vector.broadcast %123 : vector<16x1xf32> to vector<16x256xf32>
    %597 = arith.addf %595, %596 : vector<16x256xf32>
    %598 = arith.addf %125, %597 : vector<16x256xf32>
    %c0_77 = arith.constant 0 : index
    %c0_78 = arith.constant 0 : index
    %c0_79 = arith.constant 0 : index
    %599 = vector.load %arg8[%c0_77, %c0_78, %c0_79] : memref<2x16x256xf32, #tpu.memory_space<vmem>>, vector<1x16x256xf32>
    %600 = vector.shape_cast %599 : vector<1x16x256xf32> to vector<16x256xf32>
    %601 = vector.shape_cast %598 : vector<16x256xf32> to vector<1x16x256xf32>
    tpu.vector_store %arg8[%c0_77, %c0_78, %c0_79], %601 {strides = array<i32>} : memref<2x16x256xf32, #tpu.memory_space<vmem>>, vector<1x16x256xf32>,
    %c1 = arith.constant 1 : index
    %c0_80 = arith.constant 0 : index
    %c0_81 = arith.constant 0 : index
    %602 = vector.load %arg1[%c1, %c0_80, %c0_81] : memref<2x16x256xf32, #tpu.memory_space<vmem>>, vector<1x16x256xf32>
    %603 = vector.shape_cast %602 : vector<1x16x256xf32> to vector<16x256xf32>
    %cst_82 = arith.constant 0.000000e+00 : f32
    %604 = vector.broadcast %cst_82 : f32 to vector<16x3xf32>
    %605 = vector.extract_strided_slice %603 {offsets = [0, 0], sizes = [16, 253], strides = [1, 1]} : vector<16x256xf32> to vector<16x253xf32>
    %606 = tpu.concatenate %604, %605 in 1 : vector<16x3xf32>, vector<16x253xf32> -> vector<16x256xf32>
    %cst_83 = arith.constant 0.000000e+00 : f32
    %607 = vector.shape_cast %9 : vector<1x256xi1> to vector<1x256xi1>
    %608 = vector.broadcast %607 : vector<1x256xi1> to vector<16x256xi1>
    %609 = vector.broadcast %cst_83 : f32 to vector<16x256xf32>
    %610 = arith.select %608, %606, %609 : vector<16x256xi1>, vector<16x256xf32>
    %cst_84 = arith.constant 0.000000e+00 : f32
    %611 = vector.broadcast %cst_84 : f32 to vector<16x2xf32>
    %612 = vector.extract_strided_slice %603 {offsets = [0, 0], sizes = [16, 254], strides = [1, 1]} : vector<16x256xf32> to vector<16x254xf32>
    %613 = tpu.concatenate %611, %612 in 1 : vector<16x2xf32>, vector<16x254xf32> -> vector<16x256xf32>
    %cst_85 = arith.constant 0.000000e+00 : f32
    %614 = vector.shape_cast %11 : vector<1x256xi1> to vector<1x256xi1>
    %615 = vector.broadcast %614 : vector<1x256xi1> to vector<16x256xi1>
    %616 = vector.broadcast %cst_85 : f32 to vector<16x256xf32>
    %617 = arith.select %615, %613, %616 : vector<16x256xi1>, vector<16x256xf32>
    %cst_86 = arith.constant 0.000000e+00 : f32
    %618 = vector.broadcast %cst_86 : f32 to vector<16x1xf32>
    %619 = vector.extract_strided_slice %603 {offsets = [0, 0], sizes = [16, 255], strides = [1, 1]} : vector<16x256xf32> to vector<16x255xf32>
    %620 = tpu.concatenate %618, %619 in 1 : vector<16x1xf32>, vector<16x255xf32> -> vector<16x256xf32>
    %cst_87 = arith.constant 0.000000e+00 : f32
    %621 = vector.shape_cast %13 : vector<1x256xi1> to vector<1x256xi1>
    %622 = vector.broadcast %621 : vector<1x256xi1> to vector<16x256xi1>
    %623 = vector.broadcast %cst_87 : f32 to vector<16x256xf32>
    %624 = arith.select %622, %620, %623 : vector<16x256xi1>, vector<16x256xf32>
    %cst_88 = arith.constant 0.000000e+00 : f32
    %625 = vector.broadcast %cst_88 : f32 to vector<16x1xf32>
    %626 = vector.extract_strided_slice %603 {offsets = [0, 1], sizes = [16, 255], strides = [1, 1]} : vector<16x256xf32> to vector<16x255xf32>
    %627 = tpu.concatenate %626, %625 in 1 : vector<16x255xf32>, vector<16x1xf32> -> vector<16x256xf32>
    %cst_89 = arith.constant 0.000000e+00 : f32
    %628 = vector.shape_cast %15 : vector<1x256xi1> to vector<1x256xi1>
    %629 = vector.broadcast %628 : vector<1x256xi1> to vector<16x256xi1>
    %630 = vector.broadcast %cst_89 : f32 to vector<16x256xf32>
    %631 = arith.select %629, %627, %630 : vector<16x256xi1>, vector<16x256xf32>
    %cst_90 = arith.constant 0.000000e+00 : f32
    %632 = vector.broadcast %cst_90 : f32 to vector<16x2xf32>
    %633 = vector.extract_strided_slice %603 {offsets = [0, 2], sizes = [16, 254], strides = [1, 1]} : vector<16x256xf32> to vector<16x254xf32>
    %634 = tpu.concatenate %633, %632 in 1 : vector<16x254xf32>, vector<16x2xf32> -> vector<16x256xf32>
    %cst_91 = arith.constant 0.000000e+00 : f32
    %635 = vector.shape_cast %17 : vector<1x256xi1> to vector<1x256xi1>
    %636 = vector.broadcast %635 : vector<1x256xi1> to vector<16x256xi1>
    %637 = vector.broadcast %cst_91 : f32 to vector<16x256xf32>
    %638 = arith.select %636, %634, %637 : vector<16x256xi1>, vector<16x256xf32>
    %cst_92 = arith.constant 0.000000e+00 : f32
    %639 = vector.broadcast %cst_92 : f32 to vector<16x3xf32>
    %640 = vector.extract_strided_slice %603 {offsets = [0, 3], sizes = [16, 253], strides = [1, 1]} : vector<16x256xf32> to vector<16x253xf32>
    %641 = tpu.concatenate %640, %639 in 1 : vector<16x253xf32>, vector<16x3xf32> -> vector<16x256xf32>
    %cst_93 = arith.constant 0.000000e+00 : f32
    %642 = vector.shape_cast %19 : vector<1x256xi1> to vector<1x256xi1>
    %643 = vector.broadcast %642 : vector<1x256xi1> to vector<16x256xi1>
    %644 = vector.broadcast %cst_93 : f32 to vector<16x256xf32>
    %645 = arith.select %643, %641, %644 : vector<16x256xi1>, vector<16x256xf32>
    %cst_94 = arith.constant 0.000000e+00 : f32
    %646 = vector.broadcast %cst_94 : f32 to vector<16x256xf32>
    %cst_95 = arith.constant 0.000000e+00 : f32
    %647 = vector.broadcast %cst_95 : f32 to vector<16x256xf32>
    %648 = vector.broadcast %22 : vector<16x1xf32> to vector<16x256xf32>
    %649 = arith.mulf %610, %648 : vector<16x256xf32>
    %650 = vector.broadcast %71 : vector<16x1xf32> to vector<16x256xf32>
    %651 = arith.mulf %610, %650 : vector<16x256xf32>
    %652 = vector.broadcast %23 : vector<16x1xf32> to vector<16x256xf32>
    %653 = arith.mulf %617, %652 : vector<16x256xf32>
    %654 = arith.addf %649, %653 : vector<16x256xf32>
    %655 = vector.broadcast %72 : vector<16x1xf32> to vector<16x256xf32>
    %656 = arith.mulf %617, %655 : vector<16x256xf32>
    %657 = arith.addf %651, %656 : vector<16x256xf32>
    %658 = vector.broadcast %24 : vector<16x1xf32> to vector<16x256xf32>
    %659 = arith.mulf %624, %658 : vector<16x256xf32>
    %660 = arith.addf %654, %659 : vector<16x256xf32>
    %661 = vector.broadcast %73 : vector<16x1xf32> to vector<16x256xf32>
    %662 = arith.mulf %624, %661 : vector<16x256xf32>
    %663 = arith.addf %657, %662 : vector<16x256xf32>
    %664 = vector.broadcast %25 : vector<16x1xf32> to vector<16x256xf32>
    %665 = arith.mulf %603, %664 : vector<16x256xf32>
    %666 = arith.addf %660, %665 : vector<16x256xf32>
    %667 = vector.broadcast %74 : vector<16x1xf32> to vector<16x256xf32>
    %668 = arith.mulf %603, %667 : vector<16x256xf32>
    %669 = arith.addf %663, %668 : vector<16x256xf32>
    %670 = vector.broadcast %26 : vector<16x1xf32> to vector<16x256xf32>
    %671 = arith.mulf %631, %670 : vector<16x256xf32>
    %672 = arith.addf %666, %671 : vector<16x256xf32>
    %673 = vector.broadcast %75 : vector<16x1xf32> to vector<16x256xf32>
    %674 = arith.mulf %631, %673 : vector<16x256xf32>
    %675 = arith.addf %669, %674 : vector<16x256xf32>
    %676 = vector.broadcast %27 : vector<16x1xf32> to vector<16x256xf32>
    %677 = arith.mulf %638, %676 : vector<16x256xf32>
    %678 = arith.addf %672, %677 : vector<16x256xf32>
    %679 = vector.broadcast %76 : vector<16x1xf32> to vector<16x256xf32>
    %680 = arith.mulf %638, %679 : vector<16x256xf32>
    %681 = arith.addf %675, %680 : vector<16x256xf32>
    %682 = vector.broadcast %28 : vector<16x1xf32> to vector<16x256xf32>
    %683 = arith.mulf %645, %682 : vector<16x256xf32>
    %684 = arith.addf %678, %683 : vector<16x256xf32>
    %685 = vector.broadcast %77 : vector<16x1xf32> to vector<16x256xf32>
    %686 = arith.mulf %645, %685 : vector<16x256xf32>
    %687 = arith.addf %681, %686 : vector<16x256xf32>
    %cst_96 = arith.constant 0.000000e+00 : f32
    %688 = vector.broadcast %cst_96 : f32 to vector<16x48xf32>
    %689 = vector.extract_strided_slice %684 {offsets = [0, 0], sizes = [16, 208], strides = [1, 1]} : vector<16x256xf32> to vector<16x208xf32>
    %690 = tpu.concatenate %688, %689 in 1 : vector<16x48xf32>, vector<16x208xf32> -> vector<16x256xf32>
    %691 = arith.addf %646, %690 : vector<16x256xf32>
    %cst_97 = arith.constant 0.000000e+00 : f32
    %692 = vector.broadcast %cst_97 : f32 to vector<16x48xf32>
    %693 = vector.extract_strided_slice %687 {offsets = [0, 0], sizes = [16, 208], strides = [1, 1]} : vector<16x256xf32> to vector<16x208xf32>
    %694 = tpu.concatenate %692, %693 in 1 : vector<16x48xf32>, vector<16x208xf32> -> vector<16x256xf32>
    %695 = arith.addf %647, %694 : vector<16x256xf32>
    %696 = vector.broadcast %29 : vector<16x1xf32> to vector<16x256xf32>
    %697 = arith.mulf %610, %696 : vector<16x256xf32>
    %698 = vector.broadcast %78 : vector<16x1xf32> to vector<16x256xf32>
    %699 = arith.mulf %610, %698 : vector<16x256xf32>
    %700 = vector.broadcast %30 : vector<16x1xf32> to vector<16x256xf32>
    %701 = arith.mulf %617, %700 : vector<16x256xf32>
    %702 = arith.addf %697, %701 : vector<16x256xf32>
    %703 = vector.broadcast %79 : vector<16x1xf32> to vector<16x256xf32>
    %704 = arith.mulf %617, %703 : vector<16x256xf32>
    %705 = arith.addf %699, %704 : vector<16x256xf32>
    %706 = vector.broadcast %31 : vector<16x1xf32> to vector<16x256xf32>
    %707 = arith.mulf %624, %706 : vector<16x256xf32>
    %708 = arith.addf %702, %707 : vector<16x256xf32>
    %709 = vector.broadcast %80 : vector<16x1xf32> to vector<16x256xf32>
    %710 = arith.mulf %624, %709 : vector<16x256xf32>
    %711 = arith.addf %705, %710 : vector<16x256xf32>
    %712 = vector.broadcast %32 : vector<16x1xf32> to vector<16x256xf32>
    %713 = arith.mulf %603, %712 : vector<16x256xf32>
    %714 = arith.addf %708, %713 : vector<16x256xf32>
    %715 = vector.broadcast %81 : vector<16x1xf32> to vector<16x256xf32>
    %716 = arith.mulf %603, %715 : vector<16x256xf32>
    %717 = arith.addf %711, %716 : vector<16x256xf32>
    %718 = vector.broadcast %33 : vector<16x1xf32> to vector<16x256xf32>
    %719 = arith.mulf %631, %718 : vector<16x256xf32>
    %720 = arith.addf %714, %719 : vector<16x256xf32>
    %721 = vector.broadcast %82 : vector<16x1xf32> to vector<16x256xf32>
    %722 = arith.mulf %631, %721 : vector<16x256xf32>
    %723 = arith.addf %717, %722 : vector<16x256xf32>
    %724 = vector.broadcast %34 : vector<16x1xf32> to vector<16x256xf32>
    %725 = arith.mulf %638, %724 : vector<16x256xf32>
    %726 = arith.addf %720, %725 : vector<16x256xf32>
    %727 = vector.broadcast %83 : vector<16x1xf32> to vector<16x256xf32>
    %728 = arith.mulf %638, %727 : vector<16x256xf32>
    %729 = arith.addf %723, %728 : vector<16x256xf32>
    %730 = vector.broadcast %35 : vector<16x1xf32> to vector<16x256xf32>
    %731 = arith.mulf %645, %730 : vector<16x256xf32>
    %732 = arith.addf %726, %731 : vector<16x256xf32>
    %733 = vector.broadcast %84 : vector<16x1xf32> to vector<16x256xf32>
    %734 = arith.mulf %645, %733 : vector<16x256xf32>
    %735 = arith.addf %729, %734 : vector<16x256xf32>
    %cst_98 = arith.constant 0.000000e+00 : f32
    %736 = vector.broadcast %cst_98 : f32 to vector<16x32xf32>
    %737 = vector.extract_strided_slice %732 {offsets = [0, 0], sizes = [16, 224], strides = [1, 1]} : vector<16x256xf32> to vector<16x224xf32>
    %738 = tpu.concatenate %736, %737 in 1 : vector<16x32xf32>, vector<16x224xf32> -> vector<16x256xf32>
    %739 = arith.addf %691, %738 : vector<16x256xf32>
    %cst_99 = arith.constant 0.000000e+00 : f32
    %740 = vector.broadcast %cst_99 : f32 to vector<16x32xf32>
    %741 = vector.extract_strided_slice %735 {offsets = [0, 0], sizes = [16, 224], strides = [1, 1]} : vector<16x256xf32> to vector<16x224xf32>
    %742 = tpu.concatenate %740, %741 in 1 : vector<16x32xf32>, vector<16x224xf32> -> vector<16x256xf32>
    %743 = arith.addf %695, %742 : vector<16x256xf32>
    %744 = vector.broadcast %36 : vector<16x1xf32> to vector<16x256xf32>
    %745 = arith.mulf %610, %744 : vector<16x256xf32>
    %746 = vector.broadcast %85 : vector<16x1xf32> to vector<16x256xf32>
    %747 = arith.mulf %610, %746 : vector<16x256xf32>
    %748 = vector.broadcast %37 : vector<16x1xf32> to vector<16x256xf32>
    %749 = arith.mulf %617, %748 : vector<16x256xf32>
    %750 = arith.addf %745, %749 : vector<16x256xf32>
    %751 = vector.broadcast %86 : vector<16x1xf32> to vector<16x256xf32>
    %752 = arith.mulf %617, %751 : vector<16x256xf32>
    %753 = arith.addf %747, %752 : vector<16x256xf32>
    %754 = vector.broadcast %38 : vector<16x1xf32> to vector<16x256xf32>
    %755 = arith.mulf %624, %754 : vector<16x256xf32>
    %756 = arith.addf %750, %755 : vector<16x256xf32>
    %757 = vector.broadcast %87 : vector<16x1xf32> to vector<16x256xf32>
    %758 = arith.mulf %624, %757 : vector<16x256xf32>
    %759 = arith.addf %753, %758 : vector<16x256xf32>
    %760 = vector.broadcast %39 : vector<16x1xf32> to vector<16x256xf32>
    %761 = arith.mulf %603, %760 : vector<16x256xf32>
    %762 = arith.addf %756, %761 : vector<16x256xf32>
    %763 = vector.broadcast %88 : vector<16x1xf32> to vector<16x256xf32>
    %764 = arith.mulf %603, %763 : vector<16x256xf32>
    %765 = arith.addf %759, %764 : vector<16x256xf32>
    %766 = vector.broadcast %40 : vector<16x1xf32> to vector<16x256xf32>
    %767 = arith.mulf %631, %766 : vector<16x256xf32>
    %768 = arith.addf %762, %767 : vector<16x256xf32>
    %769 = vector.broadcast %89 : vector<16x1xf32> to vector<16x256xf32>
    %770 = arith.mulf %631, %769 : vector<16x256xf32>
    %771 = arith.addf %765, %770 : vector<16x256xf32>
    %772 = vector.broadcast %41 : vector<16x1xf32> to vector<16x256xf32>
    %773 = arith.mulf %638, %772 : vector<16x256xf32>
    %774 = arith.addf %768, %773 : vector<16x256xf32>
    %775 = vector.broadcast %90 : vector<16x1xf32> to vector<16x256xf32>
    %776 = arith.mulf %638, %775 : vector<16x256xf32>
    %777 = arith.addf %771, %776 : vector<16x256xf32>
    %778 = vector.broadcast %42 : vector<16x1xf32> to vector<16x256xf32>
    %779 = arith.mulf %645, %778 : vector<16x256xf32>
    %780 = arith.addf %774, %779 : vector<16x256xf32>
    %781 = vector.broadcast %91 : vector<16x1xf32> to vector<16x256xf32>
    %782 = arith.mulf %645, %781 : vector<16x256xf32>
    %783 = arith.addf %777, %782 : vector<16x256xf32>
    %cst_100 = arith.constant 0.000000e+00 : f32
    %784 = vector.broadcast %cst_100 : f32 to vector<16x16xf32>
    %785 = vector.extract_strided_slice %780 {offsets = [0, 0], sizes = [16, 240], strides = [1, 1]} : vector<16x256xf32> to vector<16x240xf32>
    %786 = tpu.concatenate %784, %785 in 1 : vector<16x16xf32>, vector<16x240xf32> -> vector<16x256xf32>
    %787 = arith.addf %739, %786 : vector<16x256xf32>
    %cst_101 = arith.constant 0.000000e+00 : f32
    %788 = vector.broadcast %cst_101 : f32 to vector<16x16xf32>
    %789 = vector.extract_strided_slice %783 {offsets = [0, 0], sizes = [16, 240], strides = [1, 1]} : vector<16x256xf32> to vector<16x240xf32>
    %790 = tpu.concatenate %788, %789 in 1 : vector<16x16xf32>, vector<16x240xf32> -> vector<16x256xf32>
    %791 = arith.addf %743, %790 : vector<16x256xf32>
    %792 = vector.broadcast %43 : vector<16x1xf32> to vector<16x256xf32>
    %793 = arith.mulf %610, %792 : vector<16x256xf32>
    %794 = vector.broadcast %92 : vector<16x1xf32> to vector<16x256xf32>
    %795 = arith.mulf %610, %794 : vector<16x256xf32>
    %796 = vector.broadcast %44 : vector<16x1xf32> to vector<16x256xf32>
    %797 = arith.mulf %617, %796 : vector<16x256xf32>
    %798 = arith.addf %793, %797 : vector<16x256xf32>
    %799 = vector.broadcast %93 : vector<16x1xf32> to vector<16x256xf32>
    %800 = arith.mulf %617, %799 : vector<16x256xf32>
    %801 = arith.addf %795, %800 : vector<16x256xf32>
    %802 = vector.broadcast %45 : vector<16x1xf32> to vector<16x256xf32>
    %803 = arith.mulf %624, %802 : vector<16x256xf32>
    %804 = arith.addf %798, %803 : vector<16x256xf32>
    %805 = vector.broadcast %94 : vector<16x1xf32> to vector<16x256xf32>
    %806 = arith.mulf %624, %805 : vector<16x256xf32>
    %807 = arith.addf %801, %806 : vector<16x256xf32>
    %808 = vector.broadcast %46 : vector<16x1xf32> to vector<16x256xf32>
    %809 = arith.mulf %603, %808 : vector<16x256xf32>
    %810 = arith.addf %804, %809 : vector<16x256xf32>
    %811 = vector.broadcast %95 : vector<16x1xf32> to vector<16x256xf32>
    %812 = arith.mulf %603, %811 : vector<16x256xf32>
    %813 = arith.addf %807, %812 : vector<16x256xf32>
    %814 = vector.broadcast %47 : vector<16x1xf32> to vector<16x256xf32>
    %815 = arith.mulf %631, %814 : vector<16x256xf32>
    %816 = arith.addf %810, %815 : vector<16x256xf32>
    %817 = vector.broadcast %96 : vector<16x1xf32> to vector<16x256xf32>
    %818 = arith.mulf %631, %817 : vector<16x256xf32>
    %819 = arith.addf %813, %818 : vector<16x256xf32>
    %820 = vector.broadcast %48 : vector<16x1xf32> to vector<16x256xf32>
    %821 = arith.mulf %638, %820 : vector<16x256xf32>
    %822 = arith.addf %816, %821 : vector<16x256xf32>
    %823 = vector.broadcast %97 : vector<16x1xf32> to vector<16x256xf32>
    %824 = arith.mulf %638, %823 : vector<16x256xf32>
    %825 = arith.addf %819, %824 : vector<16x256xf32>
    %826 = vector.broadcast %49 : vector<16x1xf32> to vector<16x256xf32>
    %827 = arith.mulf %645, %826 : vector<16x256xf32>
    %828 = arith.addf %822, %827 : vector<16x256xf32>
    %829 = vector.broadcast %98 : vector<16x1xf32> to vector<16x256xf32>
    %830 = arith.mulf %645, %829 : vector<16x256xf32>
    %831 = arith.addf %825, %830 : vector<16x256xf32>
    %832 = arith.addf %787, %828 : vector<16x256xf32>
    %833 = arith.addf %791, %831 : vector<16x256xf32>
    %834 = vector.broadcast %50 : vector<16x1xf32> to vector<16x256xf32>
    %835 = arith.mulf %610, %834 : vector<16x256xf32>
    %836 = vector.broadcast %99 : vector<16x1xf32> to vector<16x256xf32>
    %837 = arith.mulf %610, %836 : vector<16x256xf32>
    %838 = vector.broadcast %51 : vector<16x1xf32> to vector<16x256xf32>
    %839 = arith.mulf %617, %838 : vector<16x256xf32>
    %840 = arith.addf %835, %839 : vector<16x256xf32>
    %841 = vector.broadcast %100 : vector<16x1xf32> to vector<16x256xf32>
    %842 = arith.mulf %617, %841 : vector<16x256xf32>
    %843 = arith.addf %837, %842 : vector<16x256xf32>
    %844 = vector.broadcast %52 : vector<16x1xf32> to vector<16x256xf32>
    %845 = arith.mulf %624, %844 : vector<16x256xf32>
    %846 = arith.addf %840, %845 : vector<16x256xf32>
    %847 = vector.broadcast %101 : vector<16x1xf32> to vector<16x256xf32>
    %848 = arith.mulf %624, %847 : vector<16x256xf32>
    %849 = arith.addf %843, %848 : vector<16x256xf32>
    %850 = vector.broadcast %53 : vector<16x1xf32> to vector<16x256xf32>
    %851 = arith.mulf %603, %850 : vector<16x256xf32>
    %852 = arith.addf %846, %851 : vector<16x256xf32>
    %853 = vector.broadcast %102 : vector<16x1xf32> to vector<16x256xf32>
    %854 = arith.mulf %603, %853 : vector<16x256xf32>
    %855 = arith.addf %849, %854 : vector<16x256xf32>
    %856 = vector.broadcast %54 : vector<16x1xf32> to vector<16x256xf32>
    %857 = arith.mulf %631, %856 : vector<16x256xf32>
    %858 = arith.addf %852, %857 : vector<16x256xf32>
    %859 = vector.broadcast %103 : vector<16x1xf32> to vector<16x256xf32>
    %860 = arith.mulf %631, %859 : vector<16x256xf32>
    %861 = arith.addf %855, %860 : vector<16x256xf32>
    %862 = vector.broadcast %55 : vector<16x1xf32> to vector<16x256xf32>
    %863 = arith.mulf %638, %862 : vector<16x256xf32>
    %864 = arith.addf %858, %863 : vector<16x256xf32>
    %865 = vector.broadcast %104 : vector<16x1xf32> to vector<16x256xf32>
    %866 = arith.mulf %638, %865 : vector<16x256xf32>
    %867 = arith.addf %861, %866 : vector<16x256xf32>
    %868 = vector.broadcast %56 : vector<16x1xf32> to vector<16x256xf32>
    %869 = arith.mulf %645, %868 : vector<16x256xf32>
    %870 = arith.addf %864, %869 : vector<16x256xf32>
    %871 = vector.broadcast %105 : vector<16x1xf32> to vector<16x256xf32>
    %872 = arith.mulf %645, %871 : vector<16x256xf32>
    %873 = arith.addf %867, %872 : vector<16x256xf32>
    %cst_102 = arith.constant 0.000000e+00 : f32
    %874 = vector.broadcast %cst_102 : f32 to vector<16x16xf32>
    %875 = vector.extract_strided_slice %870 {offsets = [0, 16], sizes = [16, 240], strides = [1, 1]} : vector<16x256xf32> to vector<16x240xf32>
    %876 = tpu.concatenate %875, %874 in 1 : vector<16x240xf32>, vector<16x16xf32> -> vector<16x256xf32>
    %877 = arith.addf %832, %876 : vector<16x256xf32>
    %cst_103 = arith.constant 0.000000e+00 : f32
    %878 = vector.broadcast %cst_103 : f32 to vector<16x16xf32>
    %879 = vector.extract_strided_slice %873 {offsets = [0, 16], sizes = [16, 240], strides = [1, 1]} : vector<16x256xf32> to vector<16x240xf32>
    %880 = tpu.concatenate %879, %878 in 1 : vector<16x240xf32>, vector<16x16xf32> -> vector<16x256xf32>
    %881 = arith.addf %833, %880 : vector<16x256xf32>
    %882 = vector.broadcast %57 : vector<16x1xf32> to vector<16x256xf32>
    %883 = arith.mulf %610, %882 : vector<16x256xf32>
    %884 = vector.broadcast %106 : vector<16x1xf32> to vector<16x256xf32>
    %885 = arith.mulf %610, %884 : vector<16x256xf32>
    %886 = vector.broadcast %58 : vector<16x1xf32> to vector<16x256xf32>
    %887 = arith.mulf %617, %886 : vector<16x256xf32>
    %888 = arith.addf %883, %887 : vector<16x256xf32>
    %889 = vector.broadcast %107 : vector<16x1xf32> to vector<16x256xf32>
    %890 = arith.mulf %617, %889 : vector<16x256xf32>
    %891 = arith.addf %885, %890 : vector<16x256xf32>
    %892 = vector.broadcast %59 : vector<16x1xf32> to vector<16x256xf32>
    %893 = arith.mulf %624, %892 : vector<16x256xf32>
    %894 = arith.addf %888, %893 : vector<16x256xf32>
    %895 = vector.broadcast %108 : vector<16x1xf32> to vector<16x256xf32>
    %896 = arith.mulf %624, %895 : vector<16x256xf32>
    %897 = arith.addf %891, %896 : vector<16x256xf32>
    %898 = vector.broadcast %60 : vector<16x1xf32> to vector<16x256xf32>
    %899 = arith.mulf %603, %898 : vector<16x256xf32>
    %900 = arith.addf %894, %899 : vector<16x256xf32>
    %901 = vector.broadcast %109 : vector<16x1xf32> to vector<16x256xf32>
    %902 = arith.mulf %603, %901 : vector<16x256xf32>
    %903 = arith.addf %897, %902 : vector<16x256xf32>
    %904 = vector.broadcast %61 : vector<16x1xf32> to vector<16x256xf32>
    %905 = arith.mulf %631, %904 : vector<16x256xf32>
    %906 = arith.addf %900, %905 : vector<16x256xf32>
    %907 = vector.broadcast %110 : vector<16x1xf32> to vector<16x256xf32>
    %908 = arith.mulf %631, %907 : vector<16x256xf32>
    %909 = arith.addf %903, %908 : vector<16x256xf32>
    %910 = vector.broadcast %62 : vector<16x1xf32> to vector<16x256xf32>
    %911 = arith.mulf %638, %910 : vector<16x256xf32>
    %912 = arith.addf %906, %911 : vector<16x256xf32>
    %913 = vector.broadcast %111 : vector<16x1xf32> to vector<16x256xf32>
    %914 = arith.mulf %638, %913 : vector<16x256xf32>
    %915 = arith.addf %909, %914 : vector<16x256xf32>
    %916 = vector.broadcast %63 : vector<16x1xf32> to vector<16x256xf32>
    %917 = arith.mulf %645, %916 : vector<16x256xf32>
    %918 = arith.addf %912, %917 : vector<16x256xf32>
    %919 = vector.broadcast %112 : vector<16x1xf32> to vector<16x256xf32>
    %920 = arith.mulf %645, %919 : vector<16x256xf32>
    %921 = arith.addf %915, %920 : vector<16x256xf32>
    %cst_104 = arith.constant 0.000000e+00 : f32
    %922 = vector.broadcast %cst_104 : f32 to vector<16x32xf32>
    %923 = vector.extract_strided_slice %918 {offsets = [0, 32], sizes = [16, 224], strides = [1, 1]} : vector<16x256xf32> to vector<16x224xf32>
    %924 = tpu.concatenate %923, %922 in 1 : vector<16x224xf32>, vector<16x32xf32> -> vector<16x256xf32>
    %925 = arith.addf %877, %924 : vector<16x256xf32>
    %cst_105 = arith.constant 0.000000e+00 : f32
    %926 = vector.broadcast %cst_105 : f32 to vector<16x32xf32>
    %927 = vector.extract_strided_slice %921 {offsets = [0, 32], sizes = [16, 224], strides = [1, 1]} : vector<16x256xf32> to vector<16x224xf32>
    %928 = tpu.concatenate %927, %926 in 1 : vector<16x224xf32>, vector<16x32xf32> -> vector<16x256xf32>
    %929 = arith.addf %881, %928 : vector<16x256xf32>
    %930 = vector.broadcast %64 : vector<16x1xf32> to vector<16x256xf32>
    %931 = arith.mulf %610, %930 : vector<16x256xf32>
    %932 = vector.broadcast %113 : vector<16x1xf32> to vector<16x256xf32>
    %933 = arith.mulf %610, %932 : vector<16x256xf32>
    %934 = vector.broadcast %65 : vector<16x1xf32> to vector<16x256xf32>
    %935 = arith.mulf %617, %934 : vector<16x256xf32>
    %936 = arith.addf %931, %935 : vector<16x256xf32>
    %937 = vector.broadcast %114 : vector<16x1xf32> to vector<16x256xf32>
    %938 = arith.mulf %617, %937 : vector<16x256xf32>
    %939 = arith.addf %933, %938 : vector<16x256xf32>
    %940 = vector.broadcast %66 : vector<16x1xf32> to vector<16x256xf32>
    %941 = arith.mulf %624, %940 : vector<16x256xf32>
    %942 = arith.addf %936, %941 : vector<16x256xf32>
    %943 = vector.broadcast %115 : vector<16x1xf32> to vector<16x256xf32>
    %944 = arith.mulf %624, %943 : vector<16x256xf32>
    %945 = arith.addf %939, %944 : vector<16x256xf32>
    %946 = vector.broadcast %67 : vector<16x1xf32> to vector<16x256xf32>
    %947 = arith.mulf %603, %946 : vector<16x256xf32>
    %948 = arith.addf %942, %947 : vector<16x256xf32>
    %949 = vector.broadcast %116 : vector<16x1xf32> to vector<16x256xf32>
    %950 = arith.mulf %603, %949 : vector<16x256xf32>
    %951 = arith.addf %945, %950 : vector<16x256xf32>
    %952 = vector.broadcast %68 : vector<16x1xf32> to vector<16x256xf32>
    %953 = arith.mulf %631, %952 : vector<16x256xf32>
    %954 = arith.addf %948, %953 : vector<16x256xf32>
    %955 = vector.broadcast %117 : vector<16x1xf32> to vector<16x256xf32>
    %956 = arith.mulf %631, %955 : vector<16x256xf32>
    %957 = arith.addf %951, %956 : vector<16x256xf32>
    %958 = vector.broadcast %69 : vector<16x1xf32> to vector<16x256xf32>
    %959 = arith.mulf %638, %958 : vector<16x256xf32>
    %960 = arith.addf %954, %959 : vector<16x256xf32>
    %961 = vector.broadcast %118 : vector<16x1xf32> to vector<16x256xf32>
    %962 = arith.mulf %638, %961 : vector<16x256xf32>
    %963 = arith.addf %957, %962 : vector<16x256xf32>
    %964 = vector.broadcast %70 : vector<16x1xf32> to vector<16x256xf32>
    %965 = arith.mulf %645, %964 : vector<16x256xf32>
    %966 = arith.addf %960, %965 : vector<16x256xf32>
    %967 = vector.broadcast %119 : vector<16x1xf32> to vector<16x256xf32>
    %968 = arith.mulf %645, %967 : vector<16x256xf32>
    %969 = arith.addf %963, %968 : vector<16x256xf32>
    %cst_106 = arith.constant 0.000000e+00 : f32
    %970 = vector.broadcast %cst_106 : f32 to vector<16x48xf32>
    %971 = vector.extract_strided_slice %966 {offsets = [0, 48], sizes = [16, 208], strides = [1, 1]} : vector<16x256xf32> to vector<16x208xf32>
    %972 = tpu.concatenate %971, %970 in 1 : vector<16x208xf32>, vector<16x48xf32> -> vector<16x256xf32>
    %973 = arith.addf %925, %972 : vector<16x256xf32>
    %cst_107 = arith.constant 0.000000e+00 : f32
    %974 = vector.broadcast %cst_107 : f32 to vector<16x48xf32>
    %975 = vector.extract_strided_slice %969 {offsets = [0, 48], sizes = [16, 208], strides = [1, 1]} : vector<16x256xf32> to vector<16x208xf32>
    %976 = tpu.concatenate %975, %974 in 1 : vector<16x208xf32>, vector<16x48xf32> -> vector<16x256xf32>
    %977 = arith.addf %929, %976 : vector<16x256xf32>
    %cst_108 = arith.constant dense<0.000000e+00> : vector<16xf32>
    %978 = vector.multi_reduction <add>, %973, %cst_108 [1] : vector<16x256xf32> to vector<16xf32>
    %979 = vector.shape_cast %978 : vector<16xf32> to vector<16x1xf32>
    %cst_109 = arith.constant 2.560000e+02 : f32
    %980 = vector.broadcast %cst_109 : f32 to vector<16x1xf32>
    %981 = arith.divf %979, %980 : vector<16x1xf32>
    %982 = arith.mulf %973, %973 : vector<16x256xf32>
    %cst_110 = arith.constant dense<0.000000e+00> : vector<16xf32>
    %983 = vector.multi_reduction <add>, %982, %cst_110 [1] : vector<16x256xf32> to vector<16xf32>
    %984 = vector.shape_cast %983 : vector<16xf32> to vector<16x1xf32>
    %cst_111 = arith.constant 2.560000e+02 : f32
    %985 = vector.broadcast %cst_111 : f32 to vector<16x1xf32>
    %986 = arith.divf %984, %985 : vector<16x1xf32>
    %987 = vector.broadcast %981 : vector<16x1xf32> to vector<16x256xf32>
    %988 = arith.subf %973, %987 : vector<16x256xf32>
    %989 = arith.mulf %981, %981 : vector<16x1xf32>
    %990 = arith.subf %986, %989 : vector<16x1xf32>
    %cst_112 = arith.constant 9.99999974E-6 : f32
    %991 = vector.broadcast %cst_112 : f32 to vector<16x1xf32>
    %992 = arith.addf %990, %991 : vector<16x1xf32>
    %993 = math.rsqrt %992 : vector<16x1xf32>
    %994 = vector.broadcast %993 : vector<16x1xf32> to vector<16x256xf32>
    %995 = arith.mulf %988, %994 : vector<16x256xf32>
    %cst_113 = arith.constant 0.000000e+00 : f32
    %996 = vector.broadcast %cst_113 : f32 to vector<16x256xf32>
    %997 = arith.maximumf %995, %996 : vector<16x256xf32>
    %cst_114 = arith.constant dense<0.000000e+00> : vector<16xf32>
    %998 = vector.multi_reduction <add>, %977, %cst_114 [1] : vector<16x256xf32> to vector<16xf32>
    %999 = vector.shape_cast %998 : vector<16xf32> to vector<16x1xf32>
    %cst_115 = arith.constant 2.560000e+02 : f32
    %1000 = vector.broadcast %cst_115 : f32 to vector<16x1xf32>
    %1001 = arith.divf %999, %1000 : vector<16x1xf32>
    %1002 = arith.mulf %977, %977 : vector<16x256xf32>
    %cst_116 = arith.constant dense<0.000000e+00> : vector<16xf32>
    %1003 = vector.multi_reduction <add>, %1002, %cst_116 [1] : vector<16x256xf32> to vector<16xf32>
    %1004 = vector.shape_cast %1003 : vector<16xf32> to vector<16x1xf32>
    %cst_117 = arith.constant 2.560000e+02 : f32
    %1005 = vector.broadcast %cst_117 : f32 to vector<16x1xf32>
    %1006 = arith.divf %1004, %1005 : vector<16x1xf32>
    %1007 = vector.broadcast %1001 : vector<16x1xf32> to vector<16x256xf32>
    %1008 = arith.subf %977, %1007 : vector<16x256xf32>
    %1009 = arith.mulf %1001, %1001 : vector<16x1xf32>
    %1010 = arith.subf %1006, %1009 : vector<16x1xf32>
    %cst_118 = arith.constant 9.99999974E-6 : f32
    %1011 = vector.broadcast %cst_118 : f32 to vector<16x1xf32>
    %1012 = arith.addf %1010, %1011 : vector<16x1xf32>
    %1013 = math.rsqrt %1012 : vector<16x1xf32>
    %1014 = vector.broadcast %1013 : vector<16x1xf32> to vector<16x256xf32>
    %1015 = arith.mulf %1008, %1014 : vector<16x256xf32>
    %cst_119 = arith.constant 0.000000e+00 : f32
    %1016 = vector.broadcast %cst_119 : f32 to vector<16x256xf32>
    %1017 = arith.maximumf %1015, %1016 : vector<16x256xf32>
    %1018 = arith.minimumf %997, %1017 : vector<16x256xf32>
    %cst_120 = arith.constant 2.000000e+00 : f32
    %1019 = vector.broadcast %cst_120 : f32 to vector<16x256xf32>
    %1020 = arith.mulf %1019, %1018 : vector<16x256xf32>
    %1021 = arith.subf %1020, %997 : vector<16x256xf32>
    %cst_121 = arith.constant dense<0.000000e+00> : vector<256xf32>
    %1022 = vector.multi_reduction <add>, %1021, %cst_121 [0] : vector<16x256xf32> to vector<256xf32>
    %1023 = vector.shape_cast %1022 : vector<256xf32> to vector<1x256xf32>
    %cst_122 = arith.constant 1.600000e+01 : f32
    %1024 = vector.broadcast %cst_122 : f32 to vector<1x256xf32>
    %1025 = arith.divf %1023, %1024 : vector<1x256xf32>
    %1026 = arith.mulf %1021, %1021 : vector<16x256xf32>
    %cst_123 = arith.constant dense<0.000000e+00> : vector<256xf32>
    %1027 = vector.multi_reduction <add>, %1026, %cst_123 [0] : vector<16x256xf32> to vector<256xf32>
    %1028 = vector.shape_cast %1027 : vector<256xf32> to vector<1x256xf32>
    %cst_124 = arith.constant 1.600000e+01 : f32
    %1029 = vector.broadcast %cst_124 : f32 to vector<1x256xf32>
    %1030 = arith.divf %1028, %1029 : vector<1x256xf32>
    %1031 = vector.broadcast %1025 : vector<1x256xf32> to vector<16x256xf32>
    %1032 = arith.subf %1021, %1031 : vector<16x256xf32>
    %1033 = arith.mulf %1025, %1025 : vector<1x256xf32>
    %1034 = arith.subf %1030, %1033 : vector<1x256xf32>
    %cst_125 = arith.constant 9.99999997E-7 : f32
    %1035 = vector.broadcast %cst_125 : f32 to vector<1x256xf32>
    %1036 = arith.addf %1034, %1035 : vector<1x256xf32>
    %1037 = math.rsqrt %1036 : vector<1x256xf32>
    %1038 = vector.broadcast %1037 : vector<1x256xf32> to vector<16x256xf32>
    %1039 = arith.mulf %1032, %1038 : vector<16x256xf32>
    %cst_126 = arith.constant dense<0.000000e+00> : vector<64x256xf32>
    %1040 = tpu.matmul %120, %1039, %cst_126 {dimension_numbers = #tpu.dot_dimension_numbers<[1], [0], [0], [1], [0, 0, 1, 1], [], []>} : vector<64x16xf32>, vector<16x256xf32>, vector<64x256xf32> -> vector<64x256xf32>
    %1041 = vector.broadcast %121 : vector<64x1xf32> to vector<64x256xf32>
    %1042 = arith.addf %1040, %1041 : vector<64x256xf32>
    %1043 = math.absf %1042 : vector<64x256xf32>
    %cst_127 = arith.constant 0.231641889 : f32
    %1044 = vector.broadcast %cst_127 : f32 to vector<64x256xf32>
    %1045 = arith.mulf %1044, %1043 : vector<64x256xf32>
    %cst_128 = arith.constant 1.000000e+00 : f32
    %1046 = vector.broadcast %cst_128 : f32 to vector<64x256xf32>
    %1047 = arith.addf %1046, %1045 : vector<64x256xf32>
    %cst_129 = arith.constant 1.000000e+00 : f32
    %1048 = vector.broadcast %cst_129 : f32 to vector<64x256xf32>
    %1049 = arith.divf %1048, %1047 : vector<64x256xf32>
    %cst_130 = arith.constant 0.53070271 : f32
    %1050 = vector.broadcast %cst_130 : f32 to vector<64x256xf32>
    %1051 = arith.mulf %1050, %1049 : vector<64x256xf32>
    %cst_131 = arith.constant -0.72657603 : f32
    %1052 = vector.broadcast %cst_131 : f32 to vector<64x256xf32>
    %1053 = arith.addf %1051, %1052 : vector<64x256xf32>
    %1054 = arith.mulf %1053, %1049 : vector<64x256xf32>
    %cst_132 = arith.constant 0.710706889 : f32
    %1055 = vector.broadcast %cst_132 : f32 to vector<64x256xf32>
    %1056 = arith.addf %1054, %1055 : vector<64x256xf32>
    %1057 = arith.mulf %1056, %1049 : vector<64x256xf32>
    %cst_133 = arith.constant -0.142248362 : f32
    %1058 = vector.broadcast %cst_133 : f32 to vector<64x256xf32>
    %1059 = arith.addf %1057, %1058 : vector<64x256xf32>
    %1060 = arith.mulf %1059, %1049 : vector<64x256xf32>
    %cst_134 = arith.constant 0.127414793 : f32
    %1061 = vector.broadcast %cst_134 : f32 to vector<64x256xf32>
    %1062 = arith.addf %1060, %1061 : vector<64x256xf32>
    %1063 = arith.mulf %1062, %1049 : vector<64x256xf32>
    %cst_135 = arith.constant 0.000000e+00 : f32
    %1064 = vector.broadcast %cst_135 : f32 to vector<64x256xf32>
    %1065 = arith.maximumf %1042, %1064 : vector<64x256xf32>
    %1066 = arith.mulf %1043, %1063 : vector<64x256xf32>
    %cst_136 = arith.constant -5.000000e-01 : f32
    %1067 = vector.broadcast %cst_136 : f32 to vector<64x256xf32>
    %1068 = arith.mulf %1067, %1042 : vector<64x256xf32>
    %1069 = arith.mulf %1068, %1042 : vector<64x256xf32>
    %1070 = math.exp %1069 : vector<64x256xf32>
    %1071 = arith.mulf %1066, %1070 : vector<64x256xf32>
    %1072 = arith.subf %1065, %1071 : vector<64x256xf32>
    %cst_137 = arith.constant dense<0.000000e+00> : vector<16x256xf32>
    %1073 = tpu.matmul %122, %1072, %cst_137 {dimension_numbers = #tpu.dot_dimension_numbers<[1], [0], [0], [1], [0, 0, 1, 1], [], []>} : vector<16x64xf32>, vector<64x256xf32>, vector<16x256xf32> -> vector<16x256xf32>
    %1074 = vector.broadcast %123 : vector<16x1xf32> to vector<16x256xf32>
    %1075 = arith.addf %1073, %1074 : vector<16x256xf32>
    %1076 = arith.addf %603, %1075 : vector<16x256xf32>
    %c1_138 = arith.constant 1 : index
    %c0_139 = arith.constant 0 : index
    %c0_140 = arith.constant 0 : index
    %1077 = vector.load %arg8[%c1_138, %c0_139, %c0_140] : memref<2x16x256xf32, #tpu.memory_space<vmem>>, vector<1x16x256xf32>
    %1078 = vector.shape_cast %1077 : vector<1x16x256xf32> to vector<16x256xf32>
    %1079 = vector.shape_cast %1076 : vector<16x256xf32> to vector<1x16x256xf32>
    tpu.vector_store %arg8[%c1_138, %c0_139, %c0_140], %1079 {strides = array<i32>} : memref<2x16x256xf32, #tpu.memory_space<vmem>>, vector<1x16x256xf32>,
    return
  }
  func.func @transform_0(%arg0: i32) -> (i32, i32, i32) {
    %c0_i32 = arith.constant 0 : i32
    %c0_i32_0 = arith.constant 0 : i32
    %c0_i32_1 = arith.constant 0 : i32
    return %arg0, %c0_i32, %c0_i32_0 : i32, i32, i32
  }
  func.func @transform_1(%arg0: i32) -> (i32, i32) {
    %c0_i32 = arith.constant 0 : i32
    %c0_i32_0 = arith.constant 0 : i32
    %c0_i32_1 = arith.constant 0 : i32
    return %c0_i32, %c0_i32_0 : i32, i32
  }
  func.func @transform_2(%arg0: i32) -> (i32, i32) {
    %c0_i32 = arith.constant 0 : i32
    %c0_i32_0 = arith.constant 0 : i32
    %c0_i32_1 = arith.constant 0 : i32
    return %c0_i32, %c0_i32_0 : i32, i32
  }
  func.func @transform_3(%arg0: i32) -> (i32, i32) {
    %c0_i32 = arith.constant 0 : i32
    %c0_i32_0 = arith.constant 0 : i32
    %c0_i32_1 = arith.constant 0 : i32
    return %c0_i32, %c0_i32_0 : i32, i32
  }
  func.func @transform_4(%arg0: i32) -> (i32, i32) {
    %c0_i32 = arith.constant 0 : i32
    %c0_i32_0 = arith.constant 0 : i32
    %c0_i32_1 = arith.constant 0 : i32
    return %c0_i32, %c0_i32_0 : i32, i32
  }
  func.func @transform_5(%arg0: i32) -> (i32, i32) {
    %c0_i32 = arith.constant 0 : i32
    %c0_i32_0 = arith.constant 0 : i32
    %c0_i32_1 = arith.constant 0 : i32
    return %c0_i32, %c0_i32_0 : i32, i32
  }
  func.func @transform_6(%arg0: i32) -> (i32, i32) {
    %c0_i32 = arith.constant 0 : i32
    %c0_i32_0 = arith.constant 0 : i32
    %c0_i32_1 = arith.constant 0 : i32
    return %c0_i32, %c0_i32_0 : i32, i32
  }
  func.func @transform_7(%arg0: i32) -> (i32, i32, i32) {
    %c0_i32 = arith.constant 0 : i32
    %c0_i32_0 = arith.constant 0 : i32
    %c0_i32_1 = arith.constant 0 : i32
    return %arg0, %c0_i32, %c0_i32_0 : i32, i32, i32
  }
}

</mosaic_0001>

<bundles_post_ra>
// kernel: tpu_custom_call.1
= control target key start
LH: loop header
LB: loop body
LE: loop exit
PB: predicated region body
PF: predicated region fallthrough
CT: control target
= control target key end

     0   :  { %s5129_s28 = smov 3   ;;  %v5130_v4 = vmov 1   ;;  %v10203_v5 = vmov 0   ;;  %s10195_s0 = inlined_call_operand.vmem [shape: f32[2,16,256], index: 0, kind: input, shape index: {}]   ;;  %s10196_s1 = inlined_call_operand.vmem [shape: f32[16,49], index: 1, kind: input, shape index: {}]   ;;  %s10197_s2 = inlined_call_operand.vmem [shape: f32[16,49], index: 2, kind: input, shape index: {}]   ;;  %s10198_s3 = inlined_call_operand.vmem [shape: f32[64,16], index: 3, kind: input, shape index: {}]   ;;  %s10199_s4 = inlined_call_operand.vmem [shape: f32[64,1], index: 4, kind: input, shape index: {}]   ;;  %s10200_s5 = inlined_call_operand.vmem [shape: f32[16,64], index: 5, kind: input, shape index: {}]   ;;  %s10201_s6 = inlined_call_operand.vmem [shape: f32[16,1], index: 6, kind: input, shape index: {}]   ;;  %s10202_s7 = inlined_call_operand.hbm [shape: f32[2,16,256], index: 7, kind: output, shape index: {}]  }
   0x1   :  { %v79_v0 = vld [vmem:[%s10195_s0 + $0x10] sm:$0xff]  ;;  %v77_v1 = vld [vmem:[%s10195_s0] sm:$0xff]  ;;  %v80_v2 = vld [vmem:[%s10195_s0 + $0x18] sm:$0xff]  ;;  %4823 = vset.pattern.permute.xlu0 %v5130_v4  ;;  %4821 = vset.pattern.permute.xlu1 %v10203_v5 }
   0x2   :  { %89 = vrot.lane.b32.xlu1 %v79_v0, %s5129_s28  ;;  %85 = vrot.lane.b32.xlu0 %v77_v1, %s5129_s28  ;;  %v78_v3 = vld [vmem:[%s10195_s0 + $0x8] sm:$0xff] }
   0x3   :  { %12 = vsyncpa [#allocation3], 0  ;;  %s5132_s10 = smov 2   ;;  %s5133_s11 = smov 1   ;;  %v5273_v6 = vld [vmem:[%s10196_s1 + $0x8] sm:$0xff]  ;;  %v5280_v7 = vld [vmem:[%s10197_s2] sm:$0xff] }
   0x4   :  { %s5134_s12 = smov 127   ;;  %s5135_s13 = smov 126   ;;  %v5137_v8 = vmov 7   ;;  %v5287_v9 = vld [vmem:[%s10196_s1] sm:$0xff]  ;;  %v5138_v10 = vmov 8   ;;  %v5294_v11 = vld [vmem:[%s10197_s2 + $0x8] sm:$0xff] }
   0x5   :  { %s5136_s14 = smov 125   ;;  %v5139_v12 = vmov 2   ;;  %v5140_v13 = vmov 9   ;;  %v5141_v14 = vmov 14   ;;  %v5142_v15 = vmov 15   ;;  %s5185_s19 = smov 32  }
   0x6   :  { %91 = vrot.lane.b32.xlu1 %v80_v2, %s5129_s28  ;;  %87 = vrot.lane.b32.xlu0 %v78_v3, %s5129_s28  ;;  %v5143_v16 = vmov 3   ;;  %v5144_v17 = vmov 10   ;;  %v5145_v18 = vmov 16   ;;  %v5146_v19 = vmov 4   ;;  %s5186_s22 = smov 16   ;;  %s5187_s23 = smov 112  }
   0x7   :  { %v5147_v26 = vmov 11   ;;  %v5148_v29 = vmov 17   ;;  %v5149_v34 = vmov 28   ;;  %v5150_v37 = vmov 29   ;;  %s5188_s24 = smov 96   ;;  %s5189_s25 = smov 80  }
   0x8   :  { %v5151_v40 = vmov 5   ;;  %v5152_v43 = vmov 12   ;;  %v5153_v46 = vmov 18   ;;  %v10214_v49 = vmov 30  }
   0x9   :  { %v10212_v54 = vmov 35   ;;  %v10211_v57 = vmov 36   ;;  %v10210_v62 = vmov 6   ;;  %vm93_vm0 = vcmask 23552  }
   0xa   :  { %112 = vrot.lane.b32.xlu1 %v78_v3, %s5132_s10  ;;  %110 = vrot.lane.b32.xlu0 %v77_v1, %s5132_s10  ;;  %vm118_vm1 = vcmask 15360   ;;  %vm143_vm2 = vcmask 7168   ;;  %vm168_vm6 = vcmask 1039360   ;;  %vm10594_vm10 = vcmask 1031168  }
   0xb   :  { %vm10578_vm14 = vcmask 1022976  }
   0xe   :  { %116 = vrot.lane.b32.xlu1 %v80_v2, %s5132_s10  ;;  %114 = vrot.lane.b32.xlu0 %v79_v0, %s5132_s10 }
  0x12   :  { %137 = vrot.lane.b32.xlu1 %v78_v3, %s5133_s11  ;;  %135 = vrot.lane.b32.xlu0 %v77_v1, %s5133_s11 }
  0x16   :  { %141 = vrot.lane.b32.xlu1 %v80_v2, %s5133_s11  ;;  %139 = vrot.lane.b32.xlu0 %v79_v0, %s5133_s11 }
  0x1a   :  { %162 = vrot.lane.b32.xlu1 %v78_v3, %s5134_s12  ;;  %160 = vrot.lane.b32.xlu0 %v77_v1, %s5134_s12 }
  0x1e   :  { %166 = vrot.lane.b32.xlu1 %v80_v2, %s5134_s12  ;;  %164 = vrot.lane.b32.xlu0 %v79_v0, %s5134_s12 }
  0x22   :  { %187 = vrot.lane.b32.xlu1 %v78_v3, %s5135_s13  ;;  %185 = vrot.lane.b32.xlu0 %v77_v1, %s5135_s13 }
  0x26   :  { %191 = vrot.lane.b32.xlu1 %v80_v2, %s5135_s13  ;;  %189 = vrot.lane.b32.xlu0 %v79_v0, %s5135_s13 }
  0x2a   :  { %212 = vrot.lane.b32.xlu1 %v78_v3, %s5136_s14  ;;  %210 = vrot.lane.b32.xlu0 %v77_v1, %s5136_s14  ;;  %v10209_v1 = vmov 13  }
  0x2e   :  { %216 = vrot.lane.b32.xlu1 %v80_v2, %s5136_s14  ;;  %214 = vrot.lane.b32.xlu0 %v79_v0, %s5136_s14 }
  0x32   :  { %268 = vperm.xlu0 %4823, %v5273_v6   ;;  %242 = vperm.xlu1 %4821, %v5273_v6  }
  0x36   :  { %4826 = vset.pattern.permute.xlu0 %v5137_v8  ;;  %251 = vperm.xlu1 %4821, %v5280_v7  }
  0x37   :  { %509 = vperm.xlu0 %4826, %v5273_v6  }
  0x3a   :  { %4822 = vset.pattern.permute.xlu1 %v5130_v4 }
  0x3b   :  { %4827 = vset.pattern.permute.xlu0 %v5138_v10  ;;  %264 = vperm.xlu1 %4822, %v5287_v9  }
  0x3c   :  { %529 = vperm.xlu0 %4827, %v5287_v9  }
  0x3f   :  { %280 = vperm.xlu1 %4822, %v5280_v7  }
  0x40   :  { %549 = vperm.xlu0 %4827, %v5294_v11  }
  0x43   :  { %284 = vperm.xlu1 %4822, %v5294_v11  }
  0x44   :  { %4829 = vset.pattern.permute.xlu0 %v5139_v12 }
  0x45   :  { %296 = vperm.xlu0 %4829, %v5287_v9  }
  0x47   :  { %4824 = vset.pattern.permute.xlu1 %v5139_v12 }
  0x48   :  { %300 = vperm.xlu1 %4824, %v5273_v6  }
  0x49   :  { %316 = vperm.xlu0 %4829, %v5294_v11  }
  0x4c   :  { %4825 = vset.pattern.permute.xlu1 %v5137_v8 }
  0x4d   :  { %4832 = vset.pattern.permute.xlu0 %v5140_v13  ;;  %505 = vperm.xlu1 %4825, %v5287_v9  }
  0x4e   :  { %577 = vperm.xlu0 %4832, %v5280_v7  }
  0x51   :  { %517 = vperm.xlu1 %4825, %v5280_v7  }
  0x52   :  { %4834 = vset.pattern.permute.xlu0 %v5141_v14 }
  0x53   :  { %774 = vperm.xlu0 %4834, %v5273_v6  }
  0x55   :  { %521 = vperm.xlu1 %4825, %v5294_v11  }
  0x57   :  { %4835 = vset.pattern.permute.xlu0 %v5142_v15 }
  0x58   :  { %794 = vperm.xlu0 %4835, %v5287_v9  }
  0x59   :  { %4828 = vset.pattern.permute.xlu1 %v5138_v10  ;;  %v10207_v10 = vmov 19  }
  0x5a   :  { %533 = vperm.xlu1 %4828, %v5273_v6  }
  0x5c   :  { %814 = vperm.xlu0 %4835, %v5294_v11  }
  0x5e   :  { %545 = vperm.xlu1 %4828, %v5280_v7  }
  0x60   :  { %4838 = vset.pattern.permute.xlu0 %v5143_v16 }
  0x61   :  { %332 = vperm.xlu0 %4838, %v5273_v6  }
  0x62   :  { %4830 = vset.pattern.permute.xlu1 %v5139_v12 }
  0x63   :  { %312 = vperm.xlu1 %4830, %v5280_v7  }
  0x65   :  { %4839 = vset.pattern.permute.xlu0 %v5144_v17 }
  0x66   :  { %593 = vperm.xlu0 %4839, %v5287_v9  }
  0x67   :  { %4831 = vset.pattern.permute.xlu1 %v5140_v13 }
  0x68   :  { %561 = vperm.xlu1 %4831, %v5287_v9  }
  0x6a   :  { %613 = vperm.xlu0 %4839, %v5294_v11  }
  0x6c   :  { %565 = vperm.xlu1 %4831, %v5273_v6  }
  0x6e   :  { %4842 = vset.pattern.permute.xlu0 %v5145_v18 }
  0x6f   :  { %830 = vperm.xlu0 %4842, %v5273_v6  }
  0x70   :  { %581 = vperm.xlu1 %4831, %v5294_v11  }
  0x73   :  { %4843 = vset.pattern.permute.xlu0 %v5146_v19 }
  0x74   :  { %v5320_v20 = vpop.permute.xlu1 %89  ;;  %v5322_v21 = vpop.permute.xlu0 %85  ;;  %360 = vperm.xlu0 %4843, %v5287_v9   ;;  %4833 = vset.pattern.permute.xlu1 %v5141_v14 }
  0x75   :  { %770 = vperm.xlu1 %4833, %v5287_v9  }
  0x78   :  { %v5326_v22 = vpop.permute.xlu1 %91  ;;  %v5328_v23 = vpop.permute.xlu0 %87  ;;  %380 = vperm.xlu0 %4843, %v5294_v11  }
  0x79   :  { %782 = vperm.xlu1 %4833, %v5280_v7  }
  0x7c   :  { %v5332_v24 = vpop.permute.xlu1 %112  ;;  %v5334_v25 = vpop.permute.xlu0 %110  ;;  %4846 = vset.pattern.permute.xlu0 %v5147_v26 }
  0x7d   :  { %629 = vperm.xlu0 %4846, %v5273_v6   ;;  %786 = vperm.xlu1 %4833, %v5294_v11  }
  0x80   :  { %v5339_v27 = vpop.permute.xlu1 %116  ;;  %v5341_v28 = vpop.permute.xlu0 %114 }
  0x81   :  { %4847 = vset.pattern.permute.xlu0 %v5148_v29  ;;  %4836 = vset.pattern.permute.xlu1 %v5142_v15  ;;  %v10206_v15 = vmov 31  }
  0x82   :  { %858 = vperm.xlu0 %4847, %v5287_v9   ;;  %798 = vperm.xlu1 %4836, %v5273_v6  }
  0x84   :  { %v5346_v30 = vpop.permute.xlu1 %137  ;;  %v5348_v31 = vpop.permute.xlu0 %135 }
  0x86   :  { %878 = vperm.xlu0 %4847, %v5294_v11   ;;  %810 = vperm.xlu1 %4836, %v5280_v7  }
  0x88   :  { %v5352_v32 = vpop.permute.xlu1 %141  ;;  %v5354_v33 = vpop.permute.xlu0 %139 }
  0x8a   :  { %4850 = vset.pattern.permute.xlu0 %v5149_v34  ;;  %4837 = vset.pattern.permute.xlu1 %v5143_v16 }
  0x8b   :  { %1263 = vperm.xlu0 %4850, %v5273_v6   ;;  %328 = vperm.xlu1 %4837, %v5287_v9  }
  0x8c   :  { %v5359_v35 = vpop.permute.xlu1 %162  ;;  %v5361_v36 = vpop.permute.xlu0 %160 }
  0x8f   :  { %4851 = vset.pattern.permute.xlu0 %v5150_v37  ;;  %344 = vperm.xlu1 %4837, %v5280_v7  }
  0x90   :  { %1283 = vperm.xlu0 %4851, %v5287_v9   ;;  %v5368_v38 = vpop.permute.xlu1 %166  ;;  %v5370_v39 = vpop.permute.xlu0 %164 }
  0x93   :  { %348 = vperm.xlu1 %4837, %v5294_v11  }
  0x94   :  { %1303 = vperm.xlu0 %4851, %v5294_v11   ;;  %v5375_v41 = vpop.permute.xlu1 %187  ;;  %v5377_v42 = vpop.permute.xlu0 %185 }
  0x97   :  { %4840 = vset.pattern.permute.xlu1 %v5144_v17 }
  0x98   :  { %4854 = vset.pattern.permute.xlu0 %v5151_v40  ;;  %597 = vperm.xlu1 %4840, %v5273_v6   ;;  %v5382_v44 = vpop.permute.xlu1 %191  ;;  %v5384_v45 = vpop.permute.xlu0 %189 }
  0x99   :  { %396 = vperm.xlu0 %4854, %v5273_v6   ;;  %10689 = vst [vmem:[#allocation5_spill] sm:$0xff] %v5382_v44 }
  0x9c   :  { %609 = vperm.xlu1 %4840, %v5280_v7   ;;  %v5390_v47 = vpop.permute.xlu1 %212  ;;  %v5392_v48 = vpop.permute.xlu0 %210 }
  0x9d   :  { %4855 = vset.pattern.permute.xlu0 %v5152_v43  ;;  %10690 = vst [vmem:[#allocation6_spill] sm:$0xff] %v5390_v47 }
  0x9e   :  { %657 = vperm.xlu0 %4855, %v5287_v9  }
  0xa0   :  { %4841 = vset.pattern.permute.xlu1 %v5145_v18  ;;  %v5398_v50 = vpop.permute.xlu1 %216  ;;  %v5400_v51 = vpop.permute.xlu0 %214 }
  0xa1   :  { %826 = vperm.xlu1 %4841, %v5287_v9   ;;  %10691 = vst [vmem:[#allocation7_spill] sm:$0xff] %v5398_v50 }
  0xa2   :  { %677 = vperm.xlu0 %4855, %v5294_v11  }
  0xa5   :  { %842 = vperm.xlu1 %4841, %v5280_v7  }
  0xa6   :  { %4858 = vset.pattern.permute.xlu0 %v5153_v46 }
  0xa7   :  { %894 = vperm.xlu0 %4858, %v5273_v6  }
  0xa9   :  { %846 = vperm.xlu1 %4841, %v5294_v11  }
  0xab   :  { %4859 = vset.pattern.permute.xlu0 %v10214_v49 }
  0xac   :  { %1315 = vperm.xlu0 %4859, %v5287_v9  }
  0xad   :  { %4844 = vset.pattern.permute.xlu1 %v5146_v19 }
  0xae   :  { %364 = vperm.xlu1 %4844, %v5273_v6  }
  0xb0   :  { %1335 = vperm.xlu0 %4859, %v5294_v11  }
  0xb1   :  { %v5405_v52 = vpop.permute.xlu0 %268  ;;  %v5407_v53 = vpop.permute.xlu1 %242 }
  0xb2   :  { %10692 = vst [vmem:[#allocation8_spill] sm:$0xff] %v5405_v52  ;;  %10693 = vst [vmem:[#allocation9_spill] sm:$0xff] %v5407_v53  ;;  %376 = vperm.xlu1 %4844, %v5280_v7  }
  0xb4   :  { %4862 = vset.pattern.permute.xlu0 %v10212_v54 }
  0xb5   :  { %v5411_v55 = vpop.permute.xlu1 %251  ;;  %1528 = vperm.xlu0 %4862, %v5273_v6  }
  0xb6   :  { %10694 = vst [vmem:[#allocation10_spill] sm:$0xff] %v5411_v55  ;;  %v5414_v56 = vpop.permute.xlu0 %509  ;;  %4845 = vset.pattern.permute.xlu1 %v5147_v26  ;;  %v10205_v26 = vmov 37  }
  0xb7   :  { %10695 = vst [vmem:[#allocation11_spill] sm:$0xff] %v5414_v56  ;;  %625 = vperm.xlu1 %4845, %v5287_v9  }
  0xb9   :  { %4863 = vset.pattern.permute.xlu0 %v10211_v57 }
  0xba   :  { %1548 = vperm.xlu0 %4863, %v5287_v9   ;;  %v5420_v58 = vpop.permute.xlu1 %264 }
  0xbb   :  { %10696 = vst [vmem:[#allocation12_spill] sm:$0xff] %v5420_v58  ;;  %v5422_v59 = vpop.permute.xlu0 %529  ;;  %641 = vperm.xlu1 %4845, %v5280_v7  }
  0xbc   :  { %10697 = vst [vmem:[#allocation13_spill] sm:$0xff] %v5422_v59 }
  0xbe   :  { %1568 = vperm.xlu0 %4863, %v5294_v11   ;;  %v5426_v60 = vpop.permute.xlu1 %280 }
  0xbf   :  { %10698 = vst [vmem:[#allocation14_spill] sm:$0xff] %v5426_v60  ;;  %v5428_v61 = vpop.permute.xlu0 %549  ;;  %645 = vperm.xlu1 %4845, %v5294_v11  }
  0xc0   :  { %10699 = vst [vmem:[#allocation15_spill] sm:$0xff] %v5428_v61 }
  0xc2   :  { %4866 = vset.pattern.permute.xlu0 %v10210_v62  ;;  %v5432_v63 = vpop.permute.xlu1 %284  ;;  %v10215_v62 = vmov 20  }
  0xc3   :  { %10700 = vst [vmem:[#allocation16_spill] sm:$0xff] %v5432_v63  ;;  %428 = vperm.xlu0 %4866, %v5273_v6   ;;  %4848 = vset.pattern.permute.xlu1 %v5148_v29 }
  0xc4   :  { %v5436_v0 = vpop.permute.xlu0 %296  ;;  %862 = vperm.xlu1 %4848, %v5273_v6  }
  0xc5   :  { %10701 = vst [vmem:[#allocation17_spill] sm:$0xff] %v5436_v0 }
  0xc7   :  { %4867 = vset.pattern.permute.xlu0 %v10209_v1  ;;  %v5440_v2 = vpop.permute.xlu1 %300 }
  0xc8   :  { %10702 = vst [vmem:[#allocation18_spill] sm:$0xff] %v5440_v2  ;;  %689 = vperm.xlu0 %4867, %v5287_v9   ;;  %v5443_v3 = vpop.permute.xlu0 %316  ;;  %874 = vperm.xlu1 %4848, %v5280_v7  }
  0xc9   :  { %10703 = vst [vmem:[#allocation19_spill] sm:$0xff] %v5443_v3 }
  0xcc   :  { %709 = vperm.xlu0 %4867, %v5294_v11   ;;  %4849 = vset.pattern.permute.xlu1 %v5149_v34  ;;  %v5448_v4 = vpop.permute.xlu1 %505 }
  0xcd   :  { %10704 = vst [vmem:[#allocation20_spill] sm:$0xff] %v5448_v4  ;;  %v5450_v8 = vpop.permute.xlu0 %577  ;;  %1259 = vperm.xlu1 %4849, %v5287_v9  }
  0xce   :  { %10705 = vst [vmem:[#allocation21_spill] sm:$0xff] %v5450_v8 }
  0xd0   :  { %4870 = vset.pattern.permute.xlu0 %v10207_v10  ;;  %v5454_v12 = vpop.permute.xlu1 %517  ;;  %v10213_v10 = vmov 43  }
  0xd1   :  { %10706 = vst [vmem:[#allocation22_spill] sm:$0xff] %v5454_v12  ;;  %926 = vperm.xlu0 %4870, %v5273_v6   ;;  %1271 = vperm.xlu1 %4849, %v5280_v7   ;;  %v10288_v12 = vmov 26  }
  0xd2   :  { %v5458_v13 = vpop.permute.xlu0 %774 }
  0xd3   :  { %10707 = vst [vmem:[#allocation23_spill] sm:$0xff] %v5458_v13  ;;  %v10256_v13 = vmov 41  }
  0xd4   :  { %v5460_v14 = vpop.permute.xlu1 %521 }
  0xd5   :  { %10708 = vst [vmem:[#allocation24_spill] sm:$0xff] %v5460_v14  ;;  %4871 = vset.pattern.permute.xlu0 %v10206_v15  ;;  %1275 = vperm.xlu1 %4849, %v5294_v11   ;;  %v10269_v14 = vmov 21  }
  0xd6   :  { %1347 = vperm.xlu0 %4871, %v5287_v9  }
  0xd7   :  { %v5465_v16 = vpop.permute.xlu0 %794 }
  0xd8   :  { %10709 = vst [vmem:[#allocation25_spill] sm:$0xff] %v5465_v16  ;;  %v10742_v16 = vmov 36  }
  0xd9   :  { %4852 = vset.pattern.permute.xlu1 %v5150_v37  ;;  %v5468_v17 = vpop.permute.xlu1 %533  ;;  %v10208_v37 = vmov 42  }
  0xda   :  { %10710 = vst [vmem:[#allocation26_spill] sm:$0xff] %v5468_v17  ;;  %1367 = vperm.xlu0 %4871, %v5294_v11   ;;  %1287 = vperm.xlu1 %4852, %v5273_v6  }
  0xdb   :  { %v5472_v18 = vpop.permute.xlu0 %814 }
  0xdc   :  { %10711 = vst [vmem:[#allocation27_spill] sm:$0xff] %v5472_v18  ;;  %v10235_v18 = vmov 39  }
  0xdd   :  { %v5474_v19 = vpop.permute.xlu1 %545 }
  0xde   :  { %10712 = vst [vmem:[#allocation28_spill] sm:$0xff] %v5474_v19  ;;  %4874 = vset.pattern.permute.xlu0 %v10205_v26  ;;  %1299 = vperm.xlu1 %4852, %v5280_v7  }
  0xdf   :  { %1584 = vperm.xlu0 %4874, %v5273_v6  }
  0xe0   :  { %v5479_v29 = vpop.permute.xlu0 %332 }
  0xe1   :  { %10713 = vst [vmem:[#allocation29_spill] sm:$0xff] %v5479_v29 }
  0xe2   :  { %4853 = vset.pattern.permute.xlu1 %v5151_v40  ;;  %v5482_v34 = vpop.permute.xlu1 %312 }
  0xe3   :  { %10714 = vst [vmem:[#allocation30_spill] sm:$0xff] %v5482_v34  ;;  %4875 = vset.pattern.permute.xlu0 %v10208_v37  ;;  %392 = vperm.xlu1 %4853, %v5287_v9  }
  0xe4   :  { %1789 = vperm.xlu0 %4875, %v5287_v9  }
  0xe5   :  { %v5487_v5 = vpop.permute.xlu0 %593 }
  0xe6   :  { %10715 = vst [vmem:[#allocation31_spill] sm:$0xff] %v5487_v5  ;;  %v10293_v5 = vmov 27  }
  0xe7   :  { %v5489_v26 = vpop.permute.xlu1 %561  ;;  %408 = vperm.xlu1 %4853, %v5280_v7  }
  0xe8   :  { %10716 = vst [vmem:[#allocation32_spill] sm:$0xff] %v5489_v26  ;;  %1805 = vperm.xlu0 %4875, %v5294_v11  }
  0xe9   :  { %v5493_v15 = vpop.permute.xlu0 %613 }
  0xea   :  { %10717 = vst [vmem:[#allocation33_spill] sm:$0xff] %v5493_v15  ;;  %v10223_v15 = vmov 38  }
  0xeb   :  { %v5495_v40 = vpop.permute.xlu1 %565  ;;  %412 = vperm.xlu1 %4853, %v5294_v11  }
  0xec   :  { %10718 = vst [vmem:[#allocation34_spill] sm:$0xff] %v5495_v40  ;;  %4878 = vset.pattern.permute.xlu0 %v10213_v10  ;;  %v10261_v40 = vmov 47  }
  0xed   :  { %1817 = vperm.xlu0 %4878, %v5273_v6  }
  0xee   :  { %v5500_v37 = vpop.permute.xlu0 %830 }
  0xef   :  { %10719 = vst [vmem:[#allocation35_spill] sm:$0xff] %v5500_v37  ;;  %v5502_v1 = vpop.permute.xlu1 %581  ;;  %4856 = vset.pattern.permute.xlu1 %v5152_v43  ;;  %v10219_v43 = vmov 32  }
  0xf0   :  { %10720 = vst [vmem:[#allocation36_spill] sm:$0xff] %v5502_v1  ;;  %661 = vperm.xlu1 %4856, %v5273_v6  }
  0xf1   :  { %4879 = vset.pattern.permute.xlu0 %v10215_v62 }
  0xf2   :  { %954 = vperm.xlu0 %4879, %v5287_v9  }
  0xf3   :  { %v5508_v57 = vpop.permute.xlu0 %360 }
  0xf4   :  { %10721 = vst [vmem:[#allocation37_spill] sm:$0xff] %v5508_v57  ;;  %v5510_v54 = vpop.permute.xlu1 %770  ;;  %673 = vperm.xlu1 %4856, %v5280_v7  }
  0xf5   :  { %10722 = vst [vmem:[#allocation38_spill] sm:$0xff] %v5510_v54  ;;  %v10228_v54 = vmov 44  }
  0xf6   :  { %974 = vperm.xlu0 %4879, %v5294_v11  }
  0xf7   :  { %v5514_v10 = vpop.permute.xlu0 %380 }
  0xf8   :  { %10723 = vst [vmem:[#allocation39_spill] sm:$0xff] %v5514_v10  ;;  %v5516_v49 = vpop.permute.xlu1 %782  ;;  %4857 = vset.pattern.permute.xlu1 %v5153_v46 }
  0xf9   :  { %10724 = vst [vmem:[#allocation40_spill] sm:$0xff] %v5516_v49  ;;  %890 = vperm.xlu1 %4857, %v5287_v9  }
  0xfa   :  { %4882 = vset.pattern.permute.xlu0 %v10219_v43 }
  0xfb   :  { %1383 = vperm.xlu0 %4882, %v5273_v6  }
  0xfc   :  { %v5522_v62 = vpop.permute.xlu1 %786  ;;  %v5524_v37 = vpop.permute.xlu0 %629 }
  0xfd   :  { %10725 = vst [vmem:[#allocation41_spill] sm:$0xff] %v5522_v62  ;;  %10726 = vst [vmem:[#allocation42_spill] sm:$0xff] %v5524_v37  ;;  %906 = vperm.xlu1 %4857, %v5280_v7   ;;  %v10731_v37 = vmov 30  }
  0xff   :  { %4883 = vset.pattern.permute.xlu0 %v10223_v15 }
 0x100   :  { %1612 = vperm.xlu0 %4883, %v5287_v9  }
 0x101   :  { %v5529_v49 = vpop.permute.xlu1 %798  ;;  %v5531_v46 = vpop.permute.xlu0 %858  ;;  %910 = vperm.xlu1 %4857, %v5294_v11  }
 0x102   :  { %10727 = vst [vmem:[#allocation43_spill] sm:$0xff] %v5529_v49  ;;  %10728 = vst [vmem:[#allocation44_spill] sm:$0xff] %v5531_v46  ;;  %v10231_v49 = vmov 33  }
 0x104   :  { %1632 = vperm.xlu0 %4883, %v5294_v11  }
 0x105   :  { %v5535_v43 = vpop.permute.xlu1 %810  ;;  %v5537_v62 = vpop.permute.xlu0 %878  ;;  %4860 = vset.pattern.permute.xlu1 %v10731_v37  ;;  %v10735_v37 = vmov 35  }
 0x106   :  { %10729 = vst [vmem:[#allocation45_spill] sm:$0xff] %v5535_v43  ;;  %10730 = vst [vmem:[#allocation46_spill] sm:$0xff] %v5537_v62  ;;  %1319 = vperm.xlu1 %4860, %v5273_v6  }
 0x108   :  { %4886 = vset.pattern.permute.xlu0 %v10228_v54 }
 0x109   :  { %1849 = vperm.xlu0 %4886, %v5273_v6  }
 0x10a   :  { %v5543_v15 = vpop.permute.xlu0 %1263  ;;  %v5545_v46 = vpop.permute.xlu1 %328  ;;  %1331 = vperm.xlu1 %4860, %v5280_v7  }
 0x10b   :  { %10732 = vst [vmem:[#allocation47_spill] sm:$0xff] %v5543_v15  ;;  %10733 = vst [vmem:[#allocation48_spill] sm:$0xff] %v5545_v46 }
 0x10d   :  { %4887 = vset.pattern.permute.xlu0 %v10231_v49 }
 0x10e   :  { %1411 = vperm.xlu0 %4887, %v5287_v9   ;;  %v5550_v62 = vpop.permute.xlu1 %344  ;;  %4861 = vset.pattern.permute.xlu1 %v10735_v37 }
 0x10f   :  { %10734 = vst [vmem:[#allocation49_spill] sm:$0xff] %v5550_v62  ;;  %v5553_v43 = vpop.permute.xlu0 %1283  ;;  %1524 = vperm.xlu1 %4861, %v5287_v9  }
 0x110   :  { %10736 = vst [vmem:[#allocation50_spill] sm:$0xff] %v5553_v43  ;;  %v10239_v43 = vmov 45  }
 0x112   :  { %1431 = vperm.xlu0 %4887, %v5294_v11   ;;  %v5557_v54 = vpop.permute.xlu1 %348 }
 0x113   :  { %10737 = vst [vmem:[#allocation51_spill] sm:$0xff] %v5557_v54  ;;  %v5559_v15 = vpop.permute.xlu0 %1303  ;;  %1536 = vperm.xlu1 %4861, %v5280_v7  }
 0x114   :  { %10738 = vst [vmem:[#allocation52_spill] sm:$0xff] %v5559_v15 }
 0x116   :  { %4890 = vset.pattern.permute.xlu0 %v10235_v18 }
 0x117   :  { %1648 = vperm.xlu0 %4890, %v5273_v6   ;;  %v5564_v49 = vpop.permute.xlu1 %597  ;;  %1540 = vperm.xlu1 %4861, %v5294_v11  }
 0x118   :  { %10739 = vst [vmem:[#allocation53_spill] sm:$0xff] %v5564_v49  ;;  %v5567_v37 = vpop.permute.xlu0 %396 }
 0x119   :  { %10740 = vst [vmem:[#allocation54_spill] sm:$0xff] %v5567_v37 }
 0x11b   :  { %4891 = vset.pattern.permute.xlu0 %v10239_v43  ;;  %v5570_v1 = vpop.permute.xlu1 %609  ;;  %4864 = vset.pattern.permute.xlu1 %v10742_v16  ;;  %v10244_v43 = vmov 34   ;;  %v10747_v16 = vmov 6  }
 0x11c   :  { %10741 = vst [vmem:[#allocation55_spill] sm:$0xff] %v5570_v1  ;;  %1877 = vperm.xlu0 %4891, %v5287_v9   ;;  %1552 = vperm.xlu1 %4864, %v5273_v6  }
 0x11d   :  { %v5575_v18 = vpop.permute.xlu0 %657 }
 0x11e   :  { %10743 = vst [vmem:[#allocation56_spill] sm:$0xff] %v5575_v18  ;;  %v10248_v18 = vmov 40  }
 0x120   :  { %v5577_v15 = vpop.permute.xlu1 %826  ;;  %1897 = vperm.xlu0 %4891, %v5294_v11   ;;  %1564 = vperm.xlu1 %4864, %v5280_v7  }
 0x121   :  { %10744 = vst [vmem:[#allocation57_spill] sm:$0xff] %v5577_v15  ;;  %v5581_v49 = vpop.permute.xlu0 %677 }
 0x122   :  { %10745 = vst [vmem:[#allocation58_spill] sm:$0xff] %v5581_v49  ;;  %v10252_v49 = vmov 46  }
 0x124   :  { %v5583_v19 = vpop.permute.xlu1 %842  ;;  %4894 = vset.pattern.permute.xlu0 %v10244_v43  ;;  %4865 = vset.pattern.permute.xlu1 %v10747_v16 }
 0x125   :  { %10746 = vst [vmem:[#allocation59_spill] sm:$0xff] %v5583_v19  ;;  %1447 = vperm.xlu0 %4894, %v5273_v6   ;;  %424 = vperm.xlu1 %4865, %v5287_v9  }
 0x126   :  { %v5589_v1 = vpop.permute.xlu0 %894 }
 0x127   :  { %10748 = vst [vmem:[#allocation60_spill] sm:$0xff] %v5589_v1 }
 0x128   :  { %v5591_v15 = vpop.permute.xlu1 %846 }
 0x129   :  { %10749 = vst [vmem:[#allocation61_spill] sm:$0xff] %v5591_v15  ;;  %4895 = vset.pattern.permute.xlu0 %v10248_v18  ;;  %440 = vperm.xlu1 %4865, %v5280_v7   ;;  %v10754_v15 = vmov 13  }
 0x12a   :  { %1676 = vperm.xlu0 %4895, %v5287_v9  }
 0x12b   :  { %v5596_v19 = vpop.permute.xlu0 %1315 }
 0x12c   :  { %10750 = vst [vmem:[#allocation62_spill] sm:$0xff] %v5596_v19 }
 0x12d   :  { %v5598_v43 = vpop.permute.xlu1 %364  ;;  %444 = vperm.xlu1 %4865, %v5294_v11  }
 0x12e   :  { %10751 = vst [vmem:[#allocation63_spill] sm:$0xff] %v5598_v43  ;;  %1696 = vperm.xlu0 %4895, %v5294_v11  }
 0x12f   :  { %v5602_v16 = vpop.permute.xlu0 %1335 }
 0x130   :  { %10752 = vst [vmem:[#allocation64_spill] sm:$0xff] %v5602_v16 }
 0x131   :  { %v5604_v1 = vpop.permute.xlu1 %376  ;;  %4868 = vset.pattern.permute.xlu1 %v10754_v15 }
 0x132   :  { %10753 = vst [vmem:[#allocation65_spill] sm:$0xff] %v5604_v1  ;;  %4898 = vset.pattern.permute.xlu0 %v10252_v49  ;;  %693 = vperm.xlu1 %4868, %v5273_v6   ;;  %v10759_v49 = vmov 19   ;;  %v10847_v1 = vmov 41  }
 0x133   :  { %1913 = vperm.xlu0 %4898, %v5273_v6  }
 0x134   :  { %v5610_v18 = vpop.permute.xlu0 %1528 }
 0x135   :  { %10755 = vst [vmem:[#allocation66_spill] sm:$0xff] %v5610_v18 }
 0x136   :  { %v5612_v19 = vpop.permute.xlu1 %625  ;;  %705 = vperm.xlu1 %4868, %v5280_v7  }
 0x137   :  { %10756 = vst [vmem:[#allocation67_spill] sm:$0xff] %v5612_v19  ;;  %4899 = vset.pattern.permute.xlu0 %v10256_v13 }
 0x138   :  { %1708 = vperm.xlu0 %4899, %v5287_v9  }
 0x139   :  { %v5617_v16 = vpop.permute.xlu0 %1548 }
 0x13a   :  { %10757 = vst [vmem:[#allocation68_spill] sm:$0xff] %v5617_v16  ;;  %v5619_v15 = vpop.permute.xlu1 %641  ;;  %4869 = vset.pattern.permute.xlu1 %v10759_v49  ;;  %v10264_v49 = vmov 48  }
 0x13b   :  { %10758 = vst [vmem:[#allocation69_spill] sm:$0xff] %v5619_v15  ;;  %922 = vperm.xlu1 %4869, %v5287_v9   ;;  %v10766_v15 = vmov 31  }
 0x13c   :  { %1728 = vperm.xlu0 %4899, %v5294_v11  }
 0x13d   :  { %v5624_v18 = vpop.permute.xlu0 %1568 }
 0x13e   :  { %10760 = vst [vmem:[#allocation70_spill] sm:$0xff] %v5624_v18  ;;  %v5626_v19 = vpop.permute.xlu1 %645 }
 0x13f   :  { %10761 = vst [vmem:[#allocation71_spill] sm:$0xff] %v5626_v19  ;;  %938 = vperm.xlu1 %4869, %v5280_v7  }
 0x140   :  { %4902 = vset.pattern.permute.xlu0 %v10261_v40 }
 0x141   :  { %1945 = vperm.xlu0 %4902, %v5273_v6  }
 0x142   :  { %v5631_v13 = vpop.permute.xlu0 %428 }
 0x143   :  { %10762 = vst [vmem:[#allocation72_spill] sm:$0xff] %v5631_v13  ;;  %v5633_v16 = vpop.permute.xlu1 %862  ;;  %942 = vperm.xlu1 %4869, %v5294_v11  }
 0x144   :  { %10763 = vst [vmem:[#allocation73_spill] sm:$0xff] %v5633_v16 }
 0x145   :  { %4903 = vset.pattern.permute.xlu0 %v10264_v49 }
 0x146   :  { %1973 = vperm.xlu0 %4903, %v5287_v9  }
 0x147   :  { %v5638_v18 = vpop.permute.xlu0 %689  ;;  %v5640_v19 = vpop.permute.xlu1 %874  ;;  %4872 = vset.pattern.permute.xlu1 %v10766_v15  ;;  %v10771_v15 = vmov 37  }
 0x148   :  { %10764 = vst [vmem:[#allocation74_spill] sm:$0xff] %v5638_v18  ;;  %10765 = vst [vmem:[#allocation75_spill] sm:$0xff] %v5640_v19  ;;  %1351 = vperm.xlu1 %4872, %v5273_v6   ;;  %v10271_v18 = vmov 22  }
 0x14a   :  { %1993 = vperm.xlu0 %4903, %v5294_v11  }
 0x14b   :  { %v5645_v40 = vpop.permute.xlu0 %709 }
 0x14c   :  { %10767 = vst [vmem:[#allocation76_spill] sm:$0xff] %v5645_v40  ;;  %v5647_v16 = vpop.permute.xlu1 %1259  ;;  %1363 = vperm.xlu1 %4872, %v5280_v7  }
 0x14d   :  { %10768 = vst [vmem:[#allocation77_spill] sm:$0xff] %v5647_v16 }
 0x14e   :  { %4906 = vset.pattern.permute.xlu0 %v10269_v14 }
 0x14f   :  { %1039 = vperm.xlu0 %4906, %v5273_v6  }
 0x150   :  { %v5652_v49 = vpop.permute.xlu0 %926  ;;  %v5654_v19 = vpop.permute.xlu1 %1271  ;;  %4873 = vset.pattern.permute.xlu1 %v10771_v15  ;;  %v10276_v15 = vmov 23  }
 0x151   :  { %10769 = vst [vmem:[#allocation78_spill] sm:$0xff] %v5652_v49  ;;  %10770 = vst [vmem:[#allocation79_spill] sm:$0xff] %v5654_v19  ;;  %1580 = vperm.xlu1 %4873, %v5287_v9   ;;  %v10280_v49 = vmov 24  }
 0x153   :  { %4907 = vset.pattern.permute.xlu0 %v10271_v18 }
 0x154   :  { %v5659_v40 = vpop.permute.xlu1 %1275  ;;  %1059 = vperm.xlu0 %4907, %v5287_v9  }
 0x155   :  { %10772 = vst [vmem:[#allocation80_spill] sm:$0xff] %v5659_v40  ;;  %v5662_v16 = vpop.permute.xlu0 %1347  ;;  %1596 = vperm.xlu1 %4873, %v5280_v7   ;;  %v10777_v40 = vmov 42  }
 0x156   :  { %10773 = vst [vmem:[#allocation81_spill] sm:$0xff] %v5662_v16 }
 0x158   :  { %1079 = vperm.xlu0 %4907, %v5294_v11  }
 0x159   :  { %v5666_v14 = vpop.permute.xlu0 %1367  ;;  %v5668_v19 = vpop.permute.xlu1 %1287  ;;  %1600 = vperm.xlu1 %4873, %v5294_v11  }
 0x15a   :  { %10774 = vst [vmem:[#allocation82_spill] sm:$0xff] %v5666_v14  ;;  %10775 = vst [vmem:[#allocation83_spill] sm:$0xff] %v5668_v19  ;;  %v10284_v19 = vmov 25  }
 0x15c   :  { %4910 = vset.pattern.permute.xlu0 %v10276_v15 }
 0x15d   :  { %v5672_v18 = vpop.permute.xlu1 %1299  ;;  %1095 = vperm.xlu0 %4910, %v5273_v6   ;;  %4876 = vset.pattern.permute.xlu1 %v10777_v40 }
 0x15e   :  { %10776 = vst [vmem:[#allocation84_spill] sm:$0xff] %v5672_v18  ;;  %v5676_v16 = vpop.permute.xlu0 %1584  ;;  %1793 = vperm.xlu1 %4876, %v5273_v6   ;;  %v10781_v18 = vmov 43  }
 0x15f   :  { %10778 = vst [vmem:[#allocation85_spill] sm:$0xff] %v5676_v16 }
 0x161   :  { %4911 = vset.pattern.permute.xlu0 %v10280_v49 }
 0x162   :  { %1123 = vperm.xlu0 %4911, %v5287_v9   ;;  %1801 = vperm.xlu1 %4876, %v5280_v7   ;;  %v5682_v14 = vpop.permute.xlu1 %392 }
 0x163   :  { %10779 = vst [vmem:[#allocation86_spill] sm:$0xff] %v5682_v14  ;;  %v5684_v15 = vpop.permute.xlu0 %1789 }
 0x164   :  { %10780 = vst [vmem:[#allocation87_spill] sm:$0xff] %v5684_v15 }
 0x166   :  { %1143 = vperm.xlu0 %4911, %v5294_v11   ;;  %4877 = vset.pattern.permute.xlu1 %v10781_v18  ;;  %v5688_v40 = vpop.permute.xlu1 %408 }
 0x167   :  { %10782 = vst [vmem:[#allocation88_spill] sm:$0xff] %v5688_v40  ;;  %v5690_v16 = vpop.permute.xlu0 %1805  ;;  %1813 = vperm.xlu1 %4877, %v5287_v9  }
 0x168   :  { %10783 = vst [vmem:[#allocation89_spill] sm:$0xff] %v5690_v16 }
 0x16a   :  { %4914 = vset.pattern.permute.xlu0 %v10284_v19  ;;  %v5694_v49 = vpop.permute.xlu1 %412  ;;  %v10788_v19 = vmov 20  }
 0x16b   :  { %10784 = vst [vmem:[#allocation90_spill] sm:$0xff] %v5694_v49  ;;  %1159 = vperm.xlu0 %4914, %v5273_v6   ;;  %1829 = vperm.xlu1 %4877, %v5280_v7  }
 0x16c   :  { %v5698_v15 = vpop.permute.xlu0 %1817 }
 0x16d   :  { %10785 = vst [vmem:[#allocation91_spill] sm:$0xff] %v5698_v15 }
 0x16f   :  { %4915 = vset.pattern.permute.xlu0 %v10288_v12  ;;  %1833 = vperm.xlu1 %4877, %v5294_v11   ;;  %v5702_v18 = vpop.permute.xlu1 %661 }
 0x170   :  { %10786 = vst [vmem:[#allocation92_spill] sm:$0xff] %v5702_v18  ;;  %1187 = vperm.xlu0 %4915, %v5287_v9   ;;  %v10795_v18 = vmov 0  }
 0x171   :  { %v5705_v16 = vpop.permute.xlu0 %954 }
 0x172   :  { %10787 = vst [vmem:[#allocation93_spill] sm:$0xff] %v5705_v16 }
 0x173   :  { %4880 = vset.pattern.permute.xlu1 %v10788_v19  ;;  %v5708_v49 = vpop.permute.xlu1 %673  ;;  %v10793_v19 = vmov 32  }
 0x174   :  { %10789 = vst [vmem:[#allocation94_spill] sm:$0xff] %v5708_v49  ;;  %1207 = vperm.xlu0 %4915, %v5294_v11   ;;  %958 = vperm.xlu1 %4880, %v5273_v6  }
 0x175   :  { %v5712_v15 = vpop.permute.xlu0 %974 }
 0x176   :  { %10790 = vst [vmem:[#allocation95_spill] sm:$0xff] %v5712_v15 }
 0x178   :  { %4918 = vset.pattern.permute.xlu0 %v10293_v5  ;;  %970 = vperm.xlu1 %4880, %v5280_v7   ;;  %v5716_v12 = vpop.permute.xlu1 %890 }
 0x179   :  { %10791 = vst [vmem:[#allocation96_spill] sm:$0xff] %v5716_v12  ;;  %1223 = vperm.xlu0 %4918, %v5273_v6  }
 0x17a   :  { %v5719_v16 = vpop.permute.xlu0 %1383 }
 0x17b   :  { %10792 = vst [vmem:[#allocation97_spill] sm:$0xff] %v5719_v16 }
 0x17c   :  { %4881 = vset.pattern.permute.xlu1 %v10793_v19  ;;  %v5722_v49 = vpop.permute.xlu1 %906 }
 0x17d   :  { %10794 = vst [vmem:[#allocation98_spill] sm:$0xff] %v5722_v49  ;;  %4919 = vset.pattern.permute.xlu0 %v10795_v18  ;;  %1379 = vperm.xlu1 %4881, %v5287_v9   ;;  %v10801_v18 = vmov 38  }
 0x17e   :  { %237 = vperm.xlu0 %4919, %v5287_v9  }
 0x17f   :  { %v5727_v15 = vpop.permute.xlu0 %1612 }
 0x180   :  { %10796 = vst [vmem:[#allocation99_spill] sm:$0xff] %v5727_v15  ;;  %v5729_v5 = vpop.permute.xlu1 %910 }
 0x181   :  { %10797 = vst [vmem:[#allocation100_spill] sm:$0xff] %v5729_v5  ;;  %1395 = vperm.xlu1 %4881, %v5280_v7  }
 0x182   :  { %256 = vperm.xlu0 %4919, %v5294_v11  }
 0x183   :  { %v5733_v12 = vpop.permute.xlu0 %1632 }
 0x184   :  { %10798 = vst [vmem:[#allocation101_spill] sm:$0xff] %v5733_v12  ;;  %v10806_v12 = vmov 44  }
 0x185   :  { %1399 = vperm.xlu1 %4881, %v5294_v11   ;;  %v5736_v19 = vpop.permute.xlu1 %1319 }
 0x186   :  { %10799 = vst [vmem:[#allocation102_spill] sm:$0xff] %v5736_v19 }
 0x188   :  { %v5738_v16 = vpop.permute.xlu0 %1849 }
 0x189   :  { %10800 = vst [vmem:[#allocation103_spill] sm:$0xff] %v5738_v16  ;;  %4884 = vset.pattern.permute.xlu1 %v10801_v18  ;;  %v5741_v49 = vpop.permute.xlu1 %1331 }
 0x18a   :  { %10802 = vst [vmem:[#allocation104_spill] sm:$0xff] %v5741_v49  ;;  %1616 = vperm.xlu1 %4884, %v5273_v6  }
 0x18d   :  { %v5744_v15 = vpop.permute.xlu0 %1411 }
 0x18e   :  { %10803 = vst [vmem:[#allocation105_spill] sm:$0xff] %v5744_v15  ;;  %1628 = vperm.xlu1 %4884, %v5280_v7   ;;  %v5747_v5 = vpop.permute.xlu1 %1524 }
 0x18f   :  { %10804 = vst [vmem:[#allocation106_spill] sm:$0xff] %v5747_v5  ;;  %v10812_v5 = vmov 33  }
 0x191   :  { %v5749_v17 = vpop.permute.xlu0 %1431 }
 0x192   :  { %10805 = vst [vmem:[#allocation107_spill] sm:$0xff] %v5749_v17  ;;  %4885 = vset.pattern.permute.xlu1 %v10806_v12  ;;  %v5752_v40 = vpop.permute.xlu1 %1536 }
 0x193   :  { %10807 = vst [vmem:[#allocation108_spill] sm:$0xff] %v5752_v40  ;;  %1845 = vperm.xlu1 %4885, %v5287_v9  }
 0x196   :  { %v5755_v16 = vpop.permute.xlu1 %1540  ;;  %v5757_v18 = vpop.permute.xlu0 %1648 }
 0x197   :  { %10808 = vst [vmem:[#allocation109_spill] sm:$0xff] %v5755_v16  ;;  %10809 = vst [vmem:[#allocation110_spill] sm:$0xff] %v5757_v18  ;;  %1861 = vperm.xlu1 %4885, %v5280_v7   ;;  %v10817_v16 = vmov 39  }
 0x19b   :  { %1865 = vperm.xlu1 %4885, %v5294_v11   ;;  %v5761_v15 = vpop.permute.xlu1 %1552  ;;  %v5763_v49 = vpop.permute.xlu0 %1877 }
 0x19c   :  { %10810 = vst [vmem:[#allocation111_spill] sm:$0xff] %v5761_v15  ;;  %10811 = vst [vmem:[#allocation112_spill] sm:$0xff] %v5763_v49 }
 0x19f   :  { %4888 = vset.pattern.permute.xlu1 %v10812_v5  ;;  %v5766_v17 = vpop.permute.xlu1 %1564  ;;  %v5768_v12 = vpop.permute.xlu0 %1897 }
 0x1a0   :  { %10813 = vst [vmem:[#allocation113_spill] sm:$0xff] %v5766_v17  ;;  %10814 = vst [vmem:[#allocation114_spill] sm:$0xff] %v5768_v12  ;;  %1415 = vperm.xlu1 %4888, %v5273_v6  }
 0x1a4   :  { %v5771_v40 = vpop.permute.xlu0 %1447  ;;  %1427 = vperm.xlu1 %4888, %v5280_v7   ;;  %v5774_v18 = vpop.permute.xlu1 %424 }
 0x1a5   :  { %10815 = vst [vmem:[#allocation115_spill] sm:$0xff] %v5771_v40  ;;  %10816 = vst [vmem:[#allocation116_spill] sm:$0xff] %v5774_v18  ;;  %v10824_v40 = vmov 45   ;;  %v10853_v18 = vmov 47  }
 0x1a8   :  { %4889 = vset.pattern.permute.xlu1 %v10817_v16  ;;  %v5777_v19 = vpop.permute.xlu1 %440 }
 0x1a9   :  { %10818 = vst [vmem:[#allocation117_spill] sm:$0xff] %v5777_v19  ;;  %v5779_v15 = vpop.permute.xlu0 %1676  ;;  %1644 = vperm.xlu1 %4889, %v5287_v9   ;;  %v10829_v19 = vmov 34  }
 0x1aa   :  { %10819 = vst [vmem:[#allocation118_spill] sm:$0xff] %v5779_v15 }
 0x1ac   :  { %v5782_v5 = vpop.permute.xlu1 %444 }
 0x1ad   :  { %10820 = vst [vmem:[#allocation119_spill] sm:$0xff] %v5782_v5  ;;  %v5784_v49 = vpop.permute.xlu0 %1696  ;;  %1660 = vperm.xlu1 %4889, %v5280_v7  }
 0x1ae   :  { %10821 = vst [vmem:[#allocation120_spill] sm:$0xff] %v5784_v49 }
 0x1b1   :  { %1664 = vperm.xlu1 %4889, %v5294_v11   ;;  %v5788_v12 = vpop.permute.xlu1 %693 }
 0x1b2   :  { %10822 = vst [vmem:[#allocation121_spill] sm:$0xff] %v5788_v12  ;;  %v5790_v17 = vpop.permute.xlu0 %1913  ;;  %v10841_v12 = vmov 46  }
 0x1b3   :  { %10823 = vst [vmem:[#allocation122_spill] sm:$0xff] %v5790_v17 }
 0x1b5   :  { %4892 = vset.pattern.permute.xlu1 %v10824_v40  ;;  %v5793_v16 = vpop.permute.xlu1 %705 }
 0x1b6   :  { %10825 = vst [vmem:[#allocation123_spill] sm:$0xff] %v5793_v16  ;;  %1881 = vperm.xlu1 %4892, %v5273_v6  }
 0x1b7   :  { %v5796_v15 = vpop.permute.xlu0 %1708 }
 0x1b8   :  { %10826 = vst [vmem:[#allocation124_spill] sm:$0xff] %v5796_v15 }
 0x1ba   :  { %1893 = vperm.xlu1 %4892, %v5280_v7   ;;  %v5799_v5 = vpop.permute.xlu1 %922 }
 0x1bb   :  { %10827 = vst [vmem:[#allocation125_spill] sm:$0xff] %v5799_v5  ;;  %v5801_v49 = vpop.permute.xlu0 %1728 }
 0x1bc   :  { %10828 = vst [vmem:[#allocation126_spill] sm:$0xff] %v5801_v49  ;;  %v10836_v49 = vmov 40  }
 0x1be   :  { %4893 = vset.pattern.permute.xlu1 %v10829_v19  ;;  %v5804_v10 = vpop.permute.xlu1 %938 }
 0x1bf   :  { %10830 = vst [vmem:[#allocation127_spill] sm:$0xff] %v5804_v10  ;;  %1443 = vperm.xlu1 %4893, %v5287_v9  }
 0x1c0   :  { %v5807_v17 = vpop.permute.xlu0 %1945 }
 0x1c1   :  { %10831 = vst [vmem:[#allocation128_spill] sm:$0xff] %v5807_v17 }
 0x1c2   :  { %v5809_v40 = vpop.permute.xlu1 %942 }
 0x1c3   :  { %10832 = vst [vmem:[#allocation129_spill] sm:$0xff] %v5809_v40  ;;  %1459 = vperm.xlu1 %4893, %v5280_v7   ;;  %v27_v40 = vlaneseq }
 0x1c5   :  { %v5812_v16 = vpop.permute.xlu0 %1973 }
 0x1c6   :  { %10833 = vst [vmem:[#allocation130_spill] sm:$0xff] %v5812_v16 }
 0x1c7   :  { %1463 = vperm.xlu1 %4893, %v5294_v11   ;;  %v5815_v15 = vpop.permute.xlu1 %1351 }
 0x1c8   :  { %10834 = vst [vmem:[#allocation131_spill] sm:$0xff] %v5815_v15 }
 0x1c9   :  { %v5817_v5 = vpop.permute.xlu0 %1993 }
 0x1ca   :  { %10835 = vst [vmem:[#allocation132_spill] sm:$0xff] %v5817_v5 }
 0x1cb   :  { %4896 = vset.pattern.permute.xlu1 %v10836_v49  ;;  %v5820_v19 = vpop.permute.xlu1 %1363  ;;  %v28_v49 = vand.u32 127, %v27_v40 }
 0x1cc   :  { %10837 = vst [vmem:[#allocation133_spill] sm:$0xff] %v5820_v19  ;;  %1680 = vperm.xlu1 %4896, %v5273_v6  }
 0x1cd   :  { %v29_v8 = vadd.s32 128, %v28_v49 }
 0x1ce   :  { %v5823_v10 = vpop.permute.xlu0 %1039 }
 0x1cf   :  { %10838 = vst [vmem:[#allocation134_spill] sm:$0xff] %v5823_v10  ;;  %v30_v10 = vcvt.s32.f32 %v28_v49  ;;  %v31_v13 = vcvt.s32.f32 %v29_v8 }
 0x1d0   :  { %1692 = vperm.xlu1 %4896, %v5280_v7   ;;  %v5826_v17 = vpop.permute.xlu1 %1580 }
 0x1d1   :  { %10839 = vst [vmem:[#allocation135_spill] sm:$0xff] %v5826_v17 }
 0x1d3   :  { %v5828_v16 = vpop.permute.xlu0 %1059 }
 0x1d4   :  { %10840 = vst [vmem:[#allocation136_spill] sm:$0xff] %v5828_v16  ;;  %4897 = vset.pattern.permute.xlu1 %v10841_v12  ;;  %v5831_v15 = vpop.permute.xlu1 %1596  ;;  %v33_v12 = vmul.f32 0.0625, %v30_v10 }
 0x1d5   :  { %10842 = vst [vmem:[#allocation137_spill] sm:$0xff] %v5831_v15  ;;  %1909 = vperm.xlu1 %4897, %v5287_v9   ;;  %v34_v15 = vmul.f32 0.0625, %v31_v13 }
 0x1d7   :  { %v5834_v5 = vpop.permute.xlu0 %1079  ;;  %v36_v37 = vfloor.f32 %v34_v15 }
 0x1d8   :  { %10843 = vst [vmem:[#allocation138_spill] sm:$0xff] %v5834_v5  ;;  %v5836_v19 = vpop.permute.xlu1 %1600 }
 0x1d9   :  { %10844 = vst [vmem:[#allocation139_spill] sm:$0xff] %v5836_v19  ;;  %1925 = vperm.xlu1 %4897, %v5280_v7   ;;  %v35_v19 = vfloor.f32 %v33_v12 }
 0x1dc   :  { %v5839_v17 = vpop.permute.xlu0 %1095 }
 0x1dd   :  { %10845 = vst [vmem:[#allocation140_spill] sm:$0xff] %v5839_v17  ;;  %1929 = vperm.xlu1 %4897, %v5294_v11   ;;  %v5842_v16 = vpop.permute.xlu1 %1793  ;;  %v37_v17 = vmul.f32 16.0, %v35_v19 }
 0x1de   :  { %10846 = vst [vmem:[#allocation141_spill] sm:$0xff] %v5842_v16  ;;  %v38_v16 = vmul.f32 16.0, %v36_v37 }
 0x1e1   :  { %4900 = vset.pattern.permute.xlu1 %v10847_v1  ;;  %v5845_v40 = vpop.permute.xlu1 %1801  ;;  %v5847_v5 = vpop.permute.xlu0 %1123 }
 0x1e2   :  { %10848 = vst [vmem:[#allocation142_spill] sm:$0xff] %v5845_v40  ;;  %10849 = vst [vmem:[#allocation143_spill] sm:$0xff] %v5847_v5  ;;  %1712 = vperm.xlu1 %4900, %v5273_v6   ;;  %v5861_v5 = vsub.f32 %v30_v10, %v37_v17  ;;  %v5863_v6 = vsub.f32 %v31_v13, %v38_v16  ;;  %v95_v10 = vsel %vm93_vm0, %v5320_v20, %v5326_v22 }
 0x1e3   :  { %v94_v13 = vsel %vm93_vm0, %v5322_v21, %v5328_v23  ;;  %v125_v17 = vsel %vm118_vm1, 0.0, %v5334_v25  ;;  %v119_v16 = vsel %vm118_vm1, %v5334_v25, %v5332_v24  ;;  %v150_v22 = vsel %vm143_vm2, 0.0, %v5348_v31 }
 0x1e4   :  { %10855 = vst [vmem:[#allocation148_spill] sm:$0xff] %v5861_v5  ;;  %10856 = vst [vmem:[#allocation149_spill] sm:$0xff] %v5863_v6  ;;  %vm41_vm3 = vcmp.ge.f32.partialorder %v5861_v5, 3.0  ;;  %vm43_vm4 = vcmp.ge.f32.partialorder %v5861_v5, 2.0  ;;  %vm45_vm5 = vcmp.ge.f32.partialorder %v5861_v5, 1.0  ;;  %vm42_vm7 = vcmp.ge.f32.partialorder %v5863_v6, 3.0 }
 0x1e5   :  { %v5850_v49 = vpop.permute.xlu0 %1143  ;;  %vm44_vm8 = vcmp.ge.f32.partialorder %v5863_v6, 2.0  ;;  %vm10598_vm9 = vcmp.lt.f32.partialorder %v5861_v5, 15.0  ;;  %vm46_vm11 = vcmp.ge.f32.partialorder %v5863_v6, 1.0  ;;  %vm10596_vm12 = vcmp.lt.f32.partialorder %v5863_v6, 15.0 }
 0x1e6   :  { %10850 = vst [vmem:[#allocation144_spill] sm:$0xff] %v5850_v49  ;;  %1724 = vperm.xlu1 %4900, %v5280_v7   ;;  %v5853_v8 = vpop.permute.xlu1 %1813  ;;  %vm10581_vm13 = vcmp.lt.f32.partialorder %v5861_v5, 14.0  ;;  %vm10442_vm15 = vcmp.lt.f32.partialorder %v5861_v5, 13.0  ;;  %v5920_v25 = vsel %vm42_vm7, %v95_v10, 0.0 }
 0x1e7   :  { %10851 = vst [vmem:[#allocation145_spill] sm:$0xff] %v5853_v8  ;;  %10863 = vst [vmem:[#allocation156_spill] sm:$0xff] %v5920_v25 }
 0x1ea   :  { %v5855_v26 = vpop.permute.xlu0 %1159  ;;  %4901 = vset.pattern.permute.xlu1 %v10853_v18  ;;  %v5858_v1 = vpop.permute.xlu1 %1829 }
 0x1eb   :  { %10852 = vst [vmem:[#allocation146_spill] sm:$0xff] %v5855_v26  ;;  %10854 = vst [vmem:[#allocation147_spill] sm:$0xff] %v5858_v1  ;;  %1941 = vperm.xlu1 %4901, %v5287_v9   ;;  %v101_v9 = vsel %vm93_vm0, 0.0, %v5320_v20  ;;  %v120_v20 = vsel %vm118_vm1, %v5341_v28, %v5339_v27  ;;  %v5924_v27 = vsel %vm42_vm7, %v94_v13, 0.0 }
 0x1ec   :  { %v5908_v23 = vsel %vm41_vm3, %v101_v9, 0.0  ;;  %10864 = vst [vmem:[#allocation157_spill] sm:$0xff] %v5924_v27  ;;  %v5940_v19 = vsel %vm44_vm8, %v120_v20, 0.0  ;;  %v5944_v9 = vsel %vm45_vm5, %v150_v22, 0.0  ;;  %v175_v20 = vsel %vm168_vm6, %v5359_v35, 0.0  ;;  %v5965_v22 = vld [vmem:[%s10196_s1 + $0x8] sm:$0xff] }
 0x1ed   :  { %10861 = vst [vmem:[#allocation154_spill] sm:$0xff] %v5908_v23  ;;  %10868 = vst [vmem:[#allocation161_spill] sm:$0xff] %v5940_v19  ;;  %v6056_v1 = vmul.f32 %v5414_v56, %v5908_v23 }
 0x1ee   :  { %v5865_v15 = vpop.permute.xlu1 %1833  ;;  %10869 = vst [vmem:[#allocation162_spill] sm:$0xff] %v5944_v9  ;;  %10874 = vst [vmem:[#allocation166_spill] sm:$0xff] %v5965_v22 }
 0x1ef   :  { %10857 = vst [vmem:[#allocation150_spill] sm:$0xff] %v5865_v15  ;;  %v5867_v12 = vpop.permute.xlu0 %1187  ;;  %1957 = vperm.xlu1 %4901, %v5280_v7   ;;  %v100_v7 = vsel %vm93_vm0, 0.0, %v5322_v21  ;;  %v126_v21 = vsel %vm118_vm1, 0.0, %v5341_v28  ;;  %v5928_v28 = vsel %vm43_vm4, %v125_v17, 0.0  ;;  %v145_v17 = vsel %vm143_vm2, %v5354_v33, %v5352_v32 }
 0x1f0   :  { %10858 = vst [vmem:[#allocation151_spill] sm:$0xff] %v5867_v12  ;;  %v5916_v24 = vsel %vm41_vm3, %v100_v7, 0.0  ;;  %10865 = vst [vmem:[#allocation158_spill] sm:$0xff] %v5928_v28  ;;  %v10870_v7 = vmov 48   ;;  %v176_v32 = vsel %vm168_vm6, %v5368_v38, 0.0  ;;  %v6006_v12 = vsel %vm10596_vm12, %v175_v20, 0.0 }
 0x1f1   :  { %10862 = vst [vmem:[#allocation155_spill] sm:$0xff] %v5916_v24  ;;  %10877 = vst [vmem:[#allocation169_spill] sm:$0xff] %v6006_v12  ;;  %v271_v40 = vmul.f32 %v5420_v58, %v5928_v28  ;;  %v287_v8 = vmul.f32 %v5426_v60, %v5928_v28 }
 0x1f3   :  { %v5891_v37 = vpop.permute.xlu0 %1207  ;;  %1961 = vperm.xlu1 %4901, %v5294_v11   ;;  %v5894_v18 = vpop.permute.xlu1 %958  ;;  %v144_v11 = vsel %vm143_vm2, %v5348_v31, %v5346_v30  ;;  %v5932_v30 = vsel %vm44_vm8, %v119_v16, 0.0  ;;  %v5936_v31 = vsel %vm43_vm4, %v126_v21, 0.0  ;;  %v151_v16 = vsel %vm143_vm2, 0.0, %v5354_v33 }
 0x1f4   :  { %10859 = vst [vmem:[#allocation152_spill] sm:$0xff] %v5891_v37  ;;  %10860 = vst [vmem:[#allocation153_spill] sm:$0xff] %v5894_v18  ;;  %v5951_v13 = vsel %vm46_vm11, %v144_v11, 0.0  ;;  %v169_v11 = vsel %vm168_vm6, %v5361_v36, %v5359_v35  ;;  %v170_v33 = vsel %vm168_vm6, %v5370_v39, %v5368_v38  ;;  %v219_v37 = vsel %vm10578_vm14, %v5392_v48, %v5390_v47 }
 0x1f5   :  { %10866 = vst [vmem:[#allocation159_spill] sm:$0xff] %v5932_v30  ;;  %10867 = vst [vmem:[#allocation160_spill] sm:$0xff] %v5936_v31  ;;  %v273_v35 = vmul.f32 %v5405_v52, %v5936_v31  ;;  %v247_v36 = vmul.f32 %v5407_v53, %v5908_v23  ;;  %v5991_v38 = vsel %vm45_vm5, %v151_v16, 0.0  ;;  %v220_v39 = vsel %vm10578_vm14, %v5400_v51, %v5398_v50 }
 0x1f6   :  { %10872 = vst [vmem:[#allocation164_spill] sm:$0xff] %v5951_v13  ;;  %10875 = vst [vmem:[#allocation167_spill] sm:$0xff] %v5991_v38  ;;  %v6002_v48 = vsel %vm46_vm11, %v145_v17, 0.0  ;;  %v6010_v16 = vsel %vm10598_vm9, %v169_v11, 0.0  ;;  %v6014_v51 = vsel %vm10596_vm12, %v176_v32, 0.0  ;;  %v6026_v20 = vsel %vm10598_vm9, %v170_v33, 0.0 }
 0x1f7   :  { %4904 = vset.pattern.permute.xlu1 %v10870_v7  ;;  %v5947_v10 = vpop.permute.xlu1 %970  ;;  %v194_v7 = vsel %vm10594_vm10, %v5377_v42, %v5375_v41  ;;  %v274_v42 = vmul.f32 %v5405_v52, %v5940_v19  ;;  %10876 = vst [vmem:[#allocation168_spill] sm:$0xff] %v6002_v48  ;;  %10878 = vst [vmem:[#allocation170_spill] sm:$0xff] %v6010_v16  ;;  %v6019_v52 = vld [vmem:[%s10197_s2] sm:$0xff]  ;;  %v6044_v49 = vsel %vm10442_vm15, %v220_v39, 0.0  ;;  %vm1751_vm12 = vcmask 785408  }
 0x1f8   :  { %10871 = vst [vmem:[#allocation163_spill] sm:$0xff] %v5947_v10  ;;  %v5960_v21 = vpop.permute.xlu0 %1223  ;;  %1977 = vperm.xlu1 %4904, %v5965_v22   ;;  %10879 = vst [vmem:[#allocation171_spill] sm:$0xff] %v6014_v51  ;;  %v6030_v11 = vsel %vm10581_vm13, %v194_v7, 0.0  ;;  %v277_v33 = vadd.f32 %v273_v35, %v247_v36  ;;  %v6060_v35 = vmul.f32 %v5414_v56, %v5920_v25  ;;  %vm2016_vm9 = vcmask 654336  }
 0x1f9   :  { %10873 = vst [vmem:[#allocation165_spill] sm:$0xff] %v5960_v21  ;;  %v195_v21 = vsel %vm10594_vm10, %v5384_v45, %v5382_v44  ;;  %v248_v45 = vmul.f32 %v5407_v53, %v5920_v25  ;;  %10881 = vst [vmem:[#allocation173_spill] sm:$0xff] %v6026_v20  ;;  %v6038_v53 = vsel %vm10442_vm15, %v219_v37, 0.0  ;;  %v260_v37 = vmul.f32 %v5411_v55, %v5924_v27  ;;  %v6111_v44 = vld [vmem:[%s10195_s0 + $0x10] sm:$0xff] }
 0x1fa   :  { %10882 = vst [vmem:[#allocation174_spill] sm:$0xff] %v6030_v11  ;;  %v6034_v32 = vsel %vm10581_vm13, %v195_v21, 0.0  ;;  %10883 = vst [vmem:[#allocation175_spill] sm:$0xff] %v6038_v53  ;;  %v259_v21 = vmul.f32 %v5411_v55, %v5916_v24  ;;  %v6064_v36 = vmul.f32 %v5420_v58, %v5932_v30  ;;  %v303_v39 = vmul.f32 %v5436_v0, %v5944_v9 }
 0x1fb   :  { %10885 = vst [vmem:[#allocation177_spill] sm:$0xff] %v6044_v49  ;;  %v278_v15 = vadd.f32 %v274_v42, %v248_v45  ;;  %v10887_v45 = vmov 21   ;;  %v536_v55 = vmul.f32 %v5422_v59, %v5928_v28  ;;  %v288_v56 = vmul.f32 %v5426_v60, %v5932_v30 }
 0x1fc   :  { %1989 = vperm.xlu1 %4904, %v6019_v52   ;;  %v6022_v17 = vpop.permute.xlu1 %1379  ;;  %10886 = vst [vmem:[#allocation178_spill] sm:$0xff] %v6064_v36  ;;  %v305_v58 = vmul.f32 %v5440_v2, %v5991_v38  ;;  %v537_v47 = vmul.f32 %v5422_v59, %v5932_v30  ;;  %v367_v59 = vmul.f32 %v5508_v57, %v6010_v16  ;;  %vm997_vm13 = vcmask 130048  }
 0x1fd   :  { %10880 = vst [vmem:[#allocation172_spill] sm:$0xff] %v6022_v17  ;;  %v6040_v26 = vpop.permute.xlu0 %237  ;;  %v6102_v17 = vmul.f32 %v5428_v61, %v5936_v31  ;;  %v321_v12 = vmul.f32 %v5443_v3, %v5991_v38  ;;  %v369_v18 = vmul.f32 %v5598_v43, %v6026_v20  ;;  %v6126_v6 = vadd.f32 %v288_v56, %v260_v37 }
 0x1fe   :  { %10884 = vst [vmem:[#allocation176_spill] sm:$0xff] %v6040_v26  ;;  %v245_v7 = vmul.f32 %v6040_v26, %v5916_v24  ;;  %v6106_v26 = vmul.f32 %v5428_v61, %v5940_v19  ;;  %v291_v61 = vadd.f32 %v287_v8, %v259_v21  ;;  %v309_v10 = vadd.f32 %v305_v58, %v277_v33 }
 0x1ff   :  { %v6134_v58 = vmul.f32 %v5432_v63, %v5940_v19  ;;  %v6144_v56 = vmul.f32 %v5443_v3, %v6002_v48  ;;  %v512_v21 = vmul.f32 %v5448_v4, %v5916_v24  ;;  %v353_v37 = vmul.f32 %v6111_v44, %v5557_v54  ;;  %v10899_v3 = vld [vmem:[#allocation65_spill] sm:$0xff] }
 0x200   :  { %v275_v42 = vadd.f32 %v271_v40, %v245_v7  ;;  %4905 = vset.pattern.permute.xlu1 %v10887_v45  ;;  %v6069_v5 = vpop.permute.xlu1 %1395  ;;  %v6084_v40 = vld [vmem:[%s10196_s1] sm:$0xff]  ;;  %v289_v7 = vmul.f32 %v5432_v63, %v5936_v31  ;;  %v383_v63 = vmul.f32 %v10899_v3, %v6010_v16  ;;  %v6184_v3 = vsel %vm10594_vm10, %v5375_v41, 0.0 }
 0x201   :  { %10888 = vst [vmem:[#allocation179_spill] sm:$0xff] %v6069_v5  ;;  %v6079_v50 = vpop.permute.xlu0 %256  ;;  %10890 = vst [vmem:[#allocation181_spill] sm:$0xff] %v6084_v40  ;;  %1035 = vperm.xlu1 %4905, %v6084_v40   ;;  %v6092_v45 = vld [vmem:[%s10195_s0] sm:$0xff] }
 0x202   :  { %10889 = vst [vmem:[#allocation180_spill] sm:$0xff] %v6079_v50  ;;  %v335_v60 = vmul.f32 %v6092_v45, %v5545_v46  ;;  %v307_v5 = vadd.f32 %v303_v39, %v275_v42  ;;  %v261_v36 = vmul.f32 %v6079_v50, %v5908_v23  ;;  %v337_v39 = vmul.f32 %v6111_v44, %v5479_v29 }
 0x203   :  { %v306_v42 = vmul.f32 %v5440_v2, %v6002_v48  ;;  %v319_v2 = vmul.f32 %v5482_v34, %v5944_v9  ;;  %10892 = vst [vmem:[#allocation183_spill] sm:$0xff] %v6134_v58  ;;  %10894 = vst [vmem:[#allocation185_spill] sm:$0xff] %v6144_v56  ;;  %v540_v58 = vadd.f32 %v536_v55, %v512_v21  ;;  %v10905_v55 = vmov 22  }
 0x204   :  { %v293_v50 = vadd.f32 %v289_v7, %v261_v36  ;;  %v6119_v46 = vpop.permute.xlu1 %1399  ;;  %v339_v51 = vadd.f32 %v335_v60, %v307_v5  ;;  %v399_v36 = vmul.f32 %v5682_v14, %v6030_v11  ;;  %v6138_v60 = vmul.f32 %v5436_v0, %v5951_v13  ;;  %10903 = vst [vmem:[#allocation187_spill] sm:$0xff] %v6184_v3 }
 0x205   :  { %10891 = vst [vmem:[#allocation182_spill] sm:$0xff] %v6119_v46  ;;  %1047 = vperm.xlu1 %4905, %v6019_v52   ;;  %v341_v5 = vadd.f32 %v337_v39, %v309_v10  ;;  %v6140_v33 = vadd.f32 %v306_v42, %v278_v15  ;;  %v10895_v10 = vld [vmem:[#allocation116_spill] sm:$0xff]  ;;  %v6157_v15 = vld [vmem:[%s10197_s2 + $0x8] sm:$0xff]  ;;  %v513_v39 = vmul.f32 %v5448_v4, %v5924_v27  ;;  %s5184_s2 = smov 48  }
 0x206   :  { %v371_v7 = vadd.f32 %v367_v59, %v339_v51  ;;  %10893 = vst [vmem:[#allocation184_spill] sm:$0xff] %v6138_v60  ;;  %v325_v8 = vadd.f32 %v321_v12, %v293_v50  ;;  %v351_v51 = vmul.f32 %v6092_v45, %v5550_v62  ;;  %v431_v50 = vmul.f32 %v10895_v10, %v6038_v53  ;;  %v10900_v10 = vld [vmem:[#allocation72_spill] sm:$0xff]  ;;  %v10908_v60 = vld [vmem:[#allocation31_spill] sm:$0xff] }
 0x207   :  { %v373_v0 = vadd.f32 %v369_v18, %v341_v5  ;;  %v323_v42 = vadd.f32 %v319_v2, %v291_v61  ;;  %v10898_v18 = vld [vmem:[#allocation54_spill] sm:$0xff]  ;;  %v433_v56 = vmul.f32 %v10900_v10, %v6044_v49  ;;  %v10902_v2 = vld [vmem:[#allocation39_spill] sm:$0xff]  ;;  %v600_v41 = vmul.f32 %v6092_v45, %v10908_v60 }
 0x208   :  { %v403_v59 = vadd.f32 %v399_v36, %v371_v7  ;;  %v10897_v36 = vld [vmem:[#allocation32_spill] sm:$0xff]  ;;  %v401_v5 = vmul.f32 %v10898_v18, %v6034_v32  ;;  %v357_v43 = vadd.f32 %v353_v37, %v325_v8  ;;  %v385_v4 = vmul.f32 %v10902_v2, %v6026_v20 }
 0x209   :  { %1051 = vperm.xlu1 %4905, %v6157_v15   ;;  %v6160_v12 = vpop.permute.xlu1 %1616  ;;  %v568_v7 = vmul.f32 %v10897_v36, %v5944_v9  ;;  %v355_v18 = vadd.f32 %v351_v51, %v323_v42  ;;  %v10916_v2 = vld [vmem:[#allocation28_spill] sm:$0xff] }
 0x20a   :  { %10896 = vst [vmem:[#allocation186_spill] sm:$0xff] %v6160_v12  ;;  %v435_v14 = vadd.f32 %v431_v50, %v403_v59  ;;  %v10901_v12 = vld [vmem:[#allocation21_spill] sm:$0xff]  ;;  %v10904_v59 = vld [vmem:[#allocation88_spill] sm:$0xff]  ;;  %v405_v37 = vadd.f32 %v401_v5, %v373_v0  ;;  %v6192_v50 = vadd.f32 %v537_v47, %v513_v39  ;;  %v552_v3 = vmul.f32 %v10916_v2, %v5928_v28 }
 0x20b   :  { %v6174_v46 = vmul.f32 %v10901_v12, %v5944_v9  ;;  %v6178_v61 = vmul.f32 %v10901_v12, %v5951_v13  ;;  %v415_v8 = vmul.f32 %v10904_v59, %v6030_v11  ;;  %v10907_v12 = vld [vmem:[#allocation26_spill] sm:$0xff]  ;;  %v572_v51 = vadd.f32 %v568_v7, %v540_v58  ;;  %v10909_v59 = vld [vmem:[#allocation117_spill] sm:$0xff]  ;;  %v10911_v39 = vld [vmem:[#allocation24_spill] sm:$0xff] }
 0x20c   :  { %459 = vrot.lane.b32.xlu0 %v435_v14, %s5184_s2  ;;  %v538_v10 = vmul.f32 %v10907_v12, %v5936_v31  ;;  %v387_v42 = vadd.f32 %v383_v63, %v355_v18  ;;  %v447_v14 = vmul.f32 %v10909_v59, %v6038_v53  ;;  %v437_v54 = vadd.f32 %v433_v56, %v405_v37  ;;  %v10912_v7 = vld [vmem:[#allocation34_spill] sm:$0xff]  ;;  %v10913_v18 = vld [vmem:[#allocation67_spill] sm:$0xff] }
 0x20d   :  { %4908 = vset.pattern.permute.xlu1 %v10905_v55  ;;  %v6190_v21 = vpop.permute.xlu1 %1628  ;;  %v389_v55 = vadd.f32 %v385_v4, %v357_v43  ;;  %v526_v5 = vmul.f32 %v10911_v39, %v5908_v23  ;;  %v527_v58 = vmul.f32 %v10911_v39, %v5920_v25  ;;  %v570_v63 = vmul.f32 %v10912_v7, %v5991_v38  ;;  %v10914_v4 = vld [vmem:[#allocation90_spill] sm:$0xff]  ;;  %v10915_v37 = vld [vmem:[#allocation23_spill] sm:$0xff] }
 0x20e   :  { %10906 = vst [vmem:[#allocation188_spill] sm:$0xff] %v6190_v21  ;;  %1063 = vperm.xlu1 %4908, %v5965_v22   ;;  %v10910_v21 = vld [vmem:[#allocation22_spill] sm:$0xff]  ;;  %v632_v59 = vmul.f32 %v10913_v18, %v6010_v16  ;;  %v417_v43 = vmul.f32 %v10914_v4, %v6034_v32  ;;  %v419_v56 = vadd.f32 %v415_v8, %v387_v42  ;;  %v10918_v4 = vld [vmem:[#allocation53_spill] sm:$0xff] }
 0x20f   :  { %v524_v0 = vmul.f32 %v10910_v21, %v5916_v24  ;;  %v525_v47 = vmul.f32 %v10910_v21, %v5924_v27  ;;  %v6218_v21 = vmul.f32 %v10915_v37, %v5908_v23  ;;  %v539_v62 = vmul.f32 %v10907_v12, %v5940_v19 }
 0x210   :  { %463 = vrot.lane.b32.xlu0 %v437_v54, %s5184_s2  ;;  %v542_v39 = vadd.f32 %v538_v10, %v6056_v1  ;;  %v602_v54 = vmul.f32 %v6111_v44, %v10918_v4  ;;  %v604_v8 = vadd.f32 %v600_v41, %v572_v51  ;;  %v451_v42 = vadd.f32 %v447_v14, %v419_v56  ;;  %v10921_v41 = vld [vmem:[#allocation119_spill] sm:$0xff]  ;;  %v10926_v56 = vld [vmem:[#allocation74_spill] sm:$0xff] }
 0x211   :  { %v421_v57 = vadd.f32 %v417_v43, %v389_v55  ;;  %v6232_v27 = vmul.f32 %v10915_v37, %v5920_v25  ;;  %v558_v12 = vadd.f32 %v6102_v17, %v526_v5  ;;  %v6236_v1 = vadd.f32 %v6106_v26, %v527_v58  ;;  %v10922_v55 = vld [vmem:[#allocation36_spill] sm:$0xff]  ;;  %v10936_v25 = vld [vmem:[#allocation121_spill] sm:$0xff] }
 0x212   :  { %1075 = vperm.xlu1 %4908, %v6019_v52   ;;  %v6226_v18 = vpop.permute.xlu1 %1845  ;;  %v553_v10 = vmul.f32 %v10916_v2, %v5932_v30  ;;  %v574_v23 = vadd.f32 %v570_v63, %v542_v39  ;;  %v636_v4 = vadd.f32 %v632_v59, %v604_v8  ;;  %v449_v51 = vmul.f32 %v10921_v41, %v6044_v49  ;;  %v10925_v63 = vld [vmem:[#allocation56_spill] sm:$0xff] }
 0x213   :  { %10917 = vst [vmem:[#allocation189_spill] sm:$0xff] %v6226_v18  ;;  %10919 = vst [vmem:[#allocation190_spill] sm:$0xff] %v6232_v27  ;;  %v10920_v18 = vld [vmem:[#allocation25_spill] sm:$0xff]  ;;  %v6250_v26 = vadd.f32 %v539_v62, %v6060_v35  ;;  %v556_v17 = vadd.f32 %v552_v3, %v524_v0  ;;  %v586_v5 = vmul.f32 %v10922_v55, %v5991_v38  ;;  %v10923_v58 = vmov 23   ;;  %v10927_v62 = vld [vmem:[#allocation27_spill] sm:$0xff] }
 0x214   :  { %v801_v22 = vmul.f32 %v10920_v18, %v5928_v28  ;;  %484 = vrot.lane.b32.xlu0 %v451_v42, %s5184_s2  ;;  %v6247_v14 = vmul.f32 %v10920_v18, %v5932_v30  ;;  %v606_v59 = vadd.f32 %v602_v54, %v574_v23  ;;  %v664_v43 = vmul.f32 %v10925_v63, %v6030_v11  ;;  %v6269_v0 = vld [vmem:[%s10195_s0 + $0x18] sm:$0xff]  ;;  %v10928_v54 = vld [vmem:[#allocation38_spill] sm:$0xff]  ;;  %v10933_v63 = vld [vmem:[#allocation57_spill] sm:$0xff] }
 0x215   :  { %v696_v8 = vmul.f32 %v10926_v56, %v6038_v53  ;;  %v453_v42 = vadd.f32 %v449_v51, %v421_v57  ;;  %v6264_v3 = vmul.f32 %v10927_v62, %v5936_v31  ;;  %v557_v35 = vadd.f32 %v553_v10, %v525_v47  ;;  %v10929_v18 = vld [vmem:[#allocation42_spill] sm:$0xff]  ;;  %v10930_v57 = vld [vmem:[#allocation55_spill] sm:$0xff]  ;;  %v10931_v2 = vld [vmem:[#allocation92_spill] sm:$0xff] }
 0x216   :  { %4909 = vset.pattern.permute.xlu1 %v10923_v58  ;;  %v6255_v39 = vpop.permute.xlu1 %1861  ;;  %v338_v23 = vmul.f32 %v6269_v0, %v5479_v29  ;;  %v777_v58 = vmul.f32 %v10928_v54, %v5916_v24  ;;  %v634_v37 = vmul.f32 %v10929_v18, %v6026_v20  ;;  %v616_v51 = vmul.f32 %v6092_v45, %v10930_v57  ;;  %v10935_v18 = vld [vmem:[#allocation69_spill] sm:$0xff] }
 0x217   :  { %10924 = vst [vmem:[#allocation191_spill] sm:$0xff] %v6255_v39  ;;  %1091 = vperm.xlu1 %4909, %v6084_v40   ;;  %v666_v47 = vmul.f32 %v10931_v2, %v6034_v32  ;;  %v668_v10 = vadd.f32 %v664_v43, %v636_v4  ;;  %v10932_v39 = vld [vmem:[#allocation33_spill] sm:$0xff]  ;;  %v590_v56 = vadd.f32 %v586_v5, %v558_v12  ;;  %v10937_v5 = vld [vmem:[#allocation43_spill] sm:$0xff] }
 0x218   :  { %488 = vrot.lane.b32.xlu0 %v453_v42, %s5184_s2  ;;  %v618_v41 = vmul.f32 %v6111_v44, %v10932_v39  ;;  %v588_v29 = vadd.f32 %v6174_v46, %v556_v17  ;;  %v833_v30 = vmul.f32 %v10933_v63, %v5944_v9  ;;  %v648_v57 = vmul.f32 %v10935_v18, %v6010_v16  ;;  %v10938_v18 = vld [vmem:[#allocation71_spill] sm:$0xff] }
 0x219   :  { %v698_v2 = vmul.f32 %v10936_v25, %v6044_v49  ;;  %v700_v4 = vadd.f32 %v696_v8, %v668_v10  ;;  %v638_v43 = vadd.f32 %v634_v37, %v606_v59  ;;  %v6296_v12 = vmul.f32 %v10927_v62, %v5940_v19  ;;  %v10939_v25 = vld [vmem:[#allocation94_spill] sm:$0xff]  ;;  %v10941_v8 = vld [vmem:[#allocation44_spill] sm:$0xff]  ;;  %v10943_v62 = vld [vmem:[#allocation123_spill] sm:$0xff] }
 0x21a   :  { %v6287_v27 = vpop.permute.xlu1 %1865  ;;  %v569_v46 = vmul.f32 %v10897_v36, %v5951_v13  ;;  %v805_v17 = vadd.f32 %v801_v22, %v777_v58  ;;  %v803_v42 = vmul.f32 %v10937_v5, %v5936_v31  ;;  %v650_v63 = vmul.f32 %v10938_v18, %v6026_v20  ;;  %v10958_v18 = vld [vmem:[#allocation166_spill] sm:$0xff] }
 0x21b   :  { %10934 = vst [vmem:[#allocation192_spill] sm:$0xff] %v6287_v27  ;;  %1107 = vperm.xlu1 %4909, %v6019_v52   ;;  %v620_v27 = vadd.f32 %v616_v51, %v588_v29  ;;  %v680_v40 = vmul.f32 %v10939_v25, %v6030_v11  ;;  %v670_v37 = vadd.f32 %v666_v47, %v638_v43  ;;  %v10948_v43 = vld [vmem:[#allocation35_spill] sm:$0xff] }
 0x21c   :  { %724 = vrot.lane.b32.xlu0 %v700_v4, %s5185_s19  ;;  %v6308_v59 = vadd.f32 %v338_v23, %v6140_v33  ;;  %v865_v22 = vmul.f32 %v6092_v45, %v10941_v8  ;;  %v6313_v58 = vadd.f32 %v6178_v61, %v557_v35  ;;  %v837_v29 = vadd.f32 %v833_v30, %v805_v17  ;;  %v6325_v23 = vld [vmem:[%s10195_s0 + $0x8] sm:$0xff]  ;;  %v10947_v4 = vld [vmem:[#allocation149_spill] sm:$0xff] }
 0x21d   :  { %v652_v51 = vadd.f32 %v648_v57, %v620_v27  ;;  %v622_v10 = vadd.f32 %v618_v41, %v590_v56  ;;  %v712_v36 = vmul.f32 %v10943_v62, %v6038_v53  ;;  %v702_v47 = vadd.f32 %v698_v2, %v670_v37  ;;  %10945 = vst [vmem:[#allocation196_spill] sm:$0xff] %v6325_v23  ;;  %v10946_v2 = vld [vmem:[#allocation96_spill] sm:$0xff] }
 0x21e   :  { %10940 = vst [vmem:[#allocation193_spill] sm:$0xff] %v6308_v59  ;;  %10942 = vst [vmem:[#allocation194_spill] sm:$0xff] %v6313_v58  ;;  %v320_v33 = vmul.f32 %v5482_v34, %v5951_v13  ;;  %v601_v27 = vmul.f32 %v6325_v23, %v10908_v60  ;;  %v573_v30 = vadd.f32 %v569_v46, %v6192_v50  ;;  %vm10463_vm15 = vcmp.lt.f32.partialorder %v10947_v4, 14.0  ;;  %v10949_v46 = vld [vmem:[#allocation58_spill] sm:$0xff]  ;;  %v10962_v58 = vld [vmem:[#allocation61_spill] sm:$0xff] }
 0x21f   :  { %1111 = vperm.xlu1 %4909, %v6157_v15   ;;  %v6318_v25 = vpop.permute.xlu1 %1415  ;;  %v571_v61 = vmul.f32 %v10912_v7, %v6002_v48  ;;  %v807_v41 = vadd.f32 %v803_v42, %v6218_v21  ;;  %v654_v56 = vadd.f32 %v650_v63, %v622_v10  ;;  %v897_v35 = vmul.f32 %v10946_v2, %v6010_v16  ;;  %v10950_v21 = vld [vmem:[#allocation73_spill] sm:$0xff]  ;;  %v10951_v42 = vld [vmem:[#allocation76_spill] sm:$0xff] }
 0x220   :  { %10944 = vst [vmem:[#allocation195_spill] sm:$0xff] %v6318_v25  ;;  %728 = vrot.lane.b32.xlu0 %v702_v47, %s5185_s19  ;;  %v684_v57 = vadd.f32 %v680_v40, %v652_v51  ;;  %v835_v17 = vmul.f32 %v10948_v43, %v5991_v38  ;;  %v587_v50 = vmul.f32 %v10922_v55, %v6002_v48  ;;  %v10952_v40 = vld [vmem:[#allocation125_spill] sm:$0xff]  ;;  %v10953_v47 = vmov 24  }
 0x221   :  { %v682_v37 = vmul.f32 %v10949_v46, %v6034_v32  ;;  %v869_v7 = vadd.f32 %v865_v22, %v837_v29  ;;  %v867_v63 = vmul.f32 %v6111_v44, %v10950_v21  ;;  %v714_v10 = vmul.f32 %v10951_v42, %v6044_v49  ;;  %v10955_v29 = vld [vmem:[#allocation154_spill] sm:$0xff]  ;;  %v10956_v2 = vld [vmem:[#allocation41_spill] sm:$0xff] }
 0x222   :  { %v929_v51 = vmul.f32 %v10952_v40, %v6030_v11  ;;  %v716_v60 = vadd.f32 %v712_v36, %v684_v57  ;;  %v6353_v55 = vadd.f32 %v320_v33, %v6126_v6  ;;  %v619_v22 = vmul.f32 %v6269_v0, %v10932_v39  ;;  %v10957_v21 = vld [vmem:[#allocation45_spill] sm:$0xff]  ;;  %v10960_v33 = vld [vmem:[#allocation40_spill] sm:$0xff]  ;;  %v10961_v39 = vld [vmem:[#allocation59_spill] sm:$0xff] }
 0x223   :  { %4912 = vset.pattern.permute.xlu1 %v10953_v47  ;;  %v6350_v34 = vpop.permute.xlu1 %1427  ;;  %v791_v62 = vmul.f32 %v10956_v2, %v10955_v29  ;;  %v817_v42 = vmul.f32 %v10957_v21, %v5928_v28  ;;  %v6362_v40 = vadd.f32 %v601_v27, %v573_v30  ;;  %v839_v47 = vadd.f32 %v835_v17, %v807_v41 }
 0x224   :  { %10954 = vst [vmem:[#allocation197_spill] sm:$0xff] %v6350_v34  ;;  %1127 = vperm.xlu1 %4912, %v10958_v18   ;;  %v901_v46 = vadd.f32 %v897_v35, %v869_v7  ;;  %749 = vrot.lane.b32.xlu0 %v716_v60, %s5185_s19  ;;  %v686_v36 = vadd.f32 %v682_v37, %v654_v56  ;;  %v10963_v35 = vld [vmem:[#allocation157_spill] sm:$0xff]  ;;  %v10964_v56 = vld [vmem:[#allocation75_spill] sm:$0xff] }
 0x225   :  { %10959 = vst [vmem:[#allocation166_spill] sm:$0xff] %v6362_v40  ;;  %v6366_v6 = vadd.f32 %v571_v61, %v6250_v26  ;;  %v789_v57 = vmul.f32 %v10960_v33, %v5916_v24  ;;  %v849_v59 = vmul.f32 %v10961_v39, %v5944_v9  ;;  %v851_v34 = vmul.f32 %v10962_v58, %v5991_v38  ;;  %v10972_v58 = vld [vmem:[#allocation169_spill] sm:$0xff] }
 0x226   :  { %v591_v27 = vadd.f32 %v587_v50, %v6236_v1  ;;  %v871_v30 = vadd.f32 %v867_v63, %v839_v47  ;;  %v718_v41 = vadd.f32 %v714_v10, %v686_v36  ;;  %v933_v7 = vadd.f32 %v929_v51, %v901_v46  ;;  %v10966_v1 = vld [vmem:[#allocation60_spill] sm:$0xff]  ;;  %v10967_v46 = vld [vmem:[#allocation78_spill] sm:$0xff]  ;;  %v10968_v10 = vld [vmem:[#allocation93_spill] sm:$0xff] }
 0x227   :  { %v778_v60 = vmul.f32 %v10928_v54, %v10963_v35  ;;  %v823_v26 = vadd.f32 %v6264_v3, %v791_v62  ;;  %v821_v61 = vadd.f32 %v817_v42, %v789_v57  ;;  %v881_v17 = vmul.f32 %v6092_v45, %v10964_v56  ;;  %v10969_v42 = vld [vmem:[#allocation46_spill] sm:$0xff]  ;;  %v10971_v54 = vld [vmem:[#allocation153_spill] sm:$0xff] }
 0x228   :  { %1139 = vperm.xlu1 %4912, %v6019_v52   ;;  %v6381_v37 = vpop.permute.xlu1 %1644  ;;  %v836_v40 = vmul.f32 %v10948_v43, %v6002_v48  ;;  %v899_v50 = vmul.f32 %v10966_v1, %v6026_v20  ;;  %v931_v63 = vmul.f32 %v10967_v46, %v6034_v32  ;;  %v961_v62 = vmul.f32 %v10968_v10, %v6038_v53  ;;  %v10970_v57 = vld [vmem:[#allocation98_spill] sm:$0xff]  ;;  %v10973_v10 = vld [vmem:[#allocation37_spill] sm:$0xff] }
 0x229   :  { %10965 = vst [vmem:[#allocation198_spill] sm:$0xff] %v6381_v37  ;;  %753 = vrot.lane.b32.xlu0 %v718_v41, %s5185_s19  ;;  %v804_v3 = vmul.f32 %v10937_v5, %v5940_v19  ;;  %v883_v51 = vmul.f32 %v6111_v44, %v10969_v42  ;;  %v853_v47 = vadd.f32 %v849_v59, %v821_v61  ;;  %v10975_v59 = vmov 25  }
 0x22a   :  { %v855_v36 = vadd.f32 %v851_v34, %v823_v26  ;;  %v913_v43 = vmul.f32 %v10970_v57, %v6010_v16  ;;  %v963_v56 = vmul.f32 %v10971_v54, %v6044_v49  ;;  %v965_v46 = vadd.f32 %v961_v62, %v933_v7  ;;  %v10977_v26 = vld [vmem:[#allocation187_spill] sm:$0xff] }
 0x22b   :  { %v903_v1 = vadd.f32 %v899_v50, %v871_v30  ;;  %v6402_v48 = vmul.f32 %v10973_v10, %v10972_v58  ;;  %v6405_v41 = vadd.f32 %v6247_v14, %v778_v60  ;;  %v6407_v5 = vadd.f32 %v619_v22, %v591_v27  ;;  %v10978_v30 = vld [vmem:[#allocation100_spill] sm:$0xff]  ;;  %v10979_v50 = vld [vmem:[#allocation127_spill] sm:$0xff]  ;;  %v10980_v14 = vld [vmem:[#allocation181_spill] sm:$0xff] }
 0x22c   :  { %v885_v39 = vadd.f32 %v881_v17, %v853_v47  ;;  %4913 = vset.pattern.permute.xlu1 %v10975_v59  ;;  %v6410_v34 = vpop.permute.xlu1 %1660  ;;  %v6415_v61 = vsel %vm10463_vm15, %v10977_v26, 0.0  ;;  %v915_v7 = vmul.f32 %v10978_v30, %v6026_v20  ;;  %v945_v62 = vmul.f32 %v10979_v50, %v6030_v11  ;;  %v10981_v27 = vld [vmem:[#allocation156_spill] sm:$0xff]  ;;  %v10982_v17 = vld [vmem:[#allocation190_spill] sm:$0xff]  ;;  %v10983_v59 = vld [vmem:[#allocation77_spill] sm:$0xff] }
 0x22d   :  { %10974 = vst [vmem:[#allocation199_spill] sm:$0xff] %v6407_v5  ;;  %10976 = vst [vmem:[#allocation200_spill] sm:$0xff] %v6410_v34  ;;  %989 = vrot.lane.b32.xlu0 %v965_v46, %s5186_s22  ;;  %1155 = vperm.xlu1 %4913, %v10980_v14   ;;  %v935_v22 = vadd.f32 %v931_v63, %v903_v1  ;;  %v792_v60 = vmul.f32 %v10956_v2, %v10981_v27  ;;  %v10984_v30 = vld [vmem:[#allocation129_spill] sm:$0xff]  ;;  %v10985_v50 = vld [vmem:[#allocation163_spill] sm:$0xff] }
 0x22e   :  { %v808_v47 = vadd.f32 %v804_v3, %v10982_v17  ;;  %v1266_v26 = vmul.f32 %v10983_v59, %v5916_v24  ;;  %v887_v10 = vadd.f32 %v883_v51, %v855_v36  ;;  %v917_v54 = vadd.f32 %v913_v43, %v885_v39  ;;  %v10986_v5 = vld [vmem:[#allocation171_spill] sm:$0xff]  ;;  %v10990_v51 = vld [vmem:[#allocation50_spill] sm:$0xff]  ;;  %v10992_v36 = vld [vmem:[#allocation5_spill] sm:$0xff] }
 0x22f   :  { %v947_v57 = vmul.f32 %v10984_v30, %v6034_v32  ;;  %v977_v34 = vmul.f32 %v10985_v50, %v6038_v53  ;;  %v967_v46 = vadd.f32 %v963_v56, %v935_v22  ;;  %v10987_v58 = vld [vmem:[#allocation39_spill] sm:$0xff]  ;;  %v790_v63 = vmul.f32 %v10960_v33, %v10963_v35  ;;  %v10993_v56 = vld [vmem:[#allocation42_spill] sm:$0xff]  ;;  %v10999_v59 = vld [vmem:[#allocation81_spill] sm:$0xff] }
 0x230   :  { %v6434_v1 = vmul.f32 %v10987_v58, %v10986_v5  ;;  %v10989_v3 = vld [vmem:[#allocation159_spill] sm:$0xff]  ;;  %v1290_v39 = vmul.f32 %v10990_v51, %v5928_v28  ;;  %v6442_v43 = vpop.permute.xlu1 %1664  ;;  %v201_v2 = vsel %vm10594_vm10, %v10992_v36, 0.0  ;;  %v6448_v22 = vmul.f32 %v10993_v56, %v10986_v5 }
 0x231   :  { %v818_v17 = vmul.f32 %v10957_v21, %v10989_v3  ;;  %10991 = vst [vmem:[#allocation181_spill] sm:$0xff] %v6442_v43  ;;  %v919_v58 = vadd.f32 %v915_v7, %v887_v10  ;;  %993 = vrot.lane.b32.xlu0 %v967_v46, %s5186_s22  ;;  %1171 = vperm.xlu1 %4913, %v6019_v52   ;;  %v10996_v10 = vld [vmem:[#allocation83_spill] sm:$0xff]  ;;  %vm1486_vm10 = vcmask 916480  }
 0x232   :  { %10988 = vst [vmem:[#allocation187_spill] sm:$0xff] %v6434_v1  ;;  %v949_v33 = vadd.f32 %v945_v62, %v917_v54  ;;  %v6453_v21 = vadd.f32 %v6296_v12, %v792_v60  ;;  %v6457_v50 = vmul.f32 %v6325_v23, %v10941_v8  ;;  %v6461_v36 = vmul.f32 %v6269_v0, %v10969_v42  ;;  %v10997_v12 = vld [vmem:[#allocation47_spill] sm:$0xff]  ;;  %v10998_v60 = vld [vmem:[#allocation62_spill] sm:$0xff] }
 0x233   :  { %v1294_v30 = vadd.f32 %v1290_v39, %v1266_v26  ;;  %v6463_v56 = vadd.f32 %v836_v40, %v808_v47  ;;  %v1292_v7 = vmul.f32 %v10996_v10, %v5936_v31  ;;  %v951_v43 = vadd.f32 %v947_v57, %v919_v58  ;;  %v11001_v47 = vld [vmem:[#allocation95_spill] sm:$0xff]  ;;  %v11002_v58 = vld [vmem:[#allocation102_spill] sm:$0xff]  ;;  %v11003_v57 = vld [vmem:[#allocation176_spill] sm:$0xff] }
 0x234   :  { %10994 = vst [vmem:[#allocation190_spill] sm:$0xff] %v6461_v36  ;;  %v981_v46 = vadd.f32 %v977_v34, %v949_v33  ;;  %v6467_v54 = vadd.f32 %v818_v17, %v790_v63  ;;  %v1268_v62 = vmul.f32 %v10997_v12, %v10955_v29  ;;  %v1322_v8 = vmul.f32 %v10998_v60, %v5944_v9  ;;  %v11005_v17 = vld [vmem:[#allocation49_spill] sm:$0xff]  ;;  %v11008_v36 = vld [vmem:[#allocation131_spill] sm:$0xff] }
 0x235   :  { %10995 = vst [vmem:[#allocation5_spill] sm:$0xff] %v6463_v56  ;;  %v1354_v42 = vmul.f32 %v6092_v45, %v10999_v59  ;;  %v6477_v40 = vsel %vm10463_vm15, %v201_v2, 0.0  ;;  %v979_v26 = vmul.f32 %v11001_v47, %v6044_v49  ;;  %v1324_v33 = vmul.f32 %v11002_v58, %v5991_v38  ;;  %1175 = vperm.xlu1 %4913, %v6157_v15   ;;  %v6487_v63 = vpop.permute.xlu1 %1881  ;;  %v11006_v2 = vld [vmem:[#allocation53_spill] sm:$0xff]  ;;  %v11007_v47 = vld [vmem:[#allocation80_spill] sm:$0xff] }
 0x236   :  { %11000 = vst [vmem:[#allocation201_spill] sm:$0xff] %v6477_v40  ;;  %v246_v34 = vmul.f32 %v11003_v57, %v10963_v35  ;;  %1014 = vrot.lane.b32.xlu0 %v981_v46, %s5186_s22  ;;  %11004 = vst [vmem:[#allocation202_spill] sm:$0xff] %v6487_v63  ;;  %v352_v39 = vmul.f32 %v6325_v23, %v11005_v17  ;;  %v603_v10 = vmul.f32 %v6269_v0, %v11006_v2  ;;  %v11009_v46 = vld [vmem:[#allocation172_spill] sm:$0xff] }
 0x237   :  { %v1280_v59 = vmul.f32 %v11007_v47, %v10955_v29  ;;  %v1326_v56 = vadd.f32 %v1322_v8, %v1294_v30  ;;  %v1296_v58 = vadd.f32 %v1292_v7, %v1268_v62  ;;  %v1356_v57 = vmul.f32 %v6111_v44, %v11008_v36  ;;  %v11011_v63 = vld [vmem:[#allocation48_spill] sm:$0xff]  ;;  %v11014_v62 = vld [vmem:[#allocation6_spill] sm:$0xff] }
 0x238   :  { %v1386_v35 = vmul.f32 %v11009_v46, %v6010_v16  ;;  %v983_v1 = vadd.f32 %v979_v26, %v951_v43  ;;  %vm10571_vm15 = vcmp.lt.f32.partialorder %v10947_v4, 13.0  ;;  %v6502_v17 = vmul.f32 %v10997_v12, %v10981_v27  ;;  %v11013_v30 = vld [vmem:[#allocation52_spill] sm:$0xff]  ;;  %v11015_v36 = vld [vmem:[#allocation178_spill] sm:$0xff] }
 0x239   :  { %v336_v2 = vmul.f32 %v6325_v23, %v11011_v63  ;;  %v6508_v8 = vmul.f32 %v10990_v51, %v10989_v3  ;;  %v1308_v7 = vmul.f32 %v11013_v30, %v5936_v31  ;;  %v225_v46 = vsel %vm10578_vm14, %v11014_v62, 0.0  ;;  %v11018_v51 = vld [vmem:[#allocation51_spill] sm:$0xff]  ;;  %v11019_v62 = vld [vmem:[#allocation84_spill] sm:$0xff] }
 0x23a   :  { %11010 = vst [vmem:[#allocation203_spill] sm:$0xff] %v6502_v17  ;;  %v1358_v43 = vadd.f32 %v1354_v42, %v1326_v56  ;;  %v1328_v26 = vadd.f32 %v1324_v33, %v1296_v58  ;;  %v276_v47 = vadd.f32 %v11015_v36, %v246_v34  ;;  %1018 = vrot.lane.b32.xlu0 %v983_v1, %s5186_s22  ;;  %v11016_v12 = vmov 26   ;;  %v6517_v17 = vpop.permute.xlu1 %1893  ;;  %v11022_v33 = vld [vmem:[#allocation79_spill] sm:$0xff] }
 0x23b   :  { %11012 = vst [vmem:[#allocation204_spill] sm:$0xff] %v6508_v8  ;;  %4916 = vset.pattern.permute.xlu1 %v11016_v12  ;;  %11017 = vst [vmem:[#allocation6_spill] sm:$0xff] %v6517_v17  ;;  %v6520_v63 = vadd.f32 %v352_v39, %v6353_v55  ;;  %v6524_v8 = vmul.f32 %v6269_v0, %v11018_v51  ;;  %v1312_v3 = vadd.f32 %v1308_v7, %v1280_v59  ;;  %v11021_v55 = vld [vmem:[#allocation64_spill] sm:$0xff]  ;;  %v11023_v59 = vld [vmem:[#allocation97_spill] sm:$0xff] }
 0x23c   :  { %v1306_v42 = vmul.f32 %v11019_v62, %v5928_v28  ;;  %1191 = vperm.xlu1 %4916, %v10958_v18   ;;  %v6531_v1 = vmul.f32 %v11013_v30, %v5940_v19  ;;  %v607_v56 = vadd.f32 %v603_v10, %v6366_v6  ;;  %v1360_v36 = vadd.f32 %v1356_v57, %v1328_v26  ;;  %v11024_v7 = vld [vmem:[#allocation104_spill] sm:$0xff]  ;;  %v11025_v51 = vld [vmem:[#allocation105_spill] sm:$0xff]  ;;  %v11026_v17 = vld [vmem:[#allocation106_spill] sm:$0xff] }
 0x23d   :  { %v1390_v12 = vadd.f32 %v1386_v35, %v1358_v43  ;;  %v1340_v58 = vmul.f32 %v11021_v55, %v5991_v38  ;;  %v1278_v34 = vmul.f32 %v11022_v33, %v5916_v24  ;;  %v1388_v39 = vmul.f32 %v11023_v59, %v6026_v20  ;;  %v11027_v10 = vld [vmem:[#allocation184_spill] sm:$0xff]  ;;  %v11029_v59 = vld [vmem:[#allocation133_spill] sm:$0xff] }
 0x23e   :  { %11020 = vst [vmem:[#allocation178_spill] sm:$0xff] %v6531_v1  ;;  %v1338_v18 = vmul.f32 %v11024_v7, %v5944_v9  ;;  %v1418_v30 = vmul.f32 %v11025_v51, %v6030_v11  ;;  %v1531_v6 = vmul.f32 %v11026_v17, %v5916_v24  ;;  %v308_v35 = vadd.f32 %v11027_v10, %v276_v47  ;;  %v11028_v43 = vld [vmem:[#allocation68_spill] sm:$0xff]  ;;  %v6554_v7 = vpop.permute.xlu1 %1443  ;;  %v11031_v51 = vld [vmem:[#allocation135_spill] sm:$0xff]  ;;  %v11032_v24 = vld [vmem:[#allocation82_spill] sm:$0xff] }
 0x23f   :  { %v1420_v57 = vmul.f32 %v6318_v25, %v6034_v32  ;;  %v1555_v26 = vmul.f32 %v11028_v43, %v5928_v28  ;;  %v1344_v62 = vadd.f32 %v1340_v58, %v1312_v3  ;;  %v1310_v19 = vadd.f32 %v1306_v42, %v1278_v34  ;;  %11030 = vst [vmem:[#allocation184_spill] sm:$0xff] %v6554_v7  ;;  %v11033_v42 = vld [vmem:[#allocation179_spill] sm:$0xff]  ;;  %v11034_v34 = vld [vmem:[#allocation180_spill] sm:$0xff] }
 0x240   :  { %v1370_v1 = vmul.f32 %v6092_v45, %v11029_v59  ;;  %1203 = vperm.xlu1 %4916, %v6019_v52   ;;  %v1587_v17 = vmul.f32 %v11031_v51, %v5944_v9  ;;  %v1450_v47 = vmul.f32 %v6554_v7, %v6038_v53  ;;  %v1422_v10 = vadd.f32 %v1418_v30, %v1390_v12  ;;  %v11035_v51 = vld [vmem:[#allocation55_spill] sm:$0xff]  ;;  %v11036_v30 = vld [vmem:[#allocation57_spill] sm:$0xff] }
 0x241   :  { %v1392_v25 = vadd.f32 %v1388_v39, %v1360_v36  ;;  %v1372_v33 = vmul.f32 %v6111_v44, %v11032_v24  ;;  %v1342_v3 = vadd.f32 %v1338_v18, %v1310_v19  ;;  %v1402_v58 = vmul.f32 %v11033_v42, %v6010_v16  ;;  %v11037_v12 = vld [vmem:[#allocation115_spill] sm:$0xff]  ;;  %v11105_v7 = vld [vmem:[#allocation113_spill] sm:$0xff] }
 0x242   :  { %v262_v59 = vmul.f32 %v11034_v34, %v10981_v27  ;;  %v1559_v28 = vadd.f32 %v1555_v26, %v1531_v6  ;;  %v1454_v38 = vadd.f32 %v1450_v47, %v1422_v10  ;;  %v340_v29 = vadd.f32 %v336_v2, %v308_v35  ;;  %v6573_v42 = vpop.permute.xlu1 %1459  ;;  %v11041_v2 = vld [vmem:[#allocation182_spill] sm:$0xff]  ;;  %v11043_v47 = vld [vmem:[#allocation99_spill] sm:$0xff] }
 0x243   :  { %v1424_v43 = vadd.f32 %v1420_v57, %v1392_v25  ;;  %v617_v9 = vmul.f32 %v6325_v23, %v11035_v51  ;;  %v834_v36 = vmul.f32 %v11036_v30, %v5951_v13  ;;  %v1452_v39 = vmul.f32 %v11037_v12, %v6044_v49  ;;  %11039 = vst [vmem:[#allocation205_spill] sm:$0xff] %v6573_v42  ;;  %v11042_v57 = vld [vmem:[#allocation197_spill] sm:$0xff] }
 0x244   :  { %v1374_v19 = vadd.f32 %v1370_v1, %v1342_v3  ;;  %v11038_v18 = vmov 27   ;;  %v6577_v6 = vsel %vm10571_vm15, %v225_v46, 0.0  ;;  %v1591_v25 = vadd.f32 %v1587_v17, %v1559_v28  ;;  %1478 = vrot.lane.b32.xlu0 %v1454_v38, %s5187_s23  ;;  %v11046_v38 = vld [vmem:[#allocation63_spill] sm:$0xff] }
 0x245   :  { %4917 = vset.pattern.permute.xlu1 %v11038_v18  ;;  %11040 = vst [vmem:[#allocation206_spill] sm:$0xff] %v6577_v6  ;;  %v1404_v35 = vmul.f32 %v11041_v2, %v6026_v20  ;;  %v1434_v26 = vmul.f32 %v11042_v57, %v6030_v11  ;;  %v1376_v1 = vadd.f32 %v1372_v33, %v1344_v62  ;;  %v11044_v18 = vld [vmem:[#allocation183_spill] sm:$0xff]  ;;  %v11047_v33 = vld [vmem:[#allocation86_spill] sm:$0xff] }
 0x246   :  { %1219 = vperm.xlu1 %4917, %v10980_v14   ;;  %v1619_v10 = vmul.f32 %v6092_v45, %v11043_v47  ;;  %v1406_v3 = vadd.f32 %v1402_v58, %v1374_v19  ;;  %v294_v46 = vadd.f32 %v11044_v18, %v262_v59  ;;  %v1651_v28 = vmul.f32 %v6381_v37, %v6010_v16  ;;  %v11045_v14 = vld [vmem:[#allocation54_spill] sm:$0xff]  ;;  %v6599_v19 = vpop.permute.xlu1 %1463  ;;  %v11049_v18 = vld [vmem:[#allocation7_spill] sm:$0xff] }
 0x247   :  { %v1466_v17 = vmul.f32 %v6573_v42, %v6038_v53  ;;  %v1456_v30 = vadd.f32 %v1452_v39, %v1424_v43  ;;  %v372_v34 = vadd.f32 %v6402_v48, %v340_v29  ;;  %v402_v51 = vmul.f32 %v11045_v14, %v6477_v40  ;;  %11048 = vst [vmem:[#allocation183_spill] sm:$0xff] %v6599_v19  ;;  %v11050_v29 = vld [vmem:[#allocation194_spill] sm:$0xff] }
 0x248   :  { %v370_v62 = vmul.f32 %v11046_v38, %v10986_v5  ;;  %v400_v58 = vmul.f32 %v11047_v33, %v6415_v61  ;;  %v6602_v59 = vadd.f32 %v6448_v22, %v607_v56  ;;  %v226_v42 = vsel %vm10578_vm14, %v11049_v18, 0.0  ;;  %v11051_v38 = vld [vmem:[#allocation107_spill] sm:$0xff]  ;;  %v11052_v22 = vld [vmem:[#allocation185_spill] sm:$0xff] }
 0x249   :  { %v1408_v43 = vadd.f32 %v1404_v35, %v1376_v1  ;;  %v1623_v39 = vadd.f32 %v1619_v10, %v1591_v25  ;;  %1482 = vrot.lane.b32.xlu0 %v1456_v30, %s5187_s23  ;;  %v1438_v48 = vadd.f32 %v1434_v26, %v1406_v3  ;;  %v6609_v14 = vadd.f32 %v617_v9, %v11050_v29  ;;  %v11054_v26 = vld [vmem:[#allocation59_spill] sm:$0xff]  ;;  %v11055_v10 = vld [vmem:[#allocation168_spill] sm:$0xff]  ;;  %v11056_v3 = vld [vmem:[#allocation61_spill] sm:$0xff] }
 0x24a   :  { %1235 = vperm.xlu1 %4917, %v6019_v52   ;;  %v838_v33 = vadd.f32 %v834_v36, %v6405_v41  ;;  %v1436_v37 = vmul.f32 %v11051_v38, %v6034_v32  ;;  %v326_v56 = vadd.f32 %v11052_v22, %v294_v46  ;;  %v1468_v35 = vmul.f32 %v6599_v19, %v6044_v49  ;;  %v11053_v52 = vld [vmem:[#allocation56_spill] sm:$0xff]  ;;  %v11057_v36 = vld [vmem:[#allocation193_spill] sm:$0xff]  ;;  %v11062_v29 = vld [vmem:[#allocation58_spill] sm:$0xff] }
 0x24b   :  { %v1655_v47 = vadd.f32 %v1651_v28, %v1623_v39  ;;  %v1470_v25 = vadd.f32 %v1466_v17, %v1438_v48  ;;  %v404_v1 = vadd.f32 %v400_v58, %v372_v34  ;;  %v665_v30 = vmul.f32 %v11053_v52, %v6415_v61  ;;  %v11059_v28 = vld [vmem:[#allocation116_spill] sm:$0xff]  ;;  %v11060_v34 = vld [vmem:[#allocation118_spill] sm:$0xff]  ;;  %v6633_v58 = vpop.permute.xlu1 %1680  ;;  %v11063_v22 = vld [vmem:[#allocation169_spill] sm:$0xff] }
 0x24c   :  { %v850_v9 = vmul.f32 %v11054_v26, %v5951_v13  ;;  %v852_v41 = vmul.f32 %v11056_v3, %v11055_v10  ;;  %v374_v18 = vadd.f32 %v370_v62, %v11057_v36  ;;  %v6626_v46 = vsel %vm10571_vm15, %v226_v42, 0.0  ;;  %11061 = vst [vmem:[#allocation194_spill] sm:$0xff] %v6633_v58  ;;  %v11064_v36 = vld [vmem:[#allocation65_spill] sm:$0xff]  ;;  %v11065_v3 = vld [vmem:[#allocation72_spill] sm:$0xff] }
 0x24d   :  { %11058 = vst [vmem:[#allocation7_spill] sm:$0xff] %v6626_v46  ;;  %v432_v39 = vmul.f32 %v11059_v28, %v6577_v6  ;;  %v1683_v17 = vmul.f32 %v11060_v34, %v6030_v11  ;;  %1503 = vrot.lane.b32.xlu0 %v1470_v25, %s5187_s23  ;;  %v1440_v48 = vadd.f32 %v1436_v37, %v1408_v43  ;;  %v11066_v37 = vld [vmem:[#allocation60_spill] sm:$0xff]  ;;  %vm467_vm15 = vcmask 392192  }
 0x24e   :  { %1239 = vperm.xlu1 %4917, %v6157_v15   ;;  %v683_v62 = vmul.f32 %v11062_v29, %v6477_v40  ;;  %v384_v42 = vmul.f32 %v11064_v36, %v11063_v22  ;;  %v434_v26 = vmul.f32 %v11065_v3, %v6626_v46  ;;  %v6643_v28 = vadd.f32 %v6457_v50, %v838_v33  ;;  %v11067_v36 = vld [vmem:[#allocation67_spill] sm:$0xff]  ;;  %v11068_v3 = vld [vmem:[#allocation88_spill] sm:$0xff] }
 0x24f   :  { %v1472_v52 = vadd.f32 %v1468_v35, %v1440_v48  ;;  %v436_v4 = vadd.f32 %v432_v39, %v404_v1  ;;  %v1687_v15 = vadd.f32 %v1683_v17, %v1655_v47  ;;  %v358_v34 = vadd.f32 %v6524_v8, %v326_v56  ;;  %v11069_v50 = vld [vmem:[#allocation124_spill] sm:$0xff]  ;;  %v6656_v35 = vpop.permute.xlu1 %1692  ;;  %v11071_v47 = vld [vmem:[#allocation71_spill] sm:$0xff]  ;;  %v11072_v1 = vld [vmem:[#allocation73_spill] sm:$0xff] }
 0x250   :  { %v854_v25 = vadd.f32 %v850_v9, %v6467_v54  ;;  %v900_v43 = vmul.f32 %v11066_v37, %v10986_v5  ;;  %v856_v29 = vadd.f32 %v852_v41, %v6453_v21  ;;  %v633_v19 = vmul.f32 %v11067_v36, %v11063_v22  ;;  %11070 = vst [vmem:[#allocation185_spill] sm:$0xff] %v6656_v35  ;;  %v11074_v39 = vld [vmem:[#allocation117_spill] sm:$0xff] }
 0x251   :  { %v416_v38 = vmul.f32 %v11068_v3, %v6415_v61  ;;  %v1715_v33 = vmul.f32 %v11069_v50, %v6038_v53  ;;  %1507 = vrot.lane.b32.xlu0 %v1472_v52, %s5187_s23  ;;  %v406_v54 = vadd.f32 %v402_v51, %v374_v18  ;;  %v1323_v8 = vmul.f32 %v10998_v60, %v5951_v13  ;;  %v11077_v60 = vld [vmem:[#allocation190_spill] sm:$0xff] }
 0x252   :  { %461 = vrot.lane.b32.xlu1 %v436_v4, %s5184_s2  ;;  %v388_v21 = vadd.f32 %v384_v42, %v6520_v63  ;;  %v651_v56 = vmul.f32 %v11071_v47, %v10986_v5  ;;  %v868_v9 = vmul.f32 %v6269_v0, %v11072_v1  ;;  %v11073_v41 = vmov 0   ;;  %v11075_v4 = vld [vmem:[#allocation187_spill] sm:$0xff]  ;;  %v11076_v63 = vld [vmem:[#allocation166_spill] sm:$0xff] }
 0x253   :  { %4920 = vset.pattern.permute.xlu1 %v11073_v41  ;;  %v448_v17 = vmul.f32 %v11074_v39, %v6577_v6  ;;  %v1719_v52 = vadd.f32 %v1715_v33, %v1687_v15  ;;  %v438_v48 = vadd.f32 %v434_v26, %v406_v54  ;;  %v390_v51 = vadd.f32 %v11075_v4, %v358_v34  ;;  %v11079_v47 = vld [vmem:[#allocation111_spill] sm:$0xff]  ;;  %v11080_v41 = vld [vmem:[#allocation69_spill] sm:$0xff]  ;;  %v11081_v15 = vld [vmem:[#allocation90_spill] sm:$0xff] }
 0x254   :  { %v6673_v18 = vmul.f32 %v11021_v55, %v11055_v10  ;;  %v637_v42 = vadd.f32 %v633_v19, %v11076_v63  ;;  %v6677_v37 = vadd.f32 %v11077_v60, %v856_v29  ;;  %v1557_v3 = vmul.f32 %v11079_v47, %v5936_v31  ;;  %v11082_v33 = vld [vmem:[#allocation154_spill] sm:$0xff]  ;;  %v11084_v60 = vld [vmem:[#allocation159_spill] sm:$0xff]  ;;  %v11085_v29 = vld [vmem:[#allocation68_spill] sm:$0xff]  ;;  %v6696_v50 = vpop.permute.xlu1 %1909 }
 0x255   :  { %v649_v36 = vmul.f32 %v11080_v41, %v11063_v22  ;;  %v418_v26 = vmul.f32 %v11081_v15, %v6477_v40  ;;  %1743 = vrot.lane.b32.xlu0 %v1719_v52, %s5188_s24  ;;  %v420_v34 = vadd.f32 %v416_v38, %v388_v21  ;;  %v11083_v19 = vld [vmem:[#allocation66_spill] sm:$0xff]  ;;  %v6691_v4 = vmul.f32 %v11085_v29, %v11084_v60  ;;  %v11087_v63 = vld [vmem:[#allocation199_spill] sm:$0xff]  ;;  %v11088_v39 = vld [vmem:[#allocation157_spill] sm:$0xff] }
 0x256   :  { %11078 = vst [vmem:[#allocation168_spill] sm:$0xff] %v6677_v37  ;;  %465 = vrot.lane.b32.xlu1 %v438_v48, %s5184_s2  ;;  %v1533_v54 = vmul.f32 %v11083_v19, %v11082_v33  ;;  %v655_v55 = vadd.f32 %v651_v56, %v11087_v63  ;;  %v11089_v41 = vld [vmem:[#allocation77_spill] sm:$0xff]  ;;  %11090 = vst [vmem:[#allocation169_spill] sm:$0xff] %v6696_v50  ;;  %v11092_v52 = vld [vmem:[#allocation75_spill] sm:$0xff]  ;;  %v669_v56 = vadd.f32 %v665_v30, %v637_v42  ;;  %vm732_vm14 = vcmask 261120  }
 0x257   :  { %11086 = vst [vmem:[#allocation193_spill] sm:$0xff] %v6691_v4  ;;  %v1267_v1 = vmul.f32 %v11089_v41, %v11088_v39  ;;  %v11091_v15 = vld [vmem:[#allocation5_spill] sm:$0xff]  ;;  %v882_v48 = vmul.f32 %v6325_v23, %v11092_v52  ;;  %v452_v38 = vadd.f32 %v448_v17, %v420_v34  ;;  %v422_v21 = vadd.f32 %v418_v26, %v390_v51  ;;  %v11093_v19 = vld [vmem:[#allocation74_spill] sm:$0xff]  ;;  %v11094_v29 = vld [vmem:[#allocation76_spill] sm:$0xff] }
 0x258   :  { %v872_v57 = vadd.f32 %v868_v9, %v11091_v15  ;;  %v697_v2 = vmul.f32 %v11093_v19, %v6577_v6  ;;  %v715_v12 = vmul.f32 %v11094_v29, %v6626_v46  ;;  %v1561_v47 = vadd.f32 %v1557_v3, %v1533_v54  ;;  %v11095_v41 = vld [vmem:[#allocation70_spill] sm:$0xff]  ;;  %v11096_v9 = vld [vmem:[#allocation109_spill] sm:$0xff]  ;;  %v11097_v52 = vld [vmem:[#allocation119_spill] sm:$0xff] }
 0x259   :  { %v653_v63 = vadd.f32 %v649_v36, %v6609_v14  ;;  %v1573_v4 = vmul.f32 %v11095_v41, %v5936_v31  ;;  %v1545_v15 = vmul.f32 %v11096_v9, %v11082_v33  ;;  %v450_v17 = vmul.f32 %v11097_v52, %v6626_v46  ;;  %v11098_v51 = vld [vmem:[#allocation204_spill] sm:$0xff]  ;;  %v11099_v34 = vld [vmem:[#allocation167_spill] sm:$0xff]  ;;  %v11100_v19 = vld [vmem:[#allocation85_spill] sm:$0xff]  ;;  %v6718_v14 = vpop.permute.xlu1 %1925 }
 0x25a   :  { %486 = vrot.lane.b32.xlu1 %v452_v38, %s5184_s2  ;;  %v1295_v26 = vadd.f32 %v11098_v51, %v1267_v1  ;;  %v1589_v29 = vmul.f32 %v11100_v19, %v11099_v34  ;;  %v11101_v3 = vld [vmem:[#allocation186_spill] sm:$0xff]  ;;  %11102 = vst [vmem:[#allocation187_spill] sm:$0xff] %v6718_v14  ;;  %v687_v36 = vadd.f32 %v683_v62, %v655_v55  ;;  %v11103_v54 = vld [vmem:[#allocation139_spill] sm:$0xff] }
 0x25b   :  { %v1621_v30 = vmul.f32 %v6111_v44, %v11101_v3  ;;  %v6720_v42 = vadd.f32 %v882_v48, %v854_v25  ;;  %v1605_v41 = vmul.f32 %v11103_v54, %v11099_v34  ;;  %v454_v9 = vadd.f32 %v450_v17, %v422_v21  ;;  %v11104_v38 = vld [vmem:[#allocation158_spill] sm:$0xff]  ;;  %v11107_v55 = vld [vmem:[#allocation79_spill] sm:$0xff]  ;;  %v11108_v25 = vld [vmem:[#allocation92_spill] sm:$0xff] }
 0x25c   :  { %v6724_v52 = vadd.f32 %v900_v43, %v872_v57  ;;  %v1571_v1 = vmul.f32 %v11105_v7, %v11104_v38  ;;  %v1593_v51 = vadd.f32 %v1589_v29, %v1561_v47  ;;  %v701_v13 = vadd.f32 %v697_v2, %v669_v56  ;;  %v11106_v3 = vld [vmem:[#allocation78_spill] sm:$0xff]  ;;  %v11109_v43 = vld [vmem:[#allocation155_spill] sm:$0xff]  ;;  %v11110_v17 = vld [vmem:[#allocation108_spill] sm:$0xff] }
 0x25d   :  { %v6728_v19 = vadd.f32 %v715_v12, %v687_v36  ;;  %v932_v37 = vmul.f32 %v11106_v3, %v6477_v40  ;;  %v6734_v62 = vmul.f32 %v11107_v55, %v11088_v39  ;;  %v667_v48 = vmul.f32 %v11108_v25, %v6477_v40  ;;  %v11111_v2 = vld [vmem:[#allocation162_spill] sm:$0xff]  ;;  %v11112_v12 = vld [vmem:[#allocation137_spill] sm:$0xff]  ;;  %v6743_v36 = vpop.permute.xlu1 %1929  ;;  %v11114_v3 = vld [vmem:[#allocation80_spill] sm:$0xff] }
 0x25e   :  { %v1577_v21 = vadd.f32 %v1573_v4, %v1545_v15  ;;  %490 = vrot.lane.b32.xlu1 %v454_v9, %s5184_s2  ;;  %v1327_v57 = vadd.f32 %v1323_v8, %v1295_v26  ;;  %v1543_v47 = vmul.f32 %v11110_v17, %v11109_v43  ;;  %v1603_v29 = vmul.f32 %v11112_v12, %v11111_v2  ;;  %v11115_v54 = vld [vmem:[#allocation87_spill] sm:$0xff]  ;;  %v11116_v4 = vld [vmem:[#allocation121_spill] sm:$0xff]  ;;  %v11117_v8 = vld [vmem:[#allocation110_spill] sm:$0xff] }
 0x25f   :  { %v1625_v56 = vadd.f32 %v1621_v30, %v1593_v51  ;;  %11113 = vst [vmem:[#allocation166_spill] sm:$0xff] %v6743_v36  ;;  %v1281_v55 = vmul.f32 %v11114_v3, %v10981_v27  ;;  %v1796_v7 = vmul.f32 %v11115_v54, %v11109_v43  ;;  %v699_v15 = vmul.f32 %v11116_v4, %v6626_v46  ;;  %v11118_v17 = vld [vmem:[#allocation188_spill] sm:$0xff]  ;;  %v11119_v51 = vld [vmem:[#allocation94_spill] sm:$0xff]  ;;  %v11120_v27 = vld [vmem:[#allocation101_spill] sm:$0xff] }
 0x260   :  { %v1609_v9 = vadd.f32 %v1605_v41, %v1577_v21  ;;  %v1653_v26 = vmul.f32 %v11117_v8, %v6026_v20  ;;  %v1575_v25 = vadd.f32 %v1571_v1, %v1543_v47  ;;  %v1635_v12 = vmul.f32 %v6092_v45, %v11118_v17  ;;  %v11121_v39 = vld [vmem:[#allocation145_spill] sm:$0xff]  ;;  %v11122_v21 = vld [vmem:[#allocation200_spill] sm:$0xff] }
 0x261   :  { %v1685_v30 = vmul.f32 %v6633_v58, %v6034_v32  ;;  %v681_v3 = vmul.f32 %v11119_v51, %v6415_v61  ;;  %v1637_v54 = vmul.f32 %v6111_v44, %v11120_v27  ;;  %v1820_v4 = vmul.f32 %v11121_v39, %v11104_v38  ;;  %v11123_v17 = vld [vmem:[#allocation181_spill] sm:$0xff]  ;;  %v11124_v51 = vld [vmem:[#allocation123_spill] sm:$0xff]  ;;  %v6773_v39 = vpop.permute.xlu1 %1712 }
 0x262   :  { %726 = vrot.lane.b32.xlu1 %v701_v13, %s5185_s19  ;;  %v671_v41 = vadd.f32 %v667_v48, %v6602_v59  ;;  %v1607_v1 = vadd.f32 %v1603_v29, %v1575_v25  ;;  %v1667_v47 = vmul.f32 %v11122_v21, %v6010_v16  ;;  %v1669_v58 = vmul.f32 %v11123_v17, %v6026_v20  ;;  %v11125_v27 = vld [vmem:[#allocation189_spill] sm:$0xff]  ;;  %v11131_v21 = vld [vmem:[#allocation83_spill] sm:$0xff] }
 0x263   :  { %v1657_v8 = vadd.f32 %v1653_v26, %v1625_v56  ;;  %v713_v36 = vmul.f32 %v11124_v51, %v6577_v6  ;;  %v1852_v14 = vmul.f32 %v11125_v27, %v11111_v2  ;;  %v1641_v43 = vadd.f32 %v1637_v54, %v1609_v9  ;;  %11126 = vst [vmem:[#allocation190_spill] sm:$0xff] %v6773_v39  ;;  %v11127_v29 = vld [vmem:[#allocation81_spill] sm:$0xff]  ;;  %v11128_v26 = vld [vmem:[#allocation96_spill] sm:$0xff]  ;;  %v11129_v9 = vld [vmem:[#allocation178_spill] sm:$0xff] }
 0x264   :  { %v703_v13 = vadd.f32 %v699_v15, %v671_v41  ;;  %v1639_v40 = vadd.f32 %v1635_v12, %v1607_v1  ;;  %v1699_v59 = vmul.f32 %v6656_v35, %v6030_v11  ;;  %v1717_v25 = vmul.f32 %v6773_v39, %v6044_v49  ;;  %v11130_v35 = vld [vmem:[#allocation161_spill] sm:$0xff] }
 0x265   :  { %v1689_v48 = vadd.f32 %v1685_v30, %v1657_v8  ;;  %v1355_v56 = vmul.f32 %v6325_v23, %v11127_v29  ;;  %v898_v51 = vmul.f32 %v11128_v26, %v11063_v22  ;;  %v1824_v17 = vadd.f32 %v1820_v4, %v1796_v7  ;;  %v11132_v8 = vld [vmem:[#allocation125_spill] sm:$0xff]  ;;  %v6789_v29 = vpop.permute.xlu1 %1724  ;;  %v11134_v7 = vld [vmem:[#allocation120_spill] sm:$0xff]  ;;  %v11157_v26 = vld [vmem:[#allocation150_spill] sm:$0xff] }
 0x266   :  { %730 = vrot.lane.b32.xlu1 %v703_v13, %s5185_s19  ;;  %v685_v54 = vadd.f32 %v681_v3, %v653_v63  ;;  %v1313_v15 = vadd.f32 %v11129_v9, %v1281_v55  ;;  %v1671_v12 = vadd.f32 %v1667_v47, %v1639_v40  ;;  %v1673_v41 = vadd.f32 %v1669_v58, %v1641_v43  ;;  %v11135_v63 = vld [vmem:[#allocation141_spill] sm:$0xff]  ;;  %v11136_v43 = vld [vmem:[#allocation112_spill] sm:$0xff] }
 0x267   :  { %v1721_v1 = vadd.f32 %v1717_v25, %v1689_v48  ;;  %v1293_v27 = vmul.f32 %v11131_v21, %v11130_v35  ;;  %v930_v30 = vmul.f32 %v11132_v8, %v6415_v61  ;;  %v1856_v39 = vadd.f32 %v1852_v14, %v1824_v17  ;;  %11133 = vst [vmem:[#allocation159_spill] sm:$0xff] %v6789_v29  ;;  %v11137_v47 = vld [vmem:[#allocation84_spill] sm:$0xff]  ;;  %v11138_v25 = vld [vmem:[#allocation91_spill] sm:$0xff] }
 0x268   :  { %v717_v23 = vadd.f32 %v713_v36, %v685_v54  ;;  %v1701_v4 = vmul.f32 %v11134_v7, %v6034_v32  ;;  %v1798_v3 = vmul.f32 %v11135_v63, %v11082_v33  ;;  %v1731_v40 = vmul.f32 %v6789_v29, %v6038_v53 }
 0x269   :  { %1747 = vrot.lane.b32.xlu0 %v1721_v1, %s5188_s24  ;;  %v1703_v58 = vadd.f32 %v1699_v59, %v1671_v12  ;;  %v902_v55 = vadd.f32 %v898_v51, %v6643_v28  ;;  %v1884_v14 = vmul.f32 %v6092_v45, %v11136_v43  ;;  %v1916_v17 = vmul.f32 %v6696_v50, %v6010_v16  ;;  %v11140_v12 = vld [vmem:[#allocation126_spill] sm:$0xff] }
 0x26a   :  { %751 = vrot.lane.b32.xlu1 %v717_v23, %s5185_s19  ;;  %v936_v36 = vadd.f32 %v932_v37, %v6724_v52  ;;  %v1307_v13 = vmul.f32 %v11137_v47, %v11084_v60  ;;  %v1822_v48 = vmul.f32 %v11138_v25, %v5936_v31  ;;  %v1705_v59 = vadd.f32 %v1701_v4, %v1673_v41  ;;  %v11139_v37 = vld [vmem:[#allocation203_spill] sm:$0xff]  ;;  %v6821_v21 = vpop.permute.xlu1 %1941 }
 0x26b   :  { %v1735_v54 = vadd.f32 %v1731_v40, %v1703_v58  ;;  %v6809_v9 = vadd.f32 %v1355_v56, %v1327_v57  ;;  %v6812_v28 = vadd.f32 %v6673_v18, %v1313_v15  ;;  %v1888_v45 = vadd.f32 %v1884_v14, %v1856_v39  ;;  %11141 = vst [vmem:[#allocation199_spill] sm:$0xff] %v6821_v21  ;;  %v11142_v57 = vld [vmem:[#allocation93_spill] sm:$0xff]  ;;  %v11143_v39 = vld [vmem:[#allocation98_spill] sm:$0xff] }
 0x26c   :  { %v934_v51 = vadd.f32 %v930_v30, %v902_v55  ;;  %v6816_v23 = vmul.f32 %v6269_v0, %v11032_v24  ;;  %v1297_v52 = vadd.f32 %v1293_v27, %v11139_v37  ;;  %v1733_v1 = vmul.f32 %v11140_v12, %v6044_v49  ;;  %v11144_v30 = vld [vmem:[#allocation103_spill] sm:$0xff]  ;;  %v11146_v55 = vld [vmem:[#allocation130_spill] sm:$0xff] }
 0x26d   :  { %v1826_v47 = vadd.f32 %v1822_v48, %v1798_v3  ;;  %1768 = vrot.lane.b32.xlu0 %v1735_v54, %s5188_s24  ;;  %v962_v18 = vmul.f32 %v11142_v57, %v6577_v6  ;;  %v914_v56 = vmul.f32 %v11143_v39, %v11063_v22  ;;  %v1920_v15 = vadd.f32 %v1916_v17, %v1888_v45  ;;  %v11145_v3 = vld [vmem:[#allocation202_spill] sm:$0xff]  ;;  %v11147_v17 = vld [vmem:[#allocation153_spill] sm:$0xff]  ;;  %v11150_v39 = vld [vmem:[#allocation127_spill] sm:$0xff] }
 0x26e   :  { %v1948_v41 = vmul.f32 %v6821_v21, %v6030_v11  ;;  %755 = vrot.lane.b32.xlu1 %v6728_v19, %s5185_s19  ;;  %v6833_v27 = vadd.f32 %v1307_v13, %v6734_v62  ;;  %v1854_v4 = vmul.f32 %v11144_v30, %v11099_v34  ;;  %v1886_v40 = vmul.f32 %v6111_v44, %v11145_v3  ;;  %v11148_v19 = vld [vmem:[#allocation89_spill] sm:$0xff]  ;;  %v11149_v62 = vld [vmem:[#allocation100_spill] sm:$0xff]  ;;  %v6849_v44 = vpop.permute.xlu1 %1957 }
 0x26f   :  { %v1737_v58 = vadd.f32 %v1733_v1, %v1705_v59  ;;  %v1980_v14 = vmul.f32 %v11146_v55, %v6038_v53  ;;  %v964_v48 = vmul.f32 %v11147_v17, %v6626_v46  ;;  %v966_v54 = vadd.f32 %v962_v18, %v934_v51  ;;  %11151 = vst [vmem:[#allocation5_spill] sm:$0xff] %v6849_v44  ;;  %v11152_v59 = vld [vmem:[#allocation95_spill] sm:$0xff]  ;;  %v11174_v21 = vld [vmem:[#allocation128_spill] sm:$0xff] }
 0x270   :  { %v1952_v45 = vadd.f32 %v1948_v41, %v1920_v15  ;;  %v1810_v37 = vmul.f32 %v11148_v19, %v11082_v33  ;;  %v916_v13 = vmul.f32 %v11149_v62, %v10986_v5  ;;  %v946_v57 = vmul.f32 %v11150_v39, %v6415_v61  ;;  %v11153_v18 = vld [vmem:[#allocation147_spill] sm:$0xff]  ;;  %v11154_v62 = vld [vmem:[#allocation102_spill] sm:$0xff]  ;;  %v11155_v39 = vld [vmem:[#allocation201_spill] sm:$0xff] }
 0x271   :  { %v1858_v8 = vadd.f32 %v1854_v4, %v1826_v47  ;;  %1772 = vrot.lane.b32.xlu0 %v1737_v58, %s5188_s24  ;;  %v980_v1 = vmul.f32 %v11152_v59, %v6626_v46  ;;  %v918_v51 = vadd.f32 %v914_v56, %v6720_v42  ;;  %v1836_v15 = vmul.f32 %v11153_v18, %v11104_v38  ;;  %v11156_v47 = vld [vmem:[#allocation129_spill] sm:$0xff]  ;;  %v11158_v33 = vld [vmem:[#allocation155_spill] sm:$0xff]  ;;  %v11159_v59 = vld [vmem:[#allocation142_spill] sm:$0xff] }
 0x272   :  { %991 = vrot.lane.b32.xlu1 %v966_v54, %s5186_s22  ;;  %v1984_v41 = vadd.f32 %v1980_v14, %v1952_v45  ;;  %v1325_v17 = vmul.f32 %v11154_v62, %v11055_v10  ;;  %v948_v4 = vmul.f32 %v11156_v47, %v11155_v39  ;;  %v1838_v58 = vmul.f32 %v11157_v26, %v5936_v31  ;;  %v11160_v42 = vld [vmem:[#allocation163_spill] sm:$0xff]  ;;  %v11162_v45 = vld [vmem:[#allocation168_spill] sm:$0xff]  ;;  %v11163_v62 = vld [vmem:[#allocation122_spill] sm:$0xff]  ;;  %v6875_v31 = vpop.permute.xlu1 %1961 }
 0x273   :  { %v1890_v24 = vadd.f32 %v1886_v40, %v1858_v8  ;;  %v1808_v55 = vmul.f32 %v11159_v59, %v11158_v33  ;;  %v978_v56 = vmul.f32 %v11160_v42, %v6577_v6  ;;  %v11161_v38 = vld [vmem:[#allocation191_spill] sm:$0xff]  ;;  %v968_v14 = vadd.f32 %v964_v48, %v936_v36  ;;  %v11164_v47 = vld [vmem:[#allocation192_spill] sm:$0xff]  ;;  %11165 = vst [vmem:[#allocation204_spill] sm:$0xff] %v6875_v31 }
 0x274   :  { %v1868_v54 = vmul.f32 %v11161_v38, %v11111_v2  ;;  %v920_v19 = vadd.f32 %v916_v13, %v11162_v45  ;;  %v1918_v18 = vmul.f32 %v11163_v62, %v6026_v20  ;;  %v1870_v12 = vmul.f32 %v11164_v47, %v11099_v34  ;;  %v11166_v40 = vld [vmem:[#allocation131_spill] sm:$0xff]  ;;  %v11167_v36 = vld [vmem:[#allocation172_spill] sm:$0xff]  ;;  %v6885_v13 = vld [vmem:[%s10195_s0] sm:$0xff] }
 0x275   :  { %2008 = vrot.lane.b32.xlu0 %v1984_v41, %s5189_s25  ;;  %v950_v8 = vadd.f32 %v946_v57, %v918_v51  ;;  %v1357_v42 = vmul.f32 %v6269_v0, %v11166_v40  ;;  %v1840_v33 = vadd.f32 %v1836_v15, %v1808_v55  ;;  %v1387_v48 = vmul.f32 %v11167_v36, %v11063_v22  ;;  %v11169_v45 = vld [vmem:[#allocation6_spill] sm:$0xff]  ;;  %v11170_v41 = vld [vmem:[#allocation97_spill] sm:$0xff]  ;;  %v11171_v55 = vld [vmem:[#allocation164_spill] sm:$0xff] }
 0x276   :  { %11168 = vst [vmem:[#allocation178_spill] sm:$0xff] %v6885_v13  ;;  %v1900_v2 = vmul.f32 %v6885_v13, %v11169_v45  ;;  %995 = vrot.lane.b32.xlu1 %v968_v14, %s5186_s22  ;;  %v1389_v57 = vmul.f32 %v11170_v41, %v10986_v5  ;;  %v1329_v51 = vadd.f32 %v1325_v17, %v1297_v52  ;;  %v11172_v15 = vld [vmem:[#allocation104_spill] sm:$0xff]  ;;  %v11173_v62 = vld [vmem:[#allocation105_spill] sm:$0xff]  ;;  %v11175_v14 = vld [vmem:[#allocation187_spill] sm:$0xff] }
 0x277   :  { %v1842_v34 = vadd.f32 %v1838_v58, %v1810_v37  ;;  %v1922_v40 = vadd.f32 %v1918_v18, %v1890_v24  ;;  %v1339_v38 = vmul.f32 %v11172_v15, %v11171_v55  ;;  %v1872_v36 = vadd.f32 %v1868_v54, %v1840_v33  ;;  %v6903_v24 = vld [vmem:[%s10195_s0 + $0x10] sm:$0xff]  ;;  %v11177_v52 = vld [vmem:[#allocation114_spill] sm:$0xff]  ;;  %v6908_v18 = vpop.permute.xlu1 %1977  ;;  %v11180_v54 = vld [vmem:[#allocation157_spill] sm:$0xff] }
 0x278   :  { %v982_v59 = vadd.f32 %v978_v56, %v950_v8  ;;  %v952_v47 = vadd.f32 %v948_v4, %v920_v19  ;;  %v1419_v26 = vmul.f32 %v11173_v62, %v6415_v61  ;;  %v1950_v13 = vmul.f32 %v11174_v21, %v6034_v32  ;;  %11176 = vst [vmem:[#allocation161_spill] sm:$0xff] %v6903_v24  ;;  %v11181_v8 = vld [vmem:[#allocation106_spill] sm:$0xff] }
 0x279   :  { %v1874_v45 = vadd.f32 %v1870_v12, %v1842_v34  ;;  %v1932_v50 = vmul.f32 %v11175_v14, %v6010_v16  ;;  %v1902_v33 = vmul.f32 %v6903_v24, %v11177_v52  ;;  %v1361_v17 = vadd.f32 %v1357_v42, %v1329_v51  ;;  %11178 = vst [vmem:[#allocation203_spill] sm:$0xff] %v6908_v18  ;;  %v11179_v34 = vld [vmem:[#allocation166_spill] sm:$0xff]  ;;  %v11184_v16 = vld [vmem:[#allocation133_spill] sm:$0xff] }
 0x27a   :  { %v1391_v19 = vadd.f32 %v1387_v48, %v6809_v9  ;;  %v1904_v37 = vadd.f32 %v1900_v2, %v1872_v36  ;;  %1016 = vrot.lane.b32.xlu1 %v982_v59, %s5186_s22  ;;  %v1934_v12 = vmul.f32 %v11179_v34, %v6026_v20  ;;  %v1964_v4 = vmul.f32 %v6849_v44, %v6030_v11  ;;  %v11182_v9 = vld [vmem:[#allocation195_spill] sm:$0xff]  ;;  %v11183_v36 = vld [vmem:[#allocation184_spill] sm:$0xff] }
 0x27b   :  { %v1982_v58 = vmul.f32 %v6908_v18, %v6044_v49  ;;  %v1954_v56 = vadd.f32 %v1950_v13, %v1922_v40  ;;  %v1532_v42 = vmul.f32 %v11181_v8, %v11180_v54  ;;  %v1421_v2 = vmul.f32 %v11182_v9, %v11155_v39  ;;  %v11185_v11 = vld [vmem:[#allocation196_spill] sm:$0xff]  ;;  %v11186_v40 = vld [vmem:[#allocation135_spill] sm:$0xff]  ;;  %v6929_v8 = vpop.permute.xlu1 %1989 }
 0x27c   :  { %v1451_v48 = vmul.f32 %v11183_v36, %v6577_v6  ;;  %v984_v59 = vadd.f32 %v980_v1, %v952_v47  ;;  %v1936_v51 = vadd.f32 %v1932_v50, %v1904_v37  ;;  %v1906_v15 = vadd.f32 %v1902_v33, %v1874_v45  ;;  %11187 = vst [vmem:[#allocation201_spill] sm:$0xff] %v6929_v8  ;;  %v11188_v33 = vld [vmem:[#allocation193_spill] sm:$0xff] }
 0x27d   :  { %v1966_v41 = vmul.f32 %v6875_v31, %v6034_v32  ;;  %v1986_v62 = vadd.f32 %v1982_v58, %v1954_v56  ;;  %v1371_v20 = vmul.f32 %v11185_v11, %v11184_v16  ;;  %v1588_v13 = vmul.f32 %v11186_v40, %v11171_v55  ;;  %v11189_v58 = vld [vmem:[#allocation179_spill] sm:$0xff] }
 0x27e   :  { %1020 = vrot.lane.b32.xlu1 %v984_v59, %s5186_s22  ;;  %v1423_v9 = vadd.f32 %v1419_v26, %v1391_v19  ;;  %v1393_v24 = vadd.f32 %v1389_v57, %v1361_v17  ;;  %v1343_v1 = vadd.f32 %v1339_v38, %v6833_v27  ;;  %v1938_v50 = vadd.f32 %v1934_v12, %v1906_v15  ;;  %v11190_v59 = vld [vmem:[#allocation111_spill] sm:$0xff] }
 0x27f   :  { %v1996_v47 = vmul.f32 %v6929_v8, %v6038_v53  ;;  %2012 = vrot.lane.b32.xlu0 %v1986_v62, %s5189_s25  ;;  %v1968_v45 = vadd.f32 %v1964_v4, %v1936_v51  ;;  %v1560_v37 = vadd.f32 %v11188_v33, %v1532_v42  ;;  %v1403_v56 = vmul.f32 %v11189_v58, %v11063_v22  ;;  %v11191_v57 = vld [vmem:[#allocation115_spill] sm:$0xff]  ;;  %v11192_v62 = vld [vmem:[#allocation182_spill] sm:$0xff]  ;;  %v11193_v4 = vld [vmem:[#allocation197_spill] sm:$0xff] }
 0x280   :  { %v1455_v40 = vadd.f32 %v1451_v48, %v1423_v9  ;;  %v1425_v36 = vadd.f32 %v1421_v2, %v1393_v24  ;;  %v1558_v26 = vmul.f32 %v11190_v59, %v11130_v35  ;;  %v1453_v38 = vmul.f32 %v11191_v57, %v6626_v46  ;;  %v11194_v9 = vld [vmem:[#allocation156_spill] sm:$0xff]  ;;  %v11195_v24 = vld [vmem:[#allocation66_spill] sm:$0xff]  ;;  %v11196_v51 = vld [vmem:[#allocation99_spill] sm:$0xff] }
 0x281   :  { %v2000_v27 = vadd.f32 %v1996_v47, %v1968_v45  ;;  %v1970_v15 = vadd.f32 %v1966_v41, %v1938_v50  ;;  %v1375_v17 = vadd.f32 %v1371_v20, %v1343_v1  ;;  %v1592_v19 = vadd.f32 %v1588_v13, %v1560_v37  ;;  %v11197_v20 = vld [vmem:[#allocation132_spill] sm:$0xff]  ;;  %v6956_v13 = vpop.permute.xlu1 %1035  ;;  %v11199_v50 = vld [vmem:[#allocation198_spill] sm:$0xff]  ;;  %v11200_v45 = vld [vmem:[#allocation205_spill] sm:$0xff] }
 0x282   :  { %v1405_v12 = vmul.f32 %v11192_v62, %v10986_v5  ;;  %v1435_v42 = vmul.f32 %v11193_v4, %v6415_v61  ;;  %1480 = vrot.lane.b32.xlu1 %v1455_v40, %s5187_s23  ;;  %v1534_v2 = vmul.f32 %v11195_v24, %v11194_v9  ;;  %v1377_v48 = vadd.f32 %v6816_v23, %v6812_v28  ;;  %v11201_v4 = vld [vmem:[#allocation85_spill] sm:$0xff] }
 0x283   :  { %v1620_v47 = vmul.f32 %v11185_v11, %v11196_v51  ;;  %v1998_v41 = vmul.f32 %v11197_v20, %v6044_v49  ;;  %11198 = vst [vmem:[#allocation168_spill] sm:$0xff] %v6956_v13  ;;  %2033 = vrot.lane.b32.xlu0 %v2000_v27, %s5189_s25  ;;  %v1407_v1 = vadd.f32 %v1403_v56, %v1375_v17  ;;  %v11202_v27 = vld [vmem:[#allocation107_spill] sm:$0xff]  ;;  %v11203_v17 = vld [vmem:[#allocation186_spill] sm:$0xff] }
 0x284   :  { %v1652_v40 = vmul.f32 %v11199_v50, %v11063_v22  ;;  %v1467_v33 = vmul.f32 %v11200_v45, %v6577_v6  ;;  %v1457_v37 = vadd.f32 %v1453_v38, %v1425_v36  ;;  %v1562_v59 = vadd.f32 %v1558_v26, %v1534_v2  ;;  %v11205_v36 = vld [vmem:[#allocation109_spill] sm:$0xff]  ;;  %v11222_v45 = vld [vmem:[#allocation200_spill] sm:$0xff]  ;;  %v11270_v51 = vld [vmem:[#allocation158_spill] sm:$0xff] }
 0x285   :  { %v2002_v28 = vadd.f32 %v1998_v41, %v1970_v15  ;;  %v1409_v23 = vadd.f32 %v1405_v12, %v1377_v48  ;;  %v1624_v24 = vadd.f32 %v1620_v47, %v1592_v19  ;;  %v1439_v62 = vadd.f32 %v1435_v42, %v1407_v1  ;;  %v6970_v57 = vpop.permute.xlu1 %1047  ;;  %v11206_v15 = vld [vmem:[#allocation183_spill] sm:$0xff]  ;;  %v11207_v42 = vld [vmem:[#allocation113_spill] sm:$0xff]  ;;  %v11208_v47 = vld [vmem:[#allocation70_spill] sm:$0xff] }
 0x286   :  { %1484 = vrot.lane.b32.xlu1 %v1457_v37, %s5187_s23  ;;  %v1590_v58 = vmul.f32 %v11201_v4, %v11055_v10  ;;  %v1437_v56 = vmul.f32 %v11202_v27, %v11155_v39  ;;  %v1622_v50 = vmul.f32 %v6269_v0, %v11203_v17  ;;  %11204 = vst [vmem:[#allocation164_spill] sm:$0xff] %v6970_v57  ;;  %v11209_v0 = vld [vmem:[#allocation118_spill] sm:$0xff]  ;;  %v11210_v37 = vld [vmem:[#allocation139_spill] sm:$0xff] }
 0x287   :  { %2037 = vrot.lane.b32.xlu0 %v2002_v28, %s5189_s25  ;;  %v1546_v26 = vmul.f32 %v11205_v36, %v11194_v9  ;;  %v1656_v38 = vadd.f32 %v1652_v40, %v1624_v24  ;;  %v1469_v19 = vmul.f32 %v11206_v15, %v6626_v46  ;;  %v1471_v12 = vadd.f32 %v1467_v33, %v1439_v62  ;;  %v11211_v40 = vld [vmem:[#allocation108_spill] sm:$0xff]  ;;  %v11212_v62 = vld [vmem:[#allocation137_spill] sm:$0xff] }
 0x288   :  { %v1572_v2 = vmul.f32 %v11207_v42, %v11084_v60  ;;  %v1594_v48 = vadd.f32 %v1590_v58, %v1562_v59  ;;  %v1574_v41 = vmul.f32 %v11208_v47, %v11130_v35  ;;  %v1684_v1 = vmul.f32 %v11209_v0, %v6415_v61  ;;  %v11214_v59 = vld [vmem:[#allocation87_spill] sm:$0xff] }
 0x289   :  { %v1606_v28 = vmul.f32 %v11210_v37, %v11055_v10  ;;  %v1441_v24 = vadd.f32 %v1437_v56, %v1409_v23  ;;  %v1544_v36 = vmul.f32 %v11211_v40, %v11180_v54  ;;  %v1604_v33 = vmul.f32 %v11212_v62, %v11171_v55  ;;  %v6990_v58 = vpop.permute.xlu1 %1051  ;;  %v11215_v23 = vld [vmem:[#allocation101_spill] sm:$0xff]  ;;  %v11216_v37 = vld [vmem:[#allocation110_spill] sm:$0xff] }
 0x28a   :  { %1505 = vrot.lane.b32.xlu1 %v1471_v12, %s5187_s23  ;;  %v1626_v42 = vadd.f32 %v1622_v50, %v1594_v48  ;;  %11213 = vst [vmem:[#allocation157_spill] sm:$0xff] %v6990_v58  ;;  %v1797_v47 = vmul.f32 %v11214_v59, %v11180_v54  ;;  %v1578_v4 = vadd.f32 %v1574_v41, %v1546_v26  ;;  %v6997_v12 = vld [vmem:[%s10195_s0 + $0x18] sm:$0xff]  ;;  %v11217_v48 = vld [vmem:[#allocation145_spill] sm:$0xff] }
 0x28b   :  { %v1473_v0 = vadd.f32 %v1469_v19, %v1441_v24  ;;  %v1688_v15 = vadd.f32 %v1684_v1, %v1656_v38  ;;  %v1638_v56 = vmul.f32 %v6997_v12, %v11215_v23  ;;  %v1654_v62 = vmul.f32 %v11216_v37, %v10986_v5  ;;  %v11218_v59 = vld [vmem:[#allocation124_spill] sm:$0xff]  ;;  %v11220_v1 = vld [vmem:[#allocation194_spill] sm:$0xff] }
 0x28c   :  { %v1576_v50 = vadd.f32 %v1572_v2, %v1544_v36  ;;  %v1821_v40 = vmul.f32 %v11217_v48, %v11084_v60  ;;  %v1716_v26 = vmul.f32 %v11218_v59, %v6577_v6  ;;  %v1610_v19 = vadd.f32 %v1606_v28, %v1578_v4  ;;  %v11219_v38 = vld [vmem:[#allocation188_spill] sm:$0xff]  ;;  %v11221_v36 = vld [vmem:[#allocation189_spill] sm:$0xff] }
 0x28d   :  { %v1636_v41 = vmul.f32 %v11185_v11, %v11219_v38  ;;  %v1686_v24 = vmul.f32 %v11220_v1, %v11155_v39  ;;  %v1799_v37 = vmul.f32 %v11135_v63, %v11194_v9  ;;  %v1853_v2 = vmul.f32 %v11221_v36, %v11171_v55  ;;  %v11223_v4 = vld [vmem:[#allocation181_spill] sm:$0xff]  ;;  %v11224_v11 = vld [vmem:[#allocation190_spill] sm:$0xff]  ;;  %v7022_v1 = vpop.permute.xlu1 %1063 }
 0x28e   :  { %1509 = vrot.lane.b32.xlu1 %v1473_v0, %s5187_s23  ;;  %v1608_v27 = vadd.f32 %v1604_v33, %v1576_v50  ;;  %v1658_v48 = vadd.f32 %v1654_v62, %v1626_v42  ;;  %v1668_v59 = vmul.f32 %v11222_v45, %v11063_v22  ;;  %v1670_v28 = vmul.f32 %v11223_v4, %v10986_v5  ;;  %v11226_v42 = vld [vmem:[#allocation185_spill] sm:$0xff] }
 0x28f   :  { %v1718_v38 = vmul.f32 %v11224_v11, %v6626_v46  ;;  %11225 = vst [vmem:[#allocation196_spill] sm:$0xff] %v7022_v1  ;;  %v1720_v0 = vadd.f32 %v1716_v26, %v1688_v15  ;;  %v1823_v33 = vmul.f32 %v11138_v25, %v11130_v35  ;;  %v1825_v50 = vadd.f32 %v1821_v40, %v1797_v47  ;;  %v7038_v47 = vld [vmem:[%s10195_s0 + $0x8] sm:$0xff]  ;;  %v11229_v40 = vld [vmem:[#allocation169_spill] sm:$0xff] }
 0x290   :  { %v1640_v63 = vadd.f32 %v1636_v41, %v1608_v27  ;;  %v1642_v17 = vadd.f32 %v1638_v56, %v1610_v19  ;;  %v1700_v62 = vmul.f32 %v11226_v42, %v6415_v61  ;;  %v1690_v36 = vadd.f32 %v1686_v24, %v1658_v48  ;;  %11228 = vst [vmem:[#allocation156_spill] sm:$0xff] %v7038_v47 }
 0x291   :  { %v1827_v45 = vadd.f32 %v1823_v33, %v1799_v37  ;;  %v1857_v4 = vadd.f32 %v1853_v2, %v1825_v50  ;;  %v1732_v11 = vmul.f32 %v6789_v29, %v6577_v6  ;;  %v7031_v15 = vpop.permute.xlu1 %1075  ;;  %v1855_v27 = vmul.f32 %v11144_v30, %v11055_v10  ;;  %v11231_v2 = vld [vmem:[#allocation150_spill] sm:$0xff]  ;;  %v11234_v30 = vld [vmem:[#allocation147_spill] sm:$0xff] }
 0x292   :  { %1745 = vrot.lane.b32.xlu1 %v1720_v0, %s5188_s24  ;;  %v1672_v16 = vadd.f32 %v1668_v59, %v1640_v63  ;;  %v1674_v23 = vadd.f32 %v1670_v28, %v1642_v17  ;;  %11227 = vst [vmem:[#allocation193_spill] sm:$0xff] %v7031_v15  ;;  %v1722_v26 = vadd.f32 %v1718_v38, %v1690_v36  ;;  %v11230_v38 = vld [vmem:[#allocation199_spill] sm:$0xff]  ;;  %v11233_v33 = vld [vmem:[#allocation126_spill] sm:$0xff] }
 0x293   :  { %v1885_v37 = vmul.f32 %v7038_v47, %v11136_v43  ;;  %v1702_v63 = vmul.f32 %v11134_v7, %v11155_v39  ;;  %v1887_v17 = vmul.f32 %v6997_v12, %v11145_v3  ;;  %v1917_v59 = vmul.f32 %v11229_v40, %v11063_v22  ;;  %v11269_v3 = vld [vmem:[#allocation134_spill] sm:$0xff] }
 0x294   :  { %v1704_v56 = vadd.f32 %v1700_v62, %v1672_v16  ;;  %v1859_v48 = vadd.f32 %v1855_v27, %v1827_v45  ;;  %v1949_v41 = vmul.f32 %v11230_v38, %v6415_v61  ;;  %v1839_v28 = vmul.f32 %v11231_v2, %v11130_v35  ;;  %v11235_v45 = vld [vmem:[#allocation89_spill] sm:$0xff]  ;;  %v11237_v62 = vld [vmem:[#allocation192_spill] sm:$0xff]  ;;  %v11242_v38 = vld [vmem:[#allocation6_spill] sm:$0xff] }
 0x295   :  { %v1889_v19 = vadd.f32 %v1885_v37, %v1857_v4  ;;  %v1706_v36 = vadd.f32 %v1702_v63, %v1674_v23  ;;  %v1734_v50 = vmul.f32 %v11233_v33, %v6626_v46  ;;  %v1837_v25 = vmul.f32 %v11234_v30, %v11084_v60  ;;  %v11236_v23 = vld [vmem:[#allocation122_spill] sm:$0xff] }
 0x296   :  { %1749 = vrot.lane.b32.xlu1 %v1722_v26, %s5188_s24  ;;  %v1736_v24 = vadd.f32 %v1732_v11, %v1704_v56  ;;  %v7053_v0 = vpop.permute.xlu1 %1091  ;;  %v1891_v26 = vadd.f32 %v1887_v17, %v1859_v48  ;;  %v1811_v4 = vmul.f32 %v11235_v45, %v11194_v9  ;;  %v1919_v11 = vmul.f32 %v11236_v23, %v10986_v5  ;;  %v11238_v37 = vld [vmem:[#allocation142_spill] sm:$0xff]  ;;  %v11239_v56 = vld [vmem:[#allocation191_spill] sm:$0xff] }
 0x297   :  { %11232 = vst [vmem:[#allocation207_spill] sm:$0xff] %v7053_v0  ;;  %v1921_v16 = vadd.f32 %v1917_v59, %v1889_v19  ;;  %v1871_v27 = vmul.f32 %v11237_v62, %v11055_v10  ;;  %v1809_v63 = vmul.f32 %v11238_v37, %v11180_v54  ;;  %v1869_v2 = vmul.f32 %v11239_v56, %v11171_v55  ;;  %v11241_v19 = vld [vmem:[#allocation130_spill] sm:$0xff] }
 0x298   :  { %v1738_v30 = vadd.f32 %v1734_v50, %v1706_v36  ;;  %v1843_v59 = vadd.f32 %v1839_v28, %v1811_v4  ;;  %v1901_v23 = vmul.f32 %v7038_v47, %v11242_v38  ;;  %v1923_v62 = vadd.f32 %v1919_v11, %v1891_v26  ;;  %v11268_v38 = vld [vmem:[#allocation154_spill] sm:$0xff] }
 0x299   :  { %v1953_v17 = vadd.f32 %v1949_v41, %v1921_v16  ;;  %v1841_v45 = vadd.f32 %v1837_v25, %v1809_v63  ;;  %v1951_v37 = vmul.f32 %v11174_v21, %v11155_v39  ;;  %v1933_v41 = vmul.f32 %v11175_v14, %v11063_v22 }
 0x29a   :  { %1770 = vrot.lane.b32.xlu1 %v1736_v24, %s5188_s24  ;;  %v7070_v48 = vpop.permute.xlu1 %1107  ;;  %v1981_v24 = vmul.f32 %v11241_v19, %v6577_v6  ;;  %v1875_v40 = vadd.f32 %v1871_v27, %v1843_v59  ;;  %v1983_v36 = vmul.f32 %v6908_v18, %v6626_v46  ;;  %v1903_v25 = vmul.f32 %v6997_v12, %v11177_v52 }
 0x29b   :  { %11240 = vst [vmem:[#allocation208_spill] sm:$0xff] %v7070_v48  ;;  %v1873_v56 = vadd.f32 %v1869_v2, %v1841_v45  ;;  %v1965_v26 = vmul.f32 %v6849_v44, %v6415_v61  ;;  %v1955_v2 = vadd.f32 %v1951_v37, %v1923_v62  ;;  %v1967_v11 = vmul.f32 %v6875_v31, %v11155_v39 }
 0x29c   :  { %v1985_v28 = vadd.f32 %v1981_v24, %v1953_v17  ;;  %v1907_v45 = vadd.f32 %v1903_v25, %v1875_v40  ;;  %v1997_v27 = vmul.f32 %v6929_v8, %v6577_v6  ;;  %v1999_v40 = vmul.f32 %v11197_v20, %v6626_v46  ;;  %v11278_v6 = vld [vmem:[#allocation178_spill] sm:$0xff] }
 0x29d   :  { %v1905_v16 = vadd.f32 %v1901_v23, %v1873_v56  ;;  %v1987_v63 = vadd.f32 %v1983_v36, %v1955_v2  ;;  %v1044_v52 = vmul.f32 %v11269_v3, %v11268_v38  ;;  %v1045_v43 = vmul.f32 %v11269_v3, %v11194_v9 }
 0x29e   :  { %1774 = vrot.lane.b32.xlu1 %v1738_v30, %s5188_s24  ;;  %v7085_v50 = vpop.permute.xlu1 %1111  ;;  %v1935_v30 = vmul.f32 %v11179_v34, %v10986_v5  ;;  %v7099_v34 = vpop.permute.xlu0 %459 }
 0x29f   :  { %11243 = vst [vmem:[#allocation209_spill] sm:$0xff] %v7085_v50  ;;  %v1937_v4 = vadd.f32 %v1933_v41, %v1905_v16 }
 0x2a0   :  { %v1939_v17 = vadd.f32 %v1935_v30, %v1907_v45 }
 0x2a1   :  { %v1969_v56 = vadd.f32 %v1965_v26, %v1937_v4 }
 0x2a2   :  { %2010 = vrot.lane.b32.xlu1 %v1985_v28, %s5189_s25  ;;  %v1971_v24 = vadd.f32 %v1967_v11, %v1939_v17  ;;  %v7107_v41 = vpop.permute.xlu0 %463 }
 0x2a3   :  { %v7096_v23 = vpop.permute.xlu1 %1127  ;;  %v2001_v59 = vadd.f32 %v1997_v27, %v1969_v56  ;;  %11246 = vst [vmem:[#allocation212_spill] sm:$0xff] %v7107_v41 }
 0x2a4   :  { %11244 = vst [vmem:[#allocation210_spill] sm:$0xff] %v7096_v23  ;;  %v2003_v37 = vadd.f32 %v1999_v40, %v1971_v24 }
 0x2a6   :  { %2014 = vrot.lane.b32.xlu1 %v1987_v63, %s5189_s25  ;;  %v7113_v25 = vpop.permute.xlu0 %484 }
 0x2a7   :  { %v7103_v62 = vpop.permute.xlu1 %1139 }
 0x2a8   :  { %11245 = vst [vmem:[#allocation211_spill] sm:$0xff] %v7103_v62 }
 0x2aa   :  { %2035 = vrot.lane.b32.xlu1 %v2001_v59, %s5189_s25  ;;  %v7117_v30 = vpop.permute.xlu0 %488 }
 0x2ac   :  { %v7109_v36 = vpop.permute.xlu1 %1155 }
 0x2ad   :  { %11247 = vst [vmem:[#allocation213_spill] sm:$0xff] %v7109_v36 }
 0x2ae   :  { %2039 = vrot.lane.b32.xlu1 %v2003_v37, %s5189_s25  ;;  %v7123_v45 = vpop.permute.xlu0 %724 }
 0x2b0   :  { %v7111_v28 = vpop.permute.xlu1 %1171 }
 0x2b1   :  { %11248 = vst [vmem:[#allocation214_spill] sm:$0xff] %v7111_v28 }
 0x2b2   :  { %v7127_v11 = vpop.permute.xlu0 %728 }
 0x2b4   :  { %v7115_v16 = vpop.permute.xlu1 %1175 }
 0x2b5   :  { %11249 = vst [vmem:[#allocation215_spill] sm:$0xff] %v7115_v16 }
 0x2b6   :  { %v7131_v63 = vpop.permute.xlu0 %749 }
 0x2ba   :  { %v7137_v59 = vpop.permute.xlu0 %753 }
 0x2bb   :  { %v7119_v26 = vpop.permute.xlu1 %1191 }
 0x2bc   :  { %11250 = vst [vmem:[#allocation216_spill] sm:$0xff] %v7119_v26  ;;  %v11286_v26 = vld [vmem:[#allocation174_spill] sm:$0xff] }
 0x2be   :  { %v7141_v40 = vpop.permute.xlu0 %989 }
 0x2bf   :  { %v7121_v2 = vpop.permute.xlu1 %1203 }
 0x2c0   :  { %11251 = vst [vmem:[#allocation217_spill] sm:$0xff] %v7121_v2  ;;  %v11282_v2 = vld [vmem:[#allocation173_spill] sm:$0xff] }
 0x2c2   :  { %v7147_v31 = vpop.permute.xlu0 %993 }
 0x2c5   :  { %v7125_v4 = vpop.permute.xlu1 %1219 }
 0x2c6   :  { %11252 = vst [vmem:[#allocation218_spill] sm:$0xff] %v7125_v4  ;;  %v7151_v44 = vpop.permute.xlu0 %1014 }
 0x2c9   :  { %v7129_v27 = vpop.permute.xlu1 %1235 }
 0x2ca   :  { %11253 = vst [vmem:[#allocation219_spill] sm:$0xff] %v7129_v27  ;;  %v7157_v21 = vpop.permute.xlu0 %1018  ;;  %v11280_v27 = vld [vmem:[#allocation161_spill] sm:$0xff] }
 0x2cb   :  { %11262 = vst [vmem:[#allocation228_spill] sm:$0xff] %v7157_v21 }
 0x2cd   :  { %v7133_v17 = vpop.permute.xlu1 %1239 }
 0x2ce   :  { %11254 = vst [vmem:[#allocation220_spill] sm:$0xff] %v7133_v17  ;;  %v7161_v33 = vpop.permute.xlu0 %1478  ;;  %v11276_v17 = vld [vmem:[#allocation140_spill] sm:$0xff] }
 0x2cf   :  { %11264 = vst [vmem:[#allocation230_spill] sm:$0xff] %v7161_v33  ;;  %v11273_v33 = vld [vmem:[#allocation160_spill] sm:$0xff]  ;;  %v1101_v3 = vmul.f32 %v11276_v17, %v11055_v10 }
 0x2d1   :  { %v7135_v56 = vpop.permute.xlu1 %461 }
 0x2d2   :  { %11255 = vst [vmem:[#allocation221_spill] sm:$0xff] %v7135_v56  ;;  %v7165_v29 = vpop.permute.xlu0 %1482  ;;  %v11277_v56 = vld [vmem:[#allocation143_spill] sm:$0xff] }
 0x2d3   :  { %11266 = vst [vmem:[#allocation232_spill] sm:$0xff] %v7165_v29 }
 0x2d5   :  { %v7139_v24 = vpop.permute.xlu1 %465 }
 0x2d6   :  { %11256 = vst [vmem:[#allocation222_spill] sm:$0xff] %v7139_v24  ;;  %v11274_v24 = vld [vmem:[#allocation138_spill] sm:$0xff]  ;;  %v7199_v53 = vpop.permute.xlu0 %1503 }
 0x2d7   :  { %v1085_v29 = vmul.f32 %v11274_v24, %v11130_v35  ;;  %11281 = vst [vmem:[#allocation158_spill] sm:$0xff] %v7199_v53 }
 0x2d9   :  { %v7143_v37 = vpop.permute.xlu1 %486 }
 0x2da   :  { %11257 = vst [vmem:[#allocation223_spill] sm:$0xff] %v7143_v37 }
 0x2dd   :  { %v7145_v20 = vpop.permute.xlu1 %490 }
 0x2de   :  { %11258 = vst [vmem:[#allocation224_spill] sm:$0xff] %v7145_v20  ;;  %v11271_v20 = vld [vmem:[#allocation136_spill] sm:$0xff] }
 0x2df   :  { %v1066_v37 = vmul.f32 %v11271_v20, %v11270_v51 }
 0x2e1   :  { %v7149_v8 = vpop.permute.xlu1 %726 }
 0x2e2   :  { %11259 = vst [vmem:[#allocation225_spill] sm:$0xff] %v7149_v8  ;;  %v7189_v8 = vmul.f32 %v11278_v6, %v11277_v56 }
 0x2e5   :  { %v7153_v14 = vpop.permute.xlu1 %730 }
 0x2e6   :  { %11260 = vst [vmem:[#allocation226_spill] sm:$0xff] %v7153_v14  ;;  %v1084_v14 = vmul.f32 %v11274_v24, %v11273_v33 }
 0x2e9   :  { %v7155_v18 = vpop.permute.xlu1 %751 }
 0x2ea   :  { %11261 = vst [vmem:[#allocation227_spill] sm:$0xff] %v7155_v18 }
 0x2ed   :  { %v7159_v19 = vpop.permute.xlu1 %755 }
 0x2ee   :  { %11263 = vst [vmem:[#allocation229_spill] sm:$0xff] %v7159_v19  ;;  %v1067_v19 = vmul.f32 %v11271_v20, %v11084_v60  ;;  %v11279_v20 = vld [vmem:[#allocation144_spill] sm:$0xff] }
 0x2ef   :  { %v7197_v4 = vmul.f32 %v11280_v27, %v11279_v20  ;;  %v7203_v24 = vmul.f32 %v6997_v12, %v11279_v20  ;;  %v1043_v20 = vmul.f32 %v6956_v13, %v11180_v54 }
 0x2f1   :  { %v7163_v7 = vpop.permute.xlu1 %991 }
 0x2f2   :  { %11265 = vst [vmem:[#allocation231_spill] sm:$0xff] %v7163_v7 }
 0x2f5   :  { %v7167_v42 = vpop.permute.xlu1 %995 }
 0x2f6   :  { %11267 = vst [vmem:[#allocation233_spill] sm:$0xff] %v7167_v42  ;;  %v11275_v42 = vld [vmem:[#allocation167_spill] sm:$0xff] }
 0x2f7   :  { %v1100_v7 = vmul.f32 %v11276_v17, %v11275_v42  ;;  %v11283_v17 = vld [vmem:[#allocation146_spill] sm:$0xff] }
 0x2f8   :  { %v7207_v16 = vmul.f32 %v11283_v17, %v11282_v2  ;;  %v7211_v28 = vmul.f32 %v11283_v17, %v10986_v5  ;;  %v11290_v17 = vld [vmem:[#allocation152_spill] sm:$0xff] }
 0x2f9   :  { %v7175_v18 = vpop.permute.xlu1 %1016  ;;  %v7233_v5 = vmul.f32 %v11290_v17, %v11155_v39 }
 0x2fa   :  { %11272 = vst [vmem:[#allocation154_spill] sm:$0xff] %v7175_v18  ;;  %v7193_v18 = vmul.f32 %v7038_v47, %v11277_v56  ;;  %11284 = vst [vmem:[#allocation160_spill] sm:$0xff] %v7211_v28  ;;  %v11285_v56 = vld [vmem:[#allocation155_spill] sm:$0xff]  ;;  %v7229_v28 = vmul.f32 %v11290_v17, %v6034_v32  ;;  %v474_v17 = vsel %vm467_vm15, 0.0, %v7099_v34 }
 0x2fb   :  { %v1042_v21 = vmul.f32 %v6956_v13, %v11285_v56  ;;  %v11287_v47 = vld [vmem:[#allocation151_spill] sm:$0xff]  ;;  %11292 = vst [vmem:[#allocation234_spill] sm:$0xff] %v7233_v5 }
 0x2fc   :  { %v7217_v6 = vmul.f32 %v11287_v47, %v11286_v26  ;;  %v7221_v53 = vmul.f32 %v11287_v47, %v6415_v61  ;;  %11291 = vst [vmem:[#allocation155_spill] sm:$0xff] %v7229_v28  ;;  %v1068_v47 = vmul.f32 %v7022_v1, %v11273_v33  ;;  %v1069_v28 = vmul.f32 %v7022_v1, %v11130_v35  ;;  %v7259_v35 = vpop.permute.xlu0 %1507 }
 0x2fd   :  { %v7225_v2 = vpop.permute.xlu1 %1020  ;;  %v1070_v5 = vadd.f32 %v1066_v37, %v1042_v21  ;;  %v1071_v33 = vadd.f32 %v1067_v19, %v1043_v20  ;;  %v1055_v21 = vmul.f32 %v6970_v57, %v11180_v54  ;;  %v1099_v20 = vmul.f32 %v7053_v0, %v11171_v55 }
 0x2fe   :  { %11288 = vst [vmem:[#allocation167_spill] sm:$0xff] %v7217_v6  ;;  %11289 = vst [vmem:[#allocation161_spill] sm:$0xff] %v7225_v2  ;;  %v11293_v6 = vld [vmem:[#allocation165_spill] sm:$0xff]  ;;  %v1056_v2 = vmul.f32 %v6990_v58, %v11268_v38  ;;  %v11295_v38 = vld [vmem:[#allocation162_spill] sm:$0xff]  ;;  %v1072_v37 = vadd.f32 %v1068_v47, %v1044_v52  ;;  %v498_v19 = vsel %vm467_vm15, 0.0, %v7113_v25  ;;  %v1116_v52 = vmul.f32 %v7085_v50, %v11275_v42 }
 0x2ff   :  { %v7237_v26 = vmul.f32 %v11293_v6, %v6044_v49  ;;  %v7243_v13 = vmul.f32 %v11293_v6, %v6626_v46  ;;  %v1057_v49 = vmul.f32 %v6990_v58, %v11194_v9  ;;  %v475_v6 = vsel %vm467_vm15, 0.0, %v7107_v41  ;;  %11296 = vst [vmem:[#allocation162_spill] sm:$0xff] %v7259_v35 }
 0x300   :  { %v1098_v46 = vmul.f32 %v7053_v0, %v11295_v38  ;;  %v739_v9 = vsel %vm732_vm14, 0.0, %v7123_v45  ;;  %v1073_v58 = vadd.f32 %v1069_v28, %v1045_v43  ;;  %v1082_v35 = vmul.f32 %v7031_v15, %v11270_v51 }
 0x301   :  { %11294 = vst [vmem:[#allocation235_spill] sm:$0xff] %v7243_v13  ;;  %v1054_v13 = vmul.f32 %v6970_v57, %v11285_v56  ;;  %v7261_v1 = vpop.permute.xlu1 %1480  ;;  %v1088_v56 = vadd.f32 %v1084_v14, %v1056_v2  ;;  %v1089_v41 = vadd.f32 %v1085_v29, %v1057_v49  ;;  %v1117_v54 = vmul.f32 %v7085_v50, %v11055_v10 }
 0x302   :  { %11297 = vst [vmem:[#allocation236_spill] sm:$0xff] %v7261_v1  ;;  %v1083_v1 = vmul.f32 %v7031_v15, %v11084_v60  ;;  %v499_v47 = vsel %vm467_vm15, 0.0, %v7117_v30  ;;  %v741_v57 = vadd.f32 %v739_v9, %v474_v17  ;;  %v740_v43 = vsel %vm732_vm14, 0.0, %v7127_v11  ;;  %v7293_v9 = vpop.permute.xlu0 %1743  ;;  %v11382_v15 = vld [vmem:[#allocation133_spill] sm:$0xff] }
 0x303   :  { %v1102_v14 = vadd.f32 %v1098_v46, %v1070_v5  ;;  %v1103_v49 = vadd.f32 %v1099_v20, %v1071_v33  ;;  %v763_v60 = vsel %vm732_vm14, 0.0, %v7131_v63  ;;  %v1104_v29 = vadd.f32 %v1100_v7, %v1072_v37 }
 0x304   :  { %v1132_v51 = vmul.f32 %v11280_v27, %v7096_v23  ;;  %v1086_v42 = vadd.f32 %v1082_v35, %v1054_v13  ;;  %v1114_v10 = vmul.f32 %v7070_v48, %v11295_v38  ;;  %v1115_v2 = vmul.f32 %v7070_v48, %v11171_v55 }
 0x305   :  { %v7283_v28 = vpop.permute.xlu1 %1484  ;;  %v1105_v17 = vadd.f32 %v1101_v3, %v1073_v58  ;;  %v1087_v5 = vadd.f32 %v1083_v1, %v1055_v21  ;;  %v743_v46 = vadd.f32 %v740_v43, %v475_v6  ;;  %v1120_v33 = vadd.f32 %v1116_v52, %v1088_v56  ;;  %v11298_v21 = vld [vmem:[#allocation170_spill] sm:$0xff] }
 0x306   :  { %v1121_v20 = vadd.f32 %v1117_v54, %v1089_v41  ;;  %v765_v50 = vadd.f32 %v763_v60, %v498_v19  ;;  %v764_v7 = vsel %vm732_vm14, 0.0, %v7137_v59  ;;  %v1004_v13 = vsel %vm997_vm13, 0.0, %v7141_v40  ;;  %v11299_v54 = vld [vmem:[#allocation178_spill] sm:$0xff]  ;;  %v11301_v60 = vld [vmem:[#allocation216_spill] sm:$0xff] }
 0x307   :  { %v1134_v27 = vadd.f32 %v7189_v8, %v1102_v14  ;;  %v1133_v3 = vmul.f32 %v6997_v12, %v7096_v23  ;;  %v1136_v55 = vadd.f32 %v1132_v51, %v1104_v29  ;;  %v1135_v58 = vadd.f32 %v7193_v18, %v1103_v49  ;;  %v7311_v8 = vpop.permute.xlu0 %1747  ;;  %v11300_v14 = vld [vmem:[#allocation156_spill] sm:$0xff] }
 0x308   :  { %v1163_v6 = vmul.f32 %v7109_v36, %v11063_v22  ;;  %v1118_v1 = vadd.f32 %v1114_v10, %v1086_v42  ;;  %v1119_v41 = vadd.f32 %v1115_v2, %v1087_v5  ;;  %v1005_v35 = vsel %vm997_vm13, 0.0, %v7147_v31  ;;  %v11303_v5 = vld [vmem:[#allocation214_spill] sm:$0xff] }
 0x309   :  { %v7300_v38 = vpop.permute.xlu1 %1505  ;;  %v1162_v37 = vmul.f32 %v7109_v36, %v11298_v21  ;;  %v767_v19 = vadd.f32 %v764_v7, %v499_v47  ;;  %v7313_v56 = vadd.f32 %v1004_v13, %v741_v57  ;;  %v1152_v12 = vadd.f32 %v7197_v4, %v1120_v33  ;;  %v11304_v13 = vld [vmem:[#allocation173_spill] sm:$0xff]  ;;  %v11385_v36 = vld [vmem:[#allocation186_spill] sm:$0xff] }
 0x30a   :  { %v1153_v18 = vadd.f32 %v7203_v24, %v1121_v20  ;;  %v1028_v52 = vsel %vm997_vm13, 0.0, %v7151_v44  ;;  %v1146_v43 = vmul.f32 %v11299_v54, %v7103_v62  ;;  %v1147_v49 = vmul.f32 %v11300_v14, %v7103_v62  ;;  %v11302_v24 = vld [vmem:[#allocation228_spill] sm:$0xff]  ;;  %v11306_v14 = vld [vmem:[#allocation171_spill] sm:$0xff] }
 0x30b   :  { %v1196_v29 = vmul.f32 %v11301_v60, %v6034_v32  ;;  %v1008_v57 = vadd.f32 %v1005_v35, %v743_v46  ;;  %v1137_v47 = vadd.f32 %v1133_v3, %v1105_v17  ;;  %v1167_v42 = vadd.f32 %v1163_v6, %v1135_v58  ;;  %v11305_v32 = vld [vmem:[#allocation215_spill] sm:$0xff]  ;;  %v7342_v6 = vpop.permute.xlu0 %1768 }
 0x30c   :  { %v1168_v4 = vadd.f32 %v7207_v16, %v1136_v55  ;;  %v1029_v10 = vsel %vm997_vm13, 0.0, %v11302_v24  ;;  %v1166_v2 = vadd.f32 %v1162_v37, %v1134_v27  ;;  %v1178_v33 = vmul.f32 %v11303_v5, %v11298_v21  ;;  %v11307_v55 = vld [vmem:[#allocation174_spill] sm:$0xff]  ;;  %v11308_v27 = vld [vmem:[#allocation217_spill] sm:$0xff]  ;;  %v11309_v21 = vld [vmem:[#allocation175_spill] sm:$0xff] }
 0x30d   :  { %v7325_v51 = vpop.permute.xlu1 %1509  ;;  %v1179_v20 = vmul.f32 %v11303_v5, %v11063_v22  ;;  %v1030_v7 = vadd.f32 %v1028_v52, %v765_v50  ;;  %v1180_v54 = vmul.f32 %v11305_v32, %v11304_v13  ;;  %v1181_v17 = vmul.f32 %v11305_v32, %v11306_v14  ;;  %v11310_v37 = vld [vmem:[#allocation218_spill] sm:$0xff]  ;;  %v11311_v14 = vld [vmem:[#allocation160_spill] sm:$0xff] }
 0x30e   :  { %v1197_v16 = vmul.f32 %v11301_v60, %v11155_v39  ;;  %v1150_v46 = vadd.f32 %v1146_v43, %v1118_v1  ;;  %v1151_v3 = vadd.f32 %v1147_v49, %v1119_v41  ;;  %v1210_v58 = vmul.f32 %v11308_v27, %v11307_v55  ;;  %v11312_v41 = vld [vmem:[#allocation219_spill] sm:$0xff] }
 0x30f   :  { %v1200_v35 = vadd.f32 %v1196_v29, %v1168_v4  ;;  %v7344_v50 = vadd.f32 %v1029_v10, %v767_v19  ;;  %v1226_v52 = vmul.f32 %v11310_v37, %v11309_v21  ;;  %v1199_v13 = vadd.f32 %v7221_v53, %v1167_v42  ;;  %v11313_v49 = vld [vmem:[#allocation167_spill] sm:$0xff]  ;;  %v11314_v4 = vld [vmem:[#allocation225_spill] sm:$0xff]  ;;  %v11315_v42 = vld [vmem:[#allocation206_spill] sm:$0xff] }
 0x310   :  { %v1169_v32 = vadd.f32 %v11311_v14, %v1137_v47  ;;  %v1182_v39 = vadd.f32 %v1178_v33, %v1150_v46  ;;  %v1183_v1 = vadd.f32 %v1179_v20, %v1151_v3  ;;  %v1242_v43 = vmul.f32 %v11312_v41, %v11309_v21  ;;  %v7371_v21 = vpop.permute.xlu0 %1772  ;;  %v11321_v14 = vld [vmem:[#allocation177_spill] sm:$0xff] }
 0x311   :  { %v1746_v22 = vpop.permute.xlu1 %1745  ;;  %v1198_v55 = vadd.f32 %v11313_v49, %v1166_v2  ;;  %v1184_v5 = vadd.f32 %v1180_v54, %v1152_v12  ;;  %v1185_v29 = vadd.f32 %v1181_v17, %v1153_v18  ;;  %v733_v19 = vsel %vm732_vm14, %v7123_v45, %v11314_v4  ;;  %v11316_v12 = vld [vmem:[#allocation221_spill] sm:$0xff]  ;;  %v11317_v54 = vld [vmem:[#allocation231_spill] sm:$0xff]  ;;  %v11319_v17 = vld [vmem:[#allocation220_spill] sm:$0xff] }
 0x312   :  { %v1201_v10 = vadd.f32 %v1197_v16, %v1169_v32  ;;  %v1211_v53 = vmul.f32 %v11308_v27, %v6415_v61  ;;  %v1227_v47 = vmul.f32 %v11310_v37, %v11315_v42  ;;  %v1232_v33 = vadd.f32 %v7237_v26, %v1200_v35  ;;  %v11318_v61 = vld [vmem:[#allocation7_spill] sm:$0xff]  ;;  %v11320_v26 = vld [vmem:[#allocation226_spill] sm:$0xff] }
 0x313   :  { %v1214_v20 = vadd.f32 %v1210_v58, %v1182_v39  ;;  %v1243_v2 = vmul.f32 %v11312_v41, %v11315_v42  ;;  %v468_v18 = vsel %vm467_vm15, %v7099_v34, %v11316_v12  ;;  %v998_v45 = vsel %vm997_vm13, %v7141_v40, %v11317_v54  ;;  %v11322_v39 = vld [vmem:[#allocation235_spill] sm:$0xff]  ;;  %v11323_v4 = vld [vmem:[#allocation234_spill] sm:$0xff]  ;;  %v11326_v12 = vld [vmem:[#allocation212_spill] sm:$0xff] }
 0x314   :  { %v1230_v32 = vadd.f32 %v1226_v52, %v1198_v55  ;;  %v1245_v16 = vmul.f32 %v11319_v17, %v11318_v61  ;;  %v742_v3 = vadd.f32 %v733_v19, %v468_v18  ;;  %v734_v58 = vsel %vm732_vm14, %v7127_v11, %v11320_v26  ;;  %v11324_v52 = vld [vmem:[#allocation155_spill] sm:$0xff]  ;;  %v11325_v42 = vld [vmem:[#allocation222_spill] sm:$0xff]  ;;  %v11327_v54 = vld [vmem:[#allocation233_spill] sm:$0xff] }
 0x315   :  { %v1750_v46 = vpop.permute.xlu1 %1749  ;;  %v1246_v35 = vadd.f32 %v1242_v43, %v1214_v20  ;;  %v1244_v34 = vmul.f32 %v11319_v17, %v11321_v14  ;;  %v1233_v49 = vadd.f32 %v11322_v39, %v1201_v10  ;;  %v1217_v40 = vadd.f32 %v11323_v4, %v1185_v29  ;;  %v11328_v39 = vld [vmem:[#allocation227_spill] sm:$0xff]  ;;  %v11374_v17 = vld [vmem:[#allocation112_spill] sm:$0xff] }
 0x316   :  { %v1216_v55 = vadd.f32 %v11324_v52, %v1184_v5  ;;  %v469_v19 = vsel %vm467_vm15, %v11326_v12, %v11325_v42  ;;  %v1007_v18 = vadd.f32 %v998_v45, %v742_v3  ;;  %v999_v11 = vsel %vm997_vm13, %v7147_v31, %v11327_v54  ;;  %v11329_v45 = vld [vmem:[#allocation236_spill] sm:$0xff]  ;;  %v11330_v3 = vld [vmem:[#allocation230_spill] sm:$0xff]  ;;  %v11379_v27 = vld [vmem:[#allocation131_spill] sm:$0xff] }
 0x317   :  { %v1215_v43 = vadd.f32 %v1211_v53, %v1183_v1  ;;  %v744_v61 = vadd.f32 %v734_v58, %v469_v19  ;;  %v1231_v26 = vadd.f32 %v1227_v47, %v1199_v13  ;;  %v1250_v14 = vadd.f32 %v1230_v32, %v7313_v56  ;;  %v11331_v13 = vld [vmem:[#allocation223_spill] sm:$0xff]  ;;  %v11332_v53 = vld [vmem:[#allocation229_spill] sm:$0xff] }
 0x318   :  { %v1252_v10 = vadd.f32 %v1232_v33, %v1008_v57  ;;  %v757_v5 = vsel %vm732_vm14, %v7131_v63, %v11328_v39  ;;  %v1249_v4 = vadd.f32 %v1245_v16, %v1217_v40  ;;  %v1254_v52 = vadd.f32 %v1246_v35, %v1030_v7  ;;  %v2009_v57 = vpop.permute.xlu0 %2008  ;;  %v11333_v7 = vld [vmem:[#allocation154_spill] sm:$0xff]  ;;  %v11334_v16 = vld [vmem:[#allocation232_spill] sm:$0xff] }
 0x319   :  { %v1771_v20 = vpop.permute.xlu1 %1770  ;;  %v1247_v29 = vadd.f32 %v1243_v2, %v1215_v43  ;;  %v1009_v42 = vadd.f32 %v999_v11, %v744_v61  ;;  %v1487_v12 = vsel %vm1486_vm10, %v11330_v3, %v11329_v45  ;;  %v1493_v31 = vsel %vm1486_vm10, %v11329_v45, 0.0  ;;  %v11336_v11 = vld [vmem:[#allocation161_spill] sm:$0xff] }
 0x31a   :  { %v1248_v1 = vadd.f32 %v1244_v34, %v1216_v55  ;;  %v492_v56 = vsel %vm467_vm15, %v7113_v25, %v11331_v13  ;;  %v758_v63 = vsel %vm732_vm14, %v7137_v59, %v11332_v53  ;;  %v1251_v47 = vadd.f32 %v1231_v26, %v1007_v18  ;;  %v11335_v34 = vld [vmem:[#allocation224_spill] sm:$0xff] }
 0x31b   :  { %v1022_v33 = vsel %vm997_vm13, %v7151_v44, %v11333_v7  ;;  %v766_v32 = vadd.f32 %v757_v5, %v492_v56  ;;  %v1488_v58 = vsel %vm1486_vm10, %v11334_v16, %v7283_v28  ;;  %v1752_v35 = vsel %vm1751_vm12, %v7293_v9, %v1746_v22 }
 0x31c   :  { %v1758_v25 = vsel %vm1751_vm12, %v1746_v22, 0.0  ;;  %v493_v59 = vsel %vm467_vm15, %v7117_v30, %v11335_v34  ;;  %v1495_v40 = vadd.f32 %v1487_v12, %v1250_v14  ;;  %v1496_v55 = vadd.f32 %v1493_v31, %v1251_v47  ;;  %v2013_v61 = vpop.permute.xlu0 %2012 }
 0x31d   :  { %v1775_v2 = vpop.permute.xlu1 %1774  ;;  %v1494_v44 = vsel %vm1486_vm10, %v7283_v28, 0.0  ;;  %v768_v19 = vadd.f32 %v758_v63, %v493_v59  ;;  %v1253_v18 = vadd.f32 %v1233_v49, %v1009_v42  ;;  %v1031_v54 = vadd.f32 %v1022_v33, %v766_v32  ;;  %v11337_v42 = vld [vmem:[#allocation158_spill] sm:$0xff] }
 0x31e   :  { %v1023_v43 = vsel %vm997_vm13, %v11302_v24, %v11336_v11  ;;  %v1497_v9 = vadd.f32 %v1488_v58, %v1252_v10  ;;  %v1760_v26 = vadd.f32 %v1752_v35, %v1495_v40  ;;  %v1761_v22 = vadd.f32 %v1758_v25, %v1496_v55 }
 0x31f   :  { %v1753_v39 = vsel %vm1751_vm12, %v7311_v8, %v1750_v46  ;;  %v1498_v14 = vadd.f32 %v1494_v44, %v1253_v18  ;;  %v1759_v5 = vsel %vm1751_vm12, %v1750_v46, 0.0  ;;  %v1511_v45 = vsel %vm1486_vm10, %v11337_v42, %v7300_v38 }
 0x320   :  { %v1517_v24 = vsel %vm1486_vm10, %v7300_v38, 0.0  ;;  %v1255_v8 = vadd.f32 %v1247_v29, %v1031_v54  ;;  %v1033_v12 = vadd.f32 %v1023_v43, %v768_v19  ;;  %v1256_v31 = vadd.f32 %v1248_v1, %v7344_v50  ;;  %v2034_v33 = vpop.permute.xlu0 %2033  ;;  %v11338_v50 = vld [vmem:[#allocation162_spill] sm:$0xff] }
 0x321   :  { %v2011_v30 = vpop.permute.xlu1 %2010  ;;  %v1762_v46 = vadd.f32 %v1753_v39, %v1497_v9  ;;  %v1763_v13 = vadd.f32 %v1759_v5, %v1498_v14  ;;  %v1776_v56 = vsel %vm1751_vm12, %v7342_v6, %v1771_v20  ;;  %v1519_v38 = vadd.f32 %v1511_v45, %v1254_v52 }
 0x322   :  { %v2017_v28 = vsel %vm2016_vm9, %v2009_v57, %v2011_v30  ;;  %v2023_v49 = vsel %vm2016_vm9, %v2011_v30, 0.0  ;;  %v1782_v57 = vsel %vm1751_vm12, %v1771_v20, 0.0  ;;  %v1520_v47 = vadd.f32 %v1517_v24, %v1255_v8 }
 0x323   :  { %v7429_v10 = vadd.f32 %v2017_v28, %v1760_v26  ;;  %v7431_v3 = vadd.f32 %v2023_v49, %v1761_v22  ;;  %v1512_v1 = vsel %vm1486_vm10, %v11338_v50, %v7325_v51  ;;  %v1518_v6 = vsel %vm1486_vm10, %v7325_v51, 0.0 }
 0x324   :  { %v1257_v16 = vadd.f32 %v1249_v4, %v1033_v12  ;;  %v1784_v52 = vadd.f32 %v1776_v56, %v1519_v38  ;;  %v1785_v58 = vadd.f32 %v1782_v57, %v1520_v47  ;;  %v1777_v35 = vsel %vm1751_vm12, %v7371_v21, %v1775_v2  ;;  %v2038_v11 = vpop.permute.xlu0 %2037  ;;  %v7504_v56 = vld [vmem:[%s10195_s0 + $0x38] sm:$0xff]  ;;  %v7511_v57 = vld [vmem:[%s10195_s0 + $0x28] sm:$0xff]  ;;  %v11340_v47 = vld [vmem:[#allocation31_spill] sm:$0xff] }
 0x325   :  { %v2015_v53 = vpop.permute.xlu1 %2014  ;;  %v2053_v63 = vadd.f32 %v7431_v3, %v7429_v10  ;;  %v1783_v25 = vsel %vm1751_vm12, %v1775_v2, 0.0  ;;  %v2062_v51 = vmul.f32 %v7429_v10, %v7429_v10  ;;  %v2063_v40 = vmul.f32 %v7431_v3, %v7431_v3 }
 0x326   :  { %v2018_v7 = vsel %vm2016_vm9, %v2013_v61, %v2015_v53  ;;  %v2024_v29 = vsel %vm2016_vm9, %v2015_v53, 0.0  ;;  %v1521_v55 = vadd.f32 %v1512_v1, %v1256_v31  ;;  %v1522_v44 = vadd.f32 %v1518_v6, %v1257_v16  ;;  %v11339_v53 = vld [vmem:[#allocation29_spill] sm:$0xff]  ;;  %v11344_v16 = vld [vmem:[#allocation44_spill] sm:$0xff] }
 0x327   :  { %v7446_v32 = vadd.f32 %v2018_v7, %v1762_v46  ;;  %v7448_v20 = vadd.f32 %v2024_v29, %v1763_v13  ;;  %2054 = vadd.xlane.f32.xlu0 %v2053_v63  ;;  %v2066_v61 = vadd.f32 %v2063_v40, %v2062_v51  ;;  %v7490_v46 = vld [vmem:[%s10195_s0 + $0x20] sm:$0xff]  ;;  %v7497_v13 = vld [vmem:[%s10195_s0 + $0x30] sm:$0xff]  ;;  %v7561_v38 = vmul.f32 %v7504_v56, %v11339_v53 }
 0x328   :  { %v1786_v2 = vadd.f32 %v1777_v35, %v1521_v55  ;;  %v1787_v54 = vadd.f32 %v1783_v25, %v1522_v44  ;;  %v7557_v63 = vmul.f32 %v7497_v13, %v11339_v53  ;;  %v7565_v7 = vmul.f32 %v7490_v46, %v11340_v47  ;;  %v11347_v35 = vld [vmem:[#allocation46_spill] sm:$0xff]  ;;  %v11351_v55 = vld [vmem:[#allocation49_spill] sm:$0xff] }
 0x329   :  { %v2036_v34 = vpop.permute.xlu1 %2035  ;;  %v2056_v59 = vadd.f32 %v7448_v20, %v7446_v32  ;;  %v2064_v42 = vmul.f32 %v7446_v32, %v7446_v32  ;;  %v2065_v45 = vmul.f32 %v7448_v20, %v7448_v20  ;;  %v7569_v29 = vmul.f32 %v7511_v57, %v11340_v47  ;;  %v11365_v47 = vld [vmem:[#allocation82_spill] sm:$0xff] }
 0x32a   :  { %v2041_v4 = vsel %vm2016_vm9, %v2034_v33, %v2036_v34  ;;  %v2047_v19 = vsel %vm2016_vm9, %v2036_v34, 0.0  ;;  %v11341_v33 = vld [vmem:[#allocation33_spill] sm:$0xff]  ;;  %v7589_v25 = vmul.f32 %v7497_v13, %v11347_v35  ;;  %v7593_v34 = vmul.f32 %v7504_v56, %v11347_v35 }
 0x32b   :  { %v7461_v18 = vadd.f32 %v2041_v4, %v1784_v52  ;;  %v7463_v21 = vadd.f32 %v2047_v19, %v1785_v58  ;;  %2057 = vadd.xlane.f32.xlu1 %v2056_v59  ;;  %v2069_v24 = vadd.f32 %v2065_v45, %v2064_v42  ;;  %v7573_v50 = vmul.f32 %v7497_v13, %v11341_v33  ;;  %v11350_v59 = vld [vmem:[#allocation48_spill] sm:$0xff]  ;;  %v11359_v45 = vld [vmem:[#allocation75_spill] sm:$0xff] }
 0x32c   :  { %v7577_v6 = vmul.f32 %v7504_v56, %v11341_v33  ;;  %v7581_v52 = vmul.f32 %v7490_v46, %v11344_v16  ;;  %v7585_v58 = vmul.f32 %v7511_v57, %v11344_v16  ;;  %11348 = vst [vmem:[#allocation173_spill] sm:$0xff] %v7589_v25  ;;  %11349 = vst [vmem:[#allocation171_spill] sm:$0xff] %v7593_v34 }
 0x32d   :  { %v2040_v43 = vpop.permute.xlu1 %2039  ;;  %v2094_v9 = vadd.f32 %v7463_v21, %v7461_v18  ;;  %v2102_v26 = vmul.f32 %v7461_v18, %v7461_v18  ;;  %v2103_v22 = vmul.f32 %v7463_v21, %v7463_v21  ;;  %11342 = vst [vmem:[#allocation170_spill] sm:$0xff] %v7573_v50  ;;  %v7597_v51 = vmul.f32 %v7490_v46, %v11350_v59 }
 0x32e   :  { %v2042_v39 = vsel %vm2016_vm9, %v2038_v11, %v2040_v43  ;;  %v2048_v30 = vsel %vm2016_vm9, %v2040_v43, 0.0  ;;  %11343 = vst [vmem:[#allocation178_spill] sm:$0xff] %v7577_v6  ;;  %11345 = vst [vmem:[#allocation156_spill] sm:$0xff] %v7581_v52  ;;  %v7601_v40 = vmul.f32 %v7511_v57, %v11350_v59  ;;  %v7605_v44 = vmul.f32 %v7490_v46, %v11351_v55  ;;  %v11368_v59 = vld [vmem:[#allocation99_spill] sm:$0xff] }
 0x32f   :  { %v7473_v14 = vadd.f32 %v2042_v39, %v1786_v2  ;;  %v7475_v5 = vadd.f32 %v2048_v30, %v1787_v54  ;;  %2067 = vadd.xlane.f32.xlu1 %v2066_v61  ;;  %2095 = vadd.xlane.f32.xlu0 %v2094_v9  ;;  %v2106_v28 = vadd.f32 %v2103_v22, %v2102_v26  ;;  %v11352_v2 = vld [vmem:[#allocation51_spill] sm:$0xff]  ;;  %v11353_v61 = vld [vmem:[#allocation53_spill] sm:$0xff] }
 0x330   :  { %11346 = vst [vmem:[#allocation228_spill] sm:$0xff] %v7585_v58  ;;  %v7609_v19 = vmul.f32 %v7511_v57, %v11351_v55  ;;  %v7613_v54 = vmul.f32 %v7497_v13, %v11352_v2  ;;  %v7617_v11 = vmul.f32 %v7504_v56, %v11352_v2  ;;  %v7623_v9 = vmul.f32 %v7497_v13, %v11353_v61  ;;  %v11354_v22 = vld [vmem:[#allocation55_spill] sm:$0xff]  ;;  %v11426_v58 = vld [vmem:[#allocation13_spill] sm:$0xff] }
 0x331   :  { %v2097_v49 = vadd.f32 %v7475_v5, %v7473_v14  ;;  %v2104_v8 = vmul.f32 %v7473_v14, %v7473_v14  ;;  %v2105_v12 = vmul.f32 %v7475_v5, %v7475_v5  ;;  %v7627_v26 = vmul.f32 %v7504_v56, %v11353_v61 }
 0x332   :  { %v7631_v39 = vmul.f32 %v7490_v46, %v11354_v22  ;;  %v7635_v30 = vmul.f32 %v7511_v57, %v11354_v22  ;;  %v7663_v33 = vmul.f32 %v7497_v13, %v11365_v47  ;;  %v7671_v55 = vmul.f32 %v7490_v46, %v11368_v59 }
 0x333   :  { %2107 = vadd.xlane.f32.xlu1 %v2106_v28  ;;  %2098 = vadd.xlane.f32.xlu0 %v2097_v49  ;;  %v2109_v31 = vadd.f32 %v2105_v12, %v2104_v8  ;;  %v11356_v28 = vld [vmem:[#allocation73_spill] sm:$0xff]  ;;  %v7651_v8 = vmul.f32 %v7511_v57, %v11359_v45  ;;  %v7691_v41 = vmul.f32 %v7490_v46, %v11374_v17 }
 0x334   :  { %11355 = vst [vmem:[#allocation174_spill] sm:$0xff] %v7631_v39  ;;  %v7639_v49 = vmul.f32 %v7497_v13, %v11356_v28  ;;  %v7643_v42 = vmul.f32 %v7504_v56, %v11356_v28  ;;  %v11362_v12 = vld [vmem:[#allocation81_spill] sm:$0xff]  ;;  %11366 = vst [vmem:[#allocation231_spill] sm:$0xff] %v7663_v33  ;;  %v7679_v28 = vmul.f32 %v7511_v57, %v11368_v59 }
 0x335   :  { %11361 = vst [vmem:[#allocation225_spill] sm:$0xff] %v7651_v8  ;;  %v7659_v53 = vmul.f32 %v7511_v57, %v11362_v12  ;;  %11369 = vst [vmem:[#allocation226_spill] sm:$0xff] %v7671_v55  ;;  %v7703_v60 = vmul.f32 %v7497_v13, %v11379_v27  ;;  %v7711_v37 = vmul.f32 %v7490_v46, %v11382_v15  ;;  %v11409_v33 = vld [vmem:[#allocation77_spill] sm:$0xff] }
 0x336   :  { %11357 = vst [vmem:[#allocation175_spill] sm:$0xff] %v7639_v49  ;;  %11358 = vst [vmem:[#allocation160_spill] sm:$0xff] %v7643_v42  ;;  %v7719_v62 = vmul.f32 %v7497_v13, %v11385_v36  ;;  %v11420_v8 = vld [vmem:[#allocation149_spill] sm:$0xff] }
 0x337   :  { %2070 = vadd.xlane.f32.xlu0 %v2069_v24  ;;  %v7647_v24 = vmul.f32 %v7490_v46, %v11359_v45  ;;  %11364 = vst [vmem:[#allocation221_spill] sm:$0xff] %v7659_v53  ;;  %11370 = vst [vmem:[#allocation177_spill] sm:$0xff] %v7679_v28  ;;  %v11371_v45 = vld [vmem:[#allocation101_spill] sm:$0xff]  ;;  %v11414_v53 = vld [vmem:[#allocation180_spill] sm:$0xff] }
 0x338   :  { %11375 = vst [vmem:[#allocation155_spill] sm:$0xff] %v7691_v41  ;;  %11380 = vst [vmem:[#allocation233_spill] sm:$0xff] %v7703_v60  ;;  %v11388_v41 = vld [vmem:[#allocation188_spill] sm:$0xff] }
 0x339   :  { %11360 = vst [vmem:[#allocation167_spill] sm:$0xff] %v7647_v24  ;;  %11383 = vst [vmem:[#allocation236_spill] sm:$0xff] %v7711_v37  ;;  %v11418_v24 = vld [vmem:[#allocation24_spill] sm:$0xff] }
 0x33a   :  { %11386 = vst [vmem:[#allocation223_spill] sm:$0xff] %v7719_v62 }
 0x33b   :  { %2110 = vadd.xlane.f32.xlu0 %v2109_v31  ;;  %v7655_v31 = vmul.f32 %v7490_v46, %v11362_v12  ;;  %v7683_v12 = vmul.f32 %v7497_v13, %v11371_v45 }
 0x33d   :  { %11363 = vst [vmem:[#allocation206_spill] sm:$0xff] %v7655_v31  ;;  %11372 = vst [vmem:[#allocation235_spill] sm:$0xff] %v7683_v12  ;;  %v11391_v12 = vld [vmem:[#allocation202_spill] sm:$0xff] }
 0x344   :  { %2838 = vrot.lane.b32.xlu1 %v7490_v46, %s5129_s28 }
 0x348   :  { %2842 = vrot.lane.b32.xlu1 %v7497_v13, %s5129_s28 }
 0x34c   :  { %2844 = vrot.lane.b32.xlu1 %v7504_v56, %s5129_s28 }
 0x350   :  { %2860 = vrot.lane.b32.xlu1 %v7511_v57, %s5132_s10 }
 0x351   :  { %2840 = vrot.lane.b32.xlu0 %v7511_v57, %s5129_s28 }
 0x354   :  { %2864 = vrot.lane.b32.xlu1 %v7504_v56, %s5132_s10 }
 0x355   :  { %2858 = vrot.lane.b32.xlu0 %v7490_v46, %s5132_s10 }
 0x358   :  { %2880 = vrot.lane.b32.xlu1 %v7511_v57, %s5133_s11 }
 0x359   :  { %2862 = vrot.lane.b32.xlu0 %v7497_v13, %s5132_s10 }
 0x35c   :  { %2884 = vrot.lane.b32.xlu1 %v7504_v56, %s5133_s11 }
 0x35d   :  { %2878 = vrot.lane.b32.xlu0 %v7490_v46, %s5133_s11 }
 0x360   :  { %2900 = vrot.lane.b32.xlu1 %v7511_v57, %s5134_s12 }
 0x361   :  { %2882 = vrot.lane.b32.xlu0 %v7497_v13, %s5133_s11 }
 0x364   :  { %2904 = vrot.lane.b32.xlu1 %v7504_v56, %s5134_s12 }
 0x365   :  { %2898 = vrot.lane.b32.xlu0 %v7490_v46, %s5134_s12 }
 0x368   :  { %2920 = vrot.lane.b32.xlu1 %v7511_v57, %s5135_s13 }
 0x369   :  { %2902 = vrot.lane.b32.xlu0 %v7497_v13, %s5134_s12 }
 0x36c   :  { %2924 = vrot.lane.b32.xlu1 %v7504_v56, %s5135_s13 }
 0x36d   :  { %2918 = vrot.lane.b32.xlu0 %v7490_v46, %s5135_s13 }
 0x370   :  { %2940 = vrot.lane.b32.xlu1 %v7511_v57, %s5136_s14 }
 0x371   :  { %2922 = vrot.lane.b32.xlu0 %v7497_v13, %s5135_s13 }
 0x374   :  { %2944 = vrot.lane.b32.xlu1 %v7504_v56, %s5136_s14 }
 0x375   :  { %2938 = vrot.lane.b32.xlu0 %v7490_v46, %s5136_s14 }
 0x379   :  { %2942 = vrot.lane.b32.xlu0 %v7497_v13, %s5136_s14 }
 0x3b4   :  { %v2055_v1 = vpop.xlane.xlu0 %2054 }
 0x3b5   :  { %v7619_v43 = vmul.f32 0.00390625, %v2055_v1  ;;  %v7667_v1 = vmul.f32 %v7504_v56, %v11365_v47  ;;  %v7687_v47 = vmul.f32 %v7504_v56, %v11371_v45  ;;  %v7707_v45 = vmul.f32 %v7504_v56, %v11379_v27 }
 0x3b7   :  { %11367 = vst [vmem:[#allocation7_spill] sm:$0xff] %v7667_v1  ;;  %v2078_v2 = vmul.f32 %v7619_v43, %v7619_v43  ;;  %11373 = vst [vmem:[#allocation234_spill] sm:$0xff] %v7687_v47  ;;  %v11394_v47 = vld [vmem:[#allocation6_spill] sm:$0xff] }
 0x3b8   :  { %v2058_v4 = vpop.xlane.xlu1 %2057  ;;  %11381 = vst [vmem:[#allocation227_spill] sm:$0xff] %v7707_v45  ;;  %v7749_v62 = vmul.f32 %v7490_v46, %v11394_v47  ;;  %v11413_v45 = vld [vmem:[#allocation9_spill] sm:$0xff] }
 0x3ba   :  { %11395 = vst [vmem:[#allocation158_spill] sm:$0xff] %v7749_v62 }
 0x3bc   :  { %v2096_v16 = vpop.xlane.xlu0 %2095  ;;  %v2068_v35 = vpop.xlane.xlu1 %2067 }
 0x3bd   :  { %v7675_v61 = vmul.f32 0.00390625, %v2096_v16  ;;  %v2072_v22 = vmul.f32 0.00390625, %v2068_v35  ;;  %v7695_v16 = vmul.f32 %v7511_v57, %v11374_v17  ;;  %v11377_v35 = vld [vmem:[#allocation114_spill] sm:$0xff]  ;;  %v7715_v17 = vmul.f32 %v7511_v57, %v11382_v15 }
 0x3be   :  { %v7699_v59 = vmul.f32 %v7504_v56, %v11377_v35  ;;  %v7727_v35 = vmul.f32 %v7504_v56, %v11385_v36  ;;  %v7731_v15 = vmul.f32 %v7490_v46, %v11388_v41 }
 0x3bf   :  { %11376 = vst [vmem:[#allocation222_spill] sm:$0xff] %v7695_v16  ;;  %v2080_v48 = vsub.f32 %v2072_v22, %v2078_v2  ;;  %11384 = vst [vmem:[#allocation230_spill] sm:$0xff] %v7715_v17  ;;  %v2118_v27 = vmul.f32 %v7675_v61, %v7675_v61  ;;  %v7735_v16 = vmul.f32 %v7511_v57, %v11388_v41 }
 0x3c0   :  { %11378 = vst [vmem:[#allocation212_spill] sm:$0xff] %v7699_v59  ;;  %v2099_v0 = vpop.xlane.xlu0 %2098  ;;  %v2108_v23 = vpop.xlane.xlu1 %2107  ;;  %v7721_v59 = vmul.f32 0.00390625, %v2058_v4  ;;  %11387 = vst [vmem:[#allocation229_spill] sm:$0xff] %v7727_v35  ;;  %v7739_v4 = vmul.f32 %v7497_v13, %v11391_v12  ;;  %v7753_v41 = vmul.f32 %v7511_v57, %v11394_v47  ;;  %v2074_v13 = vsub.f32 %v7429_v10, %v7619_v43  ;;  %v11397_v47 = vld [vmem:[#allocation148_spill] sm:$0xff]  ;;  %v11405_v35 = vld [vmem:[#allocation38_spill] sm:$0xff] }
 0x3c1   :  { %v2082_v2 = vadd.f32 1e-05, %v2080_v48  ;;  %v2112_v22 = vmul.f32 0.00390625, %v2108_v23  ;;  %11389 = vst [vmem:[#allocation154_spill] sm:$0xff] %v7731_v15  ;;  %11390 = vst [vmem:[#allocation232_spill] sm:$0xff] %v7735_v16  ;;  %v7743_v48 = vmul.f32 %v7504_v56, %v11391_v12  ;;  %v7745_v23 = vmul.f32 0.00390625, %v2099_v0 }
 0x3c2   :  { %11392 = vst [vmem:[#allocation224_spill] sm:$0xff] %v7739_v4  ;;  %11396 = vst [vmem:[#allocation162_spill] sm:$0xff] %v7753_v41  ;;  %v2075_v4 = vsub.f32 %v7431_v3, %v7619_v43  ;;  %v2114_v10 = vsub.f32 %v7461_v18, %v7675_v61  ;;  %v2115_v43 = vsub.f32 %v7463_v21, %v7675_v61  ;;  %v11399_v41 = vld [vmem:[#allocation176_spill] sm:$0xff] }
 0x3c3   :  { %11393 = vst [vmem:[#allocation161_spill] sm:$0xff] %v7743_v48  ;;  %4921 = vrsqrt.f32 %v2082_v2  ;;  %v2120_v36 = vsub.f32 %v2112_v22, %v2118_v27  ;;  %v2079_v27 = vmul.f32 %v7721_v59, %v7721_v59  ;;  %v2119_v57 = vmul.f32 %v7745_v23, %v7745_v23  ;;  %v11400_v48 = vld [vmem:[#allocation10_spill] sm:$0xff] }
 0x3c4   :  { %v2071_v56 = vpop.xlane.xlu0 %2070  ;;  %v2839_v12 = vpop.permute.xlu1 %2838 }
 0x3c5   :  { %v2122_v2 = vadd.f32 1e-05, %v2120_v36  ;;  %v2073_v0 = vmul.f32 0.00390625, %v2071_v56  ;;  %v2852_v46 = vsel %vm93_vm0, 0.0, %v2839_v12  ;;  %v11403_v36 = vld [vmem:[#allocation22_spill] sm:$0xff] }
 0x3c6   :  { %v7770_v3 = vsel %vm41_vm3, %v2852_v46, 0.0 }
 0x3c7   :  { %11398 = vst [vmem:[#allocation29_spill] sm:$0xff] %v7770_v3  ;;  %4923 = vrsqrt.f32 %v2122_v2  ;;  %v2081_v56 = vsub.f32 %v2073_v0, %v2079_v27  ;;  %v2958_v46 = vmul.f32 %v7770_v3, %v11399_v41  ;;  %v7784_v15 = vmul.f32 %v7770_v3, %v11400_v48  ;;  %v11401_v0 = vld [vmem:[#allocation20_spill] sm:$0xff] }
 0x3c8   :  { %v2111_v62 = vpop.xlane.xlu0 %2110  ;;  %v2843_v18 = vpop.permute.xlu1 %2842  ;;  %v7789_v27 = vmul.f32 %v7770_v3, %v11401_v0  ;;  %v7797_v16 = vmul.f32 %v7770_v3, %v11403_v36  ;;  %v7801_v55 = vmul.f32 %v7770_v3, %v11405_v35  ;;  %v7809_v1 = vmul.f32 %v7770_v3, %v11409_v33 }
 0x3c9   :  { %v2083_v21 = vadd.f32 1e-05, %v2081_v56  ;;  %v2113_v61 = vmul.f32 0.00390625, %v2111_v62  ;;  %v2853_v2 = vsel %vm93_vm0, 0.0, %v2843_v18  ;;  %v11407_v56 = vld [vmem:[#allocation40_spill] sm:$0xff] }
 0x3ca   :  { %v7793_v22 = vsel %vm41_vm3, %v2853_v2, 0.0  ;;  %11404 = vst [vmem:[#allocation33_spill] sm:$0xff] %v7797_v16  ;;  %11406 = vst [vmem:[#allocation44_spill] sm:$0xff] %v7801_v55  ;;  %v7805_v62 = vmul.f32 %v7770_v3, %v11407_v56  ;;  %v11411_v2 = vld [vmem:[#allocation79_spill] sm:$0xff] }
 0x3cb   :  { %11402 = vst [vmem:[#allocation31_spill] sm:$0xff] %v7793_v22  ;;  %4925 = vrsqrt.f32 %v2083_v21  ;;  %v2121_v28 = vsub.f32 %v2113_v61, %v2119_v57  ;;  %11410 = vst [vmem:[#allocation48_spill] sm:$0xff] %v7809_v1  ;;  %v7813_v37 = vmul.f32 %v7770_v3, %v11411_v2  ;;  %v7817_v31 = vmul.f32 %v7793_v22, %v11413_v45  ;;  %v11415_v21 = vld [vmem:[#allocation11_spill] sm:$0xff]  ;;  %v11416_v61 = vld [vmem:[#allocation106_spill] sm:$0xff] }
 0x3cc   :  { %11408 = vst [vmem:[#allocation46_spill] sm:$0xff] %v7805_v62  ;;  %v2841_v17 = vpop.permute.xlu0 %2840  ;;  %v2845_v60 = vpop.permute.xlu1 %2844  ;;  %v7821_v25 = vmul.f32 %v7793_v22, %v11414_v53  ;;  %v7825_v57 = vmul.f32 %v7793_v22, %v11415_v21  ;;  %v7829_v1 = vmul.f32 %v7770_v3, %v11416_v61  ;;  %v7835_v62 = vmul.f32 %v7793_v22, %v11418_v24  ;;  %v11425_v61 = vld [vmem:[#allocation14_spill] sm:$0xff] }
 0x3cd   :  { %11412 = vst [vmem:[#allocation49_spill] sm:$0xff] %v7813_v37  ;;  %v4922_v2 = vpop.eup %4921  ;;  %v2123_v37 = vadd.f32 1e-05, %v2121_v28  ;;  %v2846_v34 = vsel %vm93_vm0, %v2839_v12, %v2841_v17  ;;  %v2847_v33 = vsel %vm93_vm0, %v2843_v18, %v2845_v60  ;;  %vm11439_vm0 = vcmp.lt.f32.partialorder %v11397_v47, 15.0 }
 0x3ce   :  { %11417 = vst [vmem:[#allocation51_spill] sm:$0xff] %v7829_v1  ;;  %11419 = vst [vmem:[#allocation53_spill] sm:$0xff] %v7835_v62  ;;  %v7839_v49 = vsel %vm42_vm7, %v2846_v34, 0.0  ;;  %v7843_v56 = vsel %vm42_vm7, %v2847_v33, 0.0  ;;  %v7845_v3 = vmul.f32 %v4922_v2, %v2075_v4  ;;  %v7847_v1 = vmul.f32 %v4922_v2, %v2074_v13 }
 0x3cf   :  { %11421 = vst [vmem:[#allocation55_spill] sm:$0xff] %v7839_v49  ;;  %11422 = vst [vmem:[#allocation73_spill] sm:$0xff] %v7843_v56  ;;  %4927 = vrsqrt.f32 %v2123_v37  ;;  %v2959_v60 = vmul.f32 %v7839_v49, %v11399_v41  ;;  %v2961_v28 = vmul.f32 %v7843_v56, %v11413_v45  ;;  %v2963_v17 = vmul.f32 %v7839_v49, %v11400_v48 }
 0x3d0   :  { %v2859_v34 = vpop.permute.xlu0 %2858  ;;  %v2861_v12 = vpop.permute.xlu1 %2860  ;;  %v2965_v33 = vmul.f32 %v7843_v56, %v11414_v53  ;;  %v3111_v4 = vmul.f32 %v7839_v49, %v11401_v0  ;;  %v7865_v48 = vmul.f32 %v7843_v56, %v11415_v21  ;;  %v7869_v2 = vmul.f32 %v7839_v49, %v11403_v36 }
 0x3d1   :  { %v4924_v18 = vpop.eup %4923  ;;  %v2872_v41 = vsel %vm118_vm1, 0.0, %v2859_v34  ;;  %v2866_v45 = vsel %vm118_vm1, %v2859_v34, %v2861_v12  ;;  %v11424_v34 = vld [vmem:[#allocation12_spill] sm:$0xff]  ;;  %vm11451_vm7 = vcmp.lt.f32.partialorder %v11420_v8, 14.0 }
 0x3d2   :  { %v7873_v53 = vsel %vm43_vm4, %v2872_v41, 0.0  ;;  %v7877_v0 = vsel %vm44_vm8, %v2866_v45, 0.0  ;;  %v2127_v37 = vmul.f32 %v4924_v18, %v2115_v43  ;;  %v7879_v13 = vmul.f32 %v4924_v18, %v2114_v10  ;;  %v11427_v18 = vld [vmem:[#allocation8_spill] sm:$0xff] }
 0x3d3   :  { %11423 = vst [vmem:[#allocation75_spill] sm:$0xff] %v7873_v53  ;;  %v2967_v12 = vmul.f32 %v7877_v0, %v11424_v34  ;;  %v2966_v21 = vmul.f32 %v7873_v53, %v11424_v34  ;;  %v2975_v36 = vmul.f32 %v7877_v0, %v11425_v61  ;;  %v2974_v41 = vmul.f32 %v7873_v53, %v11425_v61 }
 0x3d4   :  { %v2863_v42 = vpop.permute.xlu0 %2862  ;;  %v2865_v52 = vpop.permute.xlu1 %2864  ;;  %v3119_v45 = vmul.f32 %v7877_v0, %v11426_v58  ;;  %v3118_v10 = vmul.f32 %v7873_v53, %v11426_v58  ;;  %v2131_v43 = vmax.f32 %v2127_v37, 0.0 }
 0x3d5   :  { %v7894_v55 = vpop.eup %4925  ;;  %v2873_v34 = vsel %vm118_vm1, 0.0, %v2863_v42  ;;  %v2867_v50 = vsel %vm118_vm1, %v2863_v42, %v2865_v52  ;;  %v2971_v49 = vadd.f32 %v2967_v12, %v2959_v60  ;;  %v2970_v35 = vadd.f32 %v2966_v21, %v2958_v46  ;;  %v11428_v52 = vld [vmem:[#allocation16_spill] sm:$0xff] }
 0x3d6   :  { %v7900_v61 = vsel %vm43_vm4, %v2873_v34, 0.0  ;;  %v7904_v6 = vsel %vm44_vm8, %v2867_v50, 0.0  ;;  %v2979_v58 = vadd.f32 %v2975_v36, %v2963_v17  ;;  %v2978_v37 = vadd.f32 %v2974_v41, %v7784_v15 }
 0x3d7   :  { %v2969_v62 = vmul.f32 %v7904_v6, %v11427_v18  ;;  %v2968_v39 = vmul.f32 %v7900_v61, %v11427_v18  ;;  %v2977_v42 = vmul.f32 %v7904_v6, %v11428_v52  ;;  %v2976_v46 = vmul.f32 %v7900_v61, %v11428_v52 }
 0x3d8   :  { %v2879_v60 = vpop.permute.xlu0 %2878  ;;  %v2881_v12 = vpop.permute.xlu1 %2880  ;;  %v7915_v21 = vadd.f32 %v3119_v45, %v3111_v4  ;;  %v7918_v50 = vadd.f32 %v3118_v10, %v7789_v27  ;;  %v11429_v15 = vsub.f32 %v7448_v20, %v7721_v59  ;;  %v11430_v36 = vmax.f32 %v7845_v3, 0.0 }
 0x3d9   :  { %v7930_v18 = vpop.eup %4927  ;;  %v2892_v34 = vsel %vm143_vm2, 0.0, %v2879_v60  ;;  %v2886_v4 = vsel %vm143_vm2, %v2879_v60, %v2881_v12  ;;  %v2973_v45 = vadd.f32 %v2969_v62, %v2961_v28  ;;  %v2972_v27 = vadd.f32 %v2968_v39, %v7817_v31  ;;  %v11434_v31 = vld [vmem:[#allocation30_spill] sm:$0xff] }
 0x3da   :  { %v7924_v17 = vmul.f32 %v7894_v55, %v11429_v15  ;;  %v7928_v41 = vmin.f32 %v11430_v36, %v2131_v43  ;;  %v11431_v10 = vsub.f32 %v7473_v14, %v7745_v23  ;;  %v7943_v52 = vsel %vm45_vm5, %v2892_v34, 0.0  ;;  %v11433_v36 = vld [vmem:[#allocation17_spill] sm:$0xff] }
 0x3db   :  { %11432 = vst [vmem:[#allocation81_spill] sm:$0xff] %v7943_v52  ;;  %v7947_v43 = vsel %vm46_vm11, %v2886_v4, 0.0  ;;  %v2981_v15 = vadd.f32 %v2977_v42, %v2965_v33  ;;  %v2982_v39 = vmul.f32 %v7943_v52, %v11433_v36  ;;  %v2990_v28 = vmul.f32 %v7943_v52, %v11434_v31 }
 0x3dc   :  { %v7939_v20 = vmul.f32 %v7930_v18, %v11431_v10  ;;  %v2983_v62 = vmul.f32 %v7947_v43, %v11433_v36  ;;  %v2991_v14 = vmul.f32 %v7947_v43, %v11434_v31  ;;  %v2883_v60 = vpop.permute.xlu0 %2882  ;;  %v2885_v12 = vpop.permute.xlu1 %2884  ;;  %v2980_v34 = vadd.f32 %v2976_v46, %v7821_v25  ;;  %v11435_v10 = vld [vmem:[#allocation32_spill] sm:$0xff] }
 0x3dd   :  { %v3135_v4 = vmul.f32 %v7947_v43, %v11435_v10  ;;  %v3134_v33 = vmul.f32 %v7943_v52, %v11435_v10  ;;  %v2893_v36 = vsel %vm143_vm2, 0.0, %v2883_v60  ;;  %v2887_v56 = vsel %vm143_vm2, %v2883_v60, %v2885_v12  ;;  %v11437_v52 = vld [vmem:[#allocation18_spill] sm:$0xff]  ;;  %vm11443_vm2 = vmmov %vm11439_vm0 }
 0x3de   :  { %v2987_v24 = vadd.f32 %v2983_v62, %v2971_v49  ;;  %v2986_v22 = vadd.f32 %v2982_v39, %v2970_v35  ;;  %v7967_v31 = vsel %vm45_vm5, %v2893_v36, 0.0  ;;  %v7971_v25 = vsel %vm46_vm11, %v2887_v56, 0.0  ;;  %v11438_v56 = vld [vmem:[#allocation19_spill] sm:$0xff] }
 0x3df   :  { %11436 = vst [vmem:[#allocation82_spill] sm:$0xff] %v7971_v25  ;;  %v2995_v46 = vadd.f32 %v2991_v14, %v2979_v58  ;;  %v2994_v16 = vadd.f32 %v2990_v28, %v2978_v37  ;;  %v2985_v53 = vmul.f32 %v7971_v25, %v11437_v52  ;;  %v2984_v49 = vmul.f32 %v7967_v31, %v11437_v52  ;;  %v11441_v14 = vld [vmem:[#allocation37_spill] sm:$0xff] }
 0x3e0   :  { %v3003_v10 = vadd.f32 %v7601_v40, %v2987_v24  ;;  %v3002_v42 = vadd.f32 %v7597_v51, %v2986_v22  ;;  %v2899_v35 = vpop.permute.xlu0 %2898  ;;  %v2901_v62 = vpop.permute.xlu1 %2900  ;;  %v2993_v58 = vmul.f32 %v7971_v25, %v11438_v56  ;;  %v2992_v40 = vmul.f32 %v7967_v31, %v11438_v56 }
 0x3e1   :  { %v3011_v39 = vadd.f32 %v7609_v19, %v2995_v46  ;;  %v3010_v60 = vadd.f32 %v7605_v44, %v2994_v16  ;;  %v2906_v51 = vsel %vm168_vm6, %v2899_v35, %v2901_v62  ;;  %v2912_v24 = vsel %vm168_vm6, %v2901_v62, 0.0  ;;  %v11442_v46 = vld [vmem:[#allocation65_spill] sm:$0xff] }
 0x3e2   :  { %v2989_v22 = vadd.f32 %v2985_v53, %v2973_v45  ;;  %v2988_v37 = vadd.f32 %v2984_v49, %v2972_v27  ;;  %v7989_v52 = vsel %vm11439_vm0, %v2906_v51, 0.0  ;;  %vm11440_vm1 = vcmp.lt.f32.partialorder %v11420_v8, 15.0 }
 0x3e3   :  { %v7993_v19 = vsel %vm11440_vm1, %v2912_v24, 0.0  ;;  %v2997_v44 = vadd.f32 %v2993_v58, %v2981_v15  ;;  %v2996_v16 = vadd.f32 %v2992_v40, %v2980_v34  ;;  %v3014_v12 = vmul.f32 %v7989_v52, %v11441_v14  ;;  %vm11444_vm3 = vmmov %vm11440_vm1 }
 0x3e4   :  { %v3015_v28 = vmul.f32 %v7993_v19, %v11441_v14  ;;  %v3005_v36 = vadd.f32 %v7561_v38, %v2989_v22  ;;  %v3004_v53 = vadd.f32 %v7557_v63, %v2988_v37  ;;  %v2903_v45 = vpop.permute.xlu0 %2902  ;;  %v2905_v27 = vpop.permute.xlu1 %2904  ;;  %v3023_v49 = vmul.f32 %v7993_v19, %v11442_v46  ;;  %v11445_v22 = vld [vmem:[#allocation63_spill] sm:$0xff]  ;;  %vm11458_vm1 = vmmov %vm11451_vm7 }
 0x3e5   :  { %v3022_v35 = vmul.f32 %v7989_v52, %v11442_v46  ;;  %v3013_v15 = vadd.f32 %v7617_v11, %v2997_v44  ;;  %v3012_v34 = vadd.f32 %v7613_v54, %v2996_v16  ;;  %v2907_v62 = vsel %vm168_vm6, %v2903_v45, %v2905_v27  ;;  %v11446_v37 = vld [vmem:[#allocation39_spill] sm:$0xff] }
 0x3e6   :  { %v2913_v56 = vsel %vm168_vm6, %v2905_v27, 0.0  ;;  %v3019_v58 = vadd.f32 %v3015_v28, %v3003_v10  ;;  %v3018_v38 = vadd.f32 %v3014_v12, %v3002_v42  ;;  %v8011_v63 = vsel %vm11443_vm2, %v2907_v62, 0.0  ;;  %v11447_v28 = vld [vmem:[#allocation67_spill] sm:$0xff] }
 0x3e7   :  { %v8015_v40 = vsel %vm11444_vm3, %v2913_v56, 0.0  ;;  %v3027_v51 = vadd.f32 %v3023_v49, %v3011_v39  ;;  %v3026_v24 = vadd.f32 %v3022_v35, %v3010_v60  ;;  %v3016_v54 = vmul.f32 %v8011_v63, %v11445_v22 }
 0x3e8   :  { %v3017_v11 = vmul.f32 %v8015_v40, %v11445_v22  ;;  %v3025_v10 = vmul.f32 %v8015_v40, %v11446_v37  ;;  %v3024_v42 = vmul.f32 %v8011_v63, %v11446_v37  ;;  %v2919_v44 = vpop.permute.xlu0 %2918  ;;  %v2921_v16 = vpop.permute.xlu1 %2920  ;;  %v3139_v14 = vadd.f32 %v3135_v4, %v7915_v21  ;;  %v11453_v22 = vld [vmem:[#allocation88_spill] sm:$0xff] }
 0x3e9   :  { %v3167_v39 = vmul.f32 %v7993_v19, %v11447_v28  ;;  %v3138_v60 = vadd.f32 %v3134_v33, %v7918_v50  ;;  %v3166_v12 = vmul.f32 %v7989_v52, %v11447_v28  ;;  %vm11448_vm4 = vcmask 1031168   ;;  %v11452_v50 = vld [vmem:[#allocation86_spill] sm:$0xff] }
 0x3ea   :  { %v2926_v45 = vsel %vm11448_vm4, %v2919_v44, %v2921_v16  ;;  %vm11449_vm5 = vmmov %vm11448_vm4  ;;  %v3021_v46 = vadd.f32 %v3017_v11, %v3005_v36  ;;  %v3020_v49 = vadd.f32 %v3016_v54, %v3004_v53  ;;  %vm11450_vm6 = vcmp.lt.f32.partialorder %v11397_v47, 14.0  ;;  %v11454_v44 = vld [vmem:[#allocation56_spill] sm:$0xff] }
 0x3eb   :  { %v2932_v27 = vsel %vm11449_vm5, %v2921_v16, 0.0  ;;  %v8035_v35 = vsel %vm11450_vm6, %v2926_v45, 0.0  ;;  %v3029_v4 = vadd.f32 %v3025_v10, %v3013_v15  ;;  %v3028_v62 = vadd.f32 %v3024_v42, %v3012_v34  ;;  %vm11455_vm8 = vmmov %vm11448_vm4 }
 0x3ec   :  { %v8039_v21 = vsel %vm11451_vm7, %v2932_v27, 0.0  ;;  %v3030_v56 = vmul.f32 %v8035_v35, %v11452_v50  ;;  %v3038_v53 = vmul.f32 %v8035_v35, %v11453_v22  ;;  %v2923_v11 = vpop.permute.xlu0 %2922  ;;  %v2925_v54 = vpop.permute.xlu1 %2924  ;;  %v3155_v37 = vadd.f32 %v7569_v29, %v3139_v14  ;;  %vm11456_vm11 = vmmov %vm11448_vm4 }
 0x3ed   :  { %v3031_v33 = vmul.f32 %v8039_v21, %v11452_v50  ;;  %v3039_v36 = vmul.f32 %v8039_v21, %v11453_v22  ;;  %v3183_v15 = vmul.f32 %v8039_v21, %v11454_v44  ;;  %v3154_v34 = vadd.f32 %v7565_v7, %v3138_v60  ;;  %vm11457_vm0 = vmmov %vm11450_vm6  ;;  %v11459_v7 = vld [vmem:[#allocation54_spill] sm:$0xff] }
 0x3ee   :  { %v3182_v10 = vmul.f32 %v8035_v35, %v11454_v44  ;;  %v2927_v42 = vsel %vm11455_vm8, %v2923_v11, %v2925_v54  ;;  %v2933_v16 = vsel %vm11456_vm11, %v2925_v54, 0.0  ;;  %v3034_v45 = vadd.f32 %v3030_v56, %v3018_v38  ;;  %v11460_v11 = vld [vmem:[#allocation90_spill] sm:$0xff] }
 0x3ef   :  { %v3035_v28 = vadd.f32 %v3031_v33, %v3019_v58  ;;  %v8059_v27 = vsel %vm11457_vm0, %v2927_v42, 0.0  ;;  %v8063_v29 = vsel %vm11458_vm1, %v2933_v16, 0.0  ;;  %v3043_v14 = vadd.f32 %v3039_v36, %v3027_v51 }
 0x3f0   :  { %v3042_v50 = vadd.f32 %v3038_v53, %v3026_v24  ;;  %v3033_v60 = vmul.f32 %v8063_v29, %v11459_v7  ;;  %v3032_v22 = vmul.f32 %v8059_v27, %v11459_v7  ;;  %v3041_v58 = vmul.f32 %v8063_v29, %v11460_v11  ;;  %v2939_v33 = vpop.permute.xlu0 %2938  ;;  %v2941_v56 = vpop.permute.xlu1 %2940 }
 0x3f1   :  { %v3040_v38 = vmul.f32 %v8059_v27, %v11460_v11  ;;  %v3171_v54 = vadd.f32 %v3167_v39, %v3155_v37  ;;  %v3170_v44 = vadd.f32 %v3166_v12, %v3154_v34  ;;  %v11461_v51 = vsub.f32 %v7475_v5, %v7745_v23  ;;  %v11466_v23 = vld [vmem:[#allocation116_spill] sm:$0xff]  ;;  %v11467_v37 = vld [vmem:[#allocation117_spill] sm:$0xff] }
 0x3f2   :  { %v2139_v36 = vmul.f32 2.0, %v7928_v41  ;;  %vm11462_vm2 = vcmask 1022976   ;;  %v3037_v16 = vadd.f32 %v3033_v60, %v3021_v46  ;;  %v3036_v7 = vadd.f32 %v3032_v22, %v3020_v49 }
 0x3f3   :  { %v2129_v24 = vmul.f32 %v7930_v18, %v11461_v51  ;;  %v2946_v53 = vsel %vm11462_vm2, %v2939_v33, %v2941_v56  ;;  %vm11463_vm3 = vmmov %vm11462_vm2  ;;  %vm11464_vm4 = vcmp.lt.f32.partialorder %v11397_v47, 13.0  ;;  %vm11465_vm5 = vcmp.lt.f32.partialorder %v11420_v8, 13.0  ;;  %v11468_v33 = vld [vmem:[#allocation74_spill] sm:$0xff] }
 0x3f4   :  { %v2952_v42 = vsel %vm11463_vm3, %v2941_v56, 0.0  ;;  %v8082_v11 = vsel %vm11464_vm4, %v2946_v53, 0.0  ;;  %v3045_v12 = vadd.f32 %v3041_v58, %v3029_v4  ;;  %v3044_v5 = vadd.f32 %v3040_v38, %v3028_v62  ;;  %v2943_v34 = vpop.permute.xlu0 %2942  ;;  %v2945_v60 = vpop.permute.xlu1 %2944  ;;  %vm11469_vm6 = vmmov %vm11462_vm2 }
 0x3f5   :  { %v8086_v39 = vsel %vm11465_vm5, %v2952_v42, 0.0  ;;  %v3046_v41 = vmul.f32 %v8082_v11, %v11466_v23  ;;  %v3054_v49 = vmul.f32 %v8082_v11, %v11467_v37  ;;  %v3187_v22 = vadd.f32 %v3183_v15, %v3171_v54  ;;  %vm11470_vm7 = vmmov %vm11462_vm2 }
 0x3f6   :  { %v3047_v18 = vmul.f32 %v8086_v39, %v11466_v23  ;;  %v3055_v46 = vmul.f32 %v8086_v39, %v11467_v37  ;;  %v3199_v56 = vmul.f32 %v8086_v39, %v11468_v33  ;;  %v3186_v4 = vadd.f32 %v3182_v10, %v3170_v44  ;;  %vm11471_vm8 = vmmov %vm11464_vm4  ;;  %v11473_v10 = vld [vmem:[#allocation72_spill] sm:$0xff] }
 0x3f7   :  { %v3198_v62 = vmul.f32 %v8082_v11, %v11468_v33  ;;  %v2947_v58 = vsel %vm11469_vm6, %v2943_v34, %v2945_v60  ;;  %v2953_v38 = vsel %vm11470_vm7, %v2945_v60, 0.0  ;;  %v3050_v53 = vadd.f32 %v3046_v41, %v3034_v45  ;;  %vm11472_vm11 = vmmov %vm11465_vm5  ;;  %v11474_v45 = vld [vmem:[#allocation119_spill] sm:$0xff] }
 0x3f8   :  { %v3051_v51 = vadd.f32 %v3047_v18, %v3035_v28  ;;  %v8104_v42 = vsel %vm11471_vm8, %v2947_v58, 0.0  ;;  %v8108_v15 = vsel %vm11472_vm11, %v2953_v38, 0.0  ;;  %v3059_v54 = vadd.f32 %v3055_v46, %v3043_v14  ;;  %v11483_v38 = vld [vmem:[#allocation92_spill] sm:$0xff] }
 0x3f9   :  { %v3058_v23 = vadd.f32 %v3054_v49, %v3042_v50  ;;  %3066 = vrot.lane.b32.xlu0 %v3050_v53, %s5184_s2  ;;  %v3049_v44 = vmul.f32 %v8108_v15, %v11473_v10  ;;  %v3048_v28 = vmul.f32 %v8104_v42, %v11473_v10  ;;  %v3057_v47 = vmul.f32 %v8108_v15, %v11474_v45  ;;  %v11484_v53 = vld [vmem:[#allocation121_spill] sm:$0xff] }
 0x3fa   :  { %3068 = vrot.lane.b32.xlu1 %v3051_v51, %s5184_s2  ;;  %v2133_v18 = vmax.f32 %v2129_v24, 0.0  ;;  %v3056_v8 = vmul.f32 %v8104_v42, %v11474_v45  ;;  %v8120_v41 = vadd.f32 %v3199_v56, %v3187_v22  ;;  %v8122_v14 = vadd.f32 %v3198_v62, %v3186_v4  ;;  %v11481_v62 = vld [vmem:[#allocation34_spill] sm:$0xff] }
 0x3fb   :  { %v11475_v50 = vmax.f32 %v7845_v3, 0.0  ;;  %v3053_v46 = vadd.f32 %v3049_v44, %v3037_v16  ;;  %v3052_v49 = vadd.f32 %v3048_v28, %v3036_v7  ;;  %v3061_v34 = vadd.f32 %v3057_v47, %v3045_v12  ;;  %v11480_v12 = vld [vmem:[#allocation26_spill] sm:$0xff] }
 0x3fc   :  { %v11476_v60 = vmax.f32 %v7924_v17, 0.0  ;;  %v3060_v58 = vadd.f32 %v3056_v8, %v3044_v5  ;;  %v11477_v22 = vsub.f32 %v7446_v32, %v7721_v59  ;;  %v2132_v4 = vmax.f32 %v7939_v20, 0.0 }
 0x3fd   :  { %v8126_v37 = vsub.f32 %v2139_v36, %v11475_v50  ;;  %3070 = vrot.lane.b32.xlu0 %v3052_v49, %s5184_s2  ;;  %v11478_v36 = vmax.f32 %v7879_v13, 0.0  ;;  %v11479_v16 = vmax.f32 %v7847_v1, 0.0  ;;  %v3121_v5 = vmul.f32 %v7904_v6, %v11480_v12 }
 0x3fe   :  { %v2137_v33 = vmin.f32 %v11476_v60, %v2133_v18  ;;  %v2088_v56 = vmul.f32 %v7894_v55, %v11477_v22  ;;  %3072 = vrot.lane.b32.xlu1 %v3053_v46, %s5184_s2  ;;  %v3137_v32 = vmul.f32 %v7971_v25, %v11481_v62  ;;  %v11482_v55 = vld [vmem:[#allocation42_spill] sm:$0xff]  ;;  %v3185_v51 = vmul.f32 %v8063_v29, %v11483_v38 }
 0x3ff   :  { %v2163_v24 = vmul.f32 %v8126_v37, %v8126_v37  ;;  %v2134_v7 = vmin.f32 %v11479_v16, %v11478_v36  ;;  %v3169_v20 = vmul.f32 %v8015_v40, %v11482_v55  ;;  %v3201_v10 = vmul.f32 %v8108_v15, %v11484_v53  ;;  %v11487_v36 = vld [vmem:[#allocation28_spill] sm:$0xff] }
 0x400   :  { %v2141_v3 = vmul.f32 2.0, %v2137_v33  ;;  %v2092_v59 = vmax.f32 %v2088_v56, 0.0  ;;  %v11485_v13 = vmov %v11476_v60  ;;  %v3125_v45 = vadd.f32 %v3121_v5, %v7865_v48  ;;  %v11488_v5 = vld [vmem:[#allocation21_spill] sm:$0xff] }
 0x401   :  { %v2138_v28 = vmul.f32 2.0, %v2134_v7  ;;  %v3120_v47 = vmul.f32 %v7900_v61, %v11480_v12  ;;  %v3136_v8 = vmul.f32 %v7967_v31, %v11481_v62  ;;  %v3168_v50 = vmul.f32 %v8011_v63, %v11482_v55  ;;  %3090 = vrot.lane.b32.xlu0 %v3058_v23, %s5184_s2  ;;  %v11489_v55 = vld [vmem:[#allocation69_spill] sm:$0xff] }
 0x402   :  { %v8155_v44 = vsub.f32 %v2141_v3, %v11485_v13  ;;  %v2136_v18 = vmin.f32 %v2092_v59, %v2132_v4  ;;  %v3184_v46 = vmul.f32 %v8059_v27, %v11483_v38  ;;  %3092 = vrot.lane.b32.xlu1 %v3059_v54, %s5184_s2  ;;  %v11486_v49 = vmov %v11479_v16 }
 0x403   :  { %v8174_v60 = vsub.f32 %v2138_v28, %v11486_v49  ;;  %v3141_v22 = vadd.f32 %v3137_v32, %v3125_v45  ;;  %v3124_v56 = vadd.f32 %v3120_v47, %v7825_v57  ;;  %v3200_v4 = vmul.f32 %v8104_v42, %v11484_v53  ;;  %v11491_v49 = vld [vmem:[#allocation123_spill] sm:$0xff] }
 0x404   :  { %v2153_v48 = vadd.f32 %v8155_v44, %v8126_v37  ;;  %v2165_v17 = vmul.f32 %v8155_v44, %v8155_v44  ;;  %v2140_v33 = vmul.f32 2.0, %v2136_v18  ;;  %v3127_v16 = vmul.f32 %v7877_v0, %v11487_v36 }
 0x405   :  { %v2162_v23 = vmul.f32 %v8174_v60, %v8174_v60  ;;  %v3157_v1 = vadd.f32 %v7627_v26, %v3141_v22  ;;  %v3140_v12 = vadd.f32 %v3136_v8, %v3124_v56  ;;  %v3143_v62 = vmul.f32 %v7947_v43, %v11488_v5  ;;  %3094 = vrot.lane.b32.xlu0 %v3060_v58, %s5184_s2  ;;  %v11490_v58 = vld [vmem:[#allocation94_spill] sm:$0xff] }
 0x406   :  { %v2154_v54 = vrot.slane %v2153_v48, 4  ;;  %v2173_v3 = vadd.f32 %v2165_v17, %v2163_v24  ;;  %v8183_v7 = vsub.f32 %v2140_v33, %v2092_v59  ;;  %3096 = vrot.lane.b32.xlu1 %v3061_v34, %s5184_s2  ;;  %v3131_v32 = vadd.f32 %v3127_v16, %v7869_v2  ;;  %v11492_v16 = vld [vmem:[#allocation75_spill] sm:$0xff] }
 0x407   :  { %v3175_v38 = vmul.f32 %v7993_v19, %v11489_v55  ;;  %v3173_v53 = vadd.f32 %v3169_v20, %v3157_v1  ;;  %v3156_v13 = vadd.f32 %v7623_v9, %v3140_v12  ;;  %v3191_v47 = vmul.f32 %v8039_v21, %v11490_v58 }
 0x408   :  { %v2155_v57 = vadd.f32 %v2154_v54, %v2153_v48  ;;  %v2174_v24 = vrot.slane %v2173_v3, 4  ;;  %v2146_v59 = vadd.f32 %v8183_v7, %v8174_v60  ;;  %v2164_v26 = vmul.f32 %v8183_v7, %v8183_v7 }
 0x409   :  { %v3147_v45 = vadd.f32 %v3143_v62, %v3131_v32  ;;  %v3189_v8 = vadd.f32 %v3185_v51, %v3173_v53  ;;  %v3172_v48 = vadd.f32 %v3168_v50, %v3156_v13  ;;  %3218 = vrot.lane.b32.xlu0 %v8122_v14, %s5185_s19  ;;  %v3207_v33 = vmul.f32 %v8086_v39, %v11491_v49  ;;  %v11493_v62 = vld [vmem:[#allocation81_spill] sm:$0xff]  ;;  %v11496_v53 = vld [vmem:[#allocation31_spill] sm:$0xff] }
 0x40a   :  { %v2156_v28 = vrot.slane %v2155_v57, 2  ;;  %v2175_v34 = vadd.f32 %v2174_v24, %v2173_v3  ;;  %v2147_v18 = vrot.slane %v2146_v59, 4  ;;  %v2166_v2 = vadd.f32 %v2164_v26, %v2162_v23  ;;  %3220 = vrot.lane.b32.xlu1 %v8120_v41, %s5185_s19 }
 0x40b   :  { %v3163_v9 = vadd.f32 %v7635_v30, %v3147_v45  ;;  %v3205_v54 = vadd.f32 %v3201_v10, %v3189_v8  ;;  %v3188_v3 = vadd.f32 %v3184_v46, %v3172_v48  ;;  %v3126_v41 = vmul.f32 %v11492_v16, %v11487_v36 }
 0x40c   :  { %v2157_v17 = vadd.f32 %v2156_v28, %v2155_v57  ;;  %v2176_v20 = vrot.slane %v2175_v34, 2  ;;  %v2148_v22 = vadd.f32 %v2147_v18, %v2146_v59  ;;  %v2167_v56 = vrot.slane %v2166_v2, 4  ;;  %v11494_v59 = vld [vmem:[#allocation33_spill] sm:$0xff] }
 0x40d   :  { %v3179_v50 = vadd.f32 %v3175_v38, %v3163_v9  ;;  %v3204_v14 = vadd.f32 %v3200_v4, %v3188_v3  ;;  %v3142_v57 = vmul.f32 %v11493_v62, %v11488_v5  ;;  %v3130_v10 = vadd.f32 %v3126_v41, %v11494_v59  ;;  %v11495_v38 = vld [vmem:[#allocation23_spill] sm:$0xff] }
 0x40e   :  { %v2158_v23 = vrot.slane %v2157_v17, 1  ;;  %v2177_v51 = vadd.f32 %v2176_v20, %v2175_v34  ;;  %v2149_v1 = vrot.slane %v2148_v22, 2  ;;  %v2168_v12 = vadd.f32 %v2167_v56, %v2166_v2  ;;  %3224 = vrot.lane.b32.xlu1 %v3205_v54, %s5185_s19  ;;  %v11498_v20 = vld [vmem:[#allocation73_spill] sm:$0xff]  ;;  %v11499_v56 = vld [vmem:[#allocation174_spill] sm:$0xff]  ;;  %v11502_v41 = vld [vmem:[#allocation71_spill] sm:$0xff] }
 0x40f   :  { %v3195_v32 = vadd.f32 %v3191_v47, %v3179_v50  ;;  %3222 = vrot.lane.b32.xlu0 %v3204_v14, %s5185_s19  ;;  %v3174_v36 = vmul.f32 %v7989_v52, %v11489_v55  ;;  %v8218_v4 = vmul.f32 %v11496_v53, %v11495_v38  ;;  %v3146_v34 = vadd.f32 %v3142_v57, %v3130_v10 }
 0x410   :  { %v2159_v30 = vadd.f32 %v2158_v23, %v2157_v17  ;;  %v2178_v24 = vrot.slane %v2177_v51, 1  ;;  %v2150_v46 = vadd.f32 %v2149_v1, %v2148_v22  ;;  %v2169_v26 = vrot.slane %v2168_v12, 2  ;;  %v11497_v17 = vld [vmem:[#allocation24_spill] sm:$0xff] }
 0x411   :  { %v3211_v28 = vadd.f32 %v3207_v33, %v3195_v32  ;;  %v3190_v18 = vmul.f32 %v8035_v35, %v11490_v58  ;;  %v3206_v2 = vmul.f32 %v8082_v11, %v11491_v49  ;;  %v3117_v9 = vmul.f32 %v11498_v20, %v11497_v17  ;;  %v11500_v58 = vld [vmem:[#allocation15_spill] sm:$0xff] }
 0x412   :  { %v8220_v13 = vmul.f32 0.0625, %v2159_v30  ;;  %v2179_v5 = vadd.f32 %v2178_v24, %v2177_v51  ;;  %v2151_v45 = vrot.slane %v2150_v46, 1  ;;  %v2170_v47 = vadd.f32 %v2169_v26, %v2168_v12  ;;  %v11501_v51 = vld [vmem:[#allocation36_spill] sm:$0xff]  ;;  %v11503_v30 = vld [vmem:[#allocation58_spill] sm:$0xff] }
 0x413   :  { %3244 = vrot.lane.b32.xlu1 %v3211_v28, %s5185_s19  ;;  %v3162_v54 = vadd.f32 %v11499_v56, %v3146_v34  ;;  %v3129_v3 = vmul.f32 %v7904_v6, %v11500_v58  ;;  %v3145_v50 = vmul.f32 %v7971_v25, %v11501_v51  ;;  %v3177_v1 = vmul.f32 %v8015_v40, %v11502_v41  ;;  %v11504_v34 = vld [vmem:[#allocation76_spill] sm:$0xff] }
 0x414   :  { %v2181_v8 = vmul.f32 0.0625, %v2179_v5  ;;  %v2183_v55 = vsub.f32 %v8126_v37, %v8220_v13  ;;  %v2187_v48 = vmul.f32 %v8220_v13, %v8220_v13  ;;  %v2152_v33 = vadd.f32 %v2151_v45, %v2150_v46 }
 0x415   :  { %v2171_v22 = vrot.slane %v2170_v47, 1  ;;  %v2185_v49 = vsub.f32 %v8155_v44, %v8220_v13  ;;  %v3178_v57 = vadd.f32 %v3174_v36, %v3162_v54  ;;  %v3193_v24 = vmul.f32 %v8063_v29, %v11503_v30  ;;  %v11506_v54 = vld [vmem:[#allocation178_spill] sm:$0xff]  ;;  %v11523_v13 = vld [vmem:[#allocation160_spill] sm:$0xff] }
 0x416   :  { %v2189_v23 = vsub.f32 %v2181_v8, %v2187_v48  ;;  %v8242_v12 = vmul.f32 0.0625, %v2152_v33  ;;  %v3133_v59 = vadd.f32 %v3129_v3, %v3117_v9  ;;  %v3128_v10 = vmul.f32 %v7900_v61, %v11500_v58  ;;  %v11505_v8 = vld [vmem:[#allocation53_spill] sm:$0xff] }
 0x417   :  { %v2172_v14 = vadd.f32 %v2171_v22, %v2170_v47  ;;  %v3144_v46 = vmul.f32 %v7967_v31, %v11501_v51  ;;  %v3209_v36 = vmul.f32 %v8108_v15, %v11504_v34  ;;  %v3194_v45 = vadd.f32 %v3190_v18, %v3178_v57  ;;  %v11507_v51 = vld [vmem:[#allocation38_spill] sm:$0xff]  ;;  %v11509_v57 = vld [vmem:[#allocation25_spill] sm:$0xff] }
 0x418   :  { %v2191_v32 = vadd.f32 1e-06, %v2189_v23  ;;  %v2182_v5 = vsub.f32 %v8174_v60, %v8242_v12  ;;  %v2186_v28 = vmul.f32 %v8242_v12, %v8242_v12  ;;  %v3149_v47 = vadd.f32 %v3145_v50, %v3133_v59  ;;  %v11508_v50 = vld [vmem:[#allocation55_spill] sm:$0xff]  ;;  %v11510_v59 = vld [vmem:[#allocation57_spill] sm:$0xff] }
 0x419   :  { %v2180_v26 = vmul.f32 0.0625, %v2172_v14  ;;  %v3132_v48 = vadd.f32 %v3128_v10, %v11505_v8  ;;  %v2184_v17 = vsub.f32 %v8183_v7, %v8242_v12  ;;  %v3176_v33 = vmul.f32 %v8011_v63, %v11502_v41 }
 0x41a   :  { %4929 = vrsqrt.f32 %v2191_v32  ;;  %v3192_v22 = vmul.f32 %v8059_v27, %v11503_v30  ;;  %v3210_v56 = vadd.f32 %v3206_v2, %v3194_v45  ;;  %v3165_v58 = vadd.f32 %v11506_v54, %v3149_v47  ;;  %v11511_v2 = vld [vmem:[#allocation170_spill] sm:$0xff] }
 0x41b   :  { %v2188_v9 = vsub.f32 %v2180_v26, %v2186_v28  ;;  %v3148_v3 = vadd.f32 %v3144_v46, %v3132_v48  ;;  %v3208_v18 = vmul.f32 %v8104_v42, %v11504_v34  ;;  %v3263_v14 = vmul.f32 %v11508_v50, %v11507_v51  ;;  %v11512_v26 = vld [vmem:[#allocation96_spill] sm:$0xff]  ;;  %v11513_v28 = vld [vmem:[#allocation125_spill] sm:$0xff] }
 0x41c   :  { %v3271_v32 = vmul.f32 %v7877_v0, %v11509_v57  ;;  %v3287_v41 = vmul.f32 %v7947_v43, %v11510_v59  ;;  %3242 = vrot.lane.b32.xlu0 %v3210_v56, %s5185_s19  ;;  %v3181_v30 = vadd.f32 %v3177_v1, %v3165_v58  ;;  %v3319_v46 = vmul.f32 %v7993_v19, %v11512_v26  ;;  %v11514_v56 = vld [vmem:[#allocation93_spill] sm:$0xff] }
 0x41d   :  { %v2190_v23 = vadd.f32 1e-06, %v2188_v9  ;;  %v3164_v10 = vadd.f32 %v11511_v2, %v3148_v3  ;;  %v3335_v34 = vmul.f32 %v8039_v21, %v11513_v28  ;;  %v3270_v47 = vmul.f32 %v11492_v16, %v11509_v57  ;;  %v11515_v3 = vld [vmem:[#allocation44_spill] sm:$0xff] }
 0x41e   :  { %v3275_v45 = vadd.f32 %v3271_v32, %v3263_v14  ;;  %v3286_v8 = vmul.f32 %v11493_v62, %v11510_v59  ;;  %v3197_v48 = vadd.f32 %v3193_v24, %v3181_v30  ;;  %v3351_v1 = vmul.f32 %v8086_v39, %v11514_v56  ;;  %v11516_v59 = vld [vmem:[#allocation43_spill] sm:$0xff]  ;;  %v11518_v2 = vld [vmem:[#allocation228_spill] sm:$0xff] }
 0x41f   :  { %4931 = vrsqrt.f32 %v2190_v23  ;;  %v3180_v9 = vadd.f32 %v3176_v33, %v3164_v10  ;;  %v3318_v54 = vmul.f32 %v7989_v52, %v11512_v26  ;;  %v3274_v51 = vadd.f32 %v3270_v47, %v11515_v3  ;;  %v11517_v33 = vld [vmem:[#allocation35_spill] sm:$0xff]  ;;  %v11521_v3 = vld [vmem:[#allocation156_spill] sm:$0xff] }
 0x420   :  { %v3291_v58 = vadd.f32 %v3287_v41, %v3275_v45  ;;  %v3334_v23 = vmul.f32 %v8035_v35, %v11513_v28  ;;  %v3265_v14 = vmul.f32 %v11498_v20, %v11495_v38  ;;  %v3213_v57 = vadd.f32 %v3209_v36, %v3197_v48  ;;  %v11519_v45 = vld [vmem:[#allocation60_spill] sm:$0xff] }
 0x421   :  { %v3196_v32 = vadd.f32 %v3192_v22, %v3180_v9  ;;  %v3273_v24 = vmul.f32 %v7904_v6, %v11516_v59  ;;  %v3289_v30 = vmul.f32 %v7971_v25, %v11517_v33  ;;  %v3290_v26 = vadd.f32 %v3286_v8, %v3274_v51  ;;  %v11520_v22 = vld [vmem:[#allocation78_spill] sm:$0xff] }
 0x422   :  { %v3307_v10 = vadd.f32 %v11518_v2, %v3291_v58  ;;  %v3350_v41 = vmul.f32 %v8082_v11, %v11514_v56  ;;  %v3321_v28 = vmul.f32 %v8015_v40, %v11519_v45  ;;  %3248 = vrot.lane.b32.xlu1 %v3213_v57, %s5185_s19  ;;  %v3337_v48 = vmul.f32 %v8063_v29, %v11520_v22  ;;  %v11524_v2 = vld [vmem:[#allocation40_spill] sm:$0xff] }
 0x423   :  { %v3212_v38 = vadd.f32 %v3208_v18, %v3196_v32  ;;  %v3277_v36 = vadd.f32 %v3273_v24, %v3265_v14  ;;  %v3272_v9 = vmul.f32 %v7900_v61, %v11516_v59  ;;  %v3306_v51 = vadd.f32 %v11521_v3, %v3290_v26  ;;  %v11522_v14 = vld [vmem:[#allocation153_spill] sm:$0xff]  ;;  %v11529_v3 = vld [vmem:[#allocation47_spill] sm:$0xff] }
 0x424   :  { %v4930_v47 = vpop.eup %4929  ;;  %v3323_v58 = vadd.f32 %v3319_v46, %v3307_v10  ;;  %v3353_v57 = vmul.f32 %v8108_v15, %v11522_v14  ;;  %v3288_v59 = vmul.f32 %v7967_v31, %v11517_v33  ;;  %v3320_v44 = vmul.f32 %v8011_v63, %v11519_v45  ;;  %v11525_v33 = vld [vmem:[#allocation45_spill] sm:$0xff] }
 0x425   :  { %v2195_v8 = vmul.f32 %v4930_v47, %v2183_v55  ;;  %v2197_v56 = vmul.f32 %v4930_v47, %v2185_v49  ;;  %3246 = vrot.lane.b32.xlu0 %v3212_v38, %s5185_s19  ;;  %v3293_v18 = vadd.f32 %v3289_v30, %v3277_v36  ;;  %v3276_v32 = vadd.f32 %v3272_v9, %v8218_v4  ;;  %v11527_v9 = vld [vmem:[#allocation175_spill] sm:$0xff] }
 0x426   :  { %v3339_v55 = vadd.f32 %v3335_v34, %v3323_v58  ;;  %v3322_v24 = vadd.f32 %v3318_v54, %v3306_v51  ;;  %v3336_v30 = vmul.f32 %v8059_v27, %v11520_v22  ;;  %v3267_v10 = vmul.f32 %v11508_v50, %v11524_v2  ;;  %v11526_v54 = vld [vmem:[#allocation59_spill] sm:$0xff] }
 0x427   :  { %v4717_v37 = vpack.c.bf16 %v2197_v56, %v2195_v8  ;;  %v3309_v49 = vadd.f32 %v11523_v13, %v3293_v18  ;;  %v3292_v46 = vadd.f32 %v3288_v59, %v3276_v32  ;;  %v3279_v34 = vmul.f32 %v7877_v0, %v11525_v33  ;;  %v11528_v56 = vld [vmem:[#allocation41_spill] sm:$0xff] }
 0x428   :  { %v3355_v4 = vadd.f32 %v3351_v1, %v3339_v55  ;;  %v3338_v47 = vadd.f32 %v3334_v23, %v3322_v24  ;;  %v3295_v38 = vmul.f32 %v7947_v43, %v11526_v54  ;;  %v3268_v58 = vmul.f32 %v11496_v53, %v11528_v56  ;;  %v11532_v24 = vld [vmem:[#allocation163_spill] sm:$0xff] }
 0x429   :  { %v4932_v26 = vpop.eup %4931  ;;  %4718 = vmatprep.subr.bf16.mxu0 %v4717_v37  ;;  %v3325_v22 = vadd.f32 %v3321_v28, %v3309_v49  ;;  %v3308_v8 = vadd.f32 %v11527_v9, %v3292_v46  ;;  %v3283_v23 = vadd.f32 %v3279_v34, %v3267_v10  ;;  %v8341_v51 = vmul.f32 %v11496_v53, %v11529_v3  ;;  %v11534_v49 = vld [vmem:[#allocation46_spill] sm:$0xff]  ;;  %v11535_v10 = vld [vmem:[#allocation27_spill] sm:$0xff]  ;;  %v11538_v9 = vld [vmem:[#allocation129_spill] sm:$0xff] }
 0x42a   :  { %v2194_v45 = vmul.f32 %v4932_v26, %v2182_v5  ;;  %v2196_v36 = vmul.f32 %v4932_v26, %v2184_v17  ;;  %3372 = vrot.lane.b32.xlu1 %v3355_v4, %s5186_s22  ;;  %v3354_v1 = vadd.f32 %v3350_v41, %v3338_v47  ;;  %v3352_v7 = vmul.f32 %v8104_v42, %v11522_v14  ;;  %v11530_v17 = vld [vmem:[#allocation98_spill] sm:$0xff]  ;;  %v11536_v47 = vld [vmem:[#allocation61_spill] sm:$0xff] }
 0x42b   :  { %v3341_v5 = vadd.f32 %v3337_v48, %v3325_v22  ;;  %v3324_v18 = vadd.f32 %v3320_v44, %v3308_v8  ;;  %v3299_v12 = vadd.f32 %v3295_v38, %v3283_v23  ;;  %v3327_v41 = vmul.f32 %v7993_v19, %v11530_v17  ;;  %v11531_v48 = vld [vmem:[#allocation127_spill] sm:$0xff]  ;;  %v11533_v44 = vld [vmem:[#allocation225_spill] sm:$0xff] }
 0x42c   :  { %v4719_v60 = vpack.c.bf16 %v2196_v36, %v2194_v45  ;;  %3370 = vrot.lane.b32.xlu0 %v3354_v1, %s5186_s22  ;;  %v3278_v28 = vmul.f32 %v11492_v16, %v11525_v33  ;;  %v3294_v32 = vmul.f32 %v11493_v62, %v11526_v54  ;;  %v3343_v55 = vmul.f32 %v8039_v21, %v11531_v48  ;;  %v11537_v36 = vld [vmem:[#allocation100_spill] sm:$0xff] }
 0x42d   :  { %v3357_v59 = vadd.f32 %v3353_v57, %v3341_v5  ;;  %v3340_v37 = vadd.f32 %v3336_v30, %v3324_v18  ;;  %v3359_v14 = vmul.f32 %v8086_v39, %v11532_v24  ;;  %v3315_v13 = vadd.f32 %v11533_v44, %v3299_v12 }
 0x42e   :  { %4720 = vmatpush1.bf16.msra.mxu0 %v4719_v60  ;;  %v3282_v46 = vadd.f32 %v3278_v28, %v11534_v49  ;;  %v3269_v2 = vmul.f32 %v11498_v20, %v11528_v56  ;;  %v3281_v26 = vmul.f32 %v7904_v6, %v11535_v10  ;;  %v3326_v30 = vmul.f32 %v7989_v52, %v11530_v17  ;;  %v11539_v60 = vld [vmem:[#allocation167_spill] sm:$0xff] }
 0x42f   :  { %3376 = vrot.lane.b32.xlu1 %v3357_v59, %s5186_s22  ;;  %v3356_v57 = vadd.f32 %v3352_v7, %v3340_v37  ;;  %v3342_v4 = vmul.f32 %v8035_v35, %v11531_v48  ;;  %v3297_v33 = vmul.f32 %v7971_v25, %v11536_v47  ;;  %v3331_v34 = vadd.f32 %v3327_v41, %v3315_v13  ;;  %v11540_v7 = vld [vmem:[#allocation95_spill] sm:$0xff]  ;;  %v11541_v41 = vld [vmem:[#allocation77_spill] sm:$0xff]  ;;  %v11543_v37 = vld [vmem:[#allocation62_spill] sm:$0xff] }
 0x430   :  { %v3298_v54 = vadd.f32 %v3294_v32, %v3282_v46  ;;  %v3358_v38 = vmul.f32 %v8082_v11, %v11532_v24  ;;  %v3285_v45 = vadd.f32 %v3281_v26, %v3269_v2  ;;  %v3329_v22 = vmul.f32 %v8015_v40, %v11537_v36  ;;  %v11542_v32 = vld [vmem:[#allocation50_spill] sm:$0xff]  ;;  %v11544_v13 = vld [vmem:[#allocation171_spill] sm:$0xff] }
 0x431   :  { %3374 = vrot.lane.b32.xlu0 %v3356_v57, %s5186_s22  ;;  %v3345_v8 = vmul.f32 %v8063_v29, %v11538_v9  ;;  %v3280_v1 = vmul.f32 %v7900_v61, %v11535_v10  ;;  %v3296_v23 = vmul.f32 %v7967_v31, %v11536_v47  ;;  %v3347_v56 = vadd.f32 %v3343_v55, %v3331_v34  ;;  %v11545_v47 = vld [vmem:[#allocation173_spill] sm:$0xff] }
 0x432   :  { %v3314_v5 = vadd.f32 %v11539_v60, %v3298_v54  ;;  %v3301_v18 = vadd.f32 %v3297_v33, %v3285_v45  ;;  %v3361_v12 = vmul.f32 %v8108_v15, %v11540_v7  ;;  %v3527_v28 = vmul.f32 %v11508_v50, %v11541_v41  ;;  %v11546_v54 = vld [vmem:[#allocation172_spill] sm:$0xff]  ;;  %v11551_v41 = vld [vmem:[#allocation83_spill] sm:$0xff] }
 0x433   :  { %v3284_v17 = vadd.f32 %v3280_v1, %v3268_v58  ;;  %v3535_v59 = vmul.f32 %v7877_v0, %v11542_v32  ;;  %v3551_v48 = vmul.f32 %v7947_v43, %v11543_v37  ;;  %v3363_v24 = vadd.f32 %v3359_v14, %v3347_v56  ;;  %v11548_v56 = vld [vmem:[#allocation184_spill] sm:$0xff] }
 0x434   :  { %v3330_v44 = vadd.f32 %v3326_v30, %v3314_v5  ;;  %v3317_v55 = vadd.f32 %v11544_v13, %v3301_v18  ;;  %v3328_v49 = vmul.f32 %v8011_v63, %v11537_v36  ;;  %v3344_v58 = vmul.f32 %v8059_v27, %v11538_v9  ;;  %v11547_v36 = vld [vmem:[#allocation105_spill] sm:$0xff] }
 0x435   :  { %v3300_v46 = vadd.f32 %v3296_v23, %v3284_v17  ;;  %v3360_v2 = vmul.f32 %v8104_v42, %v11540_v7  ;;  %v3539_v10 = vadd.f32 %v3535_v59, %v3527_v28  ;;  %3396 = vrot.lane.b32.xlu1 %v3363_v24, %s5186_s22  ;;  %v3534_v14 = vmul.f32 %v11492_v16, %v11542_v32  ;;  %v11550_v18 = vld [vmem:[#allocation221_spill] sm:$0xff] }
 0x436   :  { %v3346_v26 = vadd.f32 %v3342_v4, %v3330_v44  ;;  %v3333_v57 = vadd.f32 %v3329_v22, %v3317_v55  ;;  %v3550_v30 = vmul.f32 %v11493_v62, %v11543_v37  ;;  %v3583_v45 = vmul.f32 %v7993_v19, %v11546_v54  ;;  %v11549_v22 = vld [vmem:[#allocation48_spill] sm:$0xff] }
 0x437   :  { %v3316_v33 = vadd.f32 %v11545_v47, %v3300_v46  ;;  %v3555_v34 = vadd.f32 %v3551_v48, %v3539_v10  ;;  %v3599_v9 = vmul.f32 %v8039_v21, %v11547_v36  ;;  %v3615_v4 = vmul.f32 %v8086_v39, %v11548_v56  ;;  %v11555_v47 = vld [vmem:[#allocation195_spill] sm:$0xff] }
 0x438   :  { %v3362_v1 = vadd.f32 %v3358_v38, %v3346_v26  ;;  %v3349_v23 = vadd.f32 %v3345_v8, %v3333_v57  ;;  %v3538_v60 = vadd.f32 %v3534_v14, %v11549_v22  ;;  %v3529_v17 = vmul.f32 %v11498_v20, %v11529_v3  ;;  %v11552_v8 = vld [vmem:[#allocation102_spill] sm:$0xff]  ;;  %v11554_v57 = vld [vmem:[#allocation97_spill] sm:$0xff] }
 0x439   :  { %v3332_v5 = vadd.f32 %v3328_v49, %v3316_v33  ;;  %v3571_v7 = vadd.f32 %v11550_v18, %v3555_v34  ;;  %v3537_v28 = vmul.f32 %v7904_v6, %v11551_v41  ;;  %v3582_v38 = vmul.f32 %v7989_v52, %v11546_v54  ;;  %v11553_v3 = vld [vmem:[#allocation206_spill] sm:$0xff]  ;;  %v11556_v34 = vld [vmem:[#allocation115_spill] sm:$0xff] }
 0x43a   :  { %3394 = vrot.lane.b32.xlu0 %v3362_v1, %s5186_s22  ;;  %v3365_v32 = vadd.f32 %v3361_v12, %v3349_v23  ;;  %v3554_v59 = vadd.f32 %v3550_v30, %v3538_v60  ;;  %v3553_v37 = vmul.f32 %v7971_v25, %v11552_v8  ;;  %v3598_v44 = vmul.f32 %v8035_v35, %v11547_v36  ;;  %v11557_v1 = vld [vmem:[#allocation227_spill] sm:$0xff] }
 0x43b   :  { %v3348_v48 = vadd.f32 %v3344_v58, %v3332_v5  ;;  %v3587_v24 = vadd.f32 %v3583_v45, %v3571_v7  ;;  %v3541_v13 = vadd.f32 %v3537_v28, %v3529_v17  ;;  %v3614_v12 = vmul.f32 %v8082_v11, %v11548_v56  ;;  %v11559_v56 = vld [vmem:[#allocation84_spill] sm:$0xff] }
 0x43c   :  { %3400 = vrot.lane.b32.xlu1 %v3365_v32, %s5186_s22  ;;  %v3570_v55 = vadd.f32 %v11553_v3, %v3554_v59  ;;  %v3536_v49 = vmul.f32 %v7900_v61, %v11551_v41  ;;  %v3552_v46 = vmul.f32 %v7967_v31, %v11552_v8  ;;  %v3585_v14 = vmul.f32 %v8015_v40, %v11554_v57  ;;  %v11560_v7 = vld [vmem:[#allocation104_spill] sm:$0xff]  ;;  %v11561_v59 = vld [vmem:[#allocation233_spill] sm:$0xff] }
 0x43d   :  { %v3364_v10 = vadd.f32 %v3360_v2, %v3348_v48  ;;  %v3603_v58 = vadd.f32 %v3599_v9, %v3587_v24  ;;  %v3557_v26 = vadd.f32 %v3553_v37, %v3541_v13  ;;  %v3601_v33 = vmul.f32 %v8063_v29, %v11555_v47  ;;  %v11558_v2 = vld [vmem:[#allocation79_spill] sm:$0xff]  ;;  %v11563_v3 = vld [vmem:[#allocation197_spill] sm:$0xff] }
 0x43e   :  { %v3586_v30 = vadd.f32 %v3582_v38, %v3570_v55  ;;  %v3617_v54 = vmul.f32 %v8108_v15, %v11556_v34  ;;  %v3540_v45 = vadd.f32 %v3536_v49, %v8341_v51  ;;  %v3531_v9 = vmul.f32 %v11508_v50, %v11558_v2 }
 0x43f   :  { %3398 = vrot.lane.b32.xlu0 %v3364_v10, %s5186_s22  ;;  %v3619_v36 = vadd.f32 %v3615_v4, %v3603_v58  ;;  %v3573_v23 = vadd.f32 %v11557_v1, %v3557_v26  ;;  %v3543_v22 = vmul.f32 %v7877_v0, %v11559_v56  ;;  %v3584_v18 = vmul.f32 %v8011_v63, %v11554_v57  ;;  %v11565_v10 = vld [vmem:[#allocation49_spill] sm:$0xff]  ;;  %v11566_v26 = vld [vmem:[#allocation80_spill] sm:$0xff] }
 0x440   :  { %v3602_v60 = vadd.f32 %v3598_v44, %v3586_v30  ;;  %v3556_v5 = vadd.f32 %v3552_v46, %v3540_v45  ;;  %v3559_v17 = vmul.f32 %v7947_v43, %v11560_v7  ;;  %v3600_v4 = vmul.f32 %v8059_v27, %v11555_v47  ;;  %v11562_v44 = vld [vmem:[#allocation179_spill] sm:$0xff]  ;;  %v11567_v30 = vld [vmem:[#allocation230_spill] sm:$0xff]  ;;  %v11569_v45 = vld [vmem:[#allocation64_spill] sm:$0xff] }
 0x441   :  { %3636 = vrot.lane.b32.xlu1 %v3619_v36, %s5187_s23  ;;  %v3589_v51 = vadd.f32 %v3585_v14, %v3573_v23  ;;  %v3616_v41 = vmul.f32 %v8104_v42, %v11556_v34  ;;  %v3547_v28 = vadd.f32 %v3543_v22, %v3531_v9  ;;  %v3542_v8 = vmul.f32 %v11492_v16, %v11559_v56 }
 0x442   :  { %v3618_v32 = vadd.f32 %v3614_v12, %v3602_v60  ;;  %v3572_v38 = vadd.f32 %v11561_v59, %v3556_v5  ;;  %v3558_v37 = vmul.f32 %v11493_v62, %v11560_v7  ;;  %v3591_v13 = vmul.f32 %v7993_v19, %v11562_v44  ;;  %v11564_v12 = vld [vmem:[#allocation205_spill] sm:$0xff] }
 0x443   :  { %v3605_v48 = vadd.f32 %v3601_v33, %v3589_v51  ;;  %v3563_v24 = vadd.f32 %v3559_v17, %v3547_v28  ;;  %v3607_v55 = vmul.f32 %v8039_v21, %v11563_v3  ;;  %v3623_v46 = vmul.f32 %v8086_v39, %v11564_v12  ;;  %v11568_v33 = vld [vmem:[#allocation52_spill] sm:$0xff] }
 0x444   :  { %3634 = vrot.lane.b32.xlu0 %v3618_v32, %s5187_s23  ;;  %v3588_v49 = vadd.f32 %v3584_v18, %v3572_v38  ;;  %v3546_v58 = vadd.f32 %v3542_v8, %v11565_v10  ;;  %v3533_v57 = vmul.f32 %v11498_v20, %v11566_v26  ;;  %v3545_v34 = vmul.f32 %v7904_v6, %v11568_v33  ;;  %v11570_v18 = vld [vmem:[#allocation236_spill] sm:$0xff]  ;;  %v11571_v32 = vld [vmem:[#allocation182_spill] sm:$0xff]  ;;  %v11572_v38 = vld [vmem:[#allocation107_spill] sm:$0xff] }
 0x445   :  { %v3621_v14 = vadd.f32 %v3617_v54, %v3605_v48  ;;  %v3579_v47 = vadd.f32 %v11567_v30, %v3563_v24  ;;  %v3561_v36 = vmul.f32 %v7971_v25, %v11569_v45  ;;  %v3590_v2 = vmul.f32 %v7989_v52, %v11562_v44  ;;  %v11574_v44 = vld [vmem:[#allocation106_spill] sm:$0xff] }
 0x446   :  { %v3604_v1 = vadd.f32 %v3600_v4, %v3588_v49  ;;  %v3562_v23 = vadd.f32 %v3558_v37, %v3546_v58  ;;  %v3606_v9 = vmul.f32 %v8035_v35, %v11563_v3  ;;  %v3622_v54 = vmul.f32 %v8082_v11, %v11564_v12  ;;  %v11575_v49 = vld [vmem:[#allocation7_spill] sm:$0xff]  ;;  %v11576_v12 = vld [vmem:[#allocation68_spill] sm:$0xff] }
 0x447   :  { %3640 = vrot.lane.b32.xlu1 %v3621_v14, %s5187_s23  ;;  %v3595_v56 = vadd.f32 %v3591_v13, %v3579_v47  ;;  %v3549_v22 = vadd.f32 %v3545_v34, %v3533_v57  ;;  %v3532_v60 = vmul.f32 %v11496_v53, %v11566_v26  ;;  %v3544_v17 = vmul.f32 %v7900_v61, %v11568_v33  ;;  %v11577_v58 = vld [vmem:[#allocation135_spill] sm:$0xff] }
 0x448   :  { %v3620_v5 = vadd.f32 %v3616_v41, %v3604_v1  ;;  %v3578_v7 = vadd.f32 %v11570_v18, %v3562_v23  ;;  %v3560_v51 = vmul.f32 %v7967_v31, %v11569_v45  ;;  %v3593_v59 = vmul.f32 %v8015_v40, %v11571_v32  ;;  %v11573_v41 = vld [vmem:[#allocation183_spill] sm:$0xff] }
 0x449   :  { %v3611_v4 = vadd.f32 %v3607_v55, %v3595_v56  ;;  %v3565_v28 = vadd.f32 %v3561_v36, %v3549_v22  ;;  %v3609_v8 = vmul.f32 %v8063_v29, %v11572_v38  ;;  %v3625_v48 = vmul.f32 %v8108_v15, %v11573_v41  ;;  %v11578_v1 = vld [vmem:[#allocation231_spill] sm:$0xff] }
 0x44a   :  { %3638 = vrot.lane.b32.xlu0 %v3620_v5, %s5187_s23  ;;  %v3594_v37 = vadd.f32 %v3590_v2, %v3578_v7  ;;  %v3548_v24 = vadd.f32 %v3544_v17, %v3532_v60  ;;  %v3679_v13 = vmul.f32 %v11508_v50, %v11574_v44  ;;  %v3687_v10 = vmul.f32 %v7877_v0, %v11576_v12  ;;  %v11579_v2 = vld [vmem:[#allocation198_spill] sm:$0xff]  ;;  %v11581_v7 = vld [vmem:[#allocation51_spill] sm:$0xff] }
 0x44b   :  { %v3627_v3 = vadd.f32 %v3623_v46, %v3611_v4  ;;  %v3581_v55 = vadd.f32 %v11575_v49, %v3565_v28  ;;  %v3703_v26 = vmul.f32 %v7947_v43, %v11577_v58  ;;  %v3592_v30 = vmul.f32 %v8011_v63, %v11571_v32  ;;  %v11580_v5 = vld [vmem:[#allocation118_spill] sm:$0xff]  ;;  %v11583_v32 = vld [vmem:[#allocation111_spill] sm:$0xff] }
 0x44c   :  { %v3610_v57 = vadd.f32 %v3606_v9, %v3594_v37  ;;  %v3564_v14 = vadd.f32 %v3560_v51, %v3548_v24  ;;  %v3608_v47 = vmul.f32 %v8059_v27, %v11572_v38  ;;  %v3624_v46 = vmul.f32 %v8104_v42, %v11573_v41  ;;  %v11582_v4 = vld [vmem:[#allocation66_spill] sm:$0xff]  ;;  %v11585_v24 = vld [vmem:[#allocation85_spill] sm:$0xff] }
 0x44d   :  { %3660 = vrot.lane.b32.xlu1 %v3627_v3, %s5187_s23  ;;  %v3597_v33 = vadd.f32 %v3593_v59, %v3581_v55  ;;  %v3691_v34 = vadd.f32 %v3687_v10, %v3679_v13  ;;  %v3686_v45 = vmul.f32 %v11492_v16, %v11576_v12  ;;  %v3735_v9 = vmul.f32 %v7993_v19, %v11579_v2  ;;  %v11586_v3 = vld [vmem:[#allocation124_spill] sm:$0xff] }
 0x44e   :  { %v3626_v36 = vadd.f32 %v3622_v54, %v3610_v57  ;;  %v3580_v23 = vadd.f32 %v11578_v1, %v3564_v14  ;;  %v3702_v56 = vmul.f32 %v11493_v62, %v11577_v58  ;;  %v3751_v18 = vmul.f32 %v8039_v21, %v11580_v5  ;;  %v11587_v58 = vld [vmem:[#allocation226_spill] sm:$0xff] }
 0x44f   :  { %v3613_v22 = vadd.f32 %v3609_v8, %v3597_v33  ;;  %v3707_v60 = vadd.f32 %v3703_v26, %v3691_v34  ;;  %v3690_v17 = vadd.f32 %v3686_v45, %v11581_v7  ;;  %v3734_v54 = vmul.f32 %v7989_v52, %v11579_v2  ;;  %v11584_v8 = vld [vmem:[#allocation177_spill] sm:$0xff] }
 0x450   :  { %3658 = vrot.lane.b32.xlu0 %v3626_v36, %s5187_s23  ;;  %v3596_v51 = vadd.f32 %v3592_v30, %v3580_v23  ;;  %v3681_v28 = vmul.f32 %v11498_v20, %v11582_v4  ;;  %v3689_v59 = vmul.f32 %v7904_v6, %v11583_v32  ;;  %v3705_v44 = vmul.f32 %v7971_v25, %v11585_v24  ;;  %v11589_v23 = vld [vmem:[#allocation194_spill] sm:$0xff] }
 0x451   :  { %v3629_v38 = vadd.f32 %v3625_v48, %v3613_v22  ;;  %v3723_v37 = vadd.f32 %v11584_v8, %v3707_v60  ;;  %v3706_v41 = vadd.f32 %v3702_v56, %v3690_v17  ;;  %v3767_v49 = vmul.f32 %v8086_v39, %v11586_v3  ;;  %v11588_v48 = vld [vmem:[#allocation110_spill] sm:$0xff] }
 0x452   :  { %v3612_v13 = vadd.f32 %v3608_v47, %v3596_v51  ;;  %v3750_v55 = vmul.f32 %v8035_v35, %v11580_v5  ;;  %v3693_v12 = vadd.f32 %v3689_v59, %v3681_v28  ;;  %v3737_v57 = vmul.f32 %v8015_v40, %v11588_v48  ;;  %v11592_v5 = vld [vmem:[#allocation108_spill] sm:$0xff]  ;;  %v11593_v51 = vld [vmem:[#allocation113_spill] sm:$0xff] }
 0x453   :  { %3664 = vrot.lane.b32.xlu1 %v3629_v38, %s5187_s23  ;;  %v3739_v10 = vadd.f32 %v3735_v9, %v3723_v37  ;;  %v3722_v26 = vadd.f32 %v11587_v58, %v3706_v41  ;;  %v3680_v14 = vmul.f32 %v11496_v53, %v11582_v4  ;;  %v3688_v33 = vmul.f32 %v7900_v61, %v11583_v32  ;;  %v11590_v9 = vld [vmem:[#allocation229_spill] sm:$0xff] }
 0x454   :  { %v3628_v30 = vadd.f32 %v3624_v46, %v3612_v13  ;;  %v3709_v47 = vadd.f32 %v3705_v44, %v3693_v12  ;;  %v3704_v34 = vmul.f32 %v7967_v31, %v11585_v24  ;;  %v3766_v1 = vmul.f32 %v8082_v11, %v11586_v3  ;;  %v11591_v46 = vld [vmem:[#allocation190_spill] sm:$0xff]  ;;  %v11594_v4 = vld [vmem:[#allocation137_spill] sm:$0xff] }
 0x455   :  { %v3755_v45 = vadd.f32 %v3751_v18, %v3739_v10  ;;  %v3738_v36 = vadd.f32 %v3734_v54, %v3722_v26  ;;  %v3753_v2 = vmul.f32 %v8063_v29, %v11589_v23  ;;  %v3769_v22 = vmul.f32 %v8108_v15, %v11591_v46  ;;  %v11595_v44 = vld [vmem:[#allocation29_spill] sm:$0xff]  ;;  %v11597_v26 = vld [vmem:[#allocation200_spill] sm:$0xff] }
 0x456   :  { %3662 = vrot.lane.b32.xlu0 %v3628_v30, %s5187_s23  ;;  %v3725_v56 = vadd.f32 %v11590_v9, %v3709_v47  ;;  %v3692_v60 = vadd.f32 %v3688_v33, %v3680_v14  ;;  %v3683_v7 = vmul.f32 %v11508_v50, %v11592_v5  ;;  %v3695_v54 = vmul.f32 %v7877_v0, %v11593_v51  ;;  %v11599_v30 = vld [vmem:[#allocation159_spill] sm:$0xff] }
 0x457   :  { %v3771_v17 = vadd.f32 %v3767_v49, %v3755_v45  ;;  %v3754_v18 = vadd.f32 %v3750_v55, %v3738_v36  ;;  %v3711_v28 = vmul.f32 %v7947_v43, %v11594_v4  ;;  %v3736_v38 = vmul.f32 %v8011_v63, %v11588_v48  ;;  %v11596_v49 = vld [vmem:[#allocation223_spill] sm:$0xff] }
 0x458   :  { %v3741_v32 = vadd.f32 %v3737_v57, %v3725_v56  ;;  %v3708_v59 = vadd.f32 %v3704_v34, %v3692_v60  ;;  %v3752_v8 = vmul.f32 %v8059_v27, %v11589_v23  ;;  %v3768_v41 = vmul.f32 %v8104_v42, %v11591_v46  ;;  %v11598_v57 = vld [vmem:[#allocation185_spill] sm:$0xff]  ;;  %v11602_v56 = vld [vmem:[#allocation70_spill] sm:$0xff]  ;;  %v11603_v60 = vld [vmem:[#allocation139_spill] sm:$0xff] }
 0x459   :  { %3788 = vrot.lane.b32.xlu1 %v3771_v17, %s5188_s24  ;;  %v3770_v37 = vadd.f32 %v3766_v1, %v3754_v18  ;;  %v3699_v24 = vadd.f32 %v3695_v54, %v3683_v7  ;;  %v3682_v13 = vmul.f32 %v11595_v44, %v11592_v5  ;;  %v3694_v12 = vmul.f32 %v11492_v16, %v11593_v51  ;;  %v11600_v1 = vld [vmem:[#allocation232_spill] sm:$0xff] }
 0x45a   :  { %v3757_v3 = vadd.f32 %v3753_v2, %v3741_v32  ;;  %v3724_v55 = vadd.f32 %v11596_v49, %v3708_v59  ;;  %v3710_v10 = vmul.f32 %v11493_v62, %v11594_v4  ;;  %v3743_v48 = vmul.f32 %v7993_v19, %v11597_v26  ;;  %v11601_v2 = vld [vmem:[#allocation109_spill] sm:$0xff]  ;;  %v11604_v59 = vld [vmem:[#allocation154_spill] sm:$0xff]  ;;  %v11606_v49 = vld [vmem:[#allocation120_spill] sm:$0xff] }
 0x45b   :  { %3786 = vrot.lane.b32.xlu0 %v3770_v37, %s5188_s24  ;;  %v3715_v58 = vadd.f32 %v3711_v28, %v3699_v24  ;;  %v3759_v14 = vmul.f32 %v8039_v21, %v11598_v57  ;;  %v3775_v47 = vmul.f32 %v8086_v39, %v11599_v30  ;;  %v3698_v45 = vadd.f32 %v3694_v12, %v3682_v13  ;;  %v11605_v37 = vld [vmem:[#allocation181_spill] sm:$0xff] }
 0x45c   :  { %v3773_v33 = vadd.f32 %v3769_v22, %v3757_v3  ;;  %v3740_v34 = vadd.f32 %v3736_v38, %v3724_v55  ;;  %v3742_v36 = vmul.f32 %v7989_v52, %v11597_v26  ;;  %v3685_v9 = vmul.f32 %v11498_v20, %v11601_v2 }
 0x45d   :  { %v3731_v23 = vadd.f32 %v11600_v1, %v3715_v58  ;;  %v3697_v46 = vmul.f32 %v7904_v6, %v11602_v56  ;;  %v3713_v5 = vmul.f32 %v7971_v25, %v11603_v60  ;;  %v3714_v22 = vadd.f32 %v3710_v10, %v3698_v45  ;;  %v11607_v58 = vld [vmem:[#allocation87_spill] sm:$0xff]  ;;  %v11610_v45 = vld [vmem:[#allocation189_spill] sm:$0xff] }
 0x45e   :  { %3792 = vrot.lane.b32.xlu1 %v3773_v33, %s5188_s24  ;;  %v3756_v7 = vadd.f32 %v3752_v8, %v3740_v34  ;;  %v3758_v17 = vmul.f32 %v8035_v35, %v11598_v57  ;;  %v3774_v18 = vmul.f32 %v8082_v11, %v11599_v30  ;;  %v3684_v4 = vmul.f32 %v11496_v53, %v11601_v2  ;;  %v11609_v33 = vld [vmem:[#allocation234_spill] sm:$0xff] }
 0x45f   :  { %v3747_v51 = vadd.f32 %v3743_v48, %v3731_v23  ;;  %v3701_v54 = vadd.f32 %v3697_v46, %v3685_v9  ;;  %v3696_v28 = vmul.f32 %v7900_v61, %v11602_v56  ;;  %v3730_v38 = vadd.f32 %v11604_v59, %v3714_v22  ;;  %v11608_v48 = vld [vmem:[#allocation145_spill] sm:$0xff]  ;;  %v11611_v2 = vld [vmem:[#allocation126_spill] sm:$0xff] }
 0x460   :  { %v3772_v32 = vadd.f32 %v3768_v41, %v3756_v7  ;;  %v3745_v8 = vmul.f32 %v8015_v40, %v11605_v37  ;;  %v3712_v24 = vmul.f32 %v7967_v31, %v11603_v60  ;;  %v3761_v55 = vmul.f32 %v8063_v29, %v11606_v49  ;;  %v11612_v60 = vld [vmem:[#allocation235_spill] sm:$0xff] }
 0x461   :  { %v3763_v13 = vadd.f32 %v3759_v14, %v3747_v51  ;;  %v3717_v3 = vadd.f32 %v3713_v5, %v3701_v54  ;;  %v3700_v12 = vadd.f32 %v3696_v28, %v3684_v4  ;;  %v3746_v10 = vadd.f32 %v3742_v36, %v3730_v38  ;;  %v11614_v38 = vld [vmem:[#allocation199_spill] sm:$0xff] }
 0x462   :  { %3790 = vrot.lane.b32.xlu0 %v3772_v32, %s5188_s24  ;;  %v3744_v41 = vmul.f32 %v8011_v63, %v11605_v37  ;;  %v3831_v26 = vmul.f32 %v11508_v50, %v11607_v58  ;;  %v3839_v57 = vmul.f32 %v7877_v0, %v11608_v48  ;;  %v3855_v1 = vmul.f32 %v7947_v43, %v11610_v45 }
 0x463   :  { %v3779_v30 = vadd.f32 %v3775_v47, %v3763_v13  ;;  %v3733_v14 = vadd.f32 %v11609_v33, %v3717_v3  ;;  %v3716_v34 = vadd.f32 %v3712_v24, %v3700_v12  ;;  %v3762_v23 = vadd.f32 %v3758_v17, %v3746_v10  ;;  %v11613_v47 = vld [vmem:[#allocation169_spill] sm:$0xff] }
 0x464   :  { %v3777_v36 = vmul.f32 %v8108_v15, %v11611_v2  ;;  %v3760_v9 = vmul.f32 %v8059_v27, %v11606_v49  ;;  %v3843_v56 = vadd.f32 %v3839_v57, %v3831_v26  ;;  %v3887_v7 = vmul.f32 %v7993_v19, %v11613_v47  ;;  %v11617_v49 = vld [vmem:[#allocation141_spill] sm:$0xff]  ;;  %v11619_v26 = vld [vmem:[#allocation103_spill] sm:$0xff] }
 0x465   :  { %3812 = vrot.lane.b32.xlu1 %v3779_v30, %s5188_s24  ;;  %v3749_v46 = vadd.f32 %v3745_v8, %v3733_v14  ;;  %v3732_v5 = vadd.f32 %v11612_v60, %v3716_v34  ;;  %v3830_v22 = vmul.f32 %v11595_v44, %v11607_v58  ;;  %v3778_v51 = vadd.f32 %v3774_v18, %v3762_v23  ;;  %v11615_v8 = vld [vmem:[#allocation222_spill] sm:$0xff] }
 0x466   :  { %v3859_v17 = vadd.f32 %v3855_v1, %v3843_v56  ;;  %v3838_v54 = vmul.f32 %v11492_v16, %v11608_v48  ;;  %v3854_v4 = vmul.f32 %v11493_v62, %v11610_v45  ;;  %v3776_v59 = vmul.f32 %v8104_v42, %v11611_v2  ;;  %v11616_v18 = vld [vmem:[#allocation130_spill] sm:$0xff] }
 0x467   :  { %v3765_v28 = vadd.f32 %v3761_v55, %v3749_v46  ;;  %v3748_v32 = vadd.f32 %v3744_v41, %v3732_v5  ;;  %v3903_v37 = vmul.f32 %v8039_v21, %v11614_v38  ;;  %3810 = vrot.lane.b32.xlu0 %v3778_v51, %s5188_s24  ;;  %v3919_v13 = vmul.f32 %v8086_v39, %v11616_v18  ;;  %v11618_v41 = vld [vmem:[#allocation91_spill] sm:$0xff]  ;;  %v11621_v5 = vld [vmem:[#allocation122_spill] sm:$0xff] }
 0x468   :  { %v3875_v24 = vadd.f32 %v11615_v8, %v3859_v17  ;;  %v3842_v3 = vadd.f32 %v3838_v54, %v3830_v22  ;;  %v3833_v12 = vmul.f32 %v11498_v20, %v11617_v49  ;;  %v3841_v58 = vmul.f32 %v7904_v6, %v11618_v41  ;;  %v11623_v51 = vld [vmem:[#allocation203_spill] sm:$0xff] }
 0x469   :  { %v3781_v10 = vadd.f32 %v3777_v36, %v3765_v28  ;;  %v3764_v55 = vadd.f32 %v3760_v9, %v3748_v32  ;;  %v3857_v48 = vmul.f32 %v7971_v25, %v11619_v26  ;;  %v3886_v33 = vmul.f32 %v7989_v52, %v11613_v47  ;;  %v11620_v36 = vld [vmem:[#allocation155_spill] sm:$0xff] }
 0x46a   :  { %v3891_v57 = vadd.f32 %v3887_v7, %v3875_v24  ;;  %v3858_v30 = vadd.f32 %v3854_v4, %v3842_v3  ;;  %v3902_v14 = vmul.f32 %v8035_v35, %v11614_v38  ;;  %v3918_v45 = vmul.f32 %v8082_v11, %v11616_v18  ;;  %v11622_v7 = vld [vmem:[#allocation128_spill] sm:$0xff]  ;;  %v11625_v24 = vld [vmem:[#allocation142_spill] sm:$0xff]  ;;  %v11626_v3 = vld [vmem:[#allocation147_spill] sm:$0xff] }
 0x46b   :  { %3816 = vrot.lane.b32.xlu1 %v3781_v10, %s5188_s24  ;;  %v3780_v34 = vadd.f32 %v3776_v59, %v3764_v55  ;;  %v3845_v1 = vadd.f32 %v3841_v58, %v3833_v12  ;;  %v3832_v23 = vmul.f32 %v11496_v53, %v11617_v49  ;;  %v3840_v56 = vmul.f32 %v7900_v61, %v11618_v41  ;;  %v8659_v54 = vpop.permute.xlu0 %3066  ;;  %v11627_v12 = vld [vmem:[#allocation191_spill] sm:$0xff] }
 0x46c   :  { %v3907_v2 = vadd.f32 %v3903_v37, %v3891_v57  ;;  %v3874_v9 = vadd.f32 %v11620_v36, %v3858_v30  ;;  %v3856_v46 = vmul.f32 %v7967_v31, %v11619_v26  ;;  %v3889_v47 = vmul.f32 %v8015_v40, %v11621_v5  ;;  %v8661_v4 = vpop.permute.xlu1 %3068  ;;  %v11624_v37 = vld [vmem:[#allocation161_spill] sm:$0xff] }
 0x46d   :  { %3814 = vrot.lane.b32.xlu0 %v3780_v34, %s5188_s24  ;;  %v3861_v60 = vadd.f32 %v3857_v48, %v3845_v1  ;;  %v3905_v22 = vmul.f32 %v8063_v29, %v11622_v7  ;;  %v3921_v17 = vmul.f32 %v8108_v15, %v11623_v51  ;;  %v3844_v59 = vadd.f32 %v3840_v56, %v3832_v23 }
 0x46e   :  { %v3923_v28 = vadd.f32 %v3919_v13, %v3907_v2  ;;  %v3890_v32 = vadd.f32 %v3886_v33, %v3874_v9  ;;  %v3888_v38 = vmul.f32 %v8011_v63, %v11621_v5  ;;  %v3835_v18 = vmul.f32 %v11508_v50, %v11625_v24  ;;  %v11629_v2 = vld [vmem:[#allocation187_spill] sm:$0xff] }
 0x46f   :  { %v3877_v8 = vadd.f32 %v11624_v37, %v3861_v60  ;;  %v3847_v49 = vmul.f32 %v7877_v0, %v11626_v3  ;;  %v3863_v10 = vmul.f32 %v7947_v43, %v11627_v12  ;;  %v3860_v13 = vadd.f32 %v3856_v46, %v3844_v59  ;;  %v8681_v33 = vpop.permute.xlu0 %3070  ;;  %v11630_v60 = vld [vmem:[#allocation5_spill] sm:$0xff] }
 0x470   :  { %3940 = vrot.lane.b32.xlu1 %v3923_v28, %s5189_s25  ;;  %v3906_v55 = vadd.f32 %v3902_v14, %v3890_v32  ;;  %v3904_v41 = vmul.f32 %v8059_v27, %v11622_v7  ;;  %v3920_v58 = vmul.f32 %v8104_v42, %v11623_v51  ;;  %v3834_v57 = vmul.f32 %v11595_v44, %v11625_v24  ;;  %v3073_v34 = vpop.permute.xlu1 %3072  ;;  %v11628_v14 = vld [vmem:[#allocation224_spill] sm:$0xff]  ;;  %v11631_v51 = vld [vmem:[#allocation89_spill] sm:$0xff]  ;;  %v11632_v32 = vld [vmem:[#allocation150_spill] sm:$0xff] }
 0x471   :  { %v3893_v26 = vadd.f32 %v3889_v47, %v3877_v8  ;;  %v3851_v48 = vadd.f32 %v3847_v49, %v3835_v18  ;;  %v3846_v30 = vmul.f32 %v11492_v16, %v11626_v3  ;;  %v3876_v23 = vadd.f32 %v11628_v14, %v3860_v13  ;;  %v11633_v8 = vld [vmem:[#allocation162_spill] sm:$0xff]  ;;  %v11634_v18 = vld [vmem:[#allocation192_spill] sm:$0xff] }
 0x472   :  { %v3922_v1 = vadd.f32 %v3918_v45, %v3906_v55  ;;  %v3895_v36 = vmul.f32 %v7993_v19, %v11629_v2  ;;  %v3862_v9 = vmul.f32 %v11493_v62, %v11627_v12  ;;  %v3911_v5 = vmul.f32 %v8039_v21, %v11630_v60 }
 0x473   :  { %v3909_v56 = vadd.f32 %v3905_v22, %v3893_v26  ;;  %v3867_v46 = vadd.f32 %v3863_v10, %v3851_v48  ;;  %v3850_v47 = vadd.f32 %v3846_v30, %v3834_v57  ;;  %v3892_v7 = vadd.f32 %v3888_v38, %v3876_v23  ;;  %v8700_v49 = vpop.permute.xlu0 %3090  ;;  %v11635_v10 = vld [vmem:[#allocation201_spill] sm:$0xff]  ;;  %v11636_v48 = vld [vmem:[#allocation158_spill] sm:$0xff] }
 0x474   :  { %3938 = vrot.lane.b32.xlu0 %v3922_v1, %s5189_s25  ;;  %v3894_v45 = vmul.f32 %v7989_v52, %v11629_v2  ;;  %v3837_v28 = vmul.f32 %v11498_v20, %v11631_v51  ;;  %v3849_v59 = vmul.f32 %v7904_v6, %v11632_v32  ;;  %v3865_v3 = vmul.f32 %v7971_v25, %v11634_v18  ;;  %v3093_v12 = vpop.permute.xlu1 %3092  ;;  %v11637_v30 = vld [vmem:[#allocation166_spill] sm:$0xff] }
 0x475   :  { %v3925_v37 = vadd.f32 %v3921_v17, %v3909_v56  ;;  %v3883_v22 = vadd.f32 %v11633_v8, %v3867_v46  ;;  %v3866_v24 = vadd.f32 %v3862_v9, %v3850_v47  ;;  %v3908_v38 = vadd.f32 %v3904_v41, %v3892_v7  ;;  %v11638_v47 = vld [vmem:[#allocation114_spill] sm:$0xff]  ;;  %v11639_v7 = vld [vmem:[#allocation212_spill] sm:$0xff] }
 0x476   :  { %v3927_v55 = vmul.f32 %v8086_v39, %v11635_v10  ;;  %v3910_v13 = vmul.f32 %v8035_v35, %v11630_v60  ;;  %v3853_v26 = vadd.f32 %v3849_v59, %v3837_v28  ;;  %v3897_v1 = vmul.f32 %v8015_v40, %v11637_v30  ;;  %v8721_v60 = vld [vmem:[%s10195_s0 + $0x30] sm:$0xff]  ;;  %v11640_v28 = vld [vmem:[#allocation204_spill] sm:$0xff] }
 0x477   :  { %3944 = vrot.lane.b32.xlu1 %v3925_v37, %s5189_s25  ;;  %v3899_v17 = vadd.f32 %v3895_v36, %v3883_v22  ;;  %v3882_v57 = vadd.f32 %v11636_v48, %v3866_v24  ;;  %v3836_v14 = vmul.f32 %v11496_v53, %v11631_v51  ;;  %v3924_v23 = vadd.f32 %v3920_v58, %v3908_v38  ;;  %v11641_v22 = vld [vmem:[#allocation132_spill] sm:$0xff] }
 0x478   :  { %v3869_v41 = vadd.f32 %v3865_v3, %v3853_v26  ;;  %v3848_v2 = vmul.f32 %v7900_v61, %v11632_v32  ;;  %v3864_v9 = vmul.f32 %v7967_v31, %v11634_v18  ;;  %v3926_v36 = vmul.f32 %v8082_v11, %v11635_v10  ;;  %v3097_v59 = vpop.permute.xlu1 %3096 }
 0x479   :  { %v3915_v56 = vadd.f32 %v3911_v5, %v3899_v17  ;;  %v3898_v46 = vadd.f32 %v3894_v45, %v3882_v57  ;;  %v3880_v58 = vmul.f32 %v8721_v60, %v11638_v47  ;;  %3942 = vrot.lane.b32.xlu0 %v3924_v23, %s5189_s25  ;;  %v3913_v32 = vmul.f32 %v8063_v29, %v11640_v28  ;;  %v8729_v45 = vpop.permute.xlu0 %3094  ;;  %v60_v47 = vld [vmem:[%s10198_s3 + $0x18] sm:$0xff] }
 0x47a   :  { %v3885_v51 = vadd.f32 %v11639_v7, %v3869_v41  ;;  %v3852_v5 = vadd.f32 %v3848_v2, %v3836_v14  ;;  %v3929_v24 = vmul.f32 %v8108_v15, %v11641_v22  ;;  %v8736_v18 = vsel %vm467_vm15, %v8659_v54, %v8661_v4  ;;  %v58_v41 = vld [vmem:[%s10198_s3 + $0x8] sm:$0xff]  ;;  %v61_v7 = vld [vmem:[%s10198_s3 + $0x20] sm:$0xff] }
 0x47b   :  { %v3931_v37 = vadd.f32 %v3927_v55, %v3915_v56  ;;  %v3914_v8 = vadd.f32 %v3910_v13, %v3898_v46  ;;  %v3896_v10 = vmul.f32 %v8011_v63, %v11637_v30  ;;  %v8742_v26 = vsel %vm467_vm15, %v8681_v33, %v3073_v34  ;;  %v57_v34 = vld [vmem:[%s10198_s3] sm:$0xff]  ;;  %v59_v56 = vld [vmem:[%s10198_s3 + $0x10] sm:$0xff] }
 0x47c   :  { %v3901_v3 = vadd.f32 %v3897_v1, %v3885_v51  ;;  %v3868_v38 = vadd.f32 %v3864_v9, %v3852_v5  ;;  %v8747_v13 = vsel %vm467_vm15, %v8700_v49, %v3093_v12  ;;  %v8751_v4 = vsel %vm467_vm15, %v8729_v45, %v3097_v59  ;;  %v8769_v9 = vpop.permute.xlu1 %3220  ;;  %v63_v59 = vld [vmem:[%s10198_s3 + $0x30] sm:$0xff] }
 0x47d   :  { %3964 = vrot.lane.b32.xlu1 %v3931_v37, %s5189_s25  ;;  %v3930_v55 = vadd.f32 %v3926_v36, %v3914_v8  ;;  %11642 = vst [vmem:[#allocation99_spill] sm:$0xff] %v8751_v4  ;;  %v3912_v57 = vmul.f32 %v8059_v27, %v11640_v28  ;;  %v3928_v12 = vmul.f32 %v8104_v42, %v11641_v22  ;;  %v10628_v14 = vmov 0.0   ;;  %v8777_v46 = vpop.permute.xlu0 %3218  ;;  %v62_v28 = vld [vmem:[%s10198_s3 + $0x28] sm:$0xff]  ;;  %v64_v8 = vld [vmem:[%s10198_s3 + $0x38] sm:$0xff]  ;;  %v11664_v4 = vld [vmem:[#allocation207_spill] sm:$0xff] }
 0x47e   :  { %v3917_v17 = vadd.f32 %v3913_v32, %v3901_v3  ;;  %v3884_v48 = vadd.f32 %v3880_v58, %v3868_v38  ;;  %2326 = vmatprep.mubr.f32.mxu0 %v10628_v14  ;;  %2808 = vmatprep.mubr.f32.mxu1 %v10628_v14 }
 0x47f   :  { %3962 = vrot.lane.b32.xlu0 %v3930_v55, %s5189_s25  ;;  %4693 = vmatmul.mubr.msk.f32.vlgmr.msra.gmra.mrb[0].mxu0 %vm997_vm13, %v57_v34 }
 0x480   :  { %v3933_v30 = vadd.f32 %v3929_v24, %v3917_v17  ;;  %v3900_v1 = vadd.f32 %v3896_v10, %v3884_v48  ;;  %2332 = vmatprep.mubr.f32.mxu0 %v10628_v14  ;;  %v8780_v36 = vpop.permute.xlu1 %3224 }
 0x481   :  { %v8787_v58 = vpop.permute.xlu0 %3222 }
 0x482   :  { %3968 = vrot.lane.b32.xlu1 %v3933_v30, %s5189_s25  ;;  %v3916_v23 = vadd.f32 %v3912_v57, %v3900_v1 }
 0x483   :  { %4694 = vmatmul.mubr.msk.f32.gmra.mrb[2].mxu0 %vm997_vm13, %v58_v41  ;;  %v11657_v41 = vld [vmem:[#allocation136_spill] sm:$0xff] }
 0x484   :  { %v3932_v2 = vadd.f32 %v3928_v12, %v3916_v23  ;;  %2338 = vmatprep.mubr.f32.mxu0 %v10628_v14 }
 0x485   :  { %v8793_v51 = vpop.permute.xlu1 %3244 }
 0x486   :  { %3966 = vrot.lane.b32.xlu0 %v3932_v2, %s5189_s25  ;;  %v3422_v2 = vmul.f32 %v11492_v16, %v11657_v41 }
 0x487   :  { %4695 = vmatmul.mubr.msk.f32.gmra.mrb[4].mxu0 %vm997_vm13, %v59_v56  ;;  %v5086_v56 = vld [vmem:[%s10195_s0 + $0x20] sm:$0xff] }
 0x488   :  { %2344 = vmatprep.mubr.f32.mxu0 %v10628_v14 }
 0x48b   :  { %4696 = vmatmul.mubr.msk.f32.gmra.mrb[6].mxu0 %vm997_vm13, %v60_v47  ;;  %v11658_v47 = vld [vmem:[#allocation143_spill] sm:$0xff] }
 0x48c   :  { %2350 = vmatprep.mubr.f32.mxu0 %v10628_v14 }
 0x48e   :  { %v8800_v32 = vpop.permute.xlu0 %3242 }
 0x48f   :  { %4697 = vmatmul.mubr.msk.f32.gmra.mrb[8].mxu0 %vm997_vm13, %v61_v7  ;;  %v3454_v7 = vmul.f32 %v5086_v56, %v11658_v47 }
 0x490   :  { %2356 = vmatprep.mubr.f32.mxu0 %v10628_v14 }
 0x493   :  { %4698 = vmatmul.mubr.msk.f32.gmra.mrb[10].mxu0 %vm997_vm13, %v62_v28  ;;  %v5087_v28 = vld [vmem:[%s10195_s0 + $0x28] sm:$0xff] }
 0x494   :  { %v8803_v5 = vpop.permute.xlu1 %3248  ;;  %2362 = vmatprep.mubr.f32.mxu0 %v10628_v14 }
 0x495   :  { %11643 = vst [vmem:[#allocation101_spill] sm:$0xff] %v8803_v5  ;;  %v3080_v5 = vsel %vm467_vm15, 0.0, %v8659_v54  ;;  %v3226_v54 = vsel %vm732_vm14, %v8777_v46, %v8769_v9 }
 0x497   :  { %4699 = vmatmul.mubr.msk.f32.gmra.mrb[12].mxu0 %vm997_vm13, %v63_v59  ;;  %v8810_v37 = vpop.permute.xlu0 %3246  ;;  %v3455_v59 = vmul.f32 %v5087_v28, %v11658_v47 }
 0x498   :  { %11644 = vst [vmem:[#allocation112_spill] sm:$0xff] %v8810_v37  ;;  %2368 = vmatprep.mubr.f32.mxu0 %v10628_v14 }
 0x49b   :  { %4700 = vmatmul.mubr.msk.f32.gmra.mrb[14].mxu0 %vm997_vm13, %v64_v8  ;;  %v11659_v8 = vld [vmem:[#allocation144_spill] sm:$0xff] }
 0x49c   :  { %v8816_v22 = vpop.permute.xlu1 %3372  ;;  %4655 = vmatprep.mubr.f32.mxu0 %v10628_v14  ;;  %v8858_v14 = vmul.f32 %v8721_v60, %v11659_v8 }
 0x49e   :  { %v8820_v24 = vpop.permute.xlu0 %3370  ;;  %11660 = vst [vmem:[#allocation180_spill] sm:$0xff] %v8858_v14 }
 0x4a1   :  { %v8822_v3 = vpop.permute.xlu1 %3376 }
 0x4a2   :  { %11645 = vst [vmem:[#allocation131_spill] sm:$0xff] %v8822_v3 }
 0x4a3   :  { %v8824_v38 = vpop.permute.xlu0 %3374 }
 0x4a4   :  { %11646 = vst [vmem:[#allocation133_spill] sm:$0xff] %v8824_v38 }
 0x4a7   :  { %v8826_v10 = vpop.permute.xlu1 %3396 }
 0x4a8   :  { %11647 = vst [vmem:[#allocation186_spill] sm:$0xff] %v8826_v10  ;;  %v11666_v10 = vld [vmem:[#allocation211_spill] sm:$0xff] }
 0x4ac   :  { %v8828_v55 = vpop.permute.xlu0 %3394 }
 0x4ad   :  { %11648 = vst [vmem:[#allocation188_spill] sm:$0xff] %v8828_v55  ;;  %v3438_v55 = vmul.f32 %v11493_v62, %v11664_v4 }
 0x4ae   :  { %v8830_v17 = vpop.permute.xlu1 %3400 }
 0x4af   :  { %11649 = vst [vmem:[#allocation202_spill] sm:$0xff] %v8830_v17  ;;  %v5088_v17 = vld [vmem:[%s10195_s0 + $0x38] sm:$0xff] }
 0x4b1   :  { %v8832_v48 = vpop.permute.xlu0 %3398 }
 0x4b2   :  { %11650 = vst [vmem:[#allocation6_spill] sm:$0xff] %v8832_v48  ;;  %v8866_v48 = vmul.f32 %v5088_v17, %v11659_v8 }
 0x4b3   :  { %v8834_v57 = vpop.permute.xlu1 %3636 }
 0x4b4   :  { %11651 = vst [vmem:[#allocation148_spill] sm:$0xff] %v8834_v57  ;;  %11661 = vst [vmem:[#allocation11_spill] sm:$0xff] %v8866_v48  ;;  %v3439_v48 = vmul.f32 %v7947_v43, %v11664_v4  ;;  %v8899_v4 = vsel %vm467_vm15, 0.0, %v8729_v45  ;;  %v3233_v45 = vsel %vm732_vm14, 0.0, %v8787_v58 }
 0x4b5   :  { %11667 = vst [vmem:[#allocation12_spill] sm:$0xff] %v8899_v4 }
 0x4b6   :  { %v8836_v34 = vpop.permute.xlu0 %3634 }
 0x4b7   :  { %11652 = vst [vmem:[#allocation176_spill] sm:$0xff] %v8836_v34  ;;  %v8878_v34 = vmul.f32 %v5086_v56, %v11666_v10 }
 0x4b9   :  { %v8838_v30 = vpop.permute.xlu1 %3640 }
 0x4ba   :  { %11653 = vst [vmem:[#allocation10_spill] sm:$0xff] %v8838_v30  ;;  %v11663_v30 = vld [vmem:[#allocation168_spill] sm:$0xff] }
 0x4bb   :  { %v3414_v47 = vmul.f32 %v11595_v44, %v11663_v30  ;;  %v3415_v8 = vmul.f32 %v11508_v50, %v11663_v30 }
 0x4bc   :  { %v8840_v1 = vpop.permute.xlu0 %3638 }
 0x4bd   :  { %11654 = vst [vmem:[#allocation20_spill] sm:$0xff] %v8840_v1  ;;  %v3426_v37 = vadd.f32 %v3422_v2, %v3414_v47  ;;  %v11669_v2 = vld [vmem:[#allocation196_spill] sm:$0xff] }
 0x4bf   :  { %v8842_v12 = vpop.permute.xlu1 %3660  ;;  %v3442_v56 = vadd.f32 %v3438_v55, %v3426_v37  ;;  %v8927_v55 = vadd.f32 %v3226_v54, %v8736_v18  ;;  %v11676_v18 = vld [vmem:[#allocation218_spill] sm:$0xff] }
 0x4c0   :  { %11655 = vst [vmem:[#allocation22_spill] sm:$0xff] %v8842_v12  ;;  %v11662_v12 = vld [vmem:[#allocation210_spill] sm:$0xff]  ;;  %v3502_v54 = vmul.f32 %v8082_v11, %v11676_v18 }
 0x4c1   :  { %v3456_v1 = vmul.f32 %v8721_v60, %v11662_v12  ;;  %v8885_v60 = vmul.f32 %v5087_v28, %v11666_v10  ;;  %v3424_v28 = vmul.f32 %v7900_v61, %v11669_v2  ;;  %v3458_v38 = vadd.f32 %v3454_v7, %v3442_v56 }
 0x4c2   :  { %v8844_v23 = vpop.permute.xlu0 %3658 }
 0x4c3   :  { %11656 = vst [vmem:[#allocation9_spill] sm:$0xff] %v8844_v23  ;;  %v3423_v23 = vmul.f32 %v7877_v0, %v11657_v41  ;;  %v3457_v41 = vmul.f32 %v5088_v17, %v11662_v12  ;;  %v3081_v17 = vsel %vm467_vm15, 0.0, %v8681_v33  ;;  %v8895_v12 = vsel %vm467_vm15, 0.0, %v8700_v49 }
 0x4c4   :  { %v3425_v33 = vmul.f32 %v7904_v6, %v11669_v2  ;;  %v11675_v2 = vld [vmem:[#allocation151_spill] sm:$0xff]  ;;  %v8936_v57 = vadd.f32 %v3233_v45, %v3081_v17 }
 0x4c5   :  { %v8874_v14 = vpop.permute.xlu1 %3664  ;;  %v3427_v10 = vadd.f32 %v3423_v23, %v3415_v8  ;;  %v11671_v23 = vld [vmem:[#allocation213_spill] sm:$0xff] }
 0x4c6   :  { %11665 = vst [vmem:[#allocation149_spill] sm:$0xff] %v8874_v14  ;;  %v3232_v14 = vsel %vm732_vm14, 0.0, %v8777_v46  ;;  %v3470_v8 = vmul.f32 %v7989_v52, %v11671_v23  ;;  %v11673_v46 = vld [vmem:[#allocation140_spill] sm:$0xff] }
 0x4c7   :  { %v8910_v49 = vadd.f32 %v3232_v14, %v3080_v5  ;;  %v3443_v47 = vadd.f32 %v3439_v48, %v3427_v10  ;;  %v3440_v37 = vmul.f32 %v7967_v31, %v11673_v46  ;;  %v3441_v14 = vmul.f32 %v7971_v25, %v11673_v46 }
 0x4c8   :  { %v8901_v30 = vpop.permute.xlu0 %3662  ;;  %v3227_v48 = vsel %vm732_vm14, %v8787_v58, %v8780_v36  ;;  %v3471_v10 = vmul.f32 %v7993_v19, %v11671_v23  ;;  %v3474_v17 = vadd.f32 %v3470_v8, %v3458_v38 }
 0x4c9   :  { %11668 = vst [vmem:[#allocation14_spill] sm:$0xff] %v8901_v30  ;;  %11670 = vst [vmem:[#allocation13_spill] sm:$0xff] %v8910_v49  ;;  %v11672_v30 = vld [vmem:[#allocation134_spill] sm:$0xff]  ;;  %v11677_v49 = vld [vmem:[#allocation193_spill] sm:$0xff]  ;;  %v3459_v25 = vadd.f32 %v3455_v59, %v3443_v47 }
 0x4ca   :  { %v3416_v4 = vmul.f32 %v11496_v53, %v11672_v30  ;;  %v3417_v9 = vmul.f32 %v11498_v20, %v11672_v30  ;;  %v3486_v30 = vmul.f32 %v8035_v35, %v11675_v2  ;;  %v3430_v36 = vmul.f32 %v11492_v16, %v11677_v49  ;;  %v11680_v59 = vld [vmem:[#allocation146_spill] sm:$0xff] }
 0x4cb   :  { %v8924_v5 = vpop.permute.xlu1 %3788  ;;  %v3431_v58 = vmul.f32 %v7877_v0, %v11677_v49  ;;  %v3503_v0 = vmul.f32 %v8086_v39, %v11676_v18  ;;  %v3473_v38 = vmul.f32 %v8015_v40, %v11680_v59 }
 0x4cc   :  { %11674 = vst [vmem:[#allocation8_spill] sm:$0xff] %v8924_v5  ;;  %v3428_v3 = vadd.f32 %v3424_v28, %v3416_v4  ;;  %v3429_v46 = vadd.f32 %v3425_v33, %v3417_v9  ;;  %v3487_v5 = vmul.f32 %v8039_v21, %v11675_v2  ;;  %v11678_v4 = vld [vmem:[#allocation164_spill] sm:$0xff]  ;;  %v3475_v2 = vadd.f32 %v3471_v10, %v3459_v25 }
 0x4cd   :  { %v8946_v23 = vpop.permute.xlu0 %3786  ;;  %v3418_v56 = vmul.f32 %v11595_v44, %v11678_v4  ;;  %v3419_v28 = vmul.f32 %v11508_v50, %v11678_v4  ;;  %v11679_v33 = vld [vmem:[#allocation208_spill] sm:$0xff]  ;;  %v3490_v49 = vadd.f32 %v3486_v30, %v3474_v17  ;;  %v3256_v10 = vsel %vm732_vm14, 0.0, %v8800_v32 }
 0x4ce   :  { %v3444_v45 = vadd.f32 %v3440_v37, %v3428_v3  ;;  %v3445_v7 = vadd.f32 %v3441_v14, %v3429_v46  ;;  %v3446_v9 = vmul.f32 %v11493_v62, %v11679_v33  ;;  %v3447_v16 = vmul.f32 %v7947_v43, %v11679_v33  ;;  %v11681_v50 = vld [vmem:[#allocation216_spill] sm:$0xff] }
 0x4cf   :  { %v3472_v3 = vmul.f32 %v8011_v63, %v11680_v59  ;;  %v3488_v47 = vmul.f32 %v8059_v27, %v11681_v50  ;;  %v3434_v62 = vadd.f32 %v3430_v36, %v3418_v56  ;;  %v3435_v8 = vadd.f32 %v3431_v58, %v3419_v28  ;;  %v11683_v56 = vld [vmem:[#allocation214_spill] sm:$0xff] }
 0x4d0   :  { %v8962_v44 = vpop.permute.xlu1 %3792  ;;  %v3491_v37 = vadd.f32 %v3487_v5, %v3475_v2  ;;  %v3460_v43 = vadd.f32 %v3456_v1, %v3444_v45  ;;  %v3461_v25 = vadd.f32 %v3457_v41, %v3445_v7  ;;  %v3489_v14 = vmul.f32 %v8063_v29, %v11681_v50  ;;  %v11682_v5 = vld [vmem:[#allocation165_spill] sm:$0xff]  ;;  %v11686_v59 = vld [vmem:[#allocation138_spill] sm:$0xff] }
 0x4d1   :  { %v3250_v46 = vsel %vm732_vm14, %v8800_v32, %v8793_v51  ;;  %v3450_v18 = vadd.f32 %v3446_v9, %v3434_v62  ;;  %v3451_v30 = vadd.f32 %v3447_v16, %v3435_v8  ;;  %v3237_v36 = vadd.f32 %v3227_v48, %v8742_v26  ;;  %v11684_v48 = vld [vmem:[#allocation217_spill] sm:$0xff] }
 0x4d2   :  { %v3506_v58 = vadd.f32 %v3502_v54, %v3490_v49  ;;  %v3504_v1 = vmul.f32 %v8104_v42, %v11682_v5  ;;  %v3505_v41 = vmul.f32 %v8108_v15, %v11682_v5  ;;  %v3507_v45 = vadd.f32 %v3503_v0, %v3491_v37  ;;  %v11685_v0 = vld [vmem:[#allocation219_spill] sm:$0xff]  ;;  %v11688_v8 = vld [vmem:[#allocation209_spill] sm:$0xff] }
 0x4d3   :  { %v3476_v7 = vadd.f32 %v3472_v3, %v3460_v43  ;;  %v3477_v4 = vadd.f32 %v3473_v38, %v3461_v25  ;;  %v3478_v28 = vmul.f32 %v7989_v52, %v11683_v56  ;;  %v8983_v51 = vadd.f32 %v3256_v10, %v8895_v12 }
 0x4d4   :  { %v8973_v17 = vpop.permute.xlu0 %3790  ;;  %v8986_v32 = vadd.f32 %v3250_v46, %v8747_v13  ;;  %v3479_v26 = vmul.f32 %v7993_v19, %v11683_v56  ;;  %v3494_v54 = vmul.f32 %v8035_v35, %v11684_v48  ;;  %v3466_v2 = vadd.f32 %v8878_v34, %v3450_v18  ;;  %v11696_v56 = vld [vmem:[#allocation220_spill] sm:$0xff] }
 0x4d5   :  { %v3492_v9 = vadd.f32 %v3488_v47, %v3476_v7  ;;  %v3493_v16 = vadd.f32 %v3489_v14, %v3477_v4  ;;  %v3467_v52 = vadd.f32 %v8885_v60, %v3451_v30  ;;  %v3378_v12 = vsel %vm997_vm13, %v8820_v24, %v8816_v22  ;;  %v11687_v47 = vld [vmem:[#allocation157_spill] sm:$0xff]  ;;  %v11695_v7 = vld [vmem:[#allocation152_spill] sm:$0xff] }
 0x4d6   :  { %v3495_v13 = vmul.f32 %v8039_v21, %v11684_v48  ;;  %v3510_v19 = vmul.f32 %v8082_v11, %v11685_v0  ;;  %v3432_v35 = vmul.f32 %v7900_v61, %v11686_v59  ;;  %v3511_v34 = vmul.f32 %v8086_v39, %v11685_v0  ;;  %v11693_v30 = vld [vmem:[#allocation133_spill] sm:$0xff] }
 0x4d7   :  { %v8992_v33 = vpop.permute.xlu1 %3812  ;;  %v3508_v3 = vadd.f32 %v3504_v1, %v3492_v9  ;;  %v3509_v38 = vadd.f32 %v3505_v41, %v3493_v16  ;;  %v3433_v60 = vmul.f32 %v7904_v6, %v11686_v59  ;;  %v3384_v22 = vsel %vm997_vm13, 0.0, %v8820_v24  ;;  %v11689_v6 = vld [vmem:[#allocation82_spill] sm:$0xff]  ;;  %v11690_v24 = vld [vmem:[#allocation215_spill] sm:$0xff]  ;;  %v11694_v1 = vld [vmem:[#allocation148_spill] sm:$0xff] }
 0x4d8   :  { %v3482_v21 = vadd.f32 %v3478_v28, %v3466_v2  ;;  %v3483_v50 = vadd.f32 %v3479_v26, %v3467_v52  ;;  %v3420_v11 = vmul.f32 %v11496_v53, %v11687_v47  ;;  %v3387_v61 = vadd.f32 %v3378_v12, %v8927_v55  ;;  %v11691_v53 = vld [vmem:[#allocation13_spill] sm:$0xff]  ;;  %v11692_v55 = vld [vmem:[#allocation131_spill] sm:$0xff]  ;;  %v11697_v26 = vld [vmem:[#allocation112_spill] sm:$0xff] }
 0x4d9   :  { %v9009_v49 = vpop.permute.xlu0 %3810  ;;  %v3421_v62 = vmul.f32 %v11498_v20, %v11687_v47  ;;  %v3448_v39 = vmul.f32 %v7967_v31, %v11688_v8  ;;  %v3449_v37 = vmul.f32 %v11689_v6, %v11688_v8  ;;  %v3480_v10 = vmul.f32 %v8011_v63, %v11690_v24  ;;  %v11700_v12 = vld [vmem:[#allocation8_spill] sm:$0xff] }
 0x4da   :  { %v3498_v43 = vadd.f32 %v3494_v54, %v3482_v21  ;;  %v3499_v25 = vadd.f32 %v3495_v13, %v3483_v50  ;;  %v3436_v14 = vadd.f32 %v3432_v35, %v3420_v11  ;;  %v3386_v18 = vadd.f32 %v3384_v22, %v11691_v53  ;;  %v11698_v54 = vld [vmem:[#allocation101_spill] sm:$0xff]  ;;  %v11701_v21 = vld [vmem:[#allocation12_spill] sm:$0xff]  ;;  %v11702_v11 = vld [vmem:[#allocation186_spill] sm:$0xff] }
 0x4db   :  { %v3379_v20 = vsel %vm997_vm13, %v11693_v30, %v11692_v55  ;;  %v3437_v5 = vadd.f32 %v3433_v60, %v3421_v62  ;;  %v3481_v31 = vmul.f32 %v8015_v40, %v11690_v24  ;;  %v3648_v41 = vsel %vm1486_vm10, %v11694_v1, 0.0  ;;  %v11707_v24 = vld [vmem:[#allocation20_spill] sm:$0xff] }
 0x4dc   :  { %v9036_v4 = vmul.f32 %v8059_v27, %v11695_v7  ;;  %v3497_v63 = vmul.f32 %v8063_v29, %v11695_v7  ;;  %v9042_v28 = vmul.f32 %v8104_v42, %v11696_v56  ;;  %v3257_v48 = vsel %vm732_vm14, 0.0, %v11697_v26  ;;  %v11699_v29 = vld [vmem:[#allocation176_spill] sm:$0xff] }
 0x4dd   :  { %v9024_v46 = vpop.permute.xlu1 %3816  ;;  %v3251_v40 = vsel %vm732_vm14, %v11697_v26, %v11698_v54  ;;  %v3385_v9 = vsel %vm997_vm13, 0.0, %v11693_v30  ;;  %v3519_v16 = vadd.f32 %v3507_v45, %v3387_v61  ;;  %v3389_v2 = vadd.f32 %v3379_v20, %v3237_v36  ;;  %v11703_v61 = vld [vmem:[#allocation188_spill] sm:$0xff] }
 0x4de   :  { %v3642_v52 = vsel %vm1486_vm10, %v11699_v29, %v11694_v1  ;;  %v3452_v42 = vadd.f32 %v3448_v39, %v3436_v14  ;;  %v3800_v13 = vsel %vm1751_vm12, %v11700_v12, 0.0  ;;  %v3518_v0 = vadd.f32 %v3506_v58, %v3386_v18 }
 0x4df   :  { %v9051_v27 = vpop.permute.xlu0 %3814  ;;  %v3651_v59 = vadd.f32 %v3648_v41, %v3519_v16  ;;  %v3514_v35 = vadd.f32 %v3510_v19, %v3498_v43  ;;  %v3515_v60 = vadd.f32 %v3511_v34, %v3499_v25  ;;  %v3260_v50 = vadd.f32 %v3257_v48, %v11701_v21  ;;  %v11704_v19 = vld [vmem:[#allocation99_spill] sm:$0xff]  ;;  %v11705_v43 = vld [vmem:[#allocation10_spill] sm:$0xff] }
 0x4e0   :  { %v3388_v45 = vadd.f32 %v3385_v9, %v8936_v57  ;;  %v3794_v36 = vsel %vm1751_vm12, %v8946_v23, %v11700_v12  ;;  %v3402_v62 = vsel %vm997_vm13, %v11703_v61, %v11702_v11  ;;  %v3650_v8 = vadd.f32 %v3642_v52, %v3518_v0  ;;  %v11706_v57 = vld [vmem:[#allocation180_spill] sm:$0xff]  ;;  %v11708_v41 = vld [vmem:[#allocation11_spill] sm:$0xff]  ;;  %v11709_v16 = vld [vmem:[#allocation22_spill] sm:$0xff] }
 0x4e1   :  { %v3453_v58 = vadd.f32 %v3449_v37, %v3437_v5  ;;  %v3803_v39 = vadd.f32 %v3800_v13, %v3651_v59  ;;  %v3261_v34 = vadd.f32 %v3251_v40, %v11704_v19  ;;  %v3521_v6 = vadd.f32 %v3509_v38, %v3389_v2 }
 0x4e2   :  { %v3941_v22 = vpop.permute.xlu1 %3940  ;;  %v3649_v25 = vsel %vm1486_vm10, %v11705_v43, 0.0  ;;  %v3468_v14 = vadd.f32 %v11706_v57, %v3452_v42  ;;  %v3408_v23 = vsel %vm997_vm13, 0.0, %v11703_v61  ;;  %v3643_v53 = vsel %vm1486_vm10, %v11707_v24, %v11705_v43  ;;  %v11713_v43 = vld [vmem:[#allocation149_spill] sm:$0xff]  ;;  %v11714_v24 = vld [vmem:[#allocation14_spill] sm:$0xff] }
 0x4e3   :  { %v3952_v47 = vsel %vm2016_vm9, %v3941_v22, 0.0  ;;  %v3802_v18 = vadd.f32 %v3794_v36, %v3650_v8  ;;  %v3411_v37 = vadd.f32 %v3402_v62, %v8986_v32  ;;  %v3520_v20 = vadd.f32 %v3508_v3, %v3388_v45 }
 0x4e4   :  { %v9076_v30 = vadd.f32 %v3952_v47, %v3803_v39  ;;  %v3801_v38 = vsel %vm1751_vm12, %v8962_v44, 0.0  ;;  %v3653_v1 = vadd.f32 %v3649_v25, %v3521_v6  ;;  %v3469_v7 = vadd.f32 %v11708_v41, %v3453_v58 }
 0x4e5   :  { %v3513_v26 = vmul.f32 %v8108_v15, %v11696_v56  ;;  %v3410_v54 = vadd.f32 %v3408_v23, %v8983_v51  ;;  %v3652_v40 = vadd.f32 %v3643_v53, %v3520_v20  ;;  %v3484_v9 = vadd.f32 %v3480_v10, %v3468_v14  ;;  %v11710_v56 = vld [vmem:[#allocation6_spill] sm:$0xff] }
 0x4e6   :  { %v3939_v55 = vpop.permute.xlu0 %3938  ;;  %v3795_v32 = vsel %vm1751_vm12, %v8973_v17, %v8962_v44  ;;  %v3672_v2 = vsel %vm1486_vm10, %v11709_v16, 0.0  ;;  %v3805_v29 = vadd.f32 %v3801_v38, %v3653_v1  ;;  %v3409_v42 = vsel %vm997_vm13, 0.0, %v11710_v56  ;;  %v11711_v51 = vld [vmem:[#allocation202_spill] sm:$0xff]  ;;  %v11712_v44 = vld [vmem:[#allocation9_spill] sm:$0xff] }
 0x4e7   :  { %v3946_v5 = vsel %vm2016_vm9, %v3939_v55, %v3941_v22  ;;  %v3403_v10 = vsel %vm997_vm13, %v11710_v56, %v11711_v51  ;;  %v3523_v12 = vadd.f32 %v3515_v60, %v3411_v37  ;;  %v3485_v13 = vadd.f32 %v3481_v31, %v3469_v7 }
 0x4e8   :  { %v9085_v48 = vadd.f32 %v3946_v5, %v3802_v18  ;;  %v3666_v17 = vsel %vm1486_vm10, %v11712_v44, %v11709_v16  ;;  %v3804_v0 = vadd.f32 %v3795_v32, %v3652_v40  ;;  %v3824_v59 = vsel %vm1751_vm12, %v8992_v33, 0.0  ;;  %v69_v44 = vld [vmem:[%s10199_s4 + $0x20] sm:$0xff] }
 0x4e9   :  { %v3945_v3 = vpop.permute.xlu1 %3944  ;;  %v3522_v45 = vadd.f32 %v3514_v35, %v3410_v54  ;;  %v3675_v36 = vadd.f32 %v3672_v2, %v3523_v12  ;;  %v3501_v47 = vadd.f32 %v3497_v63, %v3485_v13  ;;  %v3413_v61 = vadd.f32 %v3403_v10, %v3261_v34  ;;  %v65_v10 = vld [vmem:[%s10199_s4] sm:$0xff]  ;;  %v67_v12 = vld [vmem:[%s10199_s4 + $0x10] sm:$0xff]  ;;  %v68_v13 = vld [vmem:[%s10199_s4 + $0x18] sm:$0xff] }
 0x4ea   :  { %v3953_v52 = vsel %vm2016_vm9, %v3945_v3, 0.0  ;;  %v3982_v15 = vadd.f32 %v9076_v30, %v9085_v48  ;;  %v3500_v31 = vadd.f32 %v9036_v4, %v3484_v9  ;;  %v3818_v60 = vsel %vm1751_vm12, %v9009_v49, %v8992_v33 }
 0x4eb   :  { %v3943_v22 = vpop.permute.xlu0 %3942  ;;  %v9106_v21 = vadd.f32 %v3953_v52, %v3805_v29  ;;  %v3412_v8 = vadd.f32 %v3409_v42, %v3260_v50  ;;  %v3674_v58 = vadd.f32 %v3666_v17, %v3522_v45  ;;  %v3517_v39 = vadd.f32 %v3513_v26, %v3501_v47  ;;  %v70_v17 = vld [vmem:[%s10199_s4 + $0x28] sm:$0xff]  ;;  %v75_v45 = vld [vmem:[%s10201_s6] sm:$0xff] }
 0x4ec   :  { %3983 = vadd.xlane.f32.xlu0 %v3982_v15  ;;  %v3947_v11 = vsel %vm2016_vm9, %v3943_v22, %v3945_v3  ;;  %v3827_v19 = vadd.f32 %v3824_v59, %v3675_v36  ;;  %v3990_v34 = vmul.f32 %v9085_v48, %v9085_v48  ;;  %v3991_v4 = vmul.f32 %v9076_v30, %v9076_v30  ;;  %v71_v59 = vld [vmem:[%s10199_s4 + $0x30] sm:$0xff]  ;;  %v72_v22 = vld [vmem:[%s10199_s4 + $0x38] sm:$0xff]  ;;  %v76_v36 = vld [vmem:[%s10201_s6 + $0x8] sm:$0xff] }
 0x4ed   :  { %v9113_v62 = vadd.f32 %v3947_v11, %v3804_v0  ;;  %v3673_v33 = vsel %vm1486_vm10, %v11713_v43, 0.0  ;;  %v3826_v49 = vadd.f32 %v3818_v60, %v3674_v58  ;;  %v3516_v57 = vadd.f32 %v9042_v28, %v3500_v31  ;;  %v66_v0 = vld [vmem:[%s10199_s4 + $0x8] sm:$0xff] }
 0x4ee   :  { %v3525_v14 = vadd.f32 %v3517_v39, %v3413_v61  ;;  %v3667_v53 = vsel %vm1486_vm10, %v11714_v24, %v11713_v43  ;;  %v3825_v18 = vsel %vm1751_vm12, %v9024_v46, 0.0  ;;  %v3994_v5 = vadd.f32 %v3991_v4, %v3990_v34 }
 0x4ef   :  { %v3965_v6 = vpop.permute.xlu1 %3964  ;;  %v3985_v63 = vadd.f32 %v9106_v21, %v9113_v62  ;;  %v3524_v37 = vadd.f32 %v3516_v57, %v3412_v8  ;;  %v3819_v1 = vsel %vm1751_vm12, %v9051_v27, %v9024_v46  ;;  %v3992_v29 = vmul.f32 %v9113_v62, %v9113_v62 }
 0x4f0   :  { %v3976_v35 = vsel %vm2016_vm9, %v3965_v6, 0.0  ;;  %v3677_v20 = vadd.f32 %v3673_v33, %v3525_v14  ;;  %v3993_v52 = vmul.f32 %v9106_v21, %v9106_v21 }
 0x4f1   :  { %v3963_v50 = vpop.permute.xlu0 %3962  ;;  %v9124_v25 = vadd.f32 %v3976_v35, %v3827_v19  ;;  %3986 = vadd.xlane.f32.xlu1 %v3985_v63  ;;  %v3676_v54 = vadd.f32 %v3667_v53, %v3524_v37 }
 0x4f2   :  { %v3970_v23 = vsel %vm2016_vm9, %v3963_v50, %v3965_v6  ;;  %v3829_v40 = vadd.f32 %v3825_v18, %v3677_v20  ;;  %v3997_v15 = vadd.f32 %v3993_v52, %v3992_v29 }
 0x4f3   :  { %v9133_v55 = vadd.f32 %v3970_v23, %v3826_v49  ;;  %v4031_v28 = vmul.f32 %v9124_v25, %v9124_v25  ;;  %v3828_v9 = vadd.f32 %v3819_v1, %v3676_v54 }
 0x4f4   :  { %v3969_v38 = vpop.permute.xlu1 %3968 }
 0x4f5   :  { %v3977_v41 = vsel %vm2016_vm9, %v3969_v38, 0.0  ;;  %v4022_v7 = vadd.f32 %v9124_v25, %v9133_v55  ;;  %v4030_v26 = vmul.f32 %v9133_v55, %v9133_v55  ;;  %3995 = vadd.xlane.f32.xlu1 %v3994_v5 }
 0x4f6   :  { %v9145_v3 = vadd.f32 %v3977_v41, %v3829_v40 }
 0x4f7   :  { %4023 = vadd.xlane.f32.xlu0 %v4022_v7  ;;  %v4034_v16 = vadd.f32 %v4031_v28, %v4030_v26 }
 0x4f8   :  { %v3967_v32 = vpop.permute.xlu0 %3966  ;;  %v4033_v42 = vmul.f32 %v9145_v3, %v9145_v3 }
 0x4f9   :  { %v3971_v2 = vsel %vm2016_vm9, %v3967_v32, %v3969_v38  ;;  %4035 = vadd.xlane.f32.xlu1 %v4034_v16  ;;  %vm2737_vm9 = vcmask 523264  }
 0x4fa   :  { %v9148_v46 = vadd.f32 %v3971_v2, %v3828_v9 }
 0x4fc   :  { %v4025_v27 = vadd.f32 %v9145_v3, %v9148_v46  ;;  %v4032_v56 = vmul.f32 %v9148_v46, %v9148_v46 }
 0x4fe   :  { %4026 = vadd.xlane.f32.xlu0 %v4025_v27  ;;  %v4037_v51 = vadd.f32 %v4033_v42, %v4032_v56 }
 0x502   :  { %3998 = vadd.xlane.f32.xlu0 %v3997_v15 }
 0x506   :  { %4038 = vadd.xlane.f32.xlu0 %v4037_v51 }
 0x50a   :  { %2200 = vperm.xlu1 %4920, %v65_v10  }
 0x50e   :  { %2210 = vperm.xlu1 %4920, %v67_v12  }
 0x512   :  { %2215 = vperm.xlu1 %4920, %v68_v13  }
 0x516   :  { %2220 = vperm.xlu1 %4920, %v69_v44  }
 0x51a   :  { %2225 = vperm.xlu1 %4920, %v70_v17  }
 0x51c   :  { %2205 = vperm.xlu0 %4919, %v66_v0  }
 0x51e   :  { %2230 = vperm.xlu1 %4920, %v71_v59  }
 0x522   :  { %2235 = vperm.xlu1 %4920, %v72_v22  }
 0x526   :  { %2729 = vperm.xlu1 %4920, %v75_v45  }
 0x52a   :  { %2734 = vperm.xlu1 %4920, %v76_v36  }
 0x552   :  { %v2328_v47 = vpop.f32.mrb[0].mxu0 }
 0x553   :  { %v2330_v11 = vpop.f32.mrb[1].mxu0 }
 0x556   :  { %v9190_v61 = vpop.f32.mrb[2].mxu0 }
 0x557   :  { %v9192_v31 = vpop.f32.mrb[3].mxu0 }
 0x55a   :  { %v2340_v60 = vpop.f32.mrb[4].mxu0 }
 0x55b   :  { %v2342_v8 = vpop.f32.mrb[5].mxu0 }
 0x55e   :  { %v9194_v58 = vpop.f32.mrb[6].mxu0 }
 0x55f   :  { %v9196_v39 = vpop.f32.mrb[7].mxu0 }
 0x562   :  { %v9198_v19 = vpop.f32.mrb[8].mxu0 }
 0x563   :  { %v9200_v6 = vpop.f32.mrb[9].mxu0 }
 0x566   :  { %v9202_v35 = vpop.f32.mrb[10].mxu0 }
 0x567   :  { %v9204_v63 = vpop.f32.mrb[11].mxu0 }
 0x56a   :  { %v9206_v34 = vpop.f32.mrb[12].mxu0 }
 0x56b   :  { %v9208_v4 = vpop.f32.mrb[13].mxu0 }
 0x56e   :  { %v9210_v43 = vpop.f32.mrb[14].mxu0 }
 0x56f   :  { %v9212_v33 = vpop.f32.mrb[15].mxu0 }
 0x579   :  { %v3984_v49 = vpop.xlane.xlu0 %3983 }
 0x57a   :  { %v9214_v57 = vmul.f32 0.00390625, %v3984_v49 }
 0x57c   :  { %v4006_v24 = vmul.f32 %v9214_v57, %v9214_v57  ;;  %v4002_v32 = vsub.f32 %v9085_v48, %v9214_v57  ;;  %v4003_v16 = vsub.f32 %v9076_v30, %v9214_v57 }
 0x57e   :  { %v3987_v50 = vpop.xlane.xlu1 %3986 }
 0x57f   :  { %v9222_v1 = vmul.f32 0.00390625, %v3987_v50 }
 0x581   :  { %v4004_v2 = vsub.f32 %v9113_v62, %v9222_v1  ;;  %v4005_v52 = vsub.f32 %v9106_v21, %v9222_v1  ;;  %v4007_v56 = vmul.f32 %v9222_v1, %v9222_v1 }
 0x582   :  { %v3996_v14 = vpop.xlane.xlu1 %3995 }
 0x583   :  { %v4000_v53 = vmul.f32 0.00390625, %v3996_v14 }
 0x584   :  { %v4024_v23 = vpop.xlane.xlu0 %4023 }
 0x585   :  { %v9218_v18 = vmul.f32 0.00390625, %v4024_v23  ;;  %v4008_v37 = vsub.f32 %v4000_v53, %v4006_v24 }
 0x586   :  { %v4036_v20 = vpop.xlane.xlu1 %4035 }
 0x587   :  { %v4010_v38 = vadd.f32 1e-05, %v4008_v37  ;;  %v4046_v5 = vmul.f32 %v9218_v18, %v9218_v18  ;;  %v4040_v28 = vmul.f32 0.00390625, %v4036_v20  ;;  %v4042_v44 = vsub.f32 %v9133_v55, %v9218_v18 }
 0x588   :  { %v4043_v17 = vsub.f32 %v9124_v25, %v9218_v18 }
 0x589   :  { %4933 = vrsqrt.f32 %v4010_v38  ;;  %v4048_v41 = vsub.f32 %v4040_v28, %v4046_v5 }
 0x58a   :  { %v9224_v26 = vpop.permute.xlu1 %2200 }
 0x58b   :  { %v4027_v7 = vpop.xlane.xlu0 %4026  ;;  %11715 = vst [vmem:[#allocation16_spill] sm:$0xff] %v9224_v26  ;;  %v4050_v54 = vadd.f32 1e-05, %v4048_v41  ;;  %v9227_v40 = vadd.f32 %v2328_v47, %v9224_v26  ;;  %v9230_v9 = vadd.f32 %v2330_v11, %v9224_v26 }
 0x58c   :  { %v9238_v27 = vmul.f32 0.00390625, %v4027_v7 }
 0x58d   :  { %4935 = vrsqrt.f32 %v4050_v54  ;;  %v2631_v29 = vmul.f32 -0.5, %v9227_v40  ;;  %v2632_v48 = vmul.f32 -0.5, %v9230_v9  ;;  %v10650_v30 = vand.u32 2147483647, %v9230_v9 }
 0x58e   :  { %v9246_v42 = vpop.permute.xlu1 %2210  ;;  %v4044_v22 = vsub.f32 %v9148_v46, %v9238_v27  ;;  %v10648_v47 = vand.u32 2147483647, %v9227_v40  ;;  %v4045_v11 = vsub.f32 %v9145_v3, %v9238_v27  ;;  %v4047_v25 = vmul.f32 %v9238_v27, %v9238_v27 }
 0x58f   :  { %v3999_v15 = vpop.xlane.xlu0 %3998  ;;  %11716 = vst [vmem:[#allocation17_spill] sm:$0xff] %v9246_v42  ;;  %v2647_v10 = vmul.f32 %v2631_v29, %v9227_v40  ;;  %v9251_v12 = vadd.f32 %v2340_v60, %v9246_v42  ;;  %v9254_v13 = vadd.f32 %v2342_v8, %v9246_v42  ;;  %v2648_v0 = vmul.f32 %v2632_v48, %v9230_v9 }
 0x590   :  { %v4001_v51 = vmul.f32 0.00390625, %v3999_v15  ;;  %v2392_v59 = vmul.f32 0.23164189, %v10650_v30  ;;  %v2391_v28 = vmul.f32 0.23164189, %v10648_v47 }
 0x591   :  { %v2635_v36 = vmul.f32 -0.5, %v9251_v12  ;;  %v2663_v55 = vmul.f32 1.442695, %v2647_v10  ;;  %v2636_v8 = vmul.f32 -0.5, %v9254_v13  ;;  %v2665_v18 = vmul.f32 1.442695, %v2648_v0 }
 0x592   :  { %v4009_v45 = vsub.f32 %v4001_v51, %v4007_v56  ;;  %v9272_v49 = vpop.permute.xlu1 %2215  ;;  %v2408_v20 = vadd.f32 1.0, %v2392_v59 }
 0x593   :  { %v4039_v60 = vpop.xlane.xlu0 %4038  ;;  %11717 = vst [vmem:[#allocation30_spill] sm:$0xff] %v9272_v49  ;;  %v4934_v50 = vpop.eup %4933  ;;  %v2651_v37 = vmul.f32 %v2635_v36, %v9251_v12  ;;  %v9281_v5 = vadd.f32 %v9194_v58, %v9272_v49  ;;  %v2652_v41 = vmul.f32 %v2636_v8, %v9254_v13  ;;  %v9288_v7 = vadd.f32 %v9196_v39, %v9272_v49 }
 0x594   :  { %v4011_v57 = vadd.f32 1e-05, %v4009_v45  ;;  %v4041_v14 = vmul.f32 0.00390625, %v4039_v60  ;;  %v9276_v53 = vmul.f32 %v4934_v50, %v4002_v32  ;;  %v9293_v15 = vmul.f32 %v4934_v50, %v4003_v16 }
 0x595   :  { %v2637_v58 = vmul.f32 -0.5, %v9281_v5  ;;  %v2671_v10 = vmul.f32 1.442695, %v2651_v37  ;;  %v2638_v39 = vmul.f32 -0.5, %v9288_v7 }
 0x596   :  { %4937 = vrsqrt.f32 %v4011_v57  ;;  %v4049_v38 = vsub.f32 %v4041_v14, %v4047_v25  ;;  %v9290_v54 = vpop.permute.xlu1 %2220  ;;  %v10641_v51 = vmax.f32 %v9276_v53, 0.0 }
 0x597   :  { %4939 = vpow2.f32 %v2663_v55  ;;  %11718 = vst [vmem:[#allocation32_spill] sm:$0xff] %v9290_v54  ;;  %v4936_v29 = vpop.eup %4935  ;;  %v9298_v48 = vadd.f32 %v9198_v19, %v9290_v54  ;;  %v2653_v0 = vmul.f32 %v2637_v58, %v9281_v5  ;;  %v9305_v16 = vadd.f32 %v9200_v6, %v9290_v54 }
 0x598   :  { %v4051_v56 = vadd.f32 1e-05, %v4049_v38  ;;  %4941 = vpow2.f32 %v2665_v18  ;;  %v4054_v45 = vmul.f32 %v4936_v29, %v4042_v44  ;;  %v9308_v36 = vmul.f32 %v4936_v29, %v4043_v17 }
 0x599   :  { %11719 = vst [vmem:[#allocation18_spill] sm:$0xff] %v9298_v48  ;;  %v2639_v59 = vmul.f32 -0.5, %v9298_v48  ;;  %v2673_v19 = vmul.f32 1.442695, %v2652_v41  ;;  %v2654_v55 = vmul.f32 %v2638_v39, %v9288_v7  ;;  %v2640_v50 = vmul.f32 -0.5, %v9305_v16 }
 0x59a   :  { %4943 = vrsqrt.f32 %v4051_v56  ;;  %v9313_v60 = vpop.permute.xlu1 %2225  ;;  %v2675_v44 = vmul.f32 1.442695, %v2653_v0  ;;  %v10647_v38 = vand.u32 2147483647, %v9281_v5 }
 0x59b   :  { %v9311_v25 = vpop.permute.xlu0 %2205  ;;  %11721 = vst [vmem:[#allocation37_spill] sm:$0xff] %v9313_v60  ;;  %4945 = vrcp.f32 %v2408_v20  ;;  %v2655_v17 = vmul.f32 %v2639_v59, %v9298_v48  ;;  %v9327_v57 = vadd.f32 %v9202_v35, %v9313_v60  ;;  %v2677_v14 = vmul.f32 1.442695, %v2654_v55 }
 0x59c   :  { %11720 = vst [vmem:[#allocation19_spill] sm:$0xff] %v9311_v25  ;;  %v9317_v8 = vadd.f32 %v9190_v61, %v9311_v25  ;;  %v9321_v6 = vadd.f32 %v9192_v31, %v9311_v25  ;;  %4947 = vpow2.f32 %v2671_v10  ;;  %v2656_v37 = vmul.f32 %v2640_v50, %v9305_v16 }
 0x59d   :  { %v4058_v31 = vmax.f32 %v4054_v45, 0.0  ;;  %4949 = vpow2.f32 %v2673_v19  ;;  %v9335_v20 = vadd.f32 %v9204_v63, %v9313_v60  ;;  %v2679_v58 = vmul.f32 1.442695, %v2655_v17 }
 0x59e   :  { %v2633_v18 = vmul.f32 -0.5, %v9317_v8  ;;  %v2634_v61 = vmul.f32 -0.5, %v9321_v6  ;;  %v9337_v41 = vpop.permute.xlu1 %2230  ;;  %v2641_v10 = vmul.f32 -0.5, %v9327_v57  ;;  %4951 = vpow2.f32 %v2675_v44 }
 0x59f   :  { %11722 = vst [vmem:[#allocation65_spill] sm:$0xff] %v9337_v41  ;;  %v2681_v63 = vmul.f32 1.442695, %v2656_v37  ;;  %v2642_v59 = vmul.f32 -0.5, %v9335_v20  ;;  %4953 = vpow2.f32 %v2677_v14  ;;  %v2407_v55 = vadd.f32 1.0, %v2391_v28 }
 0x5a0   :  { %v4938_v29 = vpop.eup %4937  ;;  %v2649_v35 = vmul.f32 %v2633_v18, %v9317_v8  ;;  %v2650_v56 = vmul.f32 %v2634_v61, %v9321_v6  ;;  %v2657_v19 = vmul.f32 %v2641_v10, %v9327_v57  ;;  %v9356_v61 = vadd.f32 %v9206_v34, %v9337_v41 }
 0x5a1   :  { %v9342_v39 = vpop.eup %4939  ;;  %v9347_v0 = vmul.f32 %v4938_v29, %v4004_v2  ;;  %v2658_v18 = vmul.f32 %v2642_v59, %v9335_v20  ;;  %v9360_v62 = vadd.f32 %v9208_v4, %v9337_v41  ;;  %v4062_v14 = vmin.f32 %v10641_v51, %v4058_v31 }
 0x5a2   :  { %v2667_v45 = vmul.f32 1.442695, %v2649_v35  ;;  %v9351_v50 = vpop.eup %4941  ;;  %v2669_v17 = vmul.f32 1.442695, %v2650_v56  ;;  %v9362_v2 = vpop.permute.xlu1 %2235  ;;  %4955 = vpow2.f32 %v2679_v58  ;;  %v2683_v35 = vmul.f32 1.442695, %v2657_v19 }
 0x5a3   :  { %11723 = vst [vmem:[#allocation63_spill] sm:$0xff] %v9362_v2  ;;  %v9368_v28 = vadd.f32 %v9210_v43, %v9362_v2  ;;  %v9372_v37 = vadd.f32 %v9212_v33, %v9362_v2  ;;  %v10640_v34 = vmax.f32 %v9347_v0, 0.0  ;;  %4957 = vpow2.f32 %v2681_v63 }
 0x5a4   :  { %v4944_v44 = vpop.eup %4943  ;;  %4959 = vpow2.f32 %v2667_v45  ;;  %v2643_v43 = vmul.f32 -0.5, %v9356_v61  ;;  %v2644_v33 = vmul.f32 -0.5, %v9360_v62  ;;  %v2685_v46 = vmul.f32 1.442695, %v2658_v18 }
 0x5a5   :  { %v4056_v4 = vmul.f32 %v4944_v44, %v4044_v22  ;;  %v9378_v56 = vpop.eup %4945  ;;  %v9383_v31 = vmul.f32 %v4944_v44, %v4045_v11  ;;  %4961 = vpow2.f32 %v2669_v17  ;;  %v2646_v22 = vmul.f32 -0.5, %v9372_v37 }
 0x5a6   :  { %v9387_v58 = vpop.eup %4947  ;;  %v2659_v63 = vmul.f32 %v2643_v43, %v9356_v61  ;;  %v2660_v59 = vmul.f32 %v2644_v33, %v9360_v62  ;;  %v2645_v3 = vmul.f32 -0.5, %v9368_v28  ;;  %v10645_v27 = vand.u32 2147483647, %v9321_v6 }
 0x5a7   :  { %v4060_v10 = vmax.f32 %v4056_v4, 0.0  ;;  %v9394_v11 = vpop.eup %4949  ;;  %v9396_v45 = vmul.f32 2.0, %v4062_v14  ;;  %4963 = vpow2.f32 %v2683_v35  ;;  %v2662_v19 = vmul.f32 %v2646_v22, %v9372_v37 }
 0x5a8   :  { %v2456_v17 = vmul.f32 0.5307027, %v9378_v56  ;;  %v9403_v18 = vmul.f32 %v4938_v29, %v4005_v52  ;;  %4965 = vrcp.f32 %v2407_v55  ;;  %v9408_v43 = vpop.eup %4951  ;;  %v9410_v14 = vmul.f32 1.442695, %v2659_v63 }
 0x5a9   :  { %v4064_v4 = vmin.f32 %v10640_v34, %v4060_v10  ;;  %4967 = vpow2.f32 %v2685_v46  ;;  %v2689_v35 = vmul.f32 1.442695, %v2660_v59  ;;  %v2394_v33 = vmul.f32 0.23164189, %v10645_v27  ;;  %v9414_v22 = vpop.eup %4953 }
 0x5aa   :  { %11724 = vst [vmem:[#allocation39_spill] sm:$0xff] %v9410_v14  ;;  %v9417_v21 = vmul.f32 %v2645_v3, %v9368_v28  ;;  %v2472_v1 = vadd.f32 -0.72657603, %v2456_v17  ;;  %v10642_v52 = vand.u32 2147483647, %v9317_v8 }
 0x5ab   :  { %v10643_v29 = vand.u32 2147483647, %v9254_v13  ;;  %v2693_v55 = vmul.f32 1.442695, %v2662_v19  ;;  %v2410_v10 = vadd.f32 1.0, %v2394_v33  ;;  %v9425_v34 = vmul.f32 2.0, %v4064_v4 }
 0x5ac   :  { %11725 = vst [vmem:[#allocation67_spill] sm:$0xff] %v9417_v21  ;;  %v10644_v63 = vand.u32 2147483647, %v9288_v7  ;;  %v9423_v59 = vpop.eup %4955  ;;  %v2488_v44 = vmul.f32 %v9378_v56, %v2472_v1  ;;  %v2393_v3 = vmul.f32 0.23164189, %v10642_v52  ;;  %4969 = vpow2.f32 %v2689_v35 }
 0x5ad   :  { %11726 = vst [vmem:[#allocation86_spill] sm:$0xff] %v9423_v59  ;;  %11727 = vst [vmem:[#allocation88_spill] sm:$0xff] %v9425_v34  ;;  %v2396_v17 = vmul.f32 0.23164189, %v10643_v29  ;;  %v9432_v51 = vpop.eup %4957  ;;  %v10646_v33 = vand.u32 2147483647, %v9251_v12  ;;  %4971 = vrcp.f32 %v2410_v10 }
 0x5ae   :  { %v2398_v19 = vmul.f32 0.23164189, %v10644_v63  ;;  %v9438_v4 = vpop.eup %4959  ;;  %v2504_v1 = vadd.f32 0.7107069, %v2488_v44  ;;  %v2409_v32 = vadd.f32 1.0, %v2393_v3  ;;  %4973 = vpow2.f32 %v2693_v55 }
 0x5af   :  { %v2412_v46 = vadd.f32 1.0, %v2396_v17  ;;  %v9440_v52 = vpop.eup %4961  ;;  %v2395_v35 = vmul.f32 0.23164189, %v10646_v33  ;;  %v2397_v63 = vmul.f32 0.23164189, %v10647_v38 }
 0x5b0   :  { %v2414_v29 = vadd.f32 1.0, %v2398_v19  ;;  %v2520_v27 = vmul.f32 %v9378_v56, %v2504_v1  ;;  %4975 = vrcp.f32 %v2409_v32  ;;  %v10649_v10 = vand.u32 2147483647, %v9305_v16 }
 0x5b1   :  { %v9449_v44 = vpop.eup %4963  ;;  %4977 = vrcp.f32 %v2412_v46  ;;  %v2411_v3 = vadd.f32 1.0, %v2395_v35  ;;  %v2413_v17 = vadd.f32 1.0, %v2397_v63  ;;  %v10651_v55 = vand.u32 2147483647, %v9335_v20 }
 0x5b2   :  { %11728 = vst [vmem:[#allocation56_spill] sm:$0xff] %v9449_v44  ;;  %v9452_v19 = vpop.eup %4965  ;;  %v2536_v33 = vadd.f32 -0.14224836, %v2520_v27  ;;  %4979 = vrcp.f32 %v2414_v29  ;;  %v2400_v32 = vmul.f32 0.23164189, %v10649_v10 }
 0x5b3   :  { %v9457_v1 = vpop.eup %4967  ;;  %v2455_v24 = vmul.f32 0.5307027, %v9452_v19  ;;  %4981 = vrcp.f32 %v2411_v3  ;;  %v2402_v63 = vmul.f32 0.23164189, %v10651_v55  ;;  %v10652_v29 = vand.u32 2147483647, %v9298_v48 }
 0x5b4   :  { %v2552_v35 = vmul.f32 %v9378_v56, %v2536_v33  ;;  %4983 = vrcp.f32 %v2413_v17  ;;  %v2416_v27 = vadd.f32 1.0, %v2400_v32  ;;  %v10655_v23 = vand.u32 2147483647, %v9327_v57 }
 0x5b5   :  { %v2471_v38 = vadd.f32 -0.72657603, %v2455_v24  ;;  %v2418_v10 = vadd.f32 1.0, %v2402_v63  ;;  %v2399_v46 = vmul.f32 0.23164189, %v10652_v29 }
 0x5b6   :  { %v2568_v30 = vadd.f32 0.1274148, %v2552_v35  ;;  %4985 = vrcp.f32 %v2416_v27  ;;  %v9470_v55 = vpop.eup %4969  ;;  %v2401_v24 = vmul.f32 0.23164189, %v10655_v23  ;;  %v10662_v3 = vand.u32 2147483647, %v9372_v37 }
 0x5b7   :  { %11729 = vst [vmem:[#allocation54_spill] sm:$0xff] %v9470_v55  ;;  %v2487_v33 = vmul.f32 %v9452_v19, %v2471_v38  ;;  %4987 = vrcp.f32 %v2418_v10  ;;  %v9476_v32 = vpop.eup %4971  ;;  %v2415_v27 = vadd.f32 1.0, %v2399_v46  ;;  %v11731_v17 = vand.u32 2147483647, %v9230_v9 }
 0x5b8   :  { %v2584_v63 = vmul.f32 %v9378_v56, %v2568_v30  ;;  %v9481_v29 = vpop.eup %4973  ;;  %v2458_v47 = vmul.f32 0.5307027, %v9476_v32  ;;  %v2417_v10 = vadd.f32 1.0, %v2401_v24  ;;  %v11732_v30 = vand.u32 2147483647, %v9360_v62 }
 0x5b9   :  { %11730 = vst [vmem:[#allocation90_spill] sm:$0xff] %v9481_v29  ;;  %v2503_v38 = vadd.f32 0.7107069, %v2487_v33  ;;  %4989 = vrcp.f32 %v2415_v27  ;;  %v2406_v46 = vmul.f32 0.23164189, %v10662_v3 }
 0x5ba   :  { %v9485_v23 = vpop.eup %4975  ;;  %v2616_v41 = vmul.f32 %v2584_v63, %v11731_v17  ;;  %v2404_v56 = vmul.f32 0.23164189, %v11732_v30  ;;  %v2474_v60 = vadd.f32 -0.72657603, %v2458_v47  ;;  %4991 = vrcp.f32 %v2417_v10 }
 0x5bb   :  { %v9493_v35 = vpop.eup %4977  ;;  %v2457_v33 = vmul.f32 0.5307027, %v9485_v23  ;;  %v2519_v24 = vmul.f32 %v9452_v19, %v2503_v38  ;;  %v2422_v27 = vadd.f32 1.0, %v2406_v46  ;;  %v11733_v38 = vmax.f32 %v9230_v9, 0.0 }
 0x5bc   :  { %v9497_v2 = vpop.eup %4979  ;;  %v2696_v54 = vmul.f32 %v9351_v50, %v2616_v41  ;;  %v2460_v17 = vmul.f32 0.5307027, %v9493_v35  ;;  %v2420_v63 = vadd.f32 1.0, %v2404_v56  ;;  %v2490_v3 = vmul.f32 %v9476_v32, %v2474_v60 }
 0x5bd   :  { %v9501_v30 = vpop.eup %4981  ;;  %v2473_v49 = vadd.f32 -0.72657603, %v2457_v33  ;;  %v2535_v42 = vadd.f32 -0.14224836, %v2519_v24  ;;  %v2462_v47 = vmul.f32 0.5307027, %v9497_v2 }
 0x5be   :  { %v9505_v25 = vpop.eup %4983  ;;  %v9509_v10 = vsub.f32 %v11733_v38, %v2696_v54  ;;  %v2476_v26 = vadd.f32 -0.72657603, %v2460_v17  ;;  %v2459_v41 = vmul.f32 0.5307027, %v9501_v30  ;;  %4993 = vrcp.f32 %v2420_v63 }
 0x5bf   :  { %v2506_v50 = vadd.f32 0.7107069, %v2490_v3  ;;  %v2489_v56 = vmul.f32 %v9485_v23, %v2473_v49  ;;  %v2551_v46 = vmul.f32 %v9452_v19, %v2535_v42  ;;  %v2478_v60 = vadd.f32 -0.72657603, %v2462_v47 }
 0x5c0   :  { %v9514_v33 = vpop.eup %4985  ;;  %v2492_v24 = vmul.f32 %v9493_v35, %v2476_v26  ;;  %v2461_v14 = vmul.f32 0.5307027, %v9505_v25  ;;  %v2475_v21 = vadd.f32 -0.72657603, %v2459_v41  ;;  %4995 = vrcp.f32 %v2422_v27 }
 0x5c1   :  { %v9518_v9 = vpop.eup %4987  ;;  %v2522_v54 = vmul.f32 %v9476_v32, %v2506_v50  ;;  %v2505_v17 = vadd.f32 0.7107069, %v2489_v56  ;;  %v2567_v63 = vadd.f32 0.1274148, %v2551_v46  ;;  %v2494_v3 = vmul.f32 %v9497_v2, %v2478_v60 }
 0x5c2   :  { %v2508_v49 = vadd.f32 0.7107069, %v2492_v24  ;;  %v2477_v38 = vadd.f32 -0.72657603, %v2461_v14  ;;  %v2491_v42 = vmul.f32 %v9501_v30, %v2475_v21  ;;  %v2464_v47 = vmul.f32 0.5307027, %v9514_v33 }
 0x5c3   :  { %v2538_v29 = vadd.f32 -0.14224836, %v2522_v54  ;;  %v2521_v26 = vmul.f32 %v9485_v23, %v2505_v17  ;;  %v2583_v41 = vmul.f32 %v9452_v19, %v2567_v63  ;;  %v2510_v27 = vadd.f32 0.7107069, %v2494_v3  ;;  %v9526_v55 = vpop.eup %4989 }
 0x5c4   :  { %v2524_v50 = vmul.f32 %v9493_v35, %v2508_v49  ;;  %v2493_v56 = vmul.f32 %v9505_v25, %v2477_v38  ;;  %v2507_v46 = vadd.f32 0.7107069, %v2491_v42  ;;  %v2466_v60 = vmul.f32 0.5307027, %v9518_v9  ;;  %v9531_v14 = vpop.eup %4991 }
 0x5c5   :  { %v2554_v21 = vmul.f32 %v9476_v32, %v2538_v29  ;;  %v2537_v24 = vadd.f32 -0.14224836, %v2521_v26  ;;  %v11734_v54 = vand.u32 2147483647, %v9227_v40  ;;  %v2526_v19 = vmul.f32 %v9497_v2, %v2510_v27 }
 0x5c6   :  { %v2540_v63 = vadd.f32 -0.14224836, %v2524_v50  ;;  %v2509_v3 = vadd.f32 0.7107069, %v2493_v56  ;;  %v2523_v44 = vmul.f32 %v9501_v30, %v2507_v46  ;;  %v2480_v49 = vadd.f32 -0.72657603, %v2464_v47 }
 0x5c7   :  { %v2615_v17 = vmul.f32 %v2583_v41, %v11734_v54  ;;  %v2570_v59 = vadd.f32 0.1274148, %v2554_v21  ;;  %v2553_v38 = vmul.f32 %v9485_v23, %v2537_v24  ;;  %v2542_v48 = vadd.f32 -0.14224836, %v2526_v19 }
 0x5c8   :  { %v9540_v34 = vpop.eup %4993  ;;  %v2556_v29 = vmul.f32 %v9493_v35, %v2540_v63  ;;  %v2525_v26 = vmul.f32 %v9505_v25, %v2509_v3  ;;  %v2539_v41 = vadd.f32 -0.14224836, %v2523_v44  ;;  %v2482_v54 = vadd.f32 -0.72657603, %v2466_v60 }
 0x5c9   :  { %v2695_v42 = vmul.f32 %v9342_v39, %v2615_v17  ;;  %v2586_v27 = vmul.f32 %v9476_v32, %v2570_v59  ;;  %v2569_v50 = vadd.f32 0.1274148, %v2553_v38  ;;  %v11735_v56 = vmax.f32 %v9227_v40, 0.0 }
 0x5ca   :  { %v2558_v46 = vmul.f32 %v9497_v2, %v2542_v48  ;;  %v9548_v21 = vpop.eup %4995  ;;  %v2572_v39 = vadd.f32 0.1274148, %v2556_v29  ;;  %v2541_v24 = vadd.f32 -0.14224836, %v2525_v26  ;;  %v2555_v17 = vmul.f32 %v9501_v30, %v2539_v41 }
 0x5cb   :  { %v2711_v47 = vsub.f32 %v11735_v56, %v2695_v42  ;;  %v2496_v19 = vmul.f32 %v9514_v33, %v2480_v49  ;;  %v11736_v63 = vand.u32 2147483647, %v9321_v6  ;;  %v2585_v60 = vmul.f32 %v9485_v23, %v2569_v50 }
 0x5cc   :  { %v2574_v59 = vadd.f32 0.1274148, %v2558_v46  ;;  %v2498_v32 = vmul.f32 %v9518_v9, %v2482_v54  ;;  %v2588_v40 = vmul.f32 %v9493_v35, %v2572_v39  ;;  %v2557_v48 = vmul.f32 %v9505_v25, %v2541_v24 }
 0x5cd   :  { %v2618_v44 = vmul.f32 %v2586_v27, %v11736_v63  ;;  %v2571_v3 = vadd.f32 0.1274148, %v2555_v17  ;;  %v2512_v38 = vadd.f32 0.7107069, %v2496_v19  ;;  %v11737_v29 = vand.u32 2147483647, %v9317_v8 }
 0x5ce   :  { %v2590_v49 = vmul.f32 %v9497_v2, %v2574_v59  ;;  %v2514_v41 = vadd.f32 0.7107069, %v2498_v32  ;;  %v11738_v27 = vand.u32 2147483647, %v9254_v13  ;;  %v2573_v50 = vadd.f32 0.1274148, %v2557_v48 }
 0x5cf   :  { %v2698_v42 = vmul.f32 %v9440_v52, %v2618_v44  ;;  %v2617_v26 = vmul.f32 %v2585_v60, %v11737_v29  ;;  %v2587_v54 = vmul.f32 %v9501_v30, %v2571_v3  ;;  %v2528_v35 = vmul.f32 %v9514_v33, %v2512_v38 }
 0x5d0   :  { %v2620_v23 = vmul.f32 %v2588_v40, %v11738_v27  ;;  %v11739_v56 = vmax.f32 %v9321_v6, 0.0  ;;  %v11740_v52 = vand.u32 2147483647, %v9288_v7  ;;  %v2530_v17 = vmul.f32 %v9518_v9, %v2514_v41 }
 0x5d1   :  { %v2697_v39 = vmul.f32 %v9438_v4, %v2617_v26  ;;  %v2589_v19 = vmul.f32 %v9505_v25, %v2573_v50  ;;  %v11741_v63 = vand.u32 2147483647, %v9251_v12  ;;  %v2544_v30 = vadd.f32 -0.14224836, %v2528_v35 }
 0x5d2   :  { %v2714_v46 = vsub.f32 %v11739_v56, %v2698_v42  ;;  %v2622_v24 = vmul.f32 %v2590_v49, %v11740_v52  ;;  %v2700_v2 = vmul.f32 %v9394_v11, %v2620_v23  ;;  %v11742_v6 = vmax.f32 %v9317_v8, 0.0 }
 0x5d3   :  { %v2619_v44 = vmul.f32 %v2587_v54, %v11741_v63  ;;  %v2546_v32 = vadd.f32 -0.14224836, %v2530_v17  ;;  %v11743_v40 = vmax.f32 %v9254_v13, 0.0  ;;  %v11744_v3 = vand.u32 2147483647, %v9281_v5 }
 0x5d4   :  { %v4721_v60 = vpack.c.bf16 %v2714_v46, %v9509_v10  ;;  %v2713_v59 = vsub.f32 %v11742_v6, %v2697_v39  ;;  %v2702_v4 = vmul.f32 %v9414_v22, %v2622_v24  ;;  %v2560_v38 = vmul.f32 %v9514_v33, %v2544_v30 }
 0x5d5   :  { %v2716_v48 = vsub.f32 %v11743_v40, %v2700_v2  ;;  %v2621_v11 = vmul.f32 %v2589_v19, %v11744_v3  ;;  %v2699_v25 = vmul.f32 %v9387_v58, %v2619_v44  ;;  %v11745_v10 = vmax.f32 %v9288_v7, 0.0 }
 0x5d6   :  { %4722 = vmatprep.subr.bf16.mxu1 %v4721_v60  ;;  %v4723_v42 = vpack.c.bf16 %v2713_v59, %v2711_v47  ;;  %v2562_v8 = vmul.f32 %v9518_v9, %v2546_v32  ;;  %v2463_v22 = vmul.f32 0.5307027, %v9526_v55  ;;  %v11746_v13 = vmax.f32 %v9251_v12, 0.0 }
 0x5d7   :  { %v2718_v29 = vsub.f32 %v11745_v10, %v2702_v4  ;;  %v2701_v26 = vmul.f32 %v9408_v43, %v2621_v11  ;;  %v2576_v41 = vadd.f32 0.1274148, %v2560_v38  ;;  %v2465_v27 = vmul.f32 0.5307027, %v9531_v14 }
 0x5d8   :  { %v2715_v49 = vsub.f32 %v11746_v13, %v2699_v25  ;;  %4724 = vmatpush1.bf16.msra.mxu1 %v4723_v42  ;;  %v2578_v23 = vadd.f32 0.1274148, %v2562_v8  ;;  %v2479_v50 = vadd.f32 -0.72657603, %v2463_v22  ;;  %v2468_v47 = vmul.f32 0.5307027, %v9540_v34 }
 0x5d9   :  { %v4725_v58 = vpack.c.bf16 %v2718_v29, %v2716_v48  ;;  %v11747_v7 = vmax.f32 %v9281_v5, 0.0  ;;  %v2592_v35 = vmul.f32 %v9514_v33, %v2576_v41  ;;  %v2481_v56 = vadd.f32 -0.72657603, %v2465_v27 }
 0x5da   :  { %v2470_v43 = vmul.f32 0.5307027, %v9548_v21  ;;  %v2594_v12 = vmul.f32 %v9518_v9, %v2578_v23  ;;  %v2495_v46 = vmul.f32 %v9526_v55, %v2479_v50  ;;  %v2484_v39 = vadd.f32 -0.72657603, %v2468_v47 }
 0x5db   :  { %v2717_v54 = vsub.f32 %v11747_v7, %v2701_v26  ;;  %4726 = vmatprep.subr.bf16.mxu1 %v4725_v58  ;;  %v2387_v52 = vand.u32 2147483647, %v9356_v61  ;;  %v11748_v17 = vand.u32 2147483647, %v9305_v16  ;;  %v2497_v5 = vmul.f32 %v9531_v14, %v2481_v56 }
 0x5dc   :  { %v2486_v19 = vadd.f32 -0.72657603, %v2470_v43  ;;  %v11749_v33 = vand.u32 2147483647, %v9335_v20  ;;  %v2511_v44 = vadd.f32 0.7107069, %v2495_v46  ;;  %v2500_v30 = vmul.f32 %v9540_v34, %v2484_v39 }
 0x5dd   :  { %v4727_v24 = vpack.c.bf16 %v2717_v54, %v2715_v49  ;;  %v2624_v2 = vmul.f32 %v2592_v35, %v11748_v17  ;;  %v2389_v9 = vand.u32 2147483647, %v9368_v28  ;;  %v2513_v6 = vadd.f32 0.7107069, %v2497_v5 }
 0x5de   :  { %v2626_v63 = vmul.f32 %v2594_v12, %v11749_v33  ;;  %v2502_v59 = vmul.f32 %v9548_v21, %v2486_v19  ;;  %v2403_v4 = vmul.f32 0.23164189, %v2387_v52  ;;  %v2527_v40 = vmul.f32 %v9526_v55, %v2511_v44 }
 0x5df   :  { %4728 = vmatpush1.bf16.msra.mxu1 %v4727_v24  ;;  %v2704_v60 = vmul.f32 %v9432_v51, %v2624_v2  ;;  %v2516_v48 = vadd.f32 0.7107069, %v2500_v30  ;;  %v2405_v3 = vmul.f32 0.23164189, %v2389_v9  ;;  %v11750_v11 = vmax.f32 %v9305_v16, 0.0 }
 0x5e0   :  { %v2706_v32 = vmul.f32 %v9457_v1, %v2626_v63  ;;  %v2529_v38 = vmul.f32 %v9531_v14, %v2513_v6  ;;  %v2518_v51 = vadd.f32 0.7107069, %v2502_v59  ;;  %v2419_v42 = vadd.f32 1.0, %v2403_v4 }
 0x5e1   :  { %v2720_v25 = vsub.f32 %v11750_v11, %v2704_v60  ;;  %v11751_v10 = vmax.f32 %v9335_v20, 0.0  ;;  %v2543_v8 = vadd.f32 -0.14224836, %v2527_v40  ;;  %v2532_v22 = vmul.f32 %v9540_v34, %v2516_v48  ;;  %v11760_v40 = vld [vmem:[#allocation86_spill] sm:$0xff] }
 0x5e2   :  { %v2421_v1 = vadd.f32 1.0, %v2405_v3  ;;  %v2545_v26 = vadd.f32 -0.14224836, %v2529_v38  ;;  %v2609_v13 = vmax.f32 %v9327_v57, 0.0  ;;  %v2534_v49 = vmul.f32 %v9548_v21, %v2518_v51  ;;  %v11762_v51 = vld [vmem:[#allocation56_spill] sm:$0xff] }
 0x5e3   :  { %v2722_v29 = vsub.f32 %v11751_v10, %v2706_v32  ;;  %4997 = vrcp.f32 %v2419_v42  ;;  %v2559_v16 = vmul.f32 %v9526_v55, %v2543_v8  ;;  %v2548_v27 = vadd.f32 -0.14224836, %v2532_v22 }
 0x5e4   :  { %4999 = vrcp.f32 %v2421_v1  ;;  %v2561_v58 = vmul.f32 %v9531_v14, %v2545_v26  ;;  %v2550_v23 = vadd.f32 -0.14224836, %v2534_v49  ;;  %v2612_v20 = vmax.f32 %v9360_v62, 0.0 }
 0x5e5   :  { %v4729_v41 = vpack.c.bf16 %v2722_v29, %v2720_v25  ;;  %v4019_v50 = vmax.f32 %v9293_v15, 0.0  ;;  %v2575_v47 = vadd.f32 0.1274148, %v2559_v16  ;;  %v2564_v7 = vmul.f32 %v9540_v34, %v2548_v27  ;;  %v11766_v27 = vld [vmem:[#allocation90_spill] sm:$0xff] }
 0x5e6   :  { %v2614_v54 = vmax.f32 %v9372_v37, 0.0  ;;  %v4021_v35 = vmax.f32 %v9403_v18, 0.0  ;;  %v2577_v56 = vadd.f32 0.1274148, %v2561_v58  ;;  %v2566_v43 = vmul.f32 %v9548_v21, %v2550_v23  ;;  %v11756_v18 = vld [vmem:[#allocation88_spill] sm:$0xff] }
 0x5e7   :  { %4730 = vmatprep.subr.bf16.mxu1 %v4729_v41  ;;  %v11752_v12 = vmax.f32 %v9308_v36, 0.0  ;;  %v11753_v39 = vmax.f32 %v9276_v53, 0.0  ;;  %v2591_v15 = vmul.f32 %v9526_v55, %v2575_v47  ;;  %v2580_v17 = vadd.f32 0.1274148, %v2564_v7 }
 0x5e8   :  { %v11754_v2 = vmax.f32 %v9383_v31, 0.0  ;;  %v11755_v19 = vmax.f32 %v9347_v0, 0.0  ;;  %v2593_v63 = vmul.f32 %v9531_v14, %v2577_v56  ;;  %v2582_v36 = vadd.f32 0.1274148, %v2566_v43 }
 0x5e9   :  { %v4063_v46 = vmin.f32 %v4019_v50, %v11752_v12  ;;  %v9638_v24 = vsub.f32 %v9396_v45, %v11753_v39  ;;  %v11757_v45 = vld [vmem:[#allocation18_spill] sm:$0xff]  ;;  %v2596_v55 = vmul.f32 %v9540_v34, %v2580_v17  ;;  %v11759_v0 = vand.u32 2147483647, %v9327_v57 }
 0x5ea   :  { %v4065_v5 = vmin.f32 %v4021_v35, %v11754_v2  ;;  %v9646_v33 = vsub.f32 %v11756_v18, %v11755_v19  ;;  %v11758_v30 = vand.u32 2147483647, %v11757_v45  ;;  %v2598_v4 = vmul.f32 %v9548_v21, %v2582_v36 }
 0x5eb   :  { %v4067_v44 = vmul.f32 2.0, %v4063_v46  ;;  %v4090_v53 = vmul.f32 %v9638_v24, %v9638_v24  ;;  %v2625_v59 = vmul.f32 %v2593_v63, %v11759_v0  ;;  %v11761_v3 = vand.u32 2147483647, %v9360_v62  ;;  %v11765_v62 = vld [vmem:[#allocation54_spill] sm:$0xff] }
 0x5ec   :  { %v2623_v60 = vmul.f32 %v2591_v15, %v11758_v30  ;;  %v4069_v6 = vmul.f32 2.0, %v4065_v5  ;;  %v4074_v31 = vadd.f32 %v9646_v33, %v9638_v24  ;;  %v4092_v32 = vmul.f32 %v9646_v33, %v9646_v33 }
 0x5ed   :  { %v9659_v14 = vsub.f32 %v4067_v44, %v4019_v50  ;;  %v2628_v11 = vmul.f32 %v2596_v55, %v11761_v3  ;;  %v9668_v38 = vpop.eup %4997  ;;  %v2705_v57 = vmul.f32 %v11762_v51, %v2625_v59  ;;  %v11763_v42 = vand.u32 2147483647, %v9372_v37 }
 0x5ee   :  { %v2703_v48 = vmul.f32 %v11760_v40, %v2623_v60  ;;  %v9666_v34 = vsub.f32 %v4069_v6, %v4021_v35  ;;  %v4075_v25 = vrot.slane %v4074_v31, 4  ;;  %v4094_v29 = vadd.f32 %v4092_v32, %v4090_v53  ;;  %v5000_v8 = vpop.eup %4999 }
 0x5ef   :  { %v2630_v21 = vmul.f32 %v2598_v4, %v11763_v42  ;;  %v4091_v10 = vmul.f32 %v9659_v14, %v9659_v14  ;;  %v11764_v22 = vmax.f32 %v11757_v45, 0.0  ;;  %v2708_v26 = vmul.f32 %v11765_v62, %v2628_v11  ;;  %v11768_v45 = vld [vmem:[#allocation39_spill] sm:$0xff] }
 0x5f0   :  { %v2467_v49 = vmul.f32 0.5307027, %v9668_v38  ;;  %v4081_v41 = vadd.f32 %v9666_v34, %v9659_v14  ;;  %v2721_v16 = vsub.f32 %v2609_v13, %v2705_v57  ;;  %v2469_v37 = vmul.f32 0.5307027, %v5000_v8  ;;  %v11767_v13 = vld [vmem:[#allocation67_spill] sm:$0xff] }
 0x5f1   :  { %v2719_v1 = vsub.f32 %v11764_v22, %v2703_v48  ;;  %v2710_v58 = vmul.f32 %v11766_v27, %v2630_v21  ;;  %v4093_v23 = vmul.f32 %v9666_v34, %v9666_v34  ;;  %v2724_v50 = vsub.f32 %v2612_v20, %v2708_v26 }
 0x5f2   :  { %v2483_v47 = vadd.f32 -0.72657603, %v2467_v49  ;;  %v4082_v7 = vrot.slane %v4081_v41, 4  ;;  %v4076_v35 = vadd.f32 %v4075_v25, %v4074_v31  ;;  %v2485_v12 = vadd.f32 -0.72657603, %v2469_v37 }
 0x5f3   :  { %v4731_v56 = vpack.c.bf16 %v2721_v16, %v2719_v1  ;;  %v2726_v43 = vsub.f32 %v2614_v54, %v2710_v58  ;;  %v4101_v46 = vadd.f32 %v4093_v23, %v4091_v10  ;;  %v4095_v2 = vrot.slane %v4094_v29, 4 }
 0x5f4   :  { %v2499_v39 = vmul.f32 %v9668_v38, %v2483_v47  ;;  %v4083_v15 = vadd.f32 %v4082_v7, %v4081_v41  ;;  %v4077_v17 = vrot.slane %v4076_v35, 2  ;;  %v2691_v5 = vmul.f32 1.442695, %v11767_v13 }
 0x5f5   :  { %4732 = vmatpush1.bf16.msra.mxu1 %v4731_v56  ;;  %v4733_v19 = vpack.c.bf16 %v2726_v43, %v2724_v50  ;;  %v2501_v18 = vmul.f32 %v5000_v8, %v2485_v12  ;;  %v4102_v63 = vrot.slane %v4101_v46, 4  ;;  %v4096_v53 = vadd.f32 %v4095_v2, %v4094_v29 }
 0x5f6   :  { %v2515_v36 = vadd.f32 0.7107069, %v2499_v39  ;;  %v4084_v20 = vrot.slane %v4083_v15, 2  ;;  %v4078_v44 = vadd.f32 %v4077_v17, %v4076_v35  ;;  %5001 = vpow2.f32 %v11768_v45 }
 0x5f7   :  { %4734 = vmatprep.subr.bf16.mxu1 %v4733_v19  ;;  %v2517_v54 = vadd.f32 0.7107069, %v2501_v18  ;;  %v4103_v30 = vadd.f32 %v4102_v63, %v4101_v46  ;;  %v4097_v31 = vrot.slane %v4096_v53, 2  ;;  %5003 = vpow2.f32 %v2691_v5 }
 0x5f8   :  { %v2531_v60 = vmul.f32 %v9668_v38, %v2515_v36  ;;  %v4085_v55 = vadd.f32 %v4084_v20, %v4083_v15  ;;  %v4079_v6 = vrot.slane %v4078_v44, 1  ;;  %v2611_v43 = vmax.f32 %v9356_v61, 0.0 }
 0x5f9   :  { %v2533_v0 = vmul.f32 %v5000_v8, %v2517_v54  ;;  %v4104_v59 = vrot.slane %v4103_v30, 2  ;;  %v4098_v48 = vadd.f32 %v4097_v31, %v4096_v53  ;;  %v2613_v46 = vmax.f32 %v9368_v28, 0.0  ;;  %v9707_v28 = vld [vmem:[%s10200_s5 + $0x8] sm:$0xff]  ;;  %v9755_v31 = vpop.permute.xlu1 %2729 }
 0x5fa   :  { %v2547_v4 = vadd.f32 -0.14224836, %v2531_v60  ;;  %v4086_v32 = vrot.slane %v4085_v55, 1  ;;  %v4080_v40 = vadd.f32 %v4079_v6, %v4078_v44  ;;  %v11769_v61 = vmov 0.0   ;;  %v5094_v60 = vld [vmem:[%s10198_s3 + $0x28] sm:$0xff]  ;;  %v5096_v6 = vld [vmem:[%s10198_s3 + $0x38] sm:$0xff] }
 0x5fb   :  { %v2549_v3 = vadd.f32 -0.14224836, %v2533_v0  ;;  %v4105_v11 = vadd.f32 %v4104_v59, %v4103_v30  ;;  %v4099_v42 = vrot.slane %v4098_v48, 1  ;;  %v5093_v30 = vld [vmem:[%s10198_s3 + $0x20] sm:$0xff]  ;;  %11770 = vst [vmem:[#allocation116_spill] sm:$0xff] %v9755_v31 }
 0x5fc   :  { %v2563_v25 = vmul.f32 %v9668_v38, %v2547_v4  ;;  %v4087_v51 = vadd.f32 %v4086_v32, %v4085_v55  ;;  %v4088_v57 = vmul.f32 0.0625, %v4080_v40  ;;  %v5095_v55 = vld [vmem:[%s10198_s3 + $0x30] sm:$0xff]  ;;  %v5097_v40 = vld [vmem:[%s10195_s0] sm:$0xff] }
 0x5fd   :  { %v2565_v21 = vmul.f32 %v5000_v8, %v2549_v3  ;;  %v4106_v10 = vrot.slane %v4105_v11, 1  ;;  %v4100_v1 = vadd.f32 %v4099_v42, %v4098_v48  ;;  %v9762_v3 = vpop.permute.xlu1 %2734 }
 0x5fe   :  { %v2579_v29 = vadd.f32 0.1274148, %v2563_v25  ;;  %v4089_v22 = vmul.f32 0.0625, %v4087_v51  ;;  %v4114_v49 = vmul.f32 %v4088_v57, %v4088_v57  ;;  %v4110_v19 = vsub.f32 %v9638_v24, %v4088_v57  ;;  %v5089_v24 = vld [vmem:[%s10198_s3] sm:$0xff]  ;;  %11771 = vst [vmem:[#allocation117_spill] sm:$0xff] %v9762_v3 }
 0x5ff   :  { %v2581_v62 = vadd.f32 0.1274148, %v2565_v21  ;;  %v4107_v26 = vadd.f32 %v4106_v10, %v4105_v11  ;;  %v4108_v23 = vmul.f32 0.0625, %v4100_v1  ;;  %v4112_v18 = vsub.f32 %v9646_v33, %v4088_v57  ;;  %v5090_v33 = vld [vmem:[%s10198_s3 + $0x8] sm:$0xff]  ;;  %v5099_v10 = vld [vmem:[%s10195_s0 + $0x10] sm:$0xff] }
 0x600   :  { %v2595_v41 = vmul.f32 %v9668_v38, %v2579_v29  ;;  %v4115_v16 = vmul.f32 %v4089_v22, %v4089_v22  ;;  %v5002_v27 = vpop.eup %5001  ;;  %v4113_v13 = vsub.f32 %v9666_v34, %v4089_v22  ;;  %v5092_v34 = vld [vmem:[%s10198_s3 + $0x18] sm:$0xff]  ;;  %v5098_v11 = vld [vmem:[%s10195_s0 + $0x8] sm:$0xff] }
 0x601   :  { %v2597_v58 = vmul.f32 %v5000_v8, %v2581_v62  ;;  %v4109_v37 = vmul.f32 0.0625, %v4107_v26  ;;  %v5004_v47 = vpop.eup %5003  ;;  %v4116_v56 = vsub.f32 %v4108_v23, %v4114_v49  ;;  %v11772_v26 = vld [vmem:[#allocation16_spill] sm:$0xff] }
 0x602   :  { %v2627_v50 = vmul.f32 %v2595_v41, %v2387_v52  ;;  %v9699_v52 = vld [vmem:[%s10200_s5] sm:$0xff]  ;;  %s5191_s5 = smov [#allocation2]  }
 0x603   :  { %v2629_v7 = vmul.f32 %v2597_v58, %v2389_v9  ;;  %v4117_v35 = vsub.f32 %v4109_v37, %v4115_v16  ;;  %v4118_v15 = vadd.f32 1e-06, %v4116_v56  ;;  %v4111_v9 = vsub.f32 %v9659_v14, %v4089_v22  ;;  %v5091_v14 = vld [vmem:[%s10198_s3 + $0x10] sm:$0xff]  ;;  %v5100_v22 = vld [vmem:[%s10195_s0 + $0x18] sm:$0xff]  ;;  %s4682_s27 = sshll.u32 %s5191_s5, 4  ;;  %s4683_s27 = int_to_ptr.vmem [resolvable:$true] %s4682_s27 }
 0x604   :  { %v2707_v12 = vmul.f32 %v5002_v27, %v2627_v50  ;;  %s5105_s12 = scalar_lea.vmem %s4683_s27, 1024  ;;  %p5110_p1 = scmp.lt.s32.totalorder %s4683_s27, %s4683_s27 }
 0x605   :  { %v2709_v38 = vmul.f32 %v5004_v47, %v2629_v7  ;;  %v4119_v39 = vadd.f32 1e-06, %v4117_v35  ;;  %v11773_v35 = vld [vmem:[#allocation19_spill] sm:$0xff]  ;;  %p5106_p0 = scmp.ne.s32.totalorder %s4683_s27, %s5105_s12  ;;  %p5111_p2 = scmp.lt.s32.totalorder %s5105_s12, %s5105_s12 }
 0x606   :  { %v2723_v8 = vsub.f32 %v2611_v43, %v2707_v12 }
 0x607   :  { %v2725_v17 = vsub.f32 %v2613_v46, %v2709_v38  ;;  %5005 = vrsqrt.f32 %v4119_v39  ;;  %p5112_p3 = por %p5111_p2, %p5110_p1 }
 0x608   :  { %5007 = vrsqrt.f32 %v4118_v15 }
 0x609   :  { %v4735_v2 = vpack.c.bf16 %v2725_v17, %v2723_v8  ;;  %p5113_p4 = pnand %p5112_p3, %p5106_p0 }
 0x60b   :  { %4736 = vmatpush1.bf16.msra.mxu1 %v4735_v2 }
 0x60e   :  { %4701 = vmatmul.mubr.msk.f32.vlgmr.msra.gmra.mrb[0].mxu1 %vm2737_vm9, %v9699_v52 }
 0x60f   :  { %2814 = vmatprep.mubr.f32.mxu1 %v11769_v61 }
 0x611   :  { %v5006_v5 = vpop.eup %5005 }
 0x612   :  { %v5008_v63 = vpop.eup %5007  ;;  %v4123_v36 = vmul.f32 %v5006_v5, %v4111_v9  ;;  %v4125_v20 = vmul.f32 %v5006_v5, %v4113_v13  ;;  %4702 = vmatmul.mubr.msk.f32.gmra.mrb[2].mxu1 %vm2737_vm9, %v9707_v28 }
 0x613   :  { %v4122_v44 = vmul.f32 %v5008_v63, %v4110_v19  ;;  %v4124_v53 = vmul.f32 %v5008_v63, %v4112_v18  ;;  %4190 = vmatprep.mubr.f32.mxu1 %v11769_v61 }
 0x614   :  { %v4737_v45 = vpack.c.bf16 %v4125_v20, %v4123_v36  ;;  %v11774_v36 = vld [vmem:[#allocation17_spill] sm:$0xff] }
 0x615   :  { %v4739_v54 = vpack.c.bf16 %v4124_v53, %v4122_v44 }
 0x616   :  { %4738 = vmatprep.subr.bf16.mxu1 %v4737_v45 }
 0x617   :  { %4740 = vmatpush1.bf16.msra.mxu1 %v4739_v54 }
 0x61a   :  { %4707 = vmatmul.mubr.msk.f32.vlgmr.msra.gmra.mrb[4].mxu1 %vm997_vm13, %v5089_v24 }
 0x61b   :  { %4196 = vmatprep.mubr.f32.mxu1 %v11769_v61 }
 0x61e   :  { %4708 = vmatmul.mubr.msk.f32.gmra.mrb[6].mxu1 %vm997_vm13, %v5090_v33 }
 0x61f   :  { %4202 = vmatprep.mubr.f32.mxu1 %v11769_v61 }
 0x622   :  { %4709 = vmatmul.mubr.msk.f32.gmra.mrb[8].mxu1 %vm997_vm13, %v5091_v14 }
 0x623   :  { %4208 = vmatprep.mubr.f32.mxu1 %v11769_v61 }
 0x626   :  { %4710 = vmatmul.mubr.msk.f32.gmra.mrb[10].mxu1 %vm997_vm13, %v5092_v34 }
 0x627   :  { %4214 = vmatprep.mubr.f32.mxu1 %v11769_v61 }
 0x62a   :  { %4711 = vmatmul.mubr.msk.f32.gmra.mrb[12].mxu1 %vm997_vm13, %v5093_v30 }
 0x62b   :  { %4220 = vmatprep.mubr.f32.mxu1 %v11769_v61 }
 0x62e   :  { %4712 = vmatmul.mubr.msk.f32.gmra.mrb[14].mxu1 %vm997_vm13, %v5094_v60 }
 0x62f   :  { %4226 = vmatprep.mubr.f32.mxu1 %v11769_v61 }
 0x632   :  { %4713 = vmatmul.mubr.msk.f32.gmra.mrb[16].mxu1 %vm997_vm13, %v5095_v55 }
 0x633   :  { %4232 = vmatprep.mubr.f32.mxu1 %v11769_v61 }
 0x636   :  { %4714 = vmatmul.mubr.msk.f32.gmra.mrb[18].mxu1 %vm997_vm13, %v5096_v6 }
 0x6e1   :  { %v2810_v0 = vpop.f32.mrb[0].mxu1 }
 0x6e2   :  { %v2811_v59 = vadd.f32 %v2810_v0, %v9755_v31  ;;  %v2812_v4 = vpop.f32.mrb[1].mxu1 }
 0x6e3   :  { %v2813_v32 = vadd.f32 %v2812_v4, %v9755_v31 }
 0x6e4   :  { %v2821_v48 = vadd.f32 %v5097_v40, %v2811_v59  ;;  %v11775_v40 = vld [vmem:[#allocation30_spill] sm:$0xff] }
 0x6e5   :  { %v2822_v25 = vadd.f32 %v5098_v11, %v2813_v32  ;;  %v2816_v51 = vpop.f32.mrb[2].mxu1 }
 0x6e6   :  { %2825 = vst [vmem:[#allocation2] sm:$0xff] %v2821_v48  ;;  %v2817_v57 = vadd.f32 %v2816_v51, %v9762_v3  ;;  %v2818_v42 = vpop.f32.mrb[3].mxu1 }
 0x6e7   :  { %2826 = vst [vmem:[#allocation2 + $0x8] sm:$0xff] %v2822_v25  ;;  %v2819_v21 = vadd.f32 %v2818_v42, %v9762_v3 }
 0x6e8   :  { %v2823_v29 = vadd.f32 %v5099_v10, %v2817_v57 }
 0x6e9   :  { %v2824_v1 = vadd.f32 %v5100_v22, %v2819_v21 }
 0x6ea   :  { %2827 = vst [vmem:[#allocation2 + $0x10] sm:$0xff] %v2823_v29 }
 0x6eb   :  { %2828 = vst [vmem:[#allocation2 + $0x18] sm:$0xff] %v2824_v1 }
 0x6ed   :  { %v4192_v62 = vpop.f32.mrb[4].mxu1 }
 0x6ee   :  { %v9776_v49 = vadd.f32 %v4192_v62, %v11772_v26  ;;  %v4194_v41 = vpop.f32.mrb[5].mxu1 }
 0x6ef   :  { %v9779_v16 = vadd.f32 %v4194_v41, %v11772_v26 }
 0x6f0   :  { %v4239_v27 = vand.u32 2147483647, %v9776_v49  ;;  %v4495_v58 = vmul.f32 -0.5, %v9776_v49 }
 0x6f1   :  { %v10678_v37 = vand.u32 2147483647, %v9779_v16  ;;  %v4496_v23 = vmul.f32 -0.5, %v9779_v16  ;;  %v4198_v50 = vpop.f32.mrb[6].mxu1 }
 0x6f2   :  { %v4255_v47 = vmul.f32 0.23164189, %v4239_v27  ;;  %v4511_v7 = vmul.f32 %v4495_v58, %v9776_v49  ;;  %v9789_v56 = vadd.f32 %v4198_v50, %v11773_v35  ;;  %v4200_v43 = vpop.f32.mrb[7].mxu1 }
 0x6f3   :  { %v4256_v12 = vmul.f32 0.23164189, %v10678_v37  ;;  %v4512_v46 = vmul.f32 %v4496_v23, %v9779_v16  ;;  %v9795_v38 = vadd.f32 %v4200_v43, %v11773_v35  ;;  %v11776_v43 = vld [vmem:[#allocation32_spill] sm:$0xff] }
 0x6f4   :  { %v4271_v39 = vadd.f32 1.0, %v4255_v47  ;;  %v4527_v15 = vmul.f32 1.442695, %v4511_v7  ;;  %v4241_v8 = vand.u32 2147483647, %v9789_v56  ;;  %v4497_v2 = vmul.f32 -0.5, %v9789_v56 }
 0x6f5   :  { %v4272_v17 = vadd.f32 1.0, %v4256_v12  ;;  %v10677_v9 = vand.u32 2147483647, %v9795_v38  ;;  %v4498_v5 = vmul.f32 -0.5, %v9795_v38  ;;  %v4204_v19 = vpop.f32.mrb[8].mxu1 }
 0x6f6   :  { %5009 = vrcp.f32 %v4271_v39  ;;  %v4257_v13 = vmul.f32 0.23164189, %v4241_v8  ;;  %v4529_v18 = vmul.f32 1.442695, %v4512_v46  ;;  %v4513_v63 = vmul.f32 %v4497_v2, %v9789_v56  ;;  %v4206_v44 = vpop.f32.mrb[9].mxu1 }
 0x6f7   :  { %v9805_v20 = vadd.f32 %v4204_v19, %v11774_v36  ;;  %5011 = vpow2.f32 %v4527_v15  ;;  %v4258_v45 = vmul.f32 0.23164189, %v10677_v9  ;;  %v9810_v54 = vadd.f32 %v4206_v44, %v11774_v36 }
 0x6f8   :  { %v4273_v53 = vadd.f32 1.0, %v4257_v13  ;;  %5013 = vrcp.f32 %v4272_v17  ;;  %v4531_v24 = vmul.f32 1.442695, %v4513_v63  ;;  %v4514_v33 = vmul.f32 %v4498_v5, %v9795_v38 }
 0x6f9   :  { %v4243_v14 = vand.u32 2147483647, %v9805_v20  ;;  %v4210_v34 = vpop.f32.mrb[10].mxu1  ;;  %v4499_v60 = vmul.f32 -0.5, %v9805_v20  ;;  %v10675_v0 = vand.u32 2147483647, %v9810_v54 }
 0x6fa   :  { %5015 = vrcp.f32 %v4273_v53  ;;  %v4212_v55 = vpop.f32.mrb[11].mxu1  ;;  %v4500_v59 = vmul.f32 -0.5, %v9810_v54  ;;  %v4274_v4 = vadd.f32 1.0, %v4258_v45  ;;  %v9822_v48 = vadd.f32 %v4210_v34, %v11775_v40 }
 0x6fb   :  { %5017 = vpow2.f32 %v4529_v18  ;;  %v4259_v6 = vmul.f32 0.23164189, %v4243_v14  ;;  %v4515_v32 = vmul.f32 %v4499_v60, %v9805_v20  ;;  %v9825_v11 = vadd.f32 %v4212_v55, %v11775_v40 }
 0x6fc   :  { %5019 = vpow2.f32 %v4531_v24  ;;  %v4533_v25 = vmul.f32 1.442695, %v4514_v33  ;;  %v4260_v57 = vmul.f32 0.23164189, %v10675_v0  ;;  %v4516_v10 = vmul.f32 %v4500_v59, %v9810_v54 }
 0x6fd   :  { %v4275_v51 = vadd.f32 1.0, %v4259_v6  ;;  %v4216_v42 = vpop.f32.mrb[12].mxu1  ;;  %v4535_v21 = vmul.f32 1.442695, %v4515_v32  ;;  %v4245_v29 = vand.u32 2147483647, %v9822_v48 }
 0x6fe   :  { %v4501_v22 = vmul.f32 -0.5, %v9822_v48  ;;  %v4276_v1 = vadd.f32 1.0, %v4260_v57  ;;  %v10674_v62 = vand.u32 2147483647, %v9825_v11  ;;  %v4218_v26 = vpop.f32.mrb[13].mxu1  ;;  %v4502_v35 = vmul.f32 -0.5, %v9825_v11 }
 0x6ff   :  { %5021 = vrcp.f32 %v4275_v51  ;;  %v4261_v50 = vmul.f32 0.23164189, %v4245_v29  ;;  %v9843_v12 = vadd.f32 %v4216_v42, %v11776_v43  ;;  %v4537_v15 = vmul.f32 1.442695, %v4516_v10 }
 0x700   :  { %v9834_v58 = vpop.eup %5009  ;;  %5023 = vrcp.f32 %v4274_v4  ;;  %v4517_v2 = vmul.f32 %v4501_v22, %v9822_v48  ;;  %v4262_v18 = vmul.f32 0.23164189, %v10674_v62  ;;  %v9858_v45 = vadd.f32 %v4218_v26, %v11776_v43  ;;  %v11777_v26 = vld [vmem:[#allocation37_spill] sm:$0xff] }
 0x701   :  { %v4319_v7 = vmul.f32 0.5307027, %v9834_v58  ;;  %5025 = vpow2.f32 %v4533_v25  ;;  %v4222_v46 = vpop.f32.mrb[14].mxu1  ;;  %v9845_v39 = vpop.eup %5011  ;;  %v4277_v17 = vadd.f32 1.0, %v4261_v50  ;;  %v10680_v63 = vand.u32 2147483647, %v9843_v12 }
 0x702   :  { %5027 = vpow2.f32 %v4535_v21  ;;  %v4224_v13 = vpop.f32.mrb[15].mxu1  ;;  %v9848_v5 = vpop.eup %5013  ;;  %v4503_v53 = vmul.f32 -0.5, %v9843_v12  ;;  %v4518_v60 = vmul.f32 %v4502_v35, %v9825_v11  ;;  %v4539_v4 = vmul.f32 1.442695, %v4517_v2 }
 0x703   :  { %v4335_v19 = vadd.f32 -0.72657603, %v4319_v7  ;;  %5029 = vrcp.f32 %v4276_v1  ;;  %v4263_v55 = vmul.f32 0.23164189, %v10680_v63  ;;  %v4278_v42 = vadd.f32 1.0, %v4262_v18 }
 0x704   :  { %v9853_v36 = vpop.eup %5015  ;;  %5031 = vrcp.f32 %v4277_v17  ;;  %v4519_v32 = vmul.f32 %v4503_v53, %v9843_v12  ;;  %v10673_v22 = vand.u32 2147483647, %v9858_v45  ;;  %v4504_v1 = vmul.f32 -0.5, %v9858_v45 }
 0x705   :  { %v9860_v24 = vpop.eup %5017  ;;  %v4351_v33 = vmul.f32 %v9834_v58, %v4335_v19  ;;  %v4321_v34 = vmul.f32 0.5307027, %v9853_v36  ;;  %v4228_v6 = vpop.f32.mrb[16].mxu1  ;;  %5033 = vpow2.f32 %v4537_v15  ;;  %v4279_v21 = vadd.f32 1.0, %v4263_v55 }
 0x706   :  { %v9869_v40 = vpop.f32.mrb[17].mxu1  ;;  %v9871_v25 = vpop.eup %5019  ;;  %v9877_v50 = vadd.f32 %v4222_v46, %v11777_v26  ;;  %v4541_v15 = vmul.f32 1.442695, %v4518_v60  ;;  %v4543_v18 = vmul.f32 1.442695, %v4519_v32  ;;  %v9889_v53 = vadd.f32 %v4224_v13, %v11777_v26 }
 0x707   :  { %v4367_v51 = vadd.f32 0.7107069, %v4351_v33  ;;  %v4337_v57 = vadd.f32 -0.72657603, %v4321_v34  ;;  %5035 = vrcp.f32 %v4279_v21  ;;  %v4264_v21 = vmul.f32 0.23164189, %v10673_v22 }
 0x708   :  { %5037 = vpow2.f32 %v4539_v4  ;;  %v10676_v60 = vand.u32 2147483647, %v9877_v50  ;;  %v4520_v4 = vmul.f32 %v4504_v1, %v9858_v45  ;;  %v4505_v13 = vmul.f32 -0.5, %v9877_v50  ;;  %v11778_v1 = vld [vmem:[#allocation65_spill] sm:$0xff] }
 0x709   :  { %v9879_v7 = vpop.eup %5021  ;;  %v4383_v35 = vmul.f32 %v9834_v58, %v4367_v51  ;;  %v4353_v43 = vmul.f32 %v9853_v36, %v4337_v57  ;;  %v9883_v17 = vpop.f32.mrb[18].mxu1  ;;  %5039 = vrcp.f32 %v4278_v42  ;;  %v4506_v22 = vmul.f32 -0.5, %v9889_v53 }
 0x70a   :  { %v9885_v2 = vpop.eup %5023  ;;  %v4323_v19 = vmul.f32 0.5307027, %v9879_v7  ;;  %v9891_v46 = vpop.f32.mrb[19].mxu1  ;;  %5041 = vpow2.f32 %v4541_v15  ;;  %v4265_v42 = vmul.f32 0.23164189, %v10676_v60  ;;  %v9913_v10 = vadd.f32 %v4228_v6, %v11778_v1 }
 0x70b   :  { %v9893_v33 = vpop.eup %5025  ;;  %v4399_v34 = vadd.f32 -0.14224836, %v4383_v35  ;;  %v4369_v55 = vadd.f32 0.7107069, %v4353_v43  ;;  %5043 = vpow2.f32 %v4543_v18  ;;  %v10679_v15 = vand.u32 2147483647, %v9889_v53 }
 0x70c   :  { %v9896_v51 = vpop.eup %5027  ;;  %v4339_v57 = vadd.f32 -0.72657603, %v4323_v19  ;;  %v4280_v41 = vadd.f32 1.0, %v4264_v21  ;;  %v4545_v60 = vmul.f32 1.442695, %v4520_v4  ;;  %v4281_v9 = vadd.f32 1.0, %v4265_v42 }
 0x70d   :  { %v9902_v32 = vpop.eup %5029  ;;  %v4415_v26 = vmul.f32 %v9834_v58, %v4399_v34  ;;  %v4385_v35 = vmul.f32 %v9853_v36, %v4369_v55  ;;  %v4521_v34 = vmul.f32 %v4505_v13, %v9877_v50  ;;  %v4522_v59 = vmul.f32 %v4506_v22, %v9889_v53 }
 0x70e   :  { %v9908_v43 = vpop.eup %5031  ;;  %v4355_v19 = vmul.f32 %v9879_v7, %v4339_v57  ;;  %5045 = vrcp.f32 %v4281_v9  ;;  %v10681_v13 = vand.u32 2147483647, %v9913_v10  ;;  %v4266_v4 = vmul.f32 0.23164189, %v10679_v15 }
 0x70f   :  { %v4401_v62 = vadd.f32 -0.14224836, %v4385_v35  ;;  %v4325_v0 = vmul.f32 0.5307027, %v9908_v43  ;;  %v9918_v55 = vpop.eup %5033  ;;  %v4431_v57 = vadd.f32 0.1274148, %v4415_v26  ;;  %5047 = vrcp.f32 %v4280_v41 }
 0x710   :  { %v4371_v47 = vadd.f32 0.7107069, %v4355_v19  ;;  %v4547_v21 = vmul.f32 1.442695, %v4521_v34  ;;  %5049 = vpow2.f32 %v4545_v60  ;;  %v4267_v34 = vmul.f32 0.23164189, %v10681_v13 }
 0x711   :  { %v4417_v18 = vmul.f32 %v9853_v36, %v4401_v62  ;;  %v4341_v37 = vadd.f32 -0.72657603, %v4325_v0  ;;  %v9925_v44 = vpop.eup %5035  ;;  %v9932_v0 = vadd.f32 %v9869_v40, %v11778_v1  ;;  %v4447_v42 = vmul.f32 %v9834_v58, %v4431_v57  ;;  %v11779_v13 = vld [vmem:[#allocation63_spill] sm:$0xff] }
 0x712   :  { %v4387_v35 = vmul.f32 %v9879_v7, %v4371_v47  ;;  %v9934_v62 = vpop.eup %5037  ;;  %v4327_v22 = vmul.f32 0.5307027, %v9925_v44  ;;  %v4549_v1 = vmul.f32 1.442695, %v4522_v59  ;;  %v4507_v6 = vmul.f32 -0.5, %v9913_v10 }
 0x713   :  { %v4357_v19 = vmul.f32 %v9908_v43, %v4341_v37  ;;  %v4433_v47 = vadd.f32 0.1274148, %v4417_v18  ;;  %v9937_v26 = vpop.eup %5039  ;;  %5051 = vpow2.f32 %v4547_v21  ;;  %v4283_v41 = vadd.f32 1.0, %v4267_v34 }
 0x714   :  { %v4403_v9 = vadd.f32 -0.14224836, %v4387_v35  ;;  %v4343_v40 = vadd.f32 -0.72657603, %v4327_v22  ;;  %v9944_v18 = vpop.eup %5041  ;;  %v10682_v63 = vand.u32 2147483647, %v9932_v0  ;;  %v9955_v23 = vadd.f32 %v9883_v17, %v11779_v13 }
 0x715   :  { %v4373_v37 = vadd.f32 0.7107069, %v4357_v19  ;;  %v9948_v58 = vpop.eup %5043  ;;  %v4449_v60 = vmul.f32 %v9853_v36, %v4433_v47  ;;  %v4282_v19 = vadd.f32 1.0, %v4266_v4  ;;  %5053 = vrcp.f32 %v4283_v41 }
 0x716   :  { %v4419_v15 = vmul.f32 %v9879_v7, %v4403_v9  ;;  %v4359_v57 = vmul.f32 %v9925_v44, %v4343_v40  ;;  %v4523_v9 = vmul.f32 %v4507_v6, %v9913_v10  ;;  %v4479_v21 = vmul.f32 %v4447_v42, %v4239_v27 }
 0x717   :  { %v4389_v35 = vmul.f32 %v9908_v43, %v4373_v37  ;;  %5055 = vpow2.f32 %v4549_v1  ;;  %v4508_v34 = vmul.f32 -0.5, %v9932_v0  ;;  %v10683_v6 = vand.u32 2147483647, %v9955_v23 }
 0x718   :  { %v4435_v59 = vadd.f32 0.1274148, %v4419_v15  ;;  %v4375_v37 = vadd.f32 0.7107069, %v4359_v57  ;;  %v4268_v15 = vmul.f32 0.23164189, %v10682_v63  ;;  %v9965_v47 = vpop.eup %5045  ;;  %v4481_v17 = vmul.f32 %v4449_v60, %v4241_v8 }
 0x719   :  { %v4405_v22 = vadd.f32 -0.14224836, %v4389_v35  ;;  %5057 = vrcp.f32 %v4282_v19  ;;  %v4551_v42 = vmul.f32 1.442695, %v4523_v9  ;;  %v4329_v35 = vmul.f32 0.5307027, %v9965_v47  ;;  %v9974_v57 = vpop.eup %5047 }
 0x71a   :  { %v4391_v27 = vmul.f32 %v9925_v44, %v4375_v37  ;;  %v4451_v40 = vmul.f32 %v9879_v7, %v4435_v59  ;;  %v4269_v41 = vmul.f32 0.23164189, %v10683_v6  ;;  %v9977_v63 = vmul.f32 %v4508_v34, %v9932_v0  ;;  %v9984_v19 = vpop.eup %5049 }
 0x71b   :  { %v4421_v36 = vmul.f32 %v9908_v43, %v4405_v22  ;;  %v4509_v8 = vmul.f32 -0.5, %v9955_v23  ;;  %v9982_v60 = vadd.f32 %v9891_v46, %v11779_v13  ;;  %v4345_v7 = vadd.f32 -0.72657603, %v4329_v35 }
 0x71c   :  { %v4407_v22 = vadd.f32 -0.14224836, %v4391_v27  ;;  %v4284_v9 = vadd.f32 1.0, %v4268_v15  ;;  %v4285_v59 = vadd.f32 1.0, %v4269_v41  ;;  %v4320_v37 = vmul.f32 0.5307027, %v9848_v5 }
 0x71d   :  { %v4437_v1 = vadd.f32 0.1274148, %v4421_v36  ;;  %v10686_v4 = vand.u32 2147483647, %v9982_v60  ;;  %v9991_v6 = vpop.eup %5051  ;;  %v4361_v46 = vmul.f32 %v9965_v47, %v4345_v7  ;;  %v4525_v13 = vmul.f32 %v4509_v8, %v9955_v23 }
 0x71e   :  { %v4423_v27 = vmul.f32 %v9925_v44, %v4407_v22  ;;  %5059 = vrcp.f32 %v4285_v59  ;;  %v4322_v15 = vmul.f32 0.5307027, %v9885_v2  ;;  %v4483_v35 = vmul.f32 %v4451_v40, %v4243_v14 }
 0x71f   :  { %v4453_v36 = vmul.f32 %v9908_v43, %v4437_v1  ;;  %v4270_v43 = vmul.f32 0.23164189, %v10686_v4  ;;  %v4510_v1 = vmul.f32 -0.5, %v9982_v60  ;;  %v10001_v22 = vpop.eup %5053  ;;  %v4377_v34 = vadd.f32 0.7107069, %v4361_v46 }
 0x720   :  { %v4439_v41 = vadd.f32 0.1274148, %v4423_v27  ;;  %5061 = vpow2.f32 %v4551_v42  ;;  %v4336_v30 = vadd.f32 -0.72657603, %v4320_v37  ;;  %v4338_v7 = vadd.f32 -0.72657603, %v4322_v15 }
 0x721   :  { %v10003_v59 = vpop.eup %5055  ;;  %v4485_v8 = vmul.f32 %v4453_v36, %v4245_v29  ;;  %v4331_v3 = vmul.f32 0.5307027, %v10001_v22  ;;  %5063 = vrcp.f32 %v4284_v9  ;;  %v4559_v14 = vmul.f32 %v9845_v39, %v4479_v21 }
 0x722   :  { %v4393_v40 = vmul.f32 %v9965_v47, %v4377_v34  ;;  %v4555_v27 = vmul.f32 1.442695, %v4525_v13  ;;  %v4352_v4 = vmul.f32 %v9848_v5, %v4336_v30  ;;  %v4354_v46 = vmul.f32 %v9885_v2, %v4338_v7 }
 0x723   :  { %v10012_v42 = vpop.eup %5057  ;;  %v4347_v37 = vadd.f32 -0.72657603, %v4331_v3  ;;  %v4286_v15 = vadd.f32 1.0, %v4270_v43  ;;  %v10015_v31 = vmul.f32 %v4510_v1, %v9982_v60  ;;  %v4561_v29 = vmul.f32 %v9871_v25, %v4481_v17 }
 0x724   :  { %v4455_v9 = vmul.f32 %v9925_v44, %v4439_v41  ;;  %v4409_v36 = vadd.f32 -0.14224836, %v4393_v40  ;;  %v4368_v39 = vadd.f32 0.7107069, %v4352_v4  ;;  %v4370_v21 = vadd.f32 0.7107069, %v4354_v46 }
 0x725   :  { %v4363_v34 = vmul.f32 %v10001_v22, %v4347_v37  ;;  %v11780_v30 = vmax.f32 %v9776_v49, 0.0  ;;  %v11781_v7 = vmax.f32 %v9789_v56, 0.0  ;;  %v4324_v43 = vmul.f32 0.5307027, %v9902_v32 }
 0x726   :  { %v4425_v1 = vmul.f32 %v9965_v47, %v4409_v36  ;;  %v4384_v25 = vmul.f32 %v9848_v5, %v4368_v39  ;;  %v4386_v44 = vmul.f32 %v9885_v2, %v4370_v21  ;;  %v4326_v4 = vmul.f32 0.5307027, %v9937_v26 }
 0x727   :  { %v10022_v13 = vsub.f32 %v11780_v30, %v4559_v14  ;;  %v10026_v3 = vsub.f32 %v11781_v7, %v4561_v29  ;;  %v4379_v17 = vadd.f32 0.7107069, %v4363_v34  ;;  %5065 = vpow2.f32 %v4555_v27 }
 0x728   :  { %v4340_v41 = vadd.f32 -0.72657603, %v4324_v43  ;;  %v10035_v14 = vpop.eup %5059  ;;  %v11782_v56 = vand.u32 2147483647, %v9843_v12  ;;  %v4441_v46 = vadd.f32 0.1274148, %v4425_v1  ;;  %5067 = vrcp.f32 %v4286_v15 }
 0x729   :  { %v4400_v37 = vadd.f32 -0.14224836, %v4384_v25  ;;  %v4402_v29 = vadd.f32 -0.14224836, %v4386_v44  ;;  %v4395_v36 = vmul.f32 %v10001_v22, %v4379_v17  ;;  %v4333_v39 = vmul.f32 0.5307027, %v10035_v14 }
 0x72a   :  { %v10039_v40 = vmul.f32 %v4455_v9, %v11782_v56  ;;  %v4342_v21 = vadd.f32 -0.72657603, %v4326_v4  ;;  %v4356_v27 = vmul.f32 %v9902_v32, %v4340_v41  ;;  %v10044_v34 = vpop.eup %5061  ;;  %v4563_v9 = vmul.f32 %v9896_v51, %v4483_v35 }
 0x72b   :  { %v4416_v30 = vmul.f32 %v9848_v5, %v4400_v37  ;;  %v4418_v7 = vmul.f32 %v9885_v2, %v4402_v29  ;;  %v10049_v43 = vpop.eup %5063  ;;  %v4411_v1 = vadd.f32 -0.14224836, %v4395_v36  ;;  %v4349_v25 = vadd.f32 -0.72657603, %v4333_v39 }
 0x72c   :  { %v4358_v44 = vmul.f32 %v9937_v26, %v4342_v21  ;;  %v4372_v17 = vadd.f32 0.7107069, %v4356_v27  ;;  %v4457_v4 = vmul.f32 %v9965_v47, %v4441_v46  ;;  %v4565_v49 = vmul.f32 %v9934_v62, %v4485_v8 }
 0x72d   :  { %v4432_v56 = vadd.f32 0.1274148, %v4416_v30  ;;  %v4434_v41 = vadd.f32 0.1274148, %v4418_v7  ;;  %v4427_v15 = vmul.f32 %v10001_v22, %v4411_v1  ;;  %v4365_v37 = vmul.f32 %v10035_v14, %v4349_v25 }
 0x72e   :  { %v4374_v29 = vadd.f32 0.7107069, %v4358_v44  ;;  %v4388_v51 = vmul.f32 %v9902_v32, %v4372_v17  ;;  %v11783_v39 = vmax.f32 %v9805_v20, 0.0  ;;  %v11784_v47 = vmax.f32 %v9822_v48, 0.0 }
 0x72f   :  { %v4448_v35 = vmul.f32 %v9848_v5, %v4432_v56  ;;  %v4450_v36 = vmul.f32 %v9885_v2, %v4434_v41  ;;  %v4443_v62 = vadd.f32 0.1274148, %v4427_v15  ;;  %v4381_v8 = vadd.f32 0.7107069, %v4365_v37 }
 0x730   :  { %v10061_v21 = vsub.f32 %v11783_v39, %v4563_v9  ;;  %v10065_v46 = vsub.f32 %v11784_v47, %v4565_v49  ;;  %v4390_v27 = vmul.f32 %v9937_v26, %v4374_v29  ;;  %v4404_v30 = vadd.f32 -0.14224836, %v4388_v51 }
 0x731   :  { %v11785_v7 = vand.u32 2147483647, %v9779_v16  ;;  %v11786_v5 = vand.u32 2147483647, %v9795_v38  ;;  %v4328_v2 = vmul.f32 0.5307027, %v9974_v57  ;;  %v10075_v9 = vpop.eup %5065  ;;  %v4459_v48 = vmul.f32 %v10001_v22, %v4443_v62 }
 0x732   :  { %v4747_v20 = vpack.c.bf16 %v10065_v46, %v10061_v21  ;;  %v4397_v49 = vmul.f32 %v10035_v14, %v4381_v8  ;;  %v4406_v44 = vadd.f32 -0.14224836, %v4390_v27  ;;  %v4420_v17 = vmul.f32 %v9902_v32, %v4404_v30  ;;  %v10086_v22 = vpop.eup %5067 }
 0x733   :  { %v4480_v1 = vmul.f32 %v4448_v35, %v11785_v7  ;;  %v4482_v25 = vmul.f32 %v4450_v36, %v11786_v5  ;;  %v4330_v15 = vmul.f32 0.5307027, %v10012_v42  ;;  %v4344_v37 = vadd.f32 -0.72657603, %v4328_v2 }
 0x734   :  { %v11787_v29 = vand.u32 2147483647, %v9877_v50  ;;  %v4413_v35 = vadd.f32 -0.14224836, %v4397_v49  ;;  %v4422_v36 = vmul.f32 %v9937_v26, %v4406_v44  ;;  %v4436_v39 = vadd.f32 0.1274148, %v4420_v17 }
 0x735   :  { %v4560_v56 = vmul.f32 %v9860_v24, %v4480_v1  ;;  %v4562_v41 = vmul.f32 %v9893_v33, %v4482_v25  ;;  %v11788_v47 = vmax.f32 %v9779_v16, 0.0  ;;  %v11789_v8 = vmax.f32 %v9795_v38, 0.0 }
 0x736   :  { %v4489_v51 = vmul.f32 %v4457_v4, %v11787_v29  ;;  %v4346_v27 = vadd.f32 -0.72657603, %v4330_v15  ;;  %v4360_v33 = vmul.f32 %v9974_v57, %v4344_v37  ;;  %v4429_v30 = vmul.f32 %v10035_v14, %v4413_v35 }
 0x737   :  { %v4576_v62 = vsub.f32 %v11788_v47, %v4560_v56  ;;  %v4578_v24 = vsub.f32 %v11789_v8, %v4562_v41  ;;  %v4438_v7 = vadd.f32 0.1274148, %v4422_v36  ;;  %v4452_v4 = vmul.f32 %v9902_v32, %v4436_v39 }
 0x738   :  { %v4468_v1 = vmax.f32 %v9810_v54, 0.0  ;;  %v11790_v5 = vand.u32 2147483647, %v9913_v10  ;;  %v4362_v16 = vmul.f32 %v10012_v42, %v4346_v27  ;;  %v4376_v49 = vadd.f32 0.7107069, %v4360_v33 }
 0x739   :  { %v4741_v2 = vpack.c.bf16 %v4578_v24, %v4576_v62  ;;  %v4445_v44 = vadd.f32 0.1274148, %v4429_v30  ;;  %v4454_v38 = vmul.f32 %v9937_v26, %v4438_v7  ;;  %v11791_v17 = vand.u32 2147483647, %v9810_v54 }
 0x73a   :  { %v4491_v25 = vmul.f32 %v4459_v48, %v11790_v5  ;;  %v4567_v41 = vmul.f32 %v9948_v58, %v10039_v40  ;;  %v4378_v32 = vadd.f32 0.7107069, %v4362_v16  ;;  %v4392_v15 = vmul.f32 %v9974_v57, %v4376_v49 }
 0x73b   :  { %v4484_v56 = vmul.f32 %v4452_v4, %v11791_v17  ;;  %4742 = vmatprep.subr.bf16.mxu0 %v4741_v2  ;;  %v4569_v37 = vmul.f32 %v9991_v6, %v4489_v51  ;;  %v4332_v48 = vmul.f32 0.5307027, %v10049_v43  ;;  %v4461_v29 = vmul.f32 %v10035_v14, %v4445_v44 }
 0x73c   :  { %v11792_v35 = vpack.c.bf16 %v10026_v3, %v10022_v13  ;;  %v11793_v54 = vand.u32 2147483647, %v9825_v11  ;;  %v11794_v58 = vmax.f32 %v9843_v12, 0.0  ;;  %v4394_v39 = vmul.f32 %v10012_v42, %v4378_v32 }
 0x73d   :  { %v4564_v36 = vmul.f32 %v9918_v55, %v4484_v56  ;;  %v4408_v47 = vadd.f32 -0.14224836, %v4392_v15  ;;  %v11795_v6 = vmax.f32 %v9877_v50, 0.0  ;;  %v4334_v14 = vmul.f32 0.5307027, %v10086_v22 }
 0x73e   :  { %4744 = vmatpush1.bf16.msra.mxu0 %v11792_v35  ;;  %v4486_v26 = vmul.f32 %v4454_v38, %v11793_v54  ;;  %v4583_v40 = vsub.f32 %v11794_v58, %v4567_v41  ;;  %v11796_v62 = vand.u32 2147483647, %v9955_v23  ;;  %v4470_v3 = vmax.f32 %v9825_v11, 0.0 }
 0x73f   :  { %v4585_v51 = vsub.f32 %v11795_v6, %v4569_v37  ;;  %v4348_v24 = vadd.f32 -0.72657603, %v4332_v48  ;;  %v4410_v55 = vadd.f32 -0.14224836, %v4394_v39  ;;  %v4424_v12 = vmul.f32 %v9974_v57, %v4408_v47 }
 0x740   :  { %v4493_v13 = vmul.f32 %v4461_v29, %v11796_v62  ;;  %v4566_v8 = vmul.f32 %v9944_v18, %v4486_v26  ;;  %v4350_v33 = vadd.f32 -0.72657603, %v4334_v14  ;;  %v4553_v30 = vmul.f32 1.442695, %v9977_v63 }
 0x741   :  { %v4751_v27 = vpack.c.bf16 %v4585_v51, %v4583_v40  ;;  %v4580_v7 = vsub.f32 %v4468_v1, %v4564_v36  ;;  %v4364_v4 = vmul.f32 %v10049_v43, %v4348_v24  ;;  %v4426_v5 = vmul.f32 %v10012_v42, %v4410_v55 }
 0x742   :  { %v4582_v50 = vsub.f32 %v4470_v3, %v4566_v8  ;;  %v4440_v2 = vadd.f32 0.1274148, %v4424_v12  ;;  %v4366_v16 = vmul.f32 %v10086_v22, %v4350_v33  ;;  %v4571_v11 = vmul.f32 %v10044_v34, %v4491_v25  ;;  %v11803_v12 = vld [vmem:[#allocation116_spill] sm:$0xff]  ;;  %v5101_v33 = vld [vmem:[%s10195_s0 + $0x20] sm:$0xff] }
 0x743   :  { %v4557_v18 = vmul.f32 1.442695, %v10015_v31  ;;  %v4380_v44 = vadd.f32 0.7107069, %v4364_v4  ;;  %v4573_v38 = vmul.f32 %v10075_v9, %v4493_v13  ;;  %v4442_v17 = vadd.f32 0.1274148, %v4426_v5 }
 0x744   :  { %v4745_v49 = vpack.c.bf16 %v4582_v50, %v4580_v7  ;;  %v4456_v63 = vmul.f32 %v9974_v57, %v4440_v2  ;;  %v4382_v1 = vadd.f32 0.7107069, %v4366_v16  ;;  %v11797_v41 = vmax.f32 %v9913_v10, 0.0  ;;  %v11804_v50 = vld [vmem:[#allocation117_spill] sm:$0xff]  ;;  %v5103_v2 = vld [vmem:[%s10195_s0 + $0x30] sm:$0xff] }
 0x745   :  { %v4396_v56 = vmul.f32 %v10049_v43, %v4380_v44  ;;  %v11798_v15 = vmax.f32 %v9955_v23, 0.0  ;;  %5069 = vpow2.f32 %v4553_v30  ;;  %v4458_v31 = vmul.f32 %v10012_v42, %v4442_v17 }
 0x746   :  { %4746 = vmatprep.subr.bf16.mxu0 %v4745_v49  ;;  %v4587_v32 = vsub.f32 %v11797_v41, %v4571_v11  ;;  %v11799_v34 = vand.u32 2147483647, %v9858_v45  ;;  %v4398_v9 = vmul.f32 %v10086_v22, %v4382_v1  ;;  %5071 = vpow2.f32 %v4557_v18  ;;  %v5104_v11 = vld [vmem:[%s10195_s0 + $0x38] sm:$0xff] }
 0x747   :  { %v4589_v37 = vsub.f32 %v11798_v15, %v4573_v38  ;;  %4748 = vmatpush1.bf16.msra.mxu0 %v4747_v20  ;;  %v4412_v25 = vadd.f32 -0.14224836, %v4396_v56  ;;  %v11800_v10 = vand.u32 2147483647, %v9889_v53  ;;  %v4472_v21 = vmax.f32 %v9858_v45, 0.0 }
 0x748   :  { %v4488_v57 = vmul.f32 %v4456_v63, %v11799_v34  ;;  %v4414_v35 = vadd.f32 -0.14224836, %v4398_v9  ;;  %v4474_v42 = vmax.f32 %v9889_v53, 0.0  ;;  %v11801_v6 = vand.u32 2147483647, %v9932_v0 }
 0x749   :  { %v4755_v48 = vpack.c.bf16 %v4589_v37, %v4587_v32  ;;  %v4490_v29 = vmul.f32 %v4458_v31, %v11800_v10  ;;  %v4428_v54 = vmul.f32 %v10049_v43, %v4412_v25  ;;  %v11802_v45 = vand.u32 2147483647, %v9982_v60 }
 0x74a   :  { %v4568_v23 = vmul.f32 %v9984_v19, %v4488_v57  ;;  %v4430_v20 = vmul.f32 %v10086_v22, %v4414_v35  ;;  %v4476_v13 = vmax.f32 %v9932_v0, 0.0  ;;  %v4478_v3 = vmax.f32 %v9982_v60, 0.0 }
 0x74b   :  { %v4570_v46 = vmul.f32 %v10003_v59, %v4490_v29  ;;  %v4444_v26 = vadd.f32 0.1274148, %v4428_v54 }
 0x74c   :  { %v4584_v36 = vsub.f32 %v4472_v21, %v4568_v23  ;;  %v4446_v40 = vadd.f32 0.1274148, %v4430_v20 }
 0x74d   :  { %v4586_v58 = vsub.f32 %v4474_v42, %v4570_v46  ;;  %v4460_v39 = vmul.f32 %v10049_v43, %v4444_v26 }
 0x74e   :  { %v4462_v19 = vmul.f32 %v10086_v22, %v4446_v40 }
 0x74f   :  { %v4749_v47 = vpack.c.bf16 %v4586_v58, %v4584_v36  ;;  %v4492_v51 = vmul.f32 %v4460_v39, %v11801_v6  ;;  %v5070_v14 = vpop.eup %5069 }
 0x750   :  { %v4494_v53 = vmul.f32 %v4462_v19, %v11802_v45  ;;  %v5072_v59 = vpop.eup %5071 }
 0x751   :  { %4750 = vmatprep.subr.bf16.mxu0 %v4749_v47  ;;  %v4572_v62 = vmul.f32 %v5070_v14, %v4492_v51 }
 0x752   :  { %4752 = vmatpush1.bf16.msra.mxu0 %v4751_v27  ;;  %v4574_v8 = vmul.f32 %v5072_v59, %v4494_v53 }
 0x753   :  { %v4588_v43 = vsub.f32 %v4476_v13, %v4572_v62 }
 0x754   :  { %v4590_v24 = vsub.f32 %v4478_v3, %v4574_v8 }
 0x756   :  { %v4753_v55 = vpack.c.bf16 %v4590_v24, %v4588_v43 }
 0x758   :  { %4754 = vmatprep.subr.bf16.mxu0 %v4753_v55 }
 0x759   :  { %4756 = vmatpush1.bf16.msra.mxu0 %v4755_v48 }
 0x75c   :  { %4715 = vmatmul.mubr.msk.f32.vlgmr.msra.gmra.mrb[16].mxu0 %vm2737_vm9, %v9699_v52  ;;  %v5102_v52 = vld [vmem:[%s10195_s0 + $0x28] sm:$0xff] }
 0x75d   :  { %4661 = vmatprep.mubr.f32.mxu0 %v11769_v61 }
 0x760   :  { %4716 = vmatmul.mubr.msk.f32.gmra.mrb[18].mxu0 %vm2737_vm9, %v9707_v28 }
 0x82f   :  { %v4657_v22 = vpop.f32.mrb[16].mxu0 }
 0x830   :  { %v4658_v27 = vadd.f32 %v4657_v22, %v11803_v12  ;;  %v4659_v0 = vpop.f32.mrb[17].mxu0 }
 0x831   :  { %v4660_v60 = vadd.f32 %v4659_v0, %v11803_v12 }
 0x832   :  { %v4668_v30 = vadd.f32 %v5101_v33, %v4658_v27 }
 0x833   :  { %v4669_v7 = vadd.f32 %v5102_v52, %v4660_v60  ;;  %v4663_v61 = vpop.f32.mrb[18].mxu0 }
 0x834   :  { %4673 = vst [vmem:[#allocation2 + $0x20] sm:$0xff] %v4668_v30  ;;  %v4664_v28 = vadd.f32 %v4663_v61, %v11804_v50  ;;  %v4665_v4 = vpop.f32.mrb[19].mxu0 }
 0x835   :  { %4674 = vst [vmem:[#allocation2 + $0x28] sm:$0xff] %v4669_v7  ;;  %v4666_v5 = vadd.f32 %v4665_v4, %v11804_v50 }
 0x836   :  { %v4670_v16 = vadd.f32 %v5103_v2, %v4664_v28 }
 0x837   :  { %v4671_v18 = vadd.f32 %v5104_v11, %v4666_v5 }
 0x838   :  { %4675 = vst [vmem:[#allocation2 + $0x30] sm:$0xff] %v4670_v16 }
 0x839   :  { %4676 = vst [vmem:[#allocation2 + $0x38] sm:$0xff] %v4671_v18 }
 0x83a   :  { %5116 = shalt.err (!%p5113_p4)
}
 0x83b   :  { %s5117_s2 = scalar_lea.hbm %s10202_s7, 1024 }
 0x83c   :  { %p5118_p5 = scmp.ne.s32.totalorder %s10202_s7, %s5117_s2  ;;  %p5121_p6 = scmp.lt.u32.totalorder %s5117_s2, %s10202_s7 }
 0x83e   :  { %p5123_p7 = pnand %p5121_p6, %p5118_p5 }
 0x840   :  { %5126 = shalt.err (!%p5123_p7)
}
 0x841   :  { %s5192_s25 = smov 256  }
 0x842   :  { %4688 = dma.vmem_to_hbm [thread:$0]  %s4683_s27, 1024, %s10202_s7, [#allocation3], %s5192_s25, %s5192_s25, %s5186_s22  }
 0x843   :  { %5127 = dma.done.wait [#allocation3], 1024  }
 0x844   :  { %5128 = vsyncadd [#allocation3], 4294966272 }
 0x845   :  { %4692 = vsyncpa [#allocation3], 1 }

</bundles_post_ra>
